<compile_context>
chip_gen: v6e
topology: v6e:2x2x1
jax: 0.10.0
libtpu: 0.0.40
codegen_flags: <defaults>
</compile_context>

<pallas_src>
import jax
import jax.numpy as jnp
from jax.experimental import pallas as pl
from jax.experimental.pallas import tpu as pltpu


def _siren_kernel(x_ref, w1_ref, wh_ref, bh_ref, wf_ref, bf_ref, o_ref):
    """Run one (features, tile_n) column tile of coords through the whole MLP.

    x_ref : (k_aug, tile_n)     coords + ones row (+ zero pad rows), lane-dense
    w1_ref: (hidden, k_aug)     first sine layer, omega folded, bias as a column
    wh_ref: (L, hidden, hidden) packed hidden sine layers, omega folded
    bh_ref: (L, hidden, 1)
    wf_ref: (out, hidden)       final linear (no sine, no omega)
    bf_ref: (out, 1)
    o_ref : (out, tile_n)
    """
    # First sine layer: ones-row trick folds the bias into the MXU matmul.
    h = jnp.sin(jnp.dot(w1_ref[...], x_ref[...],
                        preferred_element_type=jnp.float32))

    # Hidden sine layers (MXU matmuls, N on the lane axis; sin on the VPU).
    for l in range(wh_ref.shape[0]):
        h = jnp.sin(jnp.dot(wh_ref[l], h, preferred_element_type=jnp.float32)
                    + bh_ref[l])

    # Final linear (no sine).
    o_ref[...] = (jnp.dot(wf_ref[...], h, preferred_element_type=jnp.float32)
                  + bf_ref[...]).astype(o_ref.dtype)


def _round_up(x, m):
    return ((x + m - 1) // m) * m


def siren_forward(coords, params, *, omega_0=30.0, tile_n=4096,
                  return_lane_major=False):
    """coords: (N, in_features) float32.

    params: list of (W, b) in torch layout: W (out_features, in_features),
    b (out_features,).  Layers: [first sine, hidden sines..., final linear].

    Returns (N, out_features) by default (PyTorch semantics), or the
    lane-dense (out_features, N) slab with return_lane_major=True (skips the
    strided output transpose; preferable when the consumer can take it).
    """
    N, in_features = coords.shape
    assert len(params) >= 3, "need first sine, >=1 hidden sine, final linear"
    hidden = params[0][0].shape[0]
    out_features = params[-1][0].shape[0]
    L = len(params) - 2

    # --- fold omega_0 into sine-layer params; fold first bias into w1 -------
    k_aug = max(8, _round_up(in_features + 1, 8))        # padded contraction dim
    w1 = (omega_0 * params[0][0]).astype(jnp.float32)                  # (hid, in)
    b1 = (omega_0 * params[0][1]).astype(jnp.float32)                  # (hid,)
    w1_aug = jnp.concatenate(
        [w1, b1[:, None],
         jnp.zeros((hidden, k_aug - in_features - 1), jnp.float32)], axis=1)
    wh = jnp.stack([(omega_0 * w).astype(jnp.float32)
                    for (w, _) in params[1:-1]])                       # (L, hid, hid)
    bh = jnp.stack([(omega_0 * b).reshape(hidden, 1).astype(jnp.float32)
                    for (_, b) in params[1:-1]])                       # (L, hid, 1)
    wf = params[-1][0].astype(jnp.float32)                             # (out, hid)
    bf = params[-1][1].reshape(out_features, 1).astype(jnp.float32)    # (out, 1)

    # --- tile selection: big tile for overhead amortization, but keep >= 2
    # grid steps when possible so both v7x TensorCores get balanced work -----
    tile_n = max(128, _round_up(tile_n, 128))
    tile = min(tile_n, max(512, _round_up(pl.cdiv(N, 2), 512)))
    n_tiles = pl.cdiv(N, tile)
    n_pad = n_tiles * tile

    # --- coords prep: cast + transpose + ones row + pad, one fused XLA pass -
    xt = coords.astype(jnp.float32).T                                  # (in, N)
    x_aug = jnp.concatenate(
        [xt, jnp.ones((1, N), jnp.float32),
         jnp.zeros((k_aug - in_features - 1, N), jnp.float32)], axis=0)
    x_aug = jnp.pad(x_aug, ((0, 0), (0, n_pad - N)))                   # (k_aug, n_pad)

    cost = pl.CostEstimate(
        flops=int(2 * n_pad * (hidden * k_aug + L * hidden * hidden
                               + out_features * hidden)),
        transcendentals=int(n_pad * hidden * (L + 1)),
        bytes_accessed=int(4 * (k_aug * n_pad + out_features * n_pad
                                + w1_aug.size + wh.size + bh.size
                                + wf.size + bf.size)))

    out_t = pl.pallas_call(
        _siren_kernel,
        out_shape=jax.ShapeDtypeStruct((out_features, n_pad), jnp.float32),
        grid_spec=pltpu.PrefetchScalarGridSpec(
            num_scalar_prefetch=0,
            grid=(n_tiles,),
            in_specs=[
                pl.BlockSpec((k_aug, tile), lambda i: (0, i)),      # coords tile
                pl.BlockSpec(w1_aug.shape, lambda i: (0, 0)),       # grid-resident
                pl.BlockSpec(wh.shape, lambda i: (0, 0, 0)),
                pl.BlockSpec(bh.shape, lambda i: (0, 0, 0)),
                pl.BlockSpec(wf.shape, lambda i: (0, 0)),
                pl.BlockSpec(bf.shape, lambda i: (0, 0)),
            ],
            out_specs=pl.BlockSpec((out_features, tile), lambda i: (0, i)),
        ),
        compiler_params=pltpu.CompilerParams(
            dimension_semantics=("parallel",)),
        cost_estimate=cost,
    )(x_aug, w1_aug, wh, bh, wf, bf)

    out_t = out_t[:, :N]                                               # (out, N)
    return out_t if return_lane_major else out_t.T                     # (N, out)


def init_siren_params(key, in_features=2, hidden_features=32, hidden_layers=3,
                      out_features=3, omega_0=30.0):
    """Deterministic init matching the PyTorch module's scheme.

    Weights in torch layout (out, in); biases (out,).
    Bias init follows nn.Linear default: U(-1/sqrt(fan_in), 1/sqrt(fan_in)).
    """
    params = []
    dims = [in_features] + [hidden_features] * (hidden_layers + 1) + [out_features]
    n_layers = len(dims) - 1  # hidden_layers + 2
    keys = jax.random.split(key, 2 * n_layers)
    for li in range(n_layers):
        fan_in, fan_out = dims[li], dims[li + 1]
        wk, bk = keys[2 * li], keys[2 * li + 1]
        if li == 0:
            w_bound = 1.0 / fan_in                      # first SineLayer
        else:
            w_bound = (6.0 / fan_in) ** 0.5 / omega_0   # hidden sines & final linear
        w = jax.random.uniform(wk, (fan_out, fan_in), jnp.float32,
                               minval=-w_bound, maxval=w_bound)
        b_bound = 1.0 / (fan_in ** 0.5)
        b = jax.random.uniform(bk, (fan_out,), jnp.float32,
                               minval=-b_bound, maxval=b_bound)
        params.append((w, b))
    return params


def siren_reference(coords, params, *, omega_0=30.0):
    """Pure-JAX reference with PyTorch semantics (omega NOT folded)."""
    h = coords
    for (w, b) in params[:-1]:
        h = jnp.sin(omega_0 * (h @ w.T + b))
    w, b = params[-1]
    return h @ w.T + b


if __name__ == "__main__":
    key = jax.random.PRNGKey(0)
    pkey, ckey = jax.random.split(key)

    in_features, hidden_features, hidden_layers, out_features = 2, 32, 3, 3
    omega_0 = 30.0
    N = 1000  # not a tile multiple -> exercises padding path; 2 balanced grid steps

    params = init_siren_params(pkey, in_features, hidden_features,
                               hidden_layers, out_features, omega_0)
    coords = jax.random.uniform(ckey, (N, in_features), jnp.float32,
                                minval=-1.0, maxval=1.0)

    out = siren_forward(coords, params, omega_0=omega_0, tile_n=4096)
    out = jax.block_until_ready(out)

    ref = jax.block_until_ready(siren_reference(coords, params, omega_0=omega_0))
    assert out.shape == (N, out_features)
    # omega_0 folding + MXU-vs-XLA accumulation order give ~1e-5-level argument
    # differences that the 4 sine layers can amplify slightly; use a modest tol.
    assert jnp.allclose(out, ref, atol=5e-4, rtol=1e-3), "mismatch vs JAX reference"

    print("KERNEL_OK")
</pallas_src>

<mosaic_0001>
module attributes {stable_mosaic.version = 11 : i64} {
  func.func @_siren_kernel(%arg0: i32, %arg1: memref<8x512xf32, #tpu.memory_space<vmem>>, %arg2: memref<32x8xf32, #tpu.memory_space<vmem>>, %arg3: memref<3x32x32xf32, #tpu.memory_space<vmem>>, %arg4: memref<3x32x1xf32, #tpu.memory_space<vmem>>, %arg5: memref<3x32xf32, #tpu.memory_space<vmem>>, %arg6: memref<3x1xf32, #tpu.memory_space<vmem>>, %arg7: memref<3x512xf32, #tpu.memory_space<vmem>>) attributes {dimension_semantics = [#tpu.dimension_semantics<parallel>], iteration_bounds = array<i64: 2>, scalar_prefetch = 0 : i64, scratch_operands = 0 : i64, tpu.core_type = #tpu.core_type<tc>, window_params = [{transform_indices = @transform_0, window_bounds = array<i64: 8, 512>}, {pipeline_mode = #tpu.pipeline_mode<synchronous>, transform_indices = @transform_1, window_bounds = array<i64: 32, 8>}, {pipeline_mode = #tpu.pipeline_mode<synchronous>, transform_indices = @transform_2, window_bounds = array<i64: 3, 32, 32>}, {pipeline_mode = #tpu.pipeline_mode<synchronous>, transform_indices = @transform_3, window_bounds = array<i64: 3, 32, 1>}, {pipeline_mode = #tpu.pipeline_mode<synchronous>, transform_indices = @transform_4, window_bounds = array<i64: 3, 32>}, {pipeline_mode = #tpu.pipeline_mode<synchronous>, transform_indices = @transform_5, window_bounds = array<i64: 3, 1>}, {transform_indices = @transform_6, window_bounds = array<i64: 3, 512>}]} {
    %c0 = arith.constant 0 : index
    %c0_0 = arith.constant 0 : index
    %0 = vector.load %arg2[%c0, %c0_0] : memref<32x8xf32, #tpu.memory_space<vmem>>, vector<32x8xf32>
    %c0_1 = arith.constant 0 : index
    %c0_2 = arith.constant 0 : index
    %1 = vector.load %arg1[%c0_1, %c0_2] : memref<8x512xf32, #tpu.memory_space<vmem>>, vector<8x512xf32>
    %cst = arith.constant dense<0.000000e+00> : vector<32x512xf32>
    %2 = tpu.matmul %0, %1, %cst {dimension_numbers = #tpu.dot_dimension_numbers<[1], [0], [0], [1], [0, 0, 1, 1], [], []>} : vector<32x8xf32>, vector<8x512xf32>, vector<32x512xf32> -> vector<32x512xf32>
    %3 = math.sin %2 : vector<32x512xf32>
    %c0_3 = arith.constant 0 : index
    %c0_4 = arith.constant 0 : index
    %c0_5 = arith.constant 0 : index
    %4 = vector.load %arg3[%c0_3, %c0_4, %c0_5] : memref<3x32x32xf32, #tpu.memory_space<vmem>>, vector<1x32x32xf32>
    %5 = vector.shape_cast %4 : vector<1x32x32xf32> to vector<32x32xf32>
    %cst_6 = arith.constant dense<0.000000e+00> : vector<32x512xf32>
    %6 = tpu.matmul %5, %3, %cst_6 {dimension_numbers = #tpu.dot_dimension_numbers<[1], [0], [0], [1], [0, 0, 1, 1], [], []>} : vector<32x32xf32>, vector<32x512xf32>, vector<32x512xf32> -> vector<32x512xf32>
    %c0_7 = arith.constant 0 : index
    %c0_8 = arith.constant 0 : index
    %c0_9 = arith.constant 0 : index
    %7 = vector.load %arg4[%c0_7, %c0_8, %c0_9] : memref<3x32x1xf32, #tpu.memory_space<vmem>>, vector<1x32x1xf32>
    %8 = vector.shape_cast %7 : vector<1x32x1xf32> to vector<32x1xf32>
    %9 = vector.broadcast %8 : vector<32x1xf32> to vector<32x512xf32>
    %10 = arith.addf %6, %9 : vector<32x512xf32>
    %11 = math.sin %10 : vector<32x512xf32>
    %c1 = arith.constant 1 : index
    %c0_10 = arith.constant 0 : index
    %c0_11 = arith.constant 0 : index
    %12 = vector.load %arg3[%c1, %c0_10, %c0_11] : memref<3x32x32xf32, #tpu.memory_space<vmem>>, vector<1x32x32xf32>
    %13 = vector.shape_cast %12 : vector<1x32x32xf32> to vector<32x32xf32>
    %cst_12 = arith.constant dense<0.000000e+00> : vector<32x512xf32>
    %14 = tpu.matmul %13, %11, %cst_12 {dimension_numbers = #tpu.dot_dimension_numbers<[1], [0], [0], [1], [0, 0, 1, 1], [], []>} : vector<32x32xf32>, vector<32x512xf32>, vector<32x512xf32> -> vector<32x512xf32>
    %c1_13 = arith.constant 1 : index
    %c0_14 = arith.constant 0 : index
    %c0_15 = arith.constant 0 : index
    %15 = vector.load %arg4[%c1_13, %c0_14, %c0_15] : memref<3x32x1xf32, #tpu.memory_space<vmem>>, vector<1x32x1xf32>
    %16 = vector.shape_cast %15 : vector<1x32x1xf32> to vector<32x1xf32>
    %17 = vector.broadcast %16 : vector<32x1xf32> to vector<32x512xf32>
    %18 = arith.addf %14, %17 : vector<32x512xf32>
    %19 = math.sin %18 : vector<32x512xf32>
    %c2 = arith.constant 2 : index
    %c0_16 = arith.constant 0 : index
    %c0_17 = arith.constant 0 : index
    %20 = vector.load %arg3[%c2, %c0_16, %c0_17] : memref<3x32x32xf32, #tpu.memory_space<vmem>>, vector<1x32x32xf32>
    %21 = vector.shape_cast %20 : vector<1x32x32xf32> to vector<32x32xf32>
    %cst_18 = arith.constant dense<0.000000e+00> : vector<32x512xf32>
    %22 = tpu.matmul %21, %19, %cst_18 {dimension_numbers = #tpu.dot_dimension_numbers<[1], [0], [0], [1], [0, 0, 1, 1], [], []>} : vector<32x32xf32>, vector<32x512xf32>, vector<32x512xf32> -> vector<32x512xf32>
    %c2_19 = arith.constant 2 : index
    %c0_20 = arith.constant 0 : index
    %c0_21 = arith.constant 0 : index
    %23 = vector.load %arg4[%c2_19, %c0_20, %c0_21] : memref<3x32x1xf32, #tpu.memory_space<vmem>>, vector<1x32x1xf32>
    %24 = vector.shape_cast %23 : vector<1x32x1xf32> to vector<32x1xf32>
    %25 = vector.broadcast %24 : vector<32x1xf32> to vector<32x512xf32>
    %26 = arith.addf %22, %25 : vector<32x512xf32>
    %27 = math.sin %26 : vector<32x512xf32>
    %c0_22 = arith.constant 0 : index
    %c0_23 = arith.constant 0 : index
    %28 = vector.load %arg5[%c0_22, %c0_23] : memref<3x32xf32, #tpu.memory_space<vmem>>, vector<3x32xf32>
    %cst_24 = arith.constant dense<0.000000e+00> : vector<3x512xf32>
    %29 = tpu.matmul %28, %27, %cst_24 {dimension_numbers = #tpu.dot_dimension_numbers<[1], [0], [0], [1], [0, 0, 1, 1], [], []>} : vector<3x32xf32>, vector<32x512xf32>, vector<3x512xf32> -> vector<3x512xf32>
    %c0_25 = arith.constant 0 : index
    %c0_26 = arith.constant 0 : index
    %30 = vector.load %arg6[%c0_25, %c0_26] : memref<3x1xf32, #tpu.memory_space<vmem>>, vector<3x1xf32>
    %31 = vector.broadcast %30 : vector<3x1xf32> to vector<3x512xf32>
    %32 = arith.addf %29, %31 : vector<3x512xf32>
    %c0_27 = arith.constant 0 : index
    %c0_28 = arith.constant 0 : index
    %33 = vector.load %arg7[%c0_27, %c0_28] : memref<3x512xf32, #tpu.memory_space<vmem>>, vector<3x512xf32>
    tpu.vector_store %arg7[%c0_27, %c0_28], %32 {strides = array<i32>} : memref<3x512xf32, #tpu.memory_space<vmem>>, vector<3x512xf32>,
    return
  }
  func.func @transform_0(%arg0: i32) -> (i32, i32) {
    %c0_i32 = arith.constant 0 : i32
    %c0_i32_0 = arith.constant 0 : i32
    return %c0_i32, %arg0 : i32, i32
  }
  func.func @transform_1(%arg0: i32) -> (i32, i32) {
    %c0_i32 = arith.constant 0 : i32
    %c0_i32_0 = arith.constant 0 : i32
    %c0_i32_1 = arith.constant 0 : i32
    return %c0_i32, %c0_i32_0 : i32, i32
  }
  func.func @transform_2(%arg0: i32) -> (i32, i32, i32) {
    %c0_i32 = arith.constant 0 : i32
    %c0_i32_0 = arith.constant 0 : i32
    %c0_i32_1 = arith.constant 0 : i32
    %c0_i32_2 = arith.constant 0 : i32
    return %c0_i32, %c0_i32_0, %c0_i32_1 : i32, i32, i32
  }
  func.func @transform_3(%arg0: i32) -> (i32, i32, i32) {
    %c0_i32 = arith.constant 0 : i32
    %c0_i32_0 = arith.constant 0 : i32
    %c0_i32_1 = arith.constant 0 : i32
    %c0_i32_2 = arith.constant 0 : i32
    return %c0_i32, %c0_i32_0, %c0_i32_1 : i32, i32, i32
  }
  func.func @transform_4(%arg0: i32) -> (i32, i32) {
    %c0_i32 = arith.constant 0 : i32
    %c0_i32_0 = arith.constant 0 : i32
    %c0_i32_1 = arith.constant 0 : i32
    return %c0_i32, %c0_i32_0 : i32, i32
  }
  func.func @transform_5(%arg0: i32) -> (i32, i32) {
    %c0_i32 = arith.constant 0 : i32
    %c0_i32_0 = arith.constant 0 : i32
    %c0_i32_1 = arith.constant 0 : i32
    return %c0_i32, %c0_i32_0 : i32, i32
  }
  func.func @transform_6(%arg0: i32) -> (i32, i32) {
    %c0_i32 = arith.constant 0 : i32
    %c0_i32_0 = arith.constant 0 : i32
    return %c0_i32, %arg0 : i32, i32
  }
}

</mosaic_0001>

<bundles_post_ra>
// kernel: tpu_custom_call.1
= control target key start
LH: loop header
LB: loop body
LE: loop exit
PB: predicated region body
PF: predicated region fallthrough
CT: control target
= control target key end

     0   :  { %11 = vsyncpa [#allocation3], 0  ;;  %s15402_s0 = inlined_call_operand.hbm [shape: f32[8,1024], index: 0, kind: input, shape index: {}]   ;;  %s15403_s1 = inlined_call_operand.vmem [shape: f32[32,8], index: 1, kind: input, shape index: {}]   ;;  %s15404_s2 = inlined_call_operand.vmem [shape: f32[3,32,32], index: 2, kind: input, shape index: {}]   ;;  %s15405_s3 = inlined_call_operand.vmem [shape: f32[3,32,1], index: 3, kind: input, shape index: {}]   ;;  %s15406_s4 = inlined_call_operand.vmem [shape: f32[3,32], index: 4, kind: input, shape index: {}]   ;;  %s15407_s5 = inlined_call_operand.vmem [shape: f32[3,1], index: 5, kind: input, shape index: {}]   ;;  %s15408_s6 = inlined_call_operand.hbm [shape: f32[3,1024], index: 6, kind: output, shape index: {}]  }
   0x1   :  { %13 = vsyncpa [#allocation3 + $0x1], 0 }
   0x2   :  { %14 = vsyncpa [#allocation4], 0 }
   0x3   :  { %16 = vsyncpa [#allocation4 + $0x1], 0  ;;  %s9060_s21 = smov 0   ;;  %s9062_s22 = smov 0  }
   0x4   :  { %s9064_s23 = smov 0   ;;  %s9066_s24 = smov 0  }
   0x5 LB: > { %s9081_s25 = sadd.s32 4294967295, %s9013_s24   ;;  %s8031_s26 = sadd.s32 4294967294, %s9013_s24   ;;  %s9013_s24 = sphi %s9066_s24, %s16278_s24   ;;  %s9009_s23 = sphi %s9064_s23, %s16277_s23   ;;  %s9005_s22 = sphi %s9062_s22, %s16276_s22   ;;  %s9001_s21 = sphi %s9060_s21, %s16275_s21  }
   0x6   : > { %s9085_s27 = sadd.s32 1, %s9013_s24   ;;  %s29_s28 = sadd.s32 1, %s9009_s23 }
   0x7   : > { %s26_s29 = ssub.s32 %s9013_s24, %s9085_s27  ;;  %p36_p0 = scmp.ne.s32.totalorder %s9009_s23, %s9005_s22 }
   0x8   : > { %p27_p1 = scmp.eq.s32.totalorder %s26_s29, 0  ;;  %p37_p2 = scmp.eq.s32.totalorder %s9013_s24, 0 }
   0x9   : > { %p42_p3 = scmp.ne.s32.totalorder %s9005_s22, %s9001_s21  ;;  %p43_p4 = scmp.eq.s32.totalorder %s9081_s25, 0 }
   0xa   : > { %s9097_s30 = scalar_select %p27_p1, %s9009_s23, %s29_s28  }
   0xb   : > { %p9099_p5 = por %p37_p2, %p36_p0  ;;  %p9103_p6 = por %p43_p4, %p42_p3 }
   0xc   : > { %p171_p7 = scmp.eq.s32.totalorder %s9081_s25, 1  ;;  %p177_p8 = scmp.eq.s32.totalorder %s8031_s26, 1 }
   0xd   : > { %s15664_s8 = scalar_select %p9103_p6, 1, 0 }
   0xe   : > { %p8621_p10 = scmp.lt.s32.totalorder %s9013_s24, 2  ;;  %p9110_p11 = por %p171_p7, %p36_p0 }
   0xf   : > { %p9114_p12 = por %p177_p8, %p42_p3  ;;  %s212_s11 = sand.u32 1, %s9009_s23  }
  0x10   : > { %s15665_s9 = scalar_select %p9110_p11, 1, 0 }
  0x11   : > { %s15666_s10 = scalar_select %p9114_p12, 1, 0 }
  0x12   : > { %s8351_s12 = sshll.u32 %s9013_s24, 9  ;;  %s8034_s13 = sshll.u32 %s212_s11, 5 }
  0x13   : > { %s9123_s16 = scalar_lea.hbm %s15402_s0, %s8351_s12  ;;  %s216_s17 = scalar_lea.vmem [#allocation2], %s8034_s13 }
  0x14   : > { %s224_s18 = sshll.u32 %s216_s17, 4  ;;  %p9127_p13 = pnand %p8621_p10, %p9099_p5  ;;  %s9131_s18 = int_to_ptr.vmem [resolvable:$true] %s224_s18 }
  0x15   : > { %s213_s20 = scalar_lea.sflag [#allocation3], %s212_s11  ;;  %s8921_s26 = scalar_lea.hbm %s9123_s16, 512 }
  0x16   : > { %p8922_p2 = scmp.ne.s32.totalorder %s9123_s16, %s8921_s26  ;;  %p8923_p3 = pneg %p9127_p13 }
  0x17   : > { %s8926_s7 = scalar_lea.hbm %s15402_s0, 1024  ;;  %p8927_p5 = scmp.lt.s32.totalorder %s9123_s16, %s15402_s0 }
  0x18   : > { %p8924_p4 = pnand %p8923_p3, %p8922_p2  ;;  %p8928_p8 = scmp.lt.s32.totalorder %s8926_s7, %s8921_s26 }
  0x1a   : > { %p8925_p7 = pneg %p8924_p4  ;;  %p8929_p10 = por %p8928_p8, %p8927_p5 }
  0x1c   : > { %p8930_p9 = pnand %p8929_p10, %p8925_p7 }
  0x1e   : > { %8933 = shalt.err (!%p8930_p9)
}
  0x1f   : > { %s8934_s11 = scalar_lea.vmem %s9131_s18, 512  ;;  %s9015_s14 = smov [#allocation2]  }
  0x20   : > { %p8935_p0 = scmp.ne.s32.totalorder %s9131_s18, %s8934_s11  ;;  %s8939_s15 = sshll.u32 %s9015_s14, 4  ;;  %s8940_s15 = int_to_ptr.vmem [resolvable:$false] %s8939_s15 }
  0x21   : > { %s8941_s17 = scalar_lea.vmem %s8940_s15, 1024  ;;  %p8942_p4 = scmp.lt.s32.totalorder %s9131_s18, %s8940_s15 }
  0x22   : > { %p8937_p1 = pnand %p8935_p0, %p8923_p3  ;;  %p8943_p12 = scmp.lt.s32.totalorder %s8941_s17, %s8934_s11 }
  0x24   : > { %p8938_p2 = pneg %p8937_p1  ;;  %p8944_p11 = por %p8943_p12, %p8942_p4 }
  0x26   : > { %p8945_p6 = pnand %p8944_p11, %p8938_p2 }
  0x28   : > { %8948 = shalt.err (!%p8945_p6)
}
  0x29   : > { %8616 = dma.hbm_to_vmem [thread:$0]  (!%p9127_p13), %s9123_s16, 512, %s9131_s18, %s213_s20  }
  0x2a   : > { %p15668_p9 = scmp.lt.s32.totalorder %s9013_s24, 3  ;;  %p15669_p7 = scmp.ge.s32.totalorder %s9013_s24, 1 }
  0x2c   : > { %p230_p0 = pnand %p15669_p7, %p15668_p9 }
  0x2e   : > { %233 = sbr.rel (%p230_p0) target bundleno = 2676 (0xa74), region = 44 }
  0x33   : > { %s9158_s26 = sand.u32 1, %s9005_s22   ;;  %p15670_p6 = scmp.ne.s32.totalorder %s15664_s8, 0 }
  0x34   : > { %s8038_s28 = sshll.u32 %s9158_s26, 5  ;;  %s236_s29 = scalar_lea.sflag [#allocation3], %s9158_s26 }
  0x35   : > { %s239_s7 = scalar_lea.vmem [#allocation2], %s8038_s28 }
  0x36   : > { %8992 = dma.done.wait (%p15670_p6), %s236_s29, 512  }
  0x37   : > { %8994 = vsyncadd (%p15670_p6), %s236_s29, 4294966784  ;;  %v15411_v0 = vmov 0.0   ;;  %v275_v1 = vld [vmem:[%s239_s7 + $0x8] sm:$0xff]  ;;  %v277_v2 = vld [vmem:[%s239_s7 + $0x18] sm:$0xff]  ;;  %vm278_vm0 = vcmask 64512   ;;  %s8039_s20 = sshll.u32 %s9158_s26, 4 }
  0x38   : > { %355 = vmatprep.mubr.f32.mxu0 %v15411_v0  ;;  %444 = vmatprep.mubr.f32.mxu1 %v15411_v0  ;;  %v274_v3 = vld [vmem:[%s239_s7] sm:$0xff]  ;;  %v276_v4 = vld [vmem:[%s239_s7 + $0x10] sm:$0xff]  ;;  %v271_v6 = vld [vmem:[%s15403_s1 + $0x8] sm:$0xff]  ;;  %v15425_v38 = vmov 683565275   ;;  %s267_s12 = scalar_lea.vmem [#allocation5], %s8039_s20 }
  0x39   : > { %321 = vmatprep.subr.mxu0 %v275_v1  ;;  %410 = vmatprep.subr.mxu1 %v277_v2  ;;  %v270_v5 = vld [vmem:[%s15403_s1] sm:$0xff]  ;;  %v272_v7 = vld [vmem:[%s15403_s1 + $0x10] sm:$0xff]  ;;  %v273_v8 = vld [vmem:[%s15403_s1 + $0x18] sm:$0xff]  ;;  %v15427_v42 = vmov 2475754826   ;;  %s8352_s13 = sshll.u32 %s9081_s25, 8 }
  0x3a   : > { %322 = vmatpush1.msra.mxu0 %v274_v3  ;;  %411 = vmatpush1.msra.mxu1 %v276_v4  ;;  %v15420_v44 = vmov 2131351028   ;;  %v15418_v46 = vmov 2102212464   ;;  %v15432_v48 = vmov 920167782   ;;  %s7959_s17 = scalar_lea.hbm %s15408_s6, %s8352_s13 }
  0x3b   : > { %8040 = vmatmul.mubr.msk.f32.vlgmr.msra.gmra.mxu0 %vm278_vm0, %v270_v5  ;;  %8044 = vmatmul.mubr.msk.f32.vlgmr.msra.gmra.mxu1 %vm278_vm0, %v270_v5  ;;  %v15422_v55 = vmov 1326507024   ;;  %s7961_s11 = sshll.u32 %s267_s12, 4  ;;  %s7947_s28 = scalar_lea.sflag [#allocation4], %s9158_s26  ;;  %s7962_s11 = int_to_ptr.vmem [resolvable:$true] %s7961_s11 }
  0x3c   : > { %361 = vmatprep.mubr.f32.mxu0 %v15411_v0  ;;  %450 = vmatprep.mubr.f32.mxu1 %v15411_v0  ;;  %s8949_s29 = scalar_lea.vmem %s7962_s11, 256  ;;  %p16272_p12 = scmp.ne.s32.totalorder %s15665_s9, 0 }
  0x3d   : > { %p8950_p11 = scmp.ne.s32.totalorder %s7962_s11, %s8949_s29  ;;  %s9024_s7 = smov [#allocation5]  }
  0x3e   : > { %s8953_s16 = sshll.u32 %s9024_s7, 4  ;;  %s8954_s16 = int_to_ptr.vmem [resolvable:$false] %s8953_s16 }
  0x3f   : > { %8041 = vmatmul.mubr.msk.f32.gmra.mxu0 %vm278_vm0, %v271_v6  ;;  %8045 = vmatmul.mubr.msk.f32.gmra.mxu1 %vm278_vm0, %v271_v6  ;;  %p8951_p13 = pnand %p8950_p11, %p16272_p12  ;;  %s8955_s25 = scalar_lea.vmem %s8954_s16, 512 }
  0x40   : > { %367 = vmatprep.mubr.f32.mxu0 %v15411_v0  ;;  %456 = vmatprep.mubr.f32.mxu1 %v15411_v0  ;;  %p8956_p3 = scmp.lt.s32.totalorder %s7962_s11, %s8954_s16  ;;  %p8957_p5 = scmp.lt.s32.totalorder %s8955_s25, %s8949_s29 }
  0x41   : > { %p8952_p1 = pneg %p8951_p13 }
  0x42   : > { %p8958_p8 = por %p8957_p5, %p8956_p3 }
  0x43   : > { %8042 = vmatmul.mubr.msk.f32.gmra.mxu0 %vm278_vm0, %v272_v7  ;;  %8046 = vmatmul.mubr.msk.f32.gmra.mxu1 %vm278_vm0, %v272_v7 }
  0x44   : > { %373 = vmatprep.mubr.f32.mxu0 %v15411_v0  ;;  %462 = vmatprep.mubr.f32.mxu1 %v15411_v0  ;;  %p8959_p10 = pnand %p8958_p8, %p8952_p1 }
  0x47   : > { %8043 = vmatmul.mubr.msk.f32.gmra.mxu0 %vm278_vm0, %v273_v8  ;;  %8047 = vmatmul.mubr.msk.f32.gmra.mxu1 %vm278_vm0, %v273_v8 }
  0x48   : > { %2238 = vmatprep.mubr.f32.mxu0 %v15411_v0  ;;  %2327 = vmatprep.mubr.f32.mxu1 %v15411_v0 }
  0xfb   : > { %v9196_v9 = vpop.f32.mrf.mxu0  ;;  %v9198_v10 = vpop.f32.mrf.mxu1 }
  0xfc   : > { %15671 = vst [vmem:[#allocation8_spill] sm:$0xff] %v9196_v9  ;;  %15672 = vst [vmem:[#allocation9_spill] sm:$0xff] %v9198_v10  ;;  %v469_v11 = vand.u32 2147483647, %v9196_v9  ;;  %v472_v12 = vand.u32 2139095040, %v9196_v9  ;;  %v680_v14 = vand.u32 2139095040, %v9198_v10 }
  0xfd   : > { %v677_v13 = vand.u32 2147483647, %v9198_v10  ;;  %v9204_v15 = vpop.f32.mrf.mxu0 }
  0xfe   : > { %15673 = vst [vmem:[#allocation10_spill] sm:$0xff] %v9204_v15  ;;  %v473_v16 = vshrl.u32 %v472_v12, 23  ;;  %v476_v17 = vand.u32 8388607, %v469_v11  ;;  %v681_v18 = vshrl.u32 %v680_v14, 23  ;;  %v576_v20 = vand.u32 2139095040, %v9204_v15 }
  0xff   : > { %v684_v19 = vand.u32 8388607, %v677_v13  ;;  %v573_v35 = vand.u32 2147483647, %v9204_v15 }
 0x100   : > { %v8048_v21 = vadd.s32 4294967169, %v473_v16  ;;  %v8056_v22 = vadd.s32 4294967169, %v681_v18  ;;  %v577_v23 = vshrl.u32 %v576_v20, 23  ;;  %v477_v25 = vor.u32 8388608, %v476_v17 }
 0x101   : > { %v685_v26 = vor.u32 8388608, %v684_v19 }
 0x102   : > { %v479_v24 = vadd.s32 1, %v8048_v21  ;;  %v687_v27 = vadd.s32 1, %v8056_v22  ;;  %v8052_v28 = vadd.s32 4294967169, %v577_v23  ;;  %v9211_v33 = vshll.u32 %v477_v25, 8 }
 0x103   : > { %v9213_v34 = vshll.u32 %v685_v26, 8 }
 0x104   : > { %vm480_vm1 = vcmp.gt.s32.totalorder %v479_v24, 0  ;;  %vm688_vm2 = vcmp.gt.s32.totalorder %v687_v27, 0  ;;  %v9216_v36 = vadd.s32 1, %v8052_v28 }
 0x105   : > { %v481_v29 = vsel %vm480_vm1, %v479_v24, 0  ;;  %v689_v32 = vsel %vm688_vm2, %v687_v27, 0 }
 0x106   : > { %v482_v30 = vshrl.u32 %v481_v29, 5  ;;  %v483_v31 = vand.u32 31, %v481_v29  ;;  %v9219_v40 = vshrl.u32 %v689_v32, 5  ;;  %v691_v41 = vand.u32 31, %v689_v32 }
 0x107   : > { %vm584_vm7 = vcmp.gt.s32.totalorder %v9216_v36, 0 }
 0x108   : > { %v484_v37 = vsub.s32 32, %v483_v31  ;;  %v486_v39 = vshll.u32 %v15425_v38, %v483_v31  ;;  %v489_v43 = vshll.u32 %v15427_v42, %v483_v31  ;;  %v492_v45 = vshll.u32 %v15420_v44, %v483_v31 }
 0x109   : > { %v495_v47 = vshll.u32 %v15418_v46, %v483_v31  ;;  %v498_v49 = vshll.u32 %v15432_v48, %v483_v31  ;;  %vm501_vm3 = vcmp.lt.s32.totalorder %v482_v30, 1  ;;  %vm502_vm4 = vcmp.lt.s32.totalorder %v482_v30, 2 }
 0x10a   : > { %v487_v50 = vshrl.u32 %v15427_v42, %v484_v37  ;;  %v490_v51 = vshrl.u32 %v15420_v44, %v484_v37  ;;  %v493_v52 = vshrl.u32 %v15418_v46, %v484_v37  ;;  %v485_v53 = vshrl.u32 %v15425_v38, %v484_v37 }
 0x10b   : > { %v496_v54 = vshrl.u32 %v15432_v48, %v484_v37  ;;  %v499_v56 = vshrl.u32 %v15422_v55, %v484_v37  ;;  %v692_v60 = vsub.s32 32, %v691_v41  ;;  %vm503_vm5 = vcmp.lt.s32.totalorder %v482_v30, 3 }
 0x10c   : > { %v488_v57 = vor.u32 %v487_v50, %v486_v39  ;;  %v491_v58 = vor.u32 %v490_v51, %v489_v43  ;;  %v494_v59 = vor.u32 %v493_v52, %v492_v45  ;;  %vm504_vm6 = vcmp.lt.s32.totalorder %v482_v30, 4 }
 0x10d   : > { %v497_v61 = vor.u32 %v496_v54, %v495_v47  ;;  %v500_v62 = vor.u32 %v499_v56, %v498_v49  ;;  %v694_v7 = vshll.u32 %v15425_v38, %v691_v41  ;;  %v695_v14 = vshrl.u32 %v15427_v42, %v692_v60 }
 0x10e   : > { %v505_v63 = vsel %vm501_vm3, %v485_v53, %v488_v57  ;;  %v506_v1 = vsel %vm504_vm6, %v494_v59, 2102212464  ;;  %v509_v2 = vsel %vm501_vm3, %v488_v57, %v491_v58  ;;  %v513_v3 = vsel %vm501_vm3, %v491_v58, %v494_v59 }
 0x10f   : > { %v507_v4 = vsel %vm503_vm5, %v491_v58, %v506_v1  ;;  %v510_v5 = vsel %vm504_vm6, %v497_v61, 920167782  ;;  %v514_v6 = vsel %vm504_vm6, %v500_v62, 1326507024  ;;  %v697_v16 = vshll.u32 %v15427_v42, %v691_v41 }
 0x110   : > { %v511_v8 = vsel %vm503_vm5, %v494_v59, %v510_v5  ;;  %v515_v12 = vsel %vm503_vm5, %v497_v61, %v514_v6  ;;  %v508_v17 = vsel %vm502_vm4, %v505_v63, %v507_v4  ;;  %v698_v20 = vshrl.u32 %v15420_v44, %v692_v60  ;;  %v9283_v5 = vpop.f32.mrf.mxu1 }
 0x111   : > { %v512_v18 = vsel %vm502_vm4, %v509_v2, %v511_v8  ;;  %v516_v19 = vsel %vm502_vm4, %v513_v3, %v515_v12  ;;  %v696_v25 = vor.u32 %v695_v14, %v694_v7  ;;  %v700_v27 = vshll.u32 %v15420_v44, %v691_v41  ;;  %15674 = vst [vmem:[#allocation11_spill] sm:$0xff] %v9283_v5 }
 0x112   : > { %v9243_v21 = vmul.u32.u64.low %v9211_v33, %v516_v19  ;;  %v9244_v22 = vmul.u32.u64.high %v9211_v33, %v516_v19, %v9243_v21  ;;  %v9247_v23 = vmul.u32.u64.low %v9211_v33, %v512_v18  ;;  %v9248_v24 = vmul.u32.u64.high %v9211_v33, %v512_v18, %v9247_v23 }
 0x113   : > { %v699_v26 = vor.u32 %v698_v20, %v697_v16  ;;  %v701_v28 = vshrl.u32 %v15418_v46, %v692_v60  ;;  %v693_v29 = vshrl.u32 %v15425_v38, %v692_v60  ;;  %v703_v30 = vshll.u32 %v15418_v46, %v691_v41 }
 0x114   : > { %v704_v31 = vshrl.u32 %v15432_v48, %v692_v60  ;;  %v707_v32 = vshrl.u32 %v15422_v55, %v692_v60  ;;  %v524_v37 = vmul.u32 %v9211_v33, %v508_v17  ;;  %v706_v43 = vshll.u32 %v15432_v48, %v691_v41 }
 0x115   : > { %v702_v39 = vor.u32 %v701_v28, %v700_v27  ;;  %vm709_vm8 = vcmp.lt.s32.totalorder %v9219_v40, 1  ;;  %vm526_vm9 = vc.u32 %v9244_v22, %v9247_v23  ;;  %v527_v45 = vadd.s32 1, %v9248_v24 }
 0x116   : > { %v705_v47 = vor.u32 %v704_v31, %v703_v30  ;;  %vm710_vm10 = vcmp.lt.s32.totalorder %v9219_v40, 2  ;;  %v708_v49 = vor.u32 %v707_v32, %v706_v43  ;;  %vm711_vm11 = vcmp.lt.s32.totalorder %v9219_v40, 3 }
 0x117   : > { %vm712_vm12 = vcmp.lt.s32.totalorder %v9219_v40, 4  ;;  %v717_v50 = vsel %vm709_vm8, %v696_v25, %v699_v26  ;;  %v528_v33 = vsel %vm526_vm9, %v527_v45, %v9248_v24  ;;  %v721_v52 = vsel %vm709_vm8, %v699_v26, %v702_v39 }
 0x118   : > { %v714_v51 = vsel %vm712_vm12, %v702_v39, 2102212464  ;;  %v718_v41 = vsel %vm712_vm12, %v705_v47, 920167782  ;;  %v529_v53 = vadd.s32 %v528_v33, %v524_v37  ;;  %v713_v54 = vsel %vm709_vm8, %v693_v29, %v696_v25 }
 0x119   : > { %v719_v56 = vsel %vm711_vm11, %v702_v39, %v718_v41  ;;  %v722_v57 = vsel %vm712_vm12, %v708_v49, 1326507024  ;;  %v715_v58 = vsel %vm711_vm11, %v699_v26, %v714_v51  ;;  %v585_v61 = vsel %vm584_vm7, %v9216_v36, 0 }
 0x11a   : > { %v720_v59 = vsel %vm710_vm10, %v717_v50, %v719_v56  ;;  %v723_v60 = vsel %vm711_vm11, %v705_v47, %v722_v57  ;;  %v530_v62 = vadd.s32 536870912, %v529_v53  ;;  %v716_v36 = vsel %vm710_vm10, %v713_v54, %v715_v58 }
 0x11b   : > { %v724_v63 = vsel %vm710_vm10, %v721_v52, %v723_v60  ;;  %v9275_v1 = vmul.u32.u64.low %v9213_v34, %v720_v59  ;;  %v9276_v2 = vmul.u32.u64.high %v9213_v34, %v720_v59, %v9275_v1  ;;  %v580_v7 = vand.u32 8388607, %v573_v35 }
 0x11c   : > { %v9280_v3 = vmul.u32.u64.low %v9213_v34, %v724_v63  ;;  %v9281_v4 = vmul.u32.u64.high %v9213_v34, %v724_v63, %v9280_v3  ;;  %v9285_v6 = vshrl.u32 %v530_v62, 30  ;;  %v587_v8 = vand.u32 31, %v585_v61 }
 0x11d   : > { %v735_v14 = vadd.s32 1, %v9276_v2  ;;  %v784_v17 = vand.u32 2139095040, %v9283_v5  ;;  %v732_v18 = vmul.u32 %v9213_v34, %v716_v36  ;;  %v581_v40 = vor.u32 8388608, %v580_v7 }
 0x11e   : > { %v532_v12 = vshll.u32 %v9285_v6, 30  ;;  %v588_v16 = vsub.s32 32, %v587_v8  ;;  %vm734_vm13 = vc.u32 %v9281_v4, %v9275_v1  ;;  %v590_v20 = vshll.u32 %v15425_v38, %v587_v8 }
 0x11f   : > { %v736_v19 = vsel %vm734_vm13, %v735_v14, %v9276_v2  ;;  %v593_v21 = vshll.u32 %v15427_v42, %v587_v8  ;;  %v586_v28 = vshrl.u32 %v585_v61, 5  ;;  %v596_v34 = vshll.u32 %v15420_v44, %v587_v8 }
 0x120   : > { %v9300_v24 = vsub.s32 %v529_v53, %v532_v12  ;;  %v737_v25 = vadd.s32 %v736_v19, %v732_v18  ;;  %v591_v26 = vshrl.u32 %v15427_v42, %v588_v16  ;;  %v594_v27 = vshrl.u32 %v15420_v44, %v588_v16 }
 0x121   : > { %v597_v29 = vshrl.u32 %v15418_v46, %v588_v16  ;;  %v785_v30 = vshrl.u32 %v784_v17, 23  ;;  %v599_v37 = vshll.u32 %v15418_v46, %v587_v8  ;;  %v600_v39 = vshrl.u32 %v15432_v48, %v588_v16 }
 0x122   : > { %v592_v31 = vor.u32 %v591_v26, %v590_v20  ;;  %v595_v32 = vor.u32 %v594_v27, %v593_v21  ;;  %v738_v43 = vadd.s32 536870912, %v737_v25  ;;  %v602_v47 = vshll.u32 %v15432_v48, %v587_v8 }
 0x123   : > { %v598_v45 = vor.u32 %v597_v29, %v596_v34  ;;  %v603_v49 = vshrl.u32 %v15422_v55, %v588_v16  ;;  %v535_v50 = vsub.s32 0, %v9300_v24  ;;  %v601_v33 = vor.u32 %v600_v39, %v599_v37 }
 0x124   : > { %vm605_vm14 = vcmp.lt.s32.totalorder %v586_v28, 1  ;;  %vm608_vm15 = vcmp.lt.s32.totalorder %v586_v28, 4  ;;  %v621_v41 = vshll.u32 %v581_v40, 8  ;;  %vm607_vm0 = vcmp.lt.s32.totalorder %v586_v28, 3 }
 0x125   : > { %v604_v51 = vor.u32 %v603_v49, %v602_v47  ;;  %v613_v52 = vsel %vm605_vm14, %v592_v31, %v595_v32  ;;  %v614_v53 = vsel %vm608_vm15, %v601_v33, 920167782  ;;  %v617_v54 = vsel %vm605_vm14, %v595_v32, %v598_v45 }
 0x126   : > { %v9313_v56 = vshrl.u32 %v738_v43, 30  ;;  %v615_v57 = vsel %vm607_vm0, %v598_v45, %v614_v53  ;;  %v8060_v59 = vadd.s32 4294967169, %v785_v30  ;;  %v8049_v60 = vmin.u32 %v535_v50, %v9300_v24 }
 0x127   : > { %v618_v58 = vsel %vm608_vm15, %v604_v51, 1326507024  ;;  %vm606_vm1 = vcmp.lt.s32.totalorder %v586_v28, 2  ;;  %v610_v61 = vsel %vm608_vm15, %v598_v45, 2102212464  ;;  %v589_v63 = vshrl.u32 %v15425_v38, %v588_v16 }
 0x128   : > { %v619_v62 = vsel %vm607_vm0, %v601_v33, %v618_v58  ;;  %v616_v2 = vsel %vm606_vm1, %v613_v52, %v615_v57  ;;  %v740_v8 = vshll.u32 %v9313_v56, 30  ;;  %v611_v14 = vsel %vm607_vm0, %v595_v32, %v610_v61 }
 0x129   : > { %v620_v3 = vsel %vm606_vm1, %v617_v54, %v619_v62  ;;  %v609_v12 = vsel %vm605_vm14, %v589_v63, %v592_v31  ;;  %v791_v17 = vadd.s32 1, %v8060_v59  ;;  %v537_v18 = vclz %v8049_v60 }
 0x12a   : > { %v9319_v36 = vmul.u32.u64.low %v621_v41, %v620_v3  ;;  %v9320_v7 = vmul.u32.u64.high %v621_v41, %v620_v3, %v9319_v36  ;;  %v9325_v19 = vmul.u32.u64.low %v621_v41, %v616_v2  ;;  %v9326_v40 = vmul.u32.u64.high %v621_v41, %v616_v2, %v9325_v19 }
 0x12b   : > { %vm792_vm2 = vcmp.gt.s32.totalorder %v791_v17, 0  ;;  %v612_v20 = vsel %vm606_vm1, %v609_v12, %v611_v14  ;;  %v15417_v16 = vand.u32 2147483647, %v9283_v5  ;;  %v9330_v26 = vsub.s32 %v737_v25, %v740_v8  ;;  %v9357_v12 = vpop.f32.mrf.mxu0 }
 0x12c   : > { %v793_v21 = vsel %vm792_vm2, %v791_v17, 0  ;;  %vm630_vm3 = vc.u32 %v9320_v7, %v9325_v19  ;;  %v8050_v34 = vadd.s32 4294967294, %v537_v18  ;;  %v631_v28 = vadd.s32 1, %v9326_v40  ;;  %15675 = vst [vmem:[#allocation12_spill] sm:$0xff] %v9357_v12 }
 0x12d   : > { %v795_v27 = vand.u32 31, %v793_v21  ;;  %v628_v29 = vmul.u32 %v621_v41, %v612_v20  ;;  %v788_v31 = vand.u32 8388607, %v15417_v16  ;;  %v743_v37 = vsub.s32 0, %v9330_v26 }
 0x12e   : > { %v632_v30 = vsel %vm630_vm3, %v631_v28, %v9326_v40  ;;  %vm8051_vm4 = vcmp.lt.s32.totalorder %v8050_v34, 0  ;;  %v794_v58 = vshrl.u32 %v793_v21, 5  ;;  %v525_v3 = vadd.s32 %v9247_v23, %v9244_v22 }
 0x12f   : > { %v796_v32 = vsub.s32 32, %v795_v27  ;;  %v633_v39 = vadd.s32 %v632_v30, %v628_v29  ;;  %v789_v43 = vor.u32 8388608, %v788_v31  ;;  %v540_v49 = vsel %vm8051_vm4, 0, %v8050_v34 }
 0x130   : > { %v8057_v50 = vmin.u32 %v743_v37, %v9330_v26  ;;  %v798_v41 = vshll.u32 %v15425_v38, %v795_v27  ;;  %v801_v52 = vshll.u32 %v15427_v42, %v795_v27  ;;  %v807_v53 = vshll.u32 %v15418_v46, %v795_v27 }
 0x131   : > { %v634_v25 = vadd.s32 536870912, %v633_v39  ;;  %v799_v45 = vshrl.u32 %v15427_v42, %v796_v32  ;;  %v802_v47 = vshrl.u32 %v15420_v44, %v796_v32  ;;  %v805_v51 = vshrl.u32 %v15418_v46, %v796_v32 }
 0x132   : > { %v808_v54 = vshrl.u32 %v15432_v48, %v796_v32  ;;  %v804_v59 = vshll.u32 %v15420_v44, %v795_v27  ;;  %v811_v60 = vshrl.u32 %v15422_v55, %v796_v32  ;;  %v810_v2 = vshll.u32 %v15432_v48, %v795_v27 }
 0x133   : > { %v9342_v33 = vshrl.u32 %v634_v25, 30  ;;  %v800_v61 = vor.u32 %v799_v45, %v798_v41  ;;  %v803_v62 = vor.u32 %v802_v47, %v801_v52  ;;  %v541_v14 = vsub.s32 32, %v540_v49 }
 0x134   : > { %v809_v63 = vor.u32 %v808_v54, %v807_v53  ;;  %v806_v8 = vor.u32 %v805_v51, %v804_v59  ;;  %v545_v17 = vsub.s32 4294967266, %v540_v49  ;;  %v745_v18 = vclz %v8057_v50 }
 0x135   : > { %v636_v57 = vshll.u32 %v9342_v33, 30  ;;  %v812_v40 = vor.u32 %v811_v60, %v810_v2  ;;  %vm813_vm5 = vcmp.lt.s32.totalorder %v794_v58, 1  ;;  %vm816_vm6 = vcmp.lt.s32.totalorder %v794_v58, 4 }
 0x136   : > { %v829_v21 = vshll.u32 %v789_v43, 8  ;;  %vm815_vm7 = vcmp.lt.s32.totalorder %v794_v58, 3  ;;  %v821_v27 = vsel %vm813_vm5, %v800_v61, %v803_v62  ;;  %v822_v34 = vsel %vm816_vm6, %v809_v63, 920167782 }
 0x137   : > { %v9355_v36 = vsub.s32 %v633_v39, %v636_v57  ;;  %v888_v22 = vand.u32 2139095040, %v9357_v12  ;;  %vm814_vm8 = vcmp.lt.s32.totalorder %v794_v58, 2  ;;  %v818_v23 = vsel %vm816_vm6, %v806_v8, 2102212464 }
 0x138   : > { %v823_v28 = vsel %vm815_vm7, %v806_v8, %v822_v34  ;;  %v825_v29 = vsel %vm813_vm5, %v803_v62, %v806_v8  ;;  %v8058_v30 = vadd.s32 4294967294, %v745_v18  ;;  %v797_v31 = vshrl.u32 %v15425_v38, %v796_v32 }
 0x139   : > { %v639_v20 = vsub.s32 0, %v9355_v36  ;;  %v824_v37 = vsel %vm814_vm8, %v821_v27, %v823_v28  ;;  %v826_v39 = vsel %vm816_vm6, %v812_v40, 1326507024  ;;  %v819_v51 = vsel %vm815_vm7, %v803_v62, %v818_v23 }
 0x13a   : > { %v827_v43 = vsel %vm815_vm7, %v809_v63, %v826_v39  ;;  %v9368_v45 = vmul.u32.u64.low %v829_v21, %v824_v37  ;;  %v9369_v47 = vmul.u32.u64.high %v829_v21, %v824_v37, %v9368_v45  ;;  %v817_v50 = vsel %vm813_vm5, %v797_v31, %v800_v61  ;;  %v9396_v31 = vpop.f32.mrf.mxu1 }
 0x13b   : > { %v8053_v25 = vmin.u32 %v639_v20, %v9355_v36  ;;  %v828_v41 = vsel %vm814_vm8, %v825_v29, %v827_v43  ;;  %v889_v52 = vshrl.u32 %v888_v22, 23  ;;  %v543_v53 = vshrl.u32 %v525_v3, %v541_v14  ;;  %15676 = vst [vmem:[#allocation13_spill] sm:$0xff] %v9396_v31 }
 0x13c   : > { %v9375_v32 = vmul.u32.u64.low %v829_v21, %v828_v41  ;;  %v9376_v54 = vmul.u32.u64.high %v829_v21, %v828_v41, %v9375_v32  ;;  %v546_v57 = vadd.s32 127, %v545_v17  ;;  %v542_v60 = vshll.u32 %v9300_v24, %v540_v49 }
 0x13d   : > { %v8064_v59 = vadd.s32 4294967169, %v889_v52  ;;  %v641_v63 = vclz %v8053_v25  ;;  %v820_v2 = vsel %vm814_vm8, %v817_v50, %v819_v51  ;;  %v839_v8 = vadd.s32 1, %v9369_v47 }
 0x13e   : > { %vm8059_vm9 = vcmp.lt.s32.totalorder %v8058_v30, 0  ;;  %v9381_v18 = vor.u32 %v543_v53, %v542_v60  ;;  %v15415_v62 = vand.u32 2147483647, %v9357_v12  ;;  %v547_v40 = vshll.u32 %v546_v57, 23 }
 0x13f   : > { %v895_v61 = vadd.s32 1, %v8064_v59  ;;  %v836_v3 = vmul.u32 %v829_v21, %v820_v2  ;;  %vm838_vm10 = vc.u32 %v9376_v54, %v9368_v45  ;;  %v9386_v14 = vsel %vm8059_vm9, 0, %v8058_v30 }
 0x140   : > { %v8054_v24 = vadd.s32 4294967294, %v641_v63  ;;  %v840_v49 = vsel %vm838_vm10, %v839_v8, %v9369_v47  ;;  %v733_v27 = vadd.s32 %v9275_v1, %v9281_v4  ;;  %v548_v34 = vor.u32 4788187, %v547_v40 }
 0x141   : > { %vm896_vm11 = vcmp.gt.s32.totalorder %v895_v61, 0  ;;  %v841_v17 = vadd.s32 %v840_v49, %v836_v3  ;;  %v551_v22 = vcvt.s32.f32 %v9381_v18  ;;  %v749_v21 = vsub.s32 32, %v9386_v14 }
 0x142   : > { %v897_v58 = vsel %vm896_vm11, %v895_v61, 0  ;;  %v753_v28 = vsub.s32 4294967266, %v9386_v14  ;;  %vm8055_vm12 = vcmp.lt.s32.totalorder %v8054_v24, 0  ;;  %v892_v30 = vand.u32 8388607, %v15415_v62 }
 0x143   : > { %v899_v20 = vand.u32 31, %v897_v58  ;;  %v842_v29 = vadd.s32 536870912, %v841_v17  ;;  %v898_v25 = vshrl.u32 %v897_v58, 5  ;;  %v1096_v53 = vand.u32 2139095040, %v9396_v31 }
 0x144   : > { %v549_v63 = vand.u32 2147483647, %v548_v34  ;;  %v750_v2 = vshll.u32 %v9330_v26, %v9386_v14  ;;  %v751_v8 = vshrl.u32 %v733_v27, %v749_v21  ;;  %v754_v18 = vadd.s32 127, %v753_v28 }
 0x145   : > { %v900_v23 = vsub.s32 32, %v899_v20  ;;  %v902_v37 = vshll.u32 %v15425_v38, %v899_v20  ;;  %v905_v1 = vshll.u32 %v15427_v42, %v899_v20  ;;  %v911_v47 = vshll.u32 %v15418_v46, %v899_v20 }
 0x146   : > { %v908_v52 = vshll.u32 %v15420_v44, %v899_v20  ;;  %v9407_v32 = vshrl.u32 %v842_v29, 30  ;;  %v914_v59 = vshll.u32 %v15432_v48, %v899_v20  ;;  %v893_v40 = vor.u32 8388608, %v892_v30 }
 0x147   : > { %v903_v39 = vshrl.u32 %v15427_v42, %v900_v23  ;;  %v906_v4 = vshrl.u32 %v15420_v44, %v900_v23  ;;  %v909_v43 = vshrl.u32 %v15418_v46, %v900_v23  ;;  %v912_v50 = vshrl.u32 %v15432_v48, %v900_v23 }
 0x148   : > { %v915_v60 = vshrl.u32 %v15422_v55, %v900_v23  ;;  %vm917_vm13 = vcmp.lt.s32.totalorder %v898_v25, 1  ;;  %v9414_v49 = vsel %vm8055_vm12, 0, %v8054_v24  ;;  %vm920_vm14 = vcmp.lt.s32.totalorder %v898_v25, 4 }
 0x149   : > { %v904_v51 = vor.u32 %v903_v39, %v902_v37  ;;  %v907_v41 = vor.u32 %v906_v4, %v905_v1  ;;  %v913_v57 = vor.u32 %v912_v50, %v911_v47  ;;  %v910_v61 = vor.u32 %v909_v43, %v908_v52 }
 0x14a   : > { %v916_v3 = vor.u32 %v915_v60, %v914_v59  ;;  %v1097_v29 = vshrl.u32 %v1096_v53, 23  ;;  %v844_v20 = vshll.u32 %v9407_v32, 30  ;;  %v901_v34 = vshrl.u32 %v15425_v38, %v900_v23 }
 0x14b   : > { %v925_v58 = vsel %vm917_vm13, %v904_v51, %v907_v41  ;;  %vm919_vm15 = vcmp.lt.s32.totalorder %v898_v25, 3  ;;  %v926_v37 = vsel %vm920_vm14, %v913_v57, 920167782  ;;  %vm918_vm0 = vcmp.lt.s32.totalorder %v898_v25, 2  ;;  %v9441_v25 = vpop.f32.mrf.mxu0 }
 0x14c   : > { %v922_v26 = vsel %vm920_vm14, %v910_v61, 2102212464  ;;  %v927_v14 = vsel %vm919_vm15, %v910_v61, %v926_v37  ;;  %v929_v27 = vsel %vm917_vm13, %v907_v41, %v910_v61  ;;  %v755_v21 = vshll.u32 %v754_v18, 23  ;;  %15677 = vst [vmem:[#allocation14_spill] sm:$0xff] %v9441_v25 }
 0x14d   : > { %v928_v28 = vsel %vm918_vm0, %v925_v58, %v927_v14  ;;  %v930_v24 = vsel %vm920_vm14, %v916_v3, 1326507024  ;;  %v933_v30 = vshll.u32 %v893_v40, 8  ;;  %v649_v39 = vsub.s32 4294967266, %v9414_v49 }
 0x14e   : > { %v921_v1 = vsel %vm917_vm13, %v901_v34, %v904_v51  ;;  %v931_v4 = vsel %vm919_vm15, %v913_v57, %v930_v24  ;;  %v8072_v43 = vadd.s32 4294967169, %v1097_v29  ;;  %v923_v47 = vsel %vm919_vm15, %v907_v41, %v922_v26 }
 0x14f   : > { %v932_v23 = vsel %vm918_vm0, %v929_v27, %v931_v4  ;;  %v9424_v50 = vmul.u32.u64.low %v933_v30, %v928_v28  ;;  %v9425_v52 = vmul.u32.u64.high %v933_v30, %v928_v28, %v9424_v50  ;;  %v9428_v53 = vsub.s32 %v841_v17, %v844_v20 }
 0x150   : > { %v9430_v59 = vmul.u32.u64.low %v933_v30, %v932_v23  ;;  %v9431_v60 = vmul.u32.u64.high %v933_v30, %v932_v23, %v9430_v59  ;;  %v1103_v61 = vadd.s32 1, %v8072_v43  ;;  %v552_v18 = vmul.f32 %v551_v22, %v549_v63 }
 0x151   : > { %v752_v40 = vor.u32 %v751_v8, %v750_v2  ;;  %v924_v3 = vsel %vm918_vm0, %v921_v1, %v923_v47  ;;  %v756_v51 = vor.u32 4788187, %v755_v21  ;;  %v943_v41 = vadd.s32 1, %v9425_v52 }
 0x152   : > { %vm1104_vm1 = vcmp.gt.s32.totalorder %v1103_v61, 0  ;;  %v15413_v57 = vand.u32 2147483647, %v9396_v31  ;;  %vm471_vm2 = vcmp.lt.s32.totalorder %v9196_v9, 0  ;;  %v650_v29 = vadd.s32 127, %v649_v39 }
 0x153   : > { %v1105_v58 = vsel %vm1104_vm1, %v1103_v61, 0  ;;  %v847_v17 = vsub.s32 0, %v9428_v53  ;;  %v555_v20 = vsub.s32 4, %v9285_v6  ;;  %v940_v34 = vmul.u32 %v933_v30, %v924_v3 }
 0x154   : > { %vm942_vm3 = vc.u32 %v9431_v60, %v9424_v50  ;;  %v1107_v22 = vand.u32 31, %v1105_v58  ;;  %v553_v63 = vxor.u32 2147483648, %v552_v18  ;;  %v759_v2 = vcvt.s32.f32 %v752_v40 }
 0x155   : > { %v629_v8 = vadd.s32 %v9325_v19, %v9320_v7  ;;  %v944_v37 = vsel %vm942_vm3, %v943_v41, %v9425_v52  ;;  %v757_v26 = vand.u32 2147483647, %v756_v51  ;;  %v1100_v27 = vand.u32 8388607, %v15413_v57 }
 0x156   : > { %v945_v14 = vadd.s32 %v944_v37, %v940_v34  ;;  %v1108_v21 = vsub.s32 32, %v1107_v22  ;;  %v645_v28 = vsub.s32 32, %v9414_v49  ;;  %v651_v24 = vshll.u32 %v650_v29, 23 }
 0x157   : > { %v8061_v30 = vmin.u32 %v847_v17, %v9428_v53  ;;  %v992_v39 = vand.u32 2139095040, %v9441_v25  ;;  %v1110_v4 = vshll.u32 %v15425_v38, %v1107_v22  ;;  %v1113_v43 = vshll.u32 %v15427_v42, %v1107_v22 }
 0x158   : > { %v946_v1 = vadd.s32 536870912, %v945_v14  ;;  %v1111_v7 = vshrl.u32 %v15427_v42, %v1108_v21  ;;  %v1114_v19 = vshrl.u32 %v15420_v44, %v1108_v21  ;;  %v1116_v47 = vshll.u32 %v15420_v44, %v1107_v22 }
 0x159   : > { %v1117_v23 = vshrl.u32 %v15418_v46, %v1108_v21  ;;  %v1120_v52 = vshrl.u32 %v15432_v48, %v1108_v21  ;;  %v1101_v59 = vor.u32 8388608, %v1100_v27  ;;  %v1106_v61 = vshrl.u32 %v1105_v58, 5 }
 0x15a   : > { %v1112_v40 = vor.u32 %v1111_v7, %v1110_v4  ;;  %v1119_v3 = vshll.u32 %v15418_v46, %v1107_v22  ;;  %v1115_v51 = vor.u32 %v1114_v19, %v1113_v43  ;;  %v1122_v29 = vshll.u32 %v15432_v48, %v1107_v22 }
 0x15b   : > { %v1118_v41 = vor.u32 %v1117_v23, %v1116_v47  ;;  %v1123_v17 = vshrl.u32 %v15422_v55, %v1108_v21  ;;  %v554_v34 = vsel %vm471_vm2, %v553_v63, %v552_v18  ;;  %vm679_vm4 = vcmp.lt.s32.totalorder %v9198_v10, 0 }
 0x15c   : > { %v763_v37 = vsub.s32 4, %v9313_v56  ;;  %v9465_v0 = vshrl.u32 %v946_v1, 30  ;;  %v1121_v27 = vor.u32 %v1120_v52, %v1119_v3  ;;  %vm9469_vm5 = vcmp.le.f32.partialorder %v469_v11, 0.7853982 }
 0x15d   : > { %v15678_v58 = vmov 0  ;;  %v760_v4 = vmul.f32 %v759_v2, %v757_v26  ;;  %v647_v22 = vshrl.u32 %v629_v8, %v645_v28  ;;  %v1124_v7 = vor.u32 %v1123_v17, %v1122_v29 }
 0x15e   : > { %v15679_v58 = vsel %vm9469_vm5, 4294967295, %v15678_v58  ;;  %v993_v19 = vshrl.u32 %v992_v39, 23  ;;  %v652_v43 = vor.u32 4788187, %v651_v24  ;;  %v849_v47 = vclz %v8061_v30 }
 0x15f   : > { %15680 = vst [vmem:[#allocation15_spill] sm:$0xff] %v15679_v58  ;;  %vm1125_vm6 = vcmp.lt.s32.totalorder %v1106_v61, 1  ;;  %vm1128_vm7 = vcmp.lt.s32.totalorder %v1106_v61, 4  ;;  %v1109_v18 = vshrl.u32 %v15425_v38, %v1108_v21  ;;  %v1141_v23 = vshll.u32 %v1101_v59, 8 }
 0x160   : > { %v1130_v63 = vsel %vm1128_vm7, %v1118_v41, 2102212464  ;;  %v1133_v1 = vsel %vm1125_vm6, %v1112_v40, %v1115_v51  ;;  %v948_v52 = vshll.u32 %v9465_v0, 30  ;;  %vm1127_vm8 = vcmp.lt.s32.totalorder %v1106_v61, 3 }
 0x161   : > { %v1134_v11 = vsel %vm1128_vm7, %v1121_v27, 920167782  ;;  %v1137_v3 = vsel %vm1125_vm6, %v1115_v51, %v1118_v41  ;;  %vm1126_vm9 = vcmp.lt.s32.totalorder %v1106_v61, 2  ;;  %v1138_v2 = vsel %vm1128_vm7, %v1124_v7, 1326507024 }
 0x162   : > { %v1135_v57 = vsel %vm1127_vm8, %v1118_v41, %v1134_v11  ;;  %v8068_v8 = vadd.s32 4294967169, %v993_v19  ;;  %vm575_vm10 = vcmp.lt.s32.totalorder %v9204_v15, 0  ;;  %v1129_v26 = vsel %vm1125_vm6, %v1109_v18, %v1112_v40 }
 0x163   : > { %v1131_v28 = vsel %vm1127_vm8, %v1115_v51, %v1130_v63  ;;  %v1136_v24 = vsel %vm1126_vm9, %v1133_v1, %v1135_v57  ;;  %v1139_v30 = vsel %vm1127_vm8, %v1121_v27, %v1138_v2  ;;  %v8062_v21 = vadd.s32 4294967294, %v849_v47 }
 0x164   : > { %v1140_v39 = vsel %vm1126_vm9, %v1137_v3, %v1139_v30  ;;  %v9478_v59 = vmul.u32.u64.low %v1141_v23, %v1136_v24  ;;  %v9479_v29 = vmul.u32.u64.high %v1141_v23, %v1136_v24, %v9478_v59  ;;  %v646_v17 = vshll.u32 %v9355_v36, %v9414_v49 }
 0x165   : > { %v9484_v41 = vsub.s32 %v945_v14, %v948_v52  ;;  %v9486_v7 = vmul.u32.u64.low %v1141_v23, %v1140_v39  ;;  %v9487_v19 = vmul.u32.u64.high %v1141_v23, %v1140_v39, %v9486_v7  ;;  %v9494_v57 = vsel %vm471_vm2, %v555_v20, %v9285_v6 }
 0x166   : > { %15681 = vst [vmem:[#allocation16_spill] sm:$0xff] %v9494_v57  ;;  %v9499_v40 = vsel %vm679_vm4, %v763_v37, %v9313_v56  ;;  %v1132_v51 = vsel %vm1126_vm9, %v1129_v26, %v1131_v28  ;;  %v999_v36 = vadd.s32 1, %v8068_v8  ;;  %v9505_v49 = vsel %vm9469_vm5, %v9196_v9, %v554_v34 }
 0x167   : > { %15682 = vst [vmem:[#allocation17_spill] sm:$0xff] %v9499_v40  ;;  %v761_v14 = vxor.u32 2147483648, %v760_v4  ;;  %v648_v27 = vor.u32 %v647_v22, %v646_v17  ;;  %v659_v47 = vsub.s32 4, %v9342_v33  ;;  %v653_v18 = vand.u32 2147483647, %v652_v43 }
 0x168   : > { %vm8063_vm11 = vcmp.lt.s32.totalorder %v8062_v21, 0  ;;  %v1151_v6 = vadd.s32 1, %v9479_v29  ;;  %vm1000_vm12 = vcmp.gt.s32.totalorder %v999_v36, 0  ;;  %v951_v56 = vsub.s32 0, %v9484_v41 }
 0x169   : > { %v1148_v20 = vmul.u32 %v1141_v23, %v1132_v51  ;;  %vm1150_vm13 = vc.u32 %v9487_v19, %v9478_v59  ;;  %v1001_v61 = vsel %vm1000_vm12, %v999_v36, 0  ;;  %vm9517_vm14 = vcmp.le.f32.partialorder %v677_v13, 0.7853982 }
 0x16a   : > { %v15683_v37 = vmov 0  ;;  %v1152_v22 = vsel %vm1150_vm13, %v1151_v6, %v9479_v29  ;;  %v1003_v43 = vand.u32 31, %v1001_v61  ;;  %v655_v1 = vcvt.s32.f32 %v648_v27 }
 0x16b   : > { %v15684_v37 = vsel %vm9517_vm14, 4294967295, %v15683_v37  ;;  %v9525_v23 = vsel %vm8063_vm11, 0, %v8062_v21  ;;  %v1153_v52 = vadd.s32 %v1152_v22, %v1148_v20  ;;  %8665 = vcosq.f32 %v9505_v49 }
 0x16c   : > { %15685 = vst [vmem:[#allocation18_spill] sm:$0xff] %v15684_v37  ;;  %v9531_v13 = vsel %vm575_vm10, %v659_v47, %v9342_v33  ;;  %v15414_v11 = vand.u32 2147483647, %v9441_v25  ;;  %v1004_v3 = vsub.s32 32, %v1003_v43  ;;  %v9536_v2 = vsel %vm679_vm4, %v761_v14, %v760_v4 }
 0x16d   : > { %15686 = vst [vmem:[#allocation19_spill] sm:$0xff] %v9531_v13  ;;  %v9538_v8 = vmul.f32 %v655_v1, %v653_v18  ;;  %v8065_v26 = vmin.u32 %v951_v56, %v9484_v41  ;;  %v1154_v28 = vadd.s32 536870912, %v1153_v52  ;;  %v857_v24 = vsub.s32 4294967266, %v9525_v23  ;;  %v9555_v56 = vpop.f32.mrf.mxu1 }
 0x16e   : > { %v1007_v30 = vshrl.u32 %v15427_v42, %v1004_v3  ;;  %v1010_v21 = vshrl.u32 %v15420_v44, %v1004_v3  ;;  %v1013_v33 = vshrl.u32 %v15418_v46, %v1004_v3  ;;  %v1006_v29 = vshll.u32 %v15425_v38, %v1003_v43  ;;  %15687 = vst [vmem:[#allocation20_spill] sm:$0xff] %v9555_v56 }
 0x16f   : > { %v9545_v39 = vshrl.u32 %v1154_v28, 30  ;;  %v1009_v4 = vshll.u32 %v15427_v42, %v1003_v43  ;;  %v1016_v17 = vshrl.u32 %v15432_v48, %v1004_v3  ;;  %v996_v7 = vand.u32 8388607, %v15414_v11 }
 0x170   : > { %v1002_v51 = vshrl.u32 %v1001_v61, 5  ;;  %v1012_v36 = vshll.u32 %v15420_v44, %v1003_v43  ;;  %v1015_v14 = vshll.u32 %v15418_v46, %v1003_v43  ;;  %v953_v27 = vclz %v8065_v26 }
 0x171   : > { %v1156_v47 = vshll.u32 %v9545_v39, 30  ;;  %v1008_v18 = vor.u32 %v1007_v30, %v1006_v29  ;;  %v1011_v6 = vor.u32 %v1010_v21, %v1009_v4  ;;  %v1018_v1 = vshll.u32 %v15432_v48, %v1003_v43 }
 0x172   : > { %v1014_v20 = vor.u32 %v1013_v33, %v1012_v36  ;;  %v1017_v22 = vor.u32 %v1016_v17, %v1015_v14  ;;  %v1019_v28 = vshrl.u32 %v15422_v55, %v1004_v3  ;;  %v657_v63 = vxor.u32 2147483648, %v9538_v8 }
 0x173   : > { %v837_v61 = vadd.s32 %v9368_v45, %v9376_v54  ;;  %v853_v34 = vsub.s32 32, %v9525_v23  ;;  %v858_v26 = vadd.s32 127, %v857_v24  ;;  %v997_v11 = vor.u32 8388608, %v996_v7 }
 0x174   : > { %v1020_v62 = vor.u32 %v1019_v28, %v1018_v1  ;;  %vm1021_vm15 = vcmp.lt.s32.totalorder %v1002_v51, 1  ;;  %v1200_v30 = vand.u32 2139095040, %v9555_v56  ;;  %v8066_v21 = vadd.s32 4294967294, %v953_v27 }
 0x175   : > { %v9564_v33 = vsub.s32 %v1153_v52, %v1156_v47  ;;  %vm1024_vm0 = vcmp.lt.s32.totalorder %v1002_v51, 4  ;;  %v1029_v43 = vsel %vm1021_vm15, %v1008_v18, %v1011_v6  ;;  %vm1023_vm1 = vcmp.lt.s32.totalorder %v1002_v51, 3 }
 0x176   : > { %v1030_v29 = vsel %vm1024_vm0, %v1017_v22, 920167782  ;;  %v1033_v4 = vsel %vm1021_vm15, %v1011_v6, %v1014_v20  ;;  %v1034_v17 = vsel %vm1024_vm0, %v1020_v62, 1326507024  ;;  %v1005_v45 = vshrl.u32 %v15425_v38, %v1004_v3 }
 0x177   : > { %vm1022_vm2 = vcmp.lt.s32.totalorder %v1002_v51, 2  ;;  %v1026_v54 = vsel %vm1024_vm0, %v1014_v20, 2102212464  ;;  %v1031_v24 = vsel %vm1023_vm1, %v1014_v20, %v1030_v29  ;;  %v1035_v36 = vsel %vm1023_vm1, %v1017_v22, %v1034_v17 }
 0x178   : > { %v1032_v7 = vsel %vm1022_vm2, %v1029_v43, %v1031_v24  ;;  %v1037_v52 = vshll.u32 %v997_v11, 8  ;;  %v1201_v14 = vshrl.u32 %v1200_v30, 23  ;;  %v9572_v27 = vpop.eup %8665  ;;  %vm9576_vm3 = vcmp.le.f32.partialorder %v573_v35, 0.7853982  ;;  %v9587_v30 = vpop.f32.mrf.mxu0 }
 0x179   : > { %15688 = vst [vmem:[#allocation21_spill] sm:$0xff] %v9572_v27  ;;  %v15689_v47 = vmov 0  ;;  %vm8067_vm4 = vcmp.lt.s32.totalorder %v8066_v21, 0  ;;  %v1159_v62 = vsub.s32 0, %v9564_v33  ;;  %v1025_v3 = vsel %vm1021_vm15, %v1005_v45, %v1008_v18 }
 0x17a   : > { %v15690_v47 = vsel %vm9576_vm3, 4294967295, %v15689_v47  ;;  %v1036_v20 = vsel %vm1022_vm2, %v1033_v4, %v1035_v36  ;;  %v1027_v1 = vsel %vm1023_vm1, %v1011_v6, %v1026_v54  ;;  %v8076_v28 = vadd.s32 4294967169, %v1201_v14 }
 0x17b   : > { %15691 = vst [vmem:[#allocation22_spill] sm:$0xff] %v15690_v47  ;;  %v9584_v22 = vmul.u32.u64.low %v1037_v52, %v1036_v20  ;;  %v9585_v11 = vmul.u32.u64.high %v1037_v52, %v1036_v20, %v9584_v22  ;;  %v855_v43 = vshrl.u32 %v837_v61, %v853_v34  ;;  %v859_v35 = vshll.u32 %v858_v26, 23 }
 0x17c   : > { %v9589_v29 = vmul.u32.u64.low %v1037_v52, %v1032_v7  ;;  %v9590_v17 = vmul.u32.u64.high %v1037_v52, %v1032_v7, %v9589_v29  ;;  %8667 = vsinq.f32 %v9505_v49  ;;  %v9594_v24 = vsel %vm8067_vm4, 0, %v8066_v21 }
 0x17d   : > { %v15416_v18 = vand.u32 2147483647, %v9555_v56  ;;  %v1207_v4 = vadd.s32 1, %v8076_v28  ;;  %v854_v6 = vshll.u32 %v9428_v53, %v9525_v23  ;;  %v8073_v45 = vmin.u32 %v1159_v62, %v9564_v33 }
 0x17e   : > { %v1028_v54 = vsel %vm1022_vm2, %v1025_v3, %v1027_v1  ;;  %v1304_v34 = vand.u32 2139095040, %v9587_v30  ;;  %v9606_v61 = vsel %vm9517_vm14, %v9198_v10, %v9536_v2  ;;  %v658_v49 = vsel %vm575_vm10, %v657_v63, %v9538_v8 }
 0x17f   : > { %vm1046_vm6 = vc.u32 %v9585_v11, %v9589_v29  ;;  %vm1208_vm7 = vcmp.gt.s32.totalorder %v1207_v4, 0  ;;  %v9613_v53 = vor.u32 %v855_v43, %v854_v6  ;;  %v9615_v23 = vor.u32 4788187, %v859_v35 }
 0x180   : > { %v957_v51 = vsub.s32 32, %v9594_v24  ;;  %v1047_v26 = vadd.s32 1, %v9590_v17  ;;  %v961_v21 = vsub.s32 4294967266, %v9594_v24  ;;  %v1044_v2 = vmul.u32 %v1037_v52, %v1028_v54 }
 0x181   : > { %v1204_v7 = vand.u32 8388607, %v15416_v18  ;;  %v1209_v36 = vsel %vm1208_vm7, %v1207_v4, 0  ;;  %v941_v63 = vadd.s32 %v9424_v50, %v9431_v60  ;;  %v1161_v8 = vclz %v8073_v45 }
 0x182   : > { %v1048_v14 = vsel %vm1046_vm6, %v1047_v26, %v9590_v17  ;;  %v1305_v62 = vshrl.u32 %v1304_v34, 23  ;;  %8669 = vcosq.f32 %v9606_v61  ;;  %v9629_v3 = vsel %vm9576_vm3, %v9204_v15, %v658_v49 }
 0x183   : > { %v1049_v20 = vadd.s32 %v1048_v14, %v1044_v2  ;;  %v1211_v52 = vand.u32 31, %v1209_v36  ;;  %v861_v1 = vand.u32 2147483647, %v9615_v23  ;;  %v863_v22 = vcvt.s32.f32 %v9613_v53 }
 0x184   : > { %v958_v50 = vshll.u32 %v9484_v41, %v9594_v24  ;;  %v959_v60 = vshrl.u32 %v941_v63, %v957_v51  ;;  %v962_v28 = vadd.s32 127, %v961_v21  ;;  %v1205_v35 = vor.u32 8388608, %v1204_v7 }
 0x185   : > { %v1050_v43 = vadd.s32 536870912, %v1049_v20  ;;  %v1212_v17 = vsub.s32 32, %v1211_v52  ;;  %v8074_v4 = vadd.s32 4294967294, %v1161_v8  ;;  %v1210_v6 = vshrl.u32 %v1209_v36, 5 }
 0x186   : > { %v1214_v45 = vshll.u32 %v15425_v38, %v1211_v52  ;;  %v8080_v54 = vadd.s32 4294967169, %v1305_v62  ;;  %v1217_v23 = vshll.u32 %v15427_v42, %v1211_v52  ;;  %v1220_v41 = vshll.u32 %v15420_v44, %v1211_v52 }
 0x187   : > { %v9636_v34 = vshrl.u32 %v1050_v43, 30  ;;  %v1215_v49 = vshrl.u32 %v15427_v42, %v1212_v17  ;;  %v1218_v53 = vshrl.u32 %v15420_v44, %v1212_v17  ;;  %v1221_v24 = vshrl.u32 %v15418_v46, %v1212_v17 }
 0x188   : > { %v1223_v51 = vshll.u32 %v15418_v46, %v1211_v52  ;;  %v1224_v26 = vshrl.u32 %v15432_v48, %v1212_v17  ;;  %v963_v21 = vshll.u32 %v962_v28, 23  ;;  %v1226_v62 = vshll.u32 %v15432_v48, %v1211_v52 }
 0x189   : > { %v1052_v2 = vshll.u32 %v9636_v34, 30  ;;  %v1216_v7 = vor.u32 %v1215_v49, %v1214_v45  ;;  %v1219_v36 = vor.u32 %v1218_v53, %v1217_v23  ;;  %v9646_v63 = vpop.eup %8667  ;;  %v1222_v8 = vor.u32 %v1221_v24, %v1220_v41 }
 0x18a   : > { %15692 = vst [vmem:[#allocation23_spill] sm:$0xff] %v9646_v63  ;;  %v1225_v14 = vor.u32 %v1224_v26, %v1223_v51  ;;  %v1227_v43 = vshrl.u32 %v15422_v55, %v1212_v17  ;;  %vm8075_vm8 = vcmp.lt.s32.totalorder %v8074_v4, 0  ;;  %v1245_v16 = vshll.u32 %v1205_v35, 8 }
 0x18b   : > { %v9650_v18 = vsub.s32 %v1049_v20, %v1052_v2  ;;  %v1311_v46 = vadd.s32 1, %v8080_v54  ;;  %v1213_v44 = vshrl.u32 %v15425_v38, %v1212_v17  ;;  %vm1229_vm9 = vcmp.lt.s32.totalorder %v1210_v6, 1 }
 0x18c   : > { %v1228_v28 = vor.u32 %v1227_v43, %v1226_v62  ;;  %vm1232_vm10 = vcmp.lt.s32.totalorder %v1210_v6, 4  ;;  %vm1231_vm11 = vcmp.lt.s32.totalorder %v1210_v6, 3  ;;  %v1237_v49 = vsel %vm1229_vm9, %v1216_v7, %v1219_v36 }
 0x18d   : > { %v1234_v45 = vsel %vm1232_vm10, %v1222_v8, 2102212464  ;;  %v1238_v23 = vsel %vm1232_vm10, %v1225_v14, 920167782  ;;  %vm783_vm12 = vcmp.lt.s32.totalorder %v9283_v5, 0  ;;  %v1055_v52 = vsub.s32 0, %v9650_v18 }
 0x18e   : > { %vm1230_vm13 = vcmp.lt.s32.totalorder %v1210_v6, 2  ;;  %v1239_v53 = vsel %vm1231_vm11, %v1222_v8, %v1238_v23  ;;  %v1241_v41 = vsel %vm1229_vm9, %v1219_v36, %v1222_v8  ;;  %v964_v20 = vor.u32 4788187, %v963_v21 }
 0x18f   : > { %v1233_v24 = vsel %vm1229_vm9, %v1213_v44, %v1216_v7  ;;  %v1240_v35 = vsel %vm1230_vm13, %v1237_v49, %v1239_v53  ;;  %v1242_v54 = vsel %vm1232_vm10, %v1228_v28, 1326507024  ;;  %v9656_v17 = vpop.eup %8669  ;;  %v1235_v51 = vsel %vm1231_vm11, %v1219_v36, %v1234_v45 }
 0x190   : > { %15693 = vst [vmem:[#allocation24_spill] sm:$0xff] %v9656_v17  ;;  %v1243_v26 = vsel %vm1231_vm11, %v1225_v14, %v1242_v54  ;;  %v9658_v2 = vmul.u32.u64.low %v1245_v16, %v1240_v35  ;;  %v9659_v62 = vmul.u32.u64.high %v1245_v16, %v1240_v35, %v9658_v2  ;;  %v960_v43 = vor.u32 %v959_v60, %v958_v50  ;;  %v9696_v54 = vpop.f32.mrf.mxu1 }
 0x191   : > { %v9663_v55 = vsel %vm8075_vm8, 0, %v8074_v4  ;;  %v1244_v23 = vsel %vm1230_vm13, %v1241_v41, %v1243_v26  ;;  %v15424_v21 = vand.u32 2147483647, %v9587_v30  ;;  %v8069_v44 = vmin.u32 %v1055_v52, %v9650_v18 }
 0x192   : > { %v9668_v7 = vmul.u32.u64.low %v1245_v16, %v1244_v23  ;;  %v9669_v8 = vmul.u32.u64.high %v1245_v16, %v1244_v23, %v9668_v7  ;;  %vm1312_vm15 = vcmp.gt.s32.totalorder %v1311_v46, 0  ;;  %v9671_v36 = vmul.f32 %v863_v22, %v861_v1 }
 0x193   : > { %v867_v14 = vsub.s32 4, %v9407_v32  ;;  %v1236_v28 = vsel %vm1230_vm13, %v1233_v24, %v1235_v51  ;;  %v1313_v50 = vsel %vm1312_vm15, %v1311_v46, 0  ;;  %8671 = vsinq.f32 %v9606_v61 }
 0x194   : > { %v965_v60 = vand.u32 2147483647, %v964_v20  ;;  %v1255_v4 = vadd.s32 1, %v9659_v62  ;;  %v1315_v45 = vand.u32 31, %v1313_v50  ;;  %8673 = vcosq.f32 %v9629_v3 }
 0x195   : > { %v967_v49 = vcvt.s32.f32 %v960_v43  ;;  %v1169_v52 = vsub.s32 4294967266, %v9663_v55  ;;  %v1308_v1 = vand.u32 8388607, %v15424_v21  ;;  %v1057_v22 = vclz %v8069_v44 }
 0x196   : > { %v1252_v53 = vmul.u32 %v1245_v16, %v1236_v28  ;;  %vm1254_vm0 = vc.u32 %v9669_v8, %v9658_v2  ;;  %v1316_v46 = vsub.s32 32, %v1315_v45  ;;  %8675 = vsinq.f32 %v9629_v3 }
 0x197   : > { %v9688_v6 = vsel %vm783_vm12, %v867_v14, %v9407_v32  ;;  %v1256_v41 = vsel %vm1254_vm0, %v1255_v4, %v9659_v62  ;;  %v9691_v20 = vmul.f32 %v967_v49, %v965_v60  ;;  %v1149_v16 = vadd.s32 %v9478_v59, %v9487_v19 }
 0x198   : > { %15694 = vst [vmem:[#allocation25_spill] sm:$0xff] %v9688_v6  ;;  %v1257_v24 = vadd.s32 %v1256_v41, %v1252_v53  ;;  %v1319_v35 = vshrl.u32 %v15427_v42, %v1316_v46  ;;  %v1165_v3 = vsub.s32 32, %v9663_v55  ;;  %v1170_v51 = vadd.s32 127, %v1169_v52 }
 0x199   : > { %v1309_v26 = vor.u32 8388608, %v1308_v1  ;;  %v15695_v43 = vmov 2131351028   ;;  %v8070_v32 = vadd.s32 4294967294, %v1057_v22  ;;  %v1318_v62 = vshll.u32 %v15425_v38, %v1315_v45 }
 0x19a   : > { %v1322_v23 = vshrl.u32 %v15695_v43, %v1316_v46  ;;  %v1258_v44 = vadd.s32 536870912, %v1257_v24  ;;  %v15696_v7 = vmov 2102212464   ;;  %v1314_v28 = vshrl.u32 %v1313_v50, 5 }
 0x19b   : > { %v1325_v14 = vshrl.u32 %v15696_v7, %v1316_v46  ;;  %v1321_v59 = vshll.u32 %v15427_v42, %v1315_v45  ;;  %v1324_v19 = vshll.u32 %v15695_v43, %v1315_v45  ;;  %v1512_v60 = vand.u32 2139095040, %v9696_v54 }
 0x19c   : > { %v9705_v4 = vshrl.u32 %v1258_v44, 30  ;;  %v1320_v49 = vor.u32 %v1319_v35, %v1318_v62  ;;  %v1327_v52 = vshll.u32 %v15696_v7, %v1315_v45  ;;  %v1328_v1 = vshrl.u32 %v15432_v48, %v1316_v46 }
 0x19d   : > { %v1323_v22 = vor.u32 %v1322_v23, %v1321_v59  ;;  %v1326_v53 = vor.u32 %v1325_v14, %v1324_v19  ;;  %v1330_v41 = vshll.u32 %v15432_v48, %v1315_v45  ;;  %v15697_v21 = vmov 1326507024  }
 0x19e   : > { %v1331_v61 = vshrl.u32 %v15697_v21, %v1316_v46  ;;  %v1167_v50 = vshrl.u32 %v1149_v16, %v1165_v3  ;;  %v1329_v38 = vor.u32 %v1328_v1, %v1327_v52  ;;  %v9711_v42 = vshll.u32 %v1309_v26, 8 }
 0x19f   : > { %v15434_v10 = vand.u32 2147483647, %v9696_v54  ;;  %v1171_v17 = vshll.u32 %v1170_v51, 23  ;;  %vm8071_vm1 = vcmp.lt.s32.totalorder %v8070_v32, 0  ;;  %v1260_v35 = vshll.u32 %v9705_v4, 30 }
 0x1a0   : > { %v1332_v44 = vor.u32 %v1331_v61, %v1330_v41  ;;  %v15698_v62 = vmov 683565275   ;;  %vm1333_vm2 = vcmp.lt.s32.totalorder %v1314_v28, 1  ;;  %vm1336_vm4 = vcmp.lt.s32.totalorder %v1314_v28, 4  ;;  %v9716_v14 = vpop.eup %8671 }
 0x1a1   : > { %v1317_v9 = vshrl.u32 %v15698_v62, %v1316_v46  ;;  %v1513_v23 = vshrl.u32 %v1512_v60, 23  ;;  %15699 = vst [vmem:[#allocation26_spill] sm:$0xff] %v9716_v14  ;;  %vm1335_vm6 = vcmp.lt.s32.totalorder %v1314_v28, 3  ;;  %v1338_v45 = vsel %vm1336_vm4, %v1326_v53, 2102212464  ;;  %v9721_v26 = vpop.eup %8673 }
 0x1a2   : > { %v1341_v16 = vsel %vm1333_vm2, %v1320_v49, %v1323_v22  ;;  %v1342_v3 = vsel %vm1336_vm4, %v1329_v38, 920167782  ;;  %15700 = vst [vmem:[#allocation27_spill] sm:$0xff] %v9721_v26  ;;  %v9723_v51 = vsel %vm8071_vm1, 0, %v8070_v32  ;;  %vm1334_vm7 = vcmp.lt.s32.totalorder %v1314_v28, 2 }
 0x1a3   : > { %v1343_v61 = vsel %vm1335_vm6, %v1326_v53, %v1342_v3  ;;  %v1345_v46 = vsel %vm1333_vm2, %v1323_v22, %v1326_v53  ;;  %v15701_v59 = vand.u32 2147483647, %v9283_v5  ;;  %v15702_v19 = vmov 0  ;;  %v9739_v41 = vpop.eup %8675 }
 0x1a4   : > { %vm887_vm9 = vcmp.lt.s32.totalorder %v9357_v12, 0  ;;  %v9734_v60 = vsub.s32 %v1257_v24, %v1260_v35  ;;  %v1337_v52 = vsel %vm1333_vm2, %v1317_v9, %v1320_v49  ;;  %v1344_v32 = vsel %vm1334_vm7, %v1341_v16, %v1343_v61  ;;  %15705 = vst [vmem:[#allocation29_spill] sm:$0xff] %v9739_v41 }
 0x1a5   : > { %vm9729_vm8 = vcmp.le.f32.partialorder %v15701_v59, 0.7853982  ;;  %v1346_v1 = vsel %vm1336_vm4, %v1332_v44, 1326507024  ;;  %vm1095_vm10 = vcmp.lt.s32.totalorder %v9396_v31, 0  ;;  %v1339_v53 = vsel %vm1335_vm6, %v1323_v22, %v1338_v45 }
 0x1a6   : > { %v15703_v19 = vsel %vm9729_vm8, 4294967295, %v15702_v19  ;;  %v1347_v3 = vsel %vm1335_vm6, %v1329_v38, %v1346_v1  ;;  %v9745_v59 = vmul.u32.u64.low %v9711_v42, %v1344_v32  ;;  %v9746_v48 = vmul.u32.u64.high %v9711_v42, %v1344_v32, %v9745_v59 }
 0x1a7   : > { %15704 = vst [vmem:[#allocation28_spill] sm:$0xff] %v15703_v19  ;;  %v1166_v9 = vshll.u32 %v9564_v33, %v9663_v55  ;;  %v1172_v24 = vor.u32 4788187, %v1171_v17  ;;  %v1348_v49 = vsel %vm1334_vm7, %v1345_v46, %v1347_v3  ;;  %v8088_v35 = vadd.s32 4294967169, %v1513_v23 }
 0x1a8   : > { %v971_v44 = vsub.s32 4, %v9465_v0  ;;  %v1065_v16 = vsub.s32 4294967266, %v9723_v51  ;;  %v9755_v22 = vmul.u32.u64.low %v9711_v42, %v1348_v49  ;;  %v9756_v45 = vmul.u32.u64.high %v9711_v42, %v1348_v49, %v9755_v22 }
 0x1a9   : > { %v1168_v38 = vor.u32 %v1167_v50, %v1166_v9  ;;  %v1263_v61 = vsub.s32 0, %v9734_v60  ;;  %v1340_v32 = vsel %vm1334_vm7, %v1337_v52, %v1339_v53  ;;  %v1519_v1 = vadd.s32 1, %v8088_v35 }
 0x1aa   : > { %v15706_v55 = vxor.u32 2147483648, %v9671_v36  ;;  %v969_v17 = vxor.u32 2147483648, %v9691_v20  ;;  %v1179_v23 = vsub.s32 4, %v9545_v39  ;;  %v1359_v46 = vadd.s32 1, %v9746_v48 }
 0x1ab   : > { %v1173_v3 = vand.u32 2147483647, %v1172_v24  ;;  %v1061_v50 = vsub.s32 32, %v9723_v51  ;;  %v1516_v28 = vand.u32 8388607, %v15434_v10  ;;  %vm1520_vm11 = vcmp.gt.s32.totalorder %v1519_v1, 0 }
 0x1ac   : > { %v866_v33 = vsel %vm783_vm12, %v15706_v55, %v9671_v36  ;;  %v1066_v52 = vadd.s32 127, %v1065_v16  ;;  %v1356_v53 = vmul.u32 %v9711_v42, %v1340_v32  ;;  %vm1358_vm13 = vc.u32 %v9756_v45, %v9745_v59 }
 0x1ad   : > { %v1521_v36 = vsel %vm1520_vm11, %v1519_v1, 0  ;;  %v1175_v9 = vcvt.s32.f32 %v1168_v38  ;;  %v8077_v49 = vmin.u32 %v1263_v61, %v9734_v60  ;;  %v1360_v35 = vsel %vm1358_vm13, %v1359_v46, %v9746_v48  ;;  %v9800_v46 = vpop.f32.mrf.mxu0 }
 0x1ae   : > { %v1523_v22 = vand.u32 31, %v1521_v36  ;;  %v9779_v24 = vsel %vm9729_vm8, %v9283_v5, %v866_v33  ;;  %v9784_v16 = vsel %vm887_vm9, %v971_v44, %v9465_v0  ;;  %v1045_v42 = vadd.s32 %v9589_v29, %v9585_v11 }
 0x1af   : > { %v1361_v32 = vadd.s32 %v1360_v35, %v1356_v53  ;;  %v9791_v38 = vsel %vm887_vm9, %v969_v17, %v9691_v20  ;;  %v9793_v48 = vmul.f32 %v1175_v9, %v1173_v3  ;;  %v9798_v61 = vsel %vm1095_vm10, %v1179_v23, %v9545_v39 }
 0x1b0   : > { %15707 = vst [vmem:[#allocation30_spill] sm:$0xff] %v9798_v61  ;;  %v1524_v1 = vsub.s32 32, %v1523_v22  ;;  %v1063_v55 = vshrl.u32 %v1045_v42, %v1061_v50  ;;  %v1067_v0 = vshll.u32 %v1066_v52, 23  ;;  %v1517_v33 = vor.u32 8388608, %v1516_v28 }
 0x1b1   : > { %v1362_v44 = vadd.s32 536870912, %v1361_v32  ;;  %v1265_v11 = vclz %v8077_v49  ;;  %v15708_v29 = vmov 2475754826   ;;  %v1526_v9 = vshll.u32 %v15698_v62, %v1523_v22 }
 0x1b2   : > { %v1527_v53 = vshrl.u32 %v15708_v29, %v1524_v1  ;;  %v1530_v20 = vshrl.u32 %v15695_v43, %v1524_v1  ;;  %v1533_v17 = vshrl.u32 %v15696_v7, %v1524_v1  ;;  %v1529_v39 = vshll.u32 %v15708_v29, %v1523_v22 }
 0x1b3   : > { %v9805_v3 = vshrl.u32 %v1362_v44, 30  ;;  %v15709_v23 = vmov 920167782   ;;  %v1522_v52 = vshrl.u32 %v1521_v36, 5  ;;  %v1532_v28 = vshll.u32 %v15695_v43, %v1523_v22 }
 0x1b4   : > { %v1536_v50 = vshrl.u32 %v15709_v23, %v1524_v1  ;;  %v1535_v35 = vshll.u32 %v15696_v7, %v1523_v22  ;;  %v1408_v49 = vand.u32 2139095040, %v9800_v46  ;;  %v1062_v42 = vshll.u32 %v9650_v18, %v9723_v51 }
 0x1b5   : > { %v1364_v10 = vshll.u32 %v9805_v3, 30  ;;  %v1528_v44 = vor.u32 %v1527_v53, %v1526_v9  ;;  %v1531_v5 = vor.u32 %v1530_v20, %v1529_v39  ;;  %v1534_v14 = vor.u32 %v1533_v17, %v1532_v28 }
 0x1b6   : > { %v1537_v40 = vor.u32 %v1536_v50, %v1535_v35  ;;  %v1538_v37 = vshll.u32 %v15709_v23, %v1523_v22  ;;  %v1539_v15 = vshrl.u32 %v15697_v21, %v1524_v1  ;;  %v15710_v36 = vand.u32 2147483647, %v9357_v12 }
 0x1b7   : > { %v1064_v63 = vor.u32 %v1063_v55, %v1062_v42  ;;  %v1068_v57 = vor.u32 4788187, %v1067_v0  ;;  %v9824_v58 = vsub.s32 %v1361_v32, %v1364_v10  ;;  %v8078_v51 = vadd.s32 4294967294, %v1265_v11 }
 0x1b8   : > { %vm9820_vm12 = vcmp.le.f32.partialorder %v15710_v36, 0.7853982  ;;  %v1540_v53 = vor.u32 %v1539_v15, %v1538_v37  ;;  %vm1541_vm15 = vcmp.lt.s32.totalorder %v1522_v52, 1  ;;  %v1409_v20 = vshrl.u32 %v1408_v49, 23 }
 0x1b9   : > { %v15713_v22 = vand.u32 2147483647, %v9396_v31  ;;  %v15714_v17 = vmov 0  ;;  %v1525_v9 = vshrl.u32 %v15698_v62, %v1524_v1  ;;  %vm1544_vm1 = vcmp.lt.s32.totalorder %v1522_v52, 4 }
 0x1ba   : > { %v1549_v55 = vsel %vm1541_vm15, %v1528_v44, %v1531_v5  ;;  %v1557_v0 = vshll.u32 %v1517_v33, 8  ;;  %vm1543_vm2 = vcmp.lt.s32.totalorder %v1522_v52, 3  ;;  %v1550_v10 = vsel %vm1544_vm1, %v1537_v40, 920167782 }
 0x1bb   : > { %vm9829_vm0 = vcmp.le.f32.partialorder %v15713_v22, 0.7853982  ;;  %v1553_v32 = vsel %vm1541_vm15, %v1531_v5, %v1534_v14  ;;  %v1554_v11 = vsel %vm1544_vm1, %v1540_v53, 1326507024  ;;  %v1367_v15 = vsub.s32 0, %v9824_v58 }
 0x1bc   : > { %v15715_v17 = vsel %vm9829_vm0, 4294967295, %v15714_v17  ;;  %vm1542_vm4 = vcmp.lt.s32.totalorder %v1522_v52, 2  ;;  %v1546_v37 = vsel %vm1544_vm1, %v1534_v14, 2102212464  ;;  %v1551_v39 = vsel %vm1543_vm2, %v1534_v14, %v1550_v10 }
 0x1bd   : > { %15716 = vst [vmem:[#allocation31_spill] sm:$0xff] %v15715_v17  ;;  %vm8079_vm6 = vcmp.lt.s32.totalorder %v8078_v51, 0  ;;  %v1552_v50 = vsel %vm1542_vm4, %v1549_v55, %v1551_v39  ;;  %v1555_v1 = vsel %vm1543_vm2, %v1537_v40, %v1554_v11  ;;  %v8084_v28 = vadd.s32 4294967169, %v1409_v20 }
 0x1be   : > { %v1069_v35 = vand.u32 2147483647, %v1068_v57  ;;  %v1071_v49 = vcvt.s32.f32 %v1064_v63  ;;  %v1545_v33 = vsel %vm1541_vm15, %v1525_v9, %v1528_v44  ;;  %v1556_v42 = vsel %vm1542_vm4, %v1553_v32, %v1555_v1 }
 0x1bf   : > { %v1547_v36 = vsel %vm1543_vm2, %v1531_v5, %v1546_v37  ;;  %v9843_v53 = vmul.u32.u64.low %v1557_v0, %v1556_v42  ;;  %v9844_v22 = vmul.u32.u64.high %v1557_v0, %v1556_v42, %v9843_v53  ;;  %v1415_v18 = vadd.s32 1, %v8084_v28 }
 0x1c0   : > { %v9846_v19 = vsel %vm8079_vm6, 0, %v8078_v51  ;;  %v8081_v14 = vmin.u32 %v1367_v15, %v9824_v58  ;;  %v9849_v55 = vmul.u32.u64.low %v1557_v0, %v1552_v50  ;;  %v9850_v10 = vmul.u32.u64.high %v1557_v0, %v1552_v50, %v9849_v55 }
 0x1c1   : > { %8677 = vcosq.f32 %v9779_v24  ;;  %v9858_v57 = vsel %vm9820_vm12, %v9357_v12, %v9791_v38  ;;  %vm1416_vm7 = vcmp.gt.s32.totalorder %v1415_v18, 0  ;;  %v1177_v40 = vxor.u32 2147483648, %v9793_v48 }
 0x1c2   : > { %v9864_v63 = vmul.f32 %v1071_v49, %v1069_v35  ;;  %v1548_v44 = vsel %vm1542_vm4, %v1545_v33, %v1547_v36  ;;  %v1417_v51 = vsel %vm1416_vm7, %v1415_v18, 0  ;;  %8679 = vsinq.f32 %v9779_v24 }
 0x1c3   : > { %v1269_v38 = vsub.s32 32, %v9846_v19  ;;  %vm1566_vm9 = vc.u32 %v9844_v22, %v9849_v55  ;;  %v1273_v9 = vsub.s32 4294967266, %v9846_v19  ;;  %v1369_v32 = vclz %v8081_v14 }
 0x1c4   : > { %v1567_v11 = vadd.s32 1, %v9850_v10  ;;  %v15717_v52 = vand.u32 2147483647, %v9800_v46  ;;  %8681 = vcosq.f32 %v9858_v57  ;;  %v1253_v24 = vadd.s32 %v9658_v2, %v9669_v8 }
 0x1c5   : > { %v1564_v18 = vmul.u32 %v1557_v0, %v1548_v44  ;;  %v1419_v37 = vand.u32 31, %v1417_v51  ;;  %v1178_v39 = vsel %vm1095_vm10, %v1177_v40, %v9793_v48  ;;  %v1270_v1 = vshll.u32 %v9734_v60, %v9846_v19 }
 0x1c6   : > { %v1412_v15 = vand.u32 8388607, %v15717_v52  ;;  %v1568_v28 = vsel %vm1566_vm9, %v1567_v11, %v9850_v10  ;;  %v1271_v35 = vshrl.u32 %v1253_v24, %v1269_v38  ;;  %v9888_v33 = vshrl.u32 %v1417_v51, 5  ;;  %v9898_v51 = vpop.f32.mrf.mxu1 }
 0x1c7   : > { %v1569_v49 = vadd.s32 %v1568_v28, %v1564_v18  ;;  %v1420_v42 = vsub.s32 32, %v1419_v37  ;;  %v1274_v36 = vadd.s32 127, %v1273_v9  ;;  %v8082_v2 = vadd.s32 4294967294, %v1369_v32 }
 0x1c8   : > { %v1413_v8 = vor.u32 8388608, %v1412_v15  ;;  %v1422_v0 = vshll.u32 %v15698_v62, %v1419_v37  ;;  %v1425_v14 = vshll.u32 %v15708_v29, %v1419_v37  ;;  %v1428_v19 = vshll.u32 %v15695_v43, %v1419_v37 }
 0x1c9   : > { %v1570_v53 = vadd.s32 536870912, %v1569_v49  ;;  %v1423_v48 = vshrl.u32 %v15708_v29, %v1420_v42  ;;  %v1426_v40 = vshrl.u32 %v15695_v43, %v1420_v42  ;;  %v1429_v60 = vshrl.u32 %v15696_v7, %v1420_v42 }
 0x1ca   : > { %v1431_v10 = vshll.u32 %v15696_v7, %v1419_v37  ;;  %v1432_v44 = vshrl.u32 %v15709_v23, %v1420_v42  ;;  %vm1437_vm10 = vcmp.lt.s32.totalorder %v9888_v33, 1  ;;  %vm991_vm11 = vcmp.lt.s32.totalorder %v9441_v25, 0 }
 0x1cb   : > { %v9900_v38 = vshrl.u32 %v1570_v53, 30  ;;  %v1424_v9 = vor.u32 %v1423_v48, %v1422_v0  ;;  %v1427_v32 = vor.u32 %v1426_v40, %v1425_v14  ;;  %v1430_v11 = vor.u32 %v1429_v60, %v1428_v19 }
 0x1cc   : > { %v1433_v52 = vor.u32 %v1432_v44, %v1431_v10  ;;  %v1434_v15 = vshll.u32 %v15709_v23, %v1419_v37  ;;  %v1435_v24 = vshrl.u32 %v15697_v21, %v1420_v42  ;;  %v1275_v18 = vshll.u32 %v1274_v36, 23 }
 0x1cd   : > { %vm1440_vm13 = vcmp.lt.s32.totalorder %v9888_v33, 4  ;;  %v1445_v28 = vsel %vm1437_vm10, %v1424_v9, %v1427_v32  ;;  %v1616_v53 = vand.u32 2139095040, %v9898_v51  ;;  %vm1438_vm15 = vcmp.lt.s32.totalorder %v9888_v33, 2 }
 0x1ce   : > { %v9910_v0 = vpop.eup %8677  ;;  %v1436_v48 = vor.u32 %v1435_v24, %v1434_v15  ;;  %vm1439_vm1 = vcmp.lt.s32.totalorder %v9888_v33, 3  ;;  %v1446_v37 = vsel %vm1440_vm13, %v1433_v52, 920167782  ;;  %v15719_v14 = vand.u32 2147483647, %v9441_v25 }
 0x1cf   : > { %15718 = vst [vmem:[#allocation32_spill] sm:$0xff] %v9910_v0  ;;  %v1572_v40 = vshll.u32 %v9900_v38, 30  ;;  %v1421_v19 = vshrl.u32 %v15698_v62, %v1420_v42  ;;  %v1442_v60 = vsel %vm1440_vm13, %v1430_v11, 2102212464  ;;  %v1447_v10 = vsel %vm1439_vm1, %v1430_v11, %v1446_v37  ;;  %v9928_v44 = vpop.eup %8679 }
 0x1d0   : > { %vm9918_vm2 = vcmp.le.f32.partialorder %v15719_v14, 0.7853982  ;;  %15722 = vst [vmem:[#allocation33_spill] sm:$0xff] %v9928_v44  ;;  %v1272_v15 = vor.u32 %v1271_v35, %v1270_v1  ;;  %vm8083_vm4 = vcmp.lt.s32.totalorder %v8082_v2, 0  ;;  %v1448_v24 = vsel %vm1438_vm15, %v1445_v28, %v1447_v10 }
 0x1d1   : > { %v1453_v14 = vshll.u32 %v1413_v8, 8  ;;  %v1276_v20 = vor.u32 4788187, %v1275_v18  ;;  %v1441_v5 = vsel %vm1437_vm10, %v1421_v19, %v1424_v9  ;;  %v1449_v42 = vsel %vm1437_vm10, %v1427_v32, %v1430_v11  ;;  %v9938_v0 = vpop.eup %8681 }
 0x1d2   : > { %v1450_v50 = vsel %vm1440_vm13, %v1436_v48, 1326507024  ;;  %15723 = vst [vmem:[#allocation34_spill] sm:$0xff] %v9938_v0  ;;  %v1443_v1 = vsel %vm1439_vm1, %v1427_v32, %v1442_v60  ;;  %v9948_v18 = vsel %vm8083_vm4, 0, %v8082_v2  ;;  %v9950_v9 = vsub.s32 %v1569_v49, %v1572_v40 }
 0x1d3   : > { %v1451_v35 = vsel %vm1439_vm1, %v1433_v52, %v1450_v50  ;;  %v9944_v28 = vmul.u32.u64.low %v1453_v14, %v1448_v24  ;;  %v9945_v8 = vmul.u32.u64.high %v1453_v14, %v1448_v24, %v9944_v28  ;;  %v1617_v48 = vshrl.u32 %v1616_v53, 23 }
 0x1d4   : > { %v1452_v11 = vsel %vm1438_vm15, %v1449_v42, %v1451_v35  ;;  %v1181_v37 = vsel %vm9829_vm0, %v9396_v31, %v1178_v39  ;;  %vm1303_vm6 = vcmp.lt.s32.totalorder %v9587_v30, 0  ;;  %v15446_v52 = vand.u32 2147483647, %v9898_v51 }
 0x1d5   : > { %v9958_v32 = vmul.u32.u64.low %v1453_v14, %v1452_v11  ;;  %v9959_v50 = vmul.u32.u64.high %v1453_v14, %v1452_v11, %v9958_v32  ;;  %v15724_v2 = vxor.u32 2147483648, %v9864_v63  ;;  %v1277_v40 = vand.u32 2147483647, %v1276_v20  ;;  %v9983_v20 = vpop.f32.mrf.mxu0 }
 0x1d6   : > { %v1444_v53 = vsel %vm1438_vm15, %v1441_v5, %v1443_v1  ;;  %v8092_v19 = vadd.s32 4294967169, %v1617_v48  ;;  %8683 = vsinq.f32 %v9858_v57  ;;  %v1075_v39 = vsub.s32 4, %v9636_v34 }
 0x1d7   : > { %v1074_v49 = vsel %vm991_vm11, %v15724_v2, %v9864_v63  ;;  %v1377_v60 = vsub.s32 4294967266, %v9948_v18  ;;  %v1463_v10 = vadd.s32 1, %v9945_v8  ;;  %8685 = vcosq.f32 %v1181_v37 }
 0x1d8   : > { %v1279_v24 = vcvt.s32.f32 %v1272_v15  ;;  %v1575_v42 = vsub.s32 0, %v9950_v9  ;;  %v1623_v35 = vadd.s32 1, %v8092_v19  ;;  %v9977_v63 = vsel %vm9918_vm2, %v9441_v25, %v1074_v49 }
 0x1d9   : > { %v1460_v5 = vmul.u32 %v1453_v14, %v1444_v53  ;;  %vm1462_vm7 = vc.u32 %v9959_v50, %v9944_v28  ;;  %v1620_v57 = vand.u32 8388607, %v15446_v52  ;;  %v1387_v15 = vsub.s32 4, %v9805_v3 }
 0x1da   : > { %v9985_v33 = vmul.f32 %v1279_v24, %v1277_v40  ;;  %v1464_v1 = vsel %vm1462_vm7, %v1463_v10, %v9945_v8  ;;  %vm1624_vm9 = vcmp.gt.s32.totalorder %v1623_v35, 0  ;;  %v1373_v11 = vsub.s32 32, %v9948_v18 }
 0x1db   : > { %v9990_v48 = vadd.s32 127, %v1377_v60  ;;  %v1465_v14 = vadd.s32 %v1464_v1, %v1460_v5  ;;  %v1625_v32 = vsel %vm1624_vm9, %v1623_v35, 0  ;;  %8687 = vsinq.f32 %v1181_v37 }
 0x1dc   : > { %v9995_v2 = vsel %vm991_vm11, %v1075_v39, %v9636_v34  ;;  %v9998_v49 = vmin.u32 %v1575_v42, %v9950_v9  ;;  %v1720_v40 = vand.u32 2139095040, %v9983_v20  ;;  %v1357_v8 = vadd.s32 %v9745_v59, %v9756_v45 }
 0x1dd   : > { %v1466_v53 = vadd.s32 536870912, %v1465_v14  ;;  %v1621_v19 = vor.u32 8388608, %v1620_v57  ;;  %v1627_v60 = vand.u32 31, %v1625_v32  ;;  %8689 = vcosq.f32 %v9977_v63 }
 0x1de   : > { %v1281_v37 = vxor.u32 2147483648, %v9985_v33  ;;  %v10009_v34 = vsel %vm1303_vm6, %v1387_v15, %v9805_v3  ;;  %v1375_v39 = vshrl.u32 %v1357_v8, %v1373_v11  ;;  %v1379_v24 = vshll.u32 %v9990_v48, 23 }
 0x1df   : > { %v10012_v42 = vshrl.u32 %v1466_v53, 30  ;;  %v1628_v59 = vsub.s32 32, %v1627_v60  ;;  %v1577_v45 = vclz %v9998_v49  ;;  %v1626_v35 = vshrl.u32 %v1625_v32, 5 }
 0x1e0   : > { %v1721_v57 = vshrl.u32 %v1720_v40, 23  ;;  %v1630_v52 = vshll.u32 %v15698_v62, %v1627_v60  ;;  %v10019_v3 = vshll.u32 %v1621_v19, 8  ;;  %vm1199_vm10 = vcmp.lt.s32.totalorder %v9555_v56, 0 }
 0x1e1   : > { %v1468_v1 = vshll.u32 %v10012_v42, 30  ;;  %v1631_v10 = vshrl.u32 %v15708_v29, %v1628_v59  ;;  %v1633_v15 = vshll.u32 %v15708_v29, %v1627_v60  ;;  %v1634_v11 = vshrl.u32 %v15695_v43, %v1628_v59 }
 0x1e2   : > { %v1636_v48 = vshll.u32 %v15695_v43, %v1627_v60  ;;  %v1637_v32 = vshrl.u32 %v15696_v7, %v1628_v59  ;;  %v1639_v8 = vshll.u32 %v15696_v7, %v1627_v60  ;;  %v1640_v53 = vshrl.u32 %v15709_v23, %v1628_v59 }
 0x1e3   : > { %v10026_v49 = vsub.s32 %v1465_v14, %v1468_v1  ;;  %v1632_v40 = vor.u32 %v1631_v10, %v1630_v52  ;;  %v10030_v5 = vpop.eup %8683  ;;  %v1635_v19 = vor.u32 %v1634_v11, %v1633_v15  ;;  %vm1645_vm11 = vcmp.lt.s32.totalorder %v1626_v35, 1 }
 0x1e4   : > { %15725 = vst [vmem:[#allocation35_spill] sm:$0xff] %v10030_v5  ;;  %v1638_v31 = vor.u32 %v1637_v32, %v1636_v48  ;;  %v8096_v44 = vadd.s32 4294967169, %v1721_v57  ;;  %v10032_v61 = vpop.eup %8685  ;;  %v1641_v6 = vor.u32 %v1640_v53, %v1639_v8  ;;  %v1642_v26 = vshll.u32 %v15709_v23, %v1627_v60 }
 0x1e5   : > { %15726 = vst [vmem:[#allocation36_spill] sm:$0xff] %v10032_v61  ;;  %v1471_v17 = vsub.s32 0, %v10026_v49  ;;  %v1643_v14 = vshrl.u32 %v15697_v21, %v1628_v59  ;;  %v15727_v52 = vand.u32 2147483647, %v9555_v56  ;;  %v15728_v10 = vmov 0 }
 0x1e6   : > { %v15731_v1 = vand.u32 2147483647, %v9587_v30  ;;  %v1629_v57 = vshrl.u32 %v15698_v62, %v1628_v59  ;;  %vm1647_vm1 = vcmp.lt.s32.totalorder %v1626_v35, 3  ;;  %vm1648_vm4 = vcmp.lt.s32.totalorder %v1626_v35, 4 }
 0x1e7   : > { %vm10039_vm13 = vcmp.le.f32.partialorder %v15727_v52, 0.7853982  ;;  %v1653_v60 = vsel %vm1645_vm11, %v1632_v40, %v1635_v19  ;;  %v8085_v11 = vmin.u32 %v1471_v17, %v10026_v49  ;;  %v1644_v48 = vor.u32 %v1643_v14, %v1642_v26 }
 0x1e8   : > { %v15729_v10 = vsel %vm10039_vm13, 4294967295, %v15728_v10  ;;  %vm10045_vm15 = vcmp.le.f32.partialorder %v15731_v1, 0.7853982  ;;  %v1650_v32 = vsel %vm1648_vm4, %v1638_v31, 2102212464  ;;  %vm1646_vm7 = vcmp.lt.s32.totalorder %v1626_v35, 2  ;;  %v10054_v61 = vpop.eup %8687 }
 0x1e9   : > { %15730 = vst [vmem:[#allocation37_spill] sm:$0xff] %v15729_v10  ;;  %v1654_v8 = vsel %vm1648_vm4, %v1641_v6, 920167782  ;;  %v1657_v52 = vsel %vm1645_vm11, %v1635_v19, %v1638_v31  ;;  %v1727_v1 = vadd.s32 1, %v8096_v44  ;;  %15734 = vst [vmem:[#allocation38_spill] sm:$0xff] %v10054_v61  ;;  %v1473_v41 = vclz %v8085_v11 }
 0x1ea   : > { %v1655_v53 = vsel %vm1647_vm1, %v1638_v31, %v1654_v8  ;;  %v1649_v59 = vsel %vm1645_vm11, %v1629_v57, %v1632_v40  ;;  %v1658_v13 = vsel %vm1648_vm4, %v1644_v48, 1326507024  ;;  %v1651_v12 = vsel %vm1647_vm1, %v1635_v19, %v1650_v32  ;;  %v10065_v8 = vpop.eup %8689 }
 0x1eb   : > { %v1656_v47 = vsel %vm1646_vm7, %v1653_v60, %v1655_v53  ;;  %v1659_v26 = vsel %vm1647_vm1, %v1641_v6, %v1658_v13  ;;  %v1282_v31 = vsel %vm1199_vm10, %v1281_v37, %v9985_v33  ;;  %v1374_v44 = vshll.u32 %v9824_v58, %v9948_v18 }
 0x1ec   : > { %v10061_v17 = vmul.u32.u64.low %v10019_v3, %v1656_v47  ;;  %v10062_v14 = vmul.u32.u64.high %v10019_v3, %v1656_v47, %v10061_v17  ;;  %v8086_v40 = vadd.s32 4294967294, %v1473_v41  ;;  %v1660_v57 = vsel %vm1646_vm7, %v1657_v52, %v1659_v26 }
 0x1ed   : > { %v8090_v19 = vadd.s32 4294967294, %v1577_v45  ;;  %v10074_v13 = vmul.u32.u64.low %v10019_v3, %v1660_v57  ;;  %v10075_v6 = vmul.u32.u64.high %v10019_v3, %v1660_v57, %v10074_v13  ;;  %vm1728_vm9 = vcmp.gt.s32.totalorder %v1727_v1, 0 }
 0x1ee   : > { %v1376_v47 = vor.u32 %v1375_v39, %v1374_v44  ;;  %v1380_v60 = vor.u32 4788187, %v1379_v24  ;;  %v1652_v11 = vsel %vm1646_vm7, %v1649_v59, %v1651_v12  ;;  %v1729_v48 = vsel %vm1728_vm9, %v1727_v1, 0 }
 0x1ef   : > { %vm8087_vm11 = vcmp.lt.s32.totalorder %v8086_v40, 0  ;;  %v1671_v33 = vadd.s32 1, %v10062_v14  ;;  %v15735_v37 = vand.u32 2147483647, %v9983_v20  ;;  %v1731_v41 = vand.u32 31, %v1729_v48 }
 0x1f0   : > { %8691 = vsinq.f32 %v9977_v63  ;;  %v15736_v18 = vsub.s32 4, %v9705_v4  ;;  %v10092_v12 = vsel %vm10039_vm13, %v9555_v56, %v1282_v31  ;;  %vm8091_vm1 = vcmp.lt.s32.totalorder %v8090_v19, 0 }
 0x1f1   : > { %v1724_v58 = vand.u32 8388607, %v15735_v37  ;;  %v1668_v24 = vmul.u32 %v10019_v3, %v1652_v11  ;;  %vm1670_vm4 = vc.u32 %v10075_v6, %v10061_v17  ;;  %v1732_v63 = vsub.s32 32, %v1731_v41 }
 0x1f2   : > { %v10087_v45 = vsel %vm1199_vm10, %v15736_v18, %v9705_v4  ;;  %v1381_v35 = vand.u32 2147483647, %v1380_v60  ;;  %v1383_v32 = vcvt.s32.f32 %v1376_v47  ;;  %v10100_v4 = vsel %vm8087_vm11, 0, %v8086_v40 }
 0x1f3   : > { %15737 = vst [vmem:[#allocation39_spill] sm:$0xff] %v10087_v45  ;;  %v1672_v53 = vsel %vm1670_vm4, %v1671_v33, %v10062_v14  ;;  %v1725_v1 = vor.u32 8388608, %v1724_v58  ;;  %v1735_v59 = vshrl.u32 %v15708_v29, %v1732_v63  ;;  %v1738_v26 = vshrl.u32 %v15695_v43, %v1732_v63 }
 0x1f4   : > { %v1673_v52 = vadd.s32 %v1672_v53, %v1668_v24  ;;  %v10105_v31 = vsel %vm8091_vm1, 0, %v8090_v19  ;;  %v1734_v3 = vshll.u32 %v15698_v62, %v1731_v41  ;;  %v1737_v44 = vshll.u32 %v15708_v29, %v1731_v41 }
 0x1f5   : > { %v1741_v57 = vshrl.u32 %v15696_v7, %v1732_v63  ;;  %v1481_v13 = vsub.s32 4294967266, %v10100_v4  ;;  %v1730_v47 = vshrl.u32 %v1729_v48, 5  ;;  %v1740_v14 = vshll.u32 %v15695_v43, %v1731_v41 }
 0x1f6   : > { %v1674_v40 = vadd.s32 536870912, %v1673_v52  ;;  %v1736_v60 = vor.u32 %v1735_v59, %v1734_v3  ;;  %v1739_v11 = vor.u32 %v1738_v26, %v1737_v44  ;;  %v1743_v33 = vshll.u32 %v15696_v7, %v1731_v41 }
 0x1f7   : > { %v1744_v37 = vshrl.u32 %v15709_v23, %v1732_v63  ;;  %v1742_v58 = vor.u32 %v1741_v57, %v1740_v14  ;;  %v1746_v18 = vshll.u32 %v15709_v23, %v1731_v41  ;;  %v1747_v24 = vshrl.u32 %v15697_v21, %v1732_v63 }
 0x1f8   : > { %v10114_v19 = vshrl.u32 %v1674_v40, 30  ;;  %v1384_v53 = vmul.f32 %v1383_v32, %v1381_v35  ;;  %v1585_v39 = vsub.s32 4294967266, %v10105_v31  ;;  %v1461_v48 = vadd.s32 %v9944_v28, %v9959_v50 }
 0x1f9   : > { %v1745_v56 = vor.u32 %v1744_v37, %v1743_v33  ;;  %v1748_v26 = vor.u32 %v1747_v24, %v1746_v18  ;;  %vm1749_vm10 = vcmp.lt.s32.totalorder %v1730_v47, 1  ;;  %v1765_v3 = vshll.u32 %v1725_v1, 8  ;;  %v10128_v33 = vpop.f32.mrf.mxu1 }
 0x1fa   : > { %v1676_v59 = vshll.u32 %v10114_v19, 30  ;;  %v1482_v44 = vadd.s32 127, %v1481_v13  ;;  %v1733_v40 = vshrl.u32 %v15698_v62, %v1732_v63  ;;  %vm1752_vm7 = vcmp.lt.s32.totalorder %v1730_v47, 4 }
 0x1fb   : > { %v1757_v41 = vsel %vm1749_vm10, %v1736_v60, %v1739_v11  ;;  %vm1751_vm9 = vcmp.lt.s32.totalorder %v1730_v47, 3  ;;  %v1754_v35 = vsel %vm1752_vm7, %v1742_v58, 2102212464  ;;  %v1758_v32 = vsel %vm1752_vm7, %v1745_v56, 920167782 }
 0x1fc   : > { %v10124_v57 = vsub.s32 %v1673_v52, %v1676_v59  ;;  %v1477_v14 = vsub.s32 32, %v10100_v4  ;;  %vm1750_vm11 = vcmp.lt.s32.totalorder %v1730_v47, 2  ;;  %v1759_v28 = vsel %vm1751_vm9, %v1742_v58, %v1758_v32 }
 0x1fd   : > { %v1761_v50 = vsel %vm1749_vm10, %v1739_v11, %v1742_v58  ;;  %v10130_v1 = vpop.eup %8691  ;;  %v1753_v13 = vsel %vm1749_vm10, %v1733_v40, %v1736_v60  ;;  %v1760_v52 = vsel %vm1750_vm11, %v1757_v41, %v1759_v28  ;;  %v1762_v37 = vsel %vm1752_vm7, %v1748_v26, 1326507024  ;;  %v10146_v41 = vpop.f32.mrf.mxu0 }
 0x1fe   : > { %v1679_v63 = vsub.s32 0, %v10124_v57  ;;  %v1755_v18 = vsel %vm1751_vm9, %v1739_v11, %v1754_v35  ;;  %v1763_v24 = vsel %vm1751_vm9, %v1745_v56, %v1762_v37  ;;  %v1483_v10 = vshll.u32 %v1482_v44, 23 }
 0x1ff   : > { %v10135_v59 = vmul.u32.u64.low %v1765_v3, %v1760_v52  ;;  %v10136_v61 = vmul.u32.u64.high %v1765_v3, %v1760_v52, %v10135_v59  ;;  %v1764_v58 = vsel %vm1750_vm11, %v1761_v50, %v1763_v24  ;;  %v1928_v45 = vand.u32 2139095040, %v10128_v33 }
 0x200   : > { %v8093_v32 = vmin.u32 %v1679_v63, %v10124_v57  ;;  %8693 = vcosq.f32 %v10092_v12  ;;  %v1385_v25 = vxor.u32 2147483648, %v1384_v53  ;;  %v1479_v40 = vshrl.u32 %v1461_v48, %v1477_v14 }
 0x201   : > { %v10142_v0 = vmul.u32.u64.low %v1765_v3, %v1764_v58  ;;  %v10143_v60 = vmul.u32.u64.high %v1765_v3, %v1764_v58, %v10142_v0  ;;  %v1756_v56 = vsel %vm1750_vm11, %v1753_v13, %v1755_v18  ;;  %v1929_v11 = vshrl.u32 %v1928_v45, 23 }
 0x202   : > { %v1681_v26 = vclz %v8093_v32  ;;  %v1581_v44 = vsub.s32 32, %v10105_v31  ;;  %v1586_v35 = vadd.s32 127, %v1585_v39  ;;  %v1775_v28 = vadd.s32 1, %v10136_v61 }
 0x203   : > { %v15462_v50 = vand.u32 2147483647, %v10128_v33  ;;  %v1478_v63 = vshll.u32 %v10026_v49, %v10100_v4  ;;  %v1484_v52 = vor.u32 4788187, %v1483_v10  ;;  %v8104_v0 = vadd.s32 4294967169, %v1929_v11 }
 0x204   : > { %v8094_v37 = vadd.s32 4294967294, %v1681_v26  ;;  %v1565_v47 = vadd.s32 %v9849_v55, %v9844_v22  ;;  %v1772_v48 = vmul.u32 %v1765_v3, %v1756_v56  ;;  %vm1774_vm1 = vc.u32 %v10143_v60, %v10135_v59 }
 0x205   : > { %v1824_v45 = vand.u32 2139095040, %v10146_v41  ;;  %v1386_v39 = vsel %vm1303_vm6, %v1385_v25, %v1384_v53  ;;  %v1480_v14 = vor.u32 %v1479_v40, %v1478_v63  ;;  %v1776_v13 = vsel %vm1774_vm1, %v1775_v28, %v10136_v61 }
 0x206   : > { %v1935_v18 = vadd.s32 1, %v8104_v0  ;;  %v1582_v49 = vshll.u32 %v9950_v9, %v10105_v31  ;;  %v1583_v10 = vshrl.u32 %v1565_v47, %v1581_v44  ;;  %v1587_v4 = vshll.u32 %v1586_v35, 23 }
 0x207   : > { %v1777_v24 = vadd.s32 %v1776_v13, %v1772_v48  ;;  %v1485_v32 = vand.u32 2147483647, %v1484_v52  ;;  %vm8095_vm4 = vcmp.lt.s32.totalorder %v8094_v37, 0  ;;  %v1932_v22 = vand.u32 8388607, %v15462_v50 }
 0x208   : > { %vm1936_vm10 = vcmp.gt.s32.totalorder %v1935_v18, 0  ;;  %v15461_v25 = vand.u32 2147483647, %v10146_v41  ;;  %v1825_v53 = vshrl.u32 %v1824_v45, 23  ;;  %8695 = vsinq.f32 %v10092_v12 }
 0x209   : > { %v1778_v55 = vadd.s32 536870912, %v1777_v24  ;;  %v1937_v3 = vsel %vm1936_vm10, %v1935_v18, 0  ;;  %v10169_v61 = vsel %vm10045_vm15, %v9587_v30, %v1386_v39  ;;  %v1487_v9 = vcvt.s32.f32 %v1480_v14 }
 0x20a   : > { %v1939_v31 = vand.u32 31, %v1937_v3  ;;  %v10171_v58 = vor.u32 %v1583_v10, %v1582_v49  ;;  %v10173_v40 = vor.u32 4788187, %v1587_v4  ;;  %v10175_v26 = vsel %vm8095_vm4, 0, %v8094_v37 }
 0x20b   : > { %v10177_v56 = vshrl.u32 %v1778_v55, 30  ;;  %v10179_v11 = vmul.f32 %v1487_v9, %v1485_v32  ;;  %v10183_v12 = vadd.s32 %v10061_v17, %v10075_v6  ;;  %v1933_v44 = vor.u32 8388608, %v1932_v22 }
 0x20c   : > { %v1940_v35 = vsub.s32 32, %v1939_v31  ;;  %v10186_v28 = vadd.s32 %v10135_v59, %v10143_v60  ;;  %v8100_v52 = vadd.s32 4294967169, %v1825_v53  ;;  %v1828_v37 = vand.u32 8388607, %v15461_v25 }
 0x20d   : > { %v1780_v63 = vshll.u32 %v10177_v56, 30  ;;  %v10191_v0 = vpop.eup %8693  ;;  %v1689_v47 = vsub.s32 4294967266, %v10175_v26  ;;  %v1942_v48 = vshll.u32 %v15698_v62, %v1939_v31  ;;  %v1945_v6 = vshll.u32 %v15708_v29, %v1939_v31 }
 0x20e   : > { %15738 = vst [vmem:[#allocation40_spill] sm:$0xff] %v10191_v0  ;;  %v1943_v17 = vshrl.u32 %v15708_v29, %v1940_v35  ;;  %v1946_v59 = vshrl.u32 %v15695_v43, %v1940_v35  ;;  %v1948_v60 = vshll.u32 %v15695_v43, %v1939_v31  ;;  %v1949_v39 = vshrl.u32 %v15696_v7, %v1940_v35 }
 0x20f   : > { %v10197_v45 = vsub.s32 %v1777_v24, %v1780_v63  ;;  %v1938_v14 = vshrl.u32 %v1937_v3, 5  ;;  %v1951_v18 = vshll.u32 %v15696_v7, %v1939_v31  ;;  %v10203_v49 = vshll.u32 %v1933_v44, 8 }
 0x210   : > { %v1944_v13 = vor.u32 %v1943_v17, %v1942_v48  ;;  %v1947_v4 = vor.u32 %v1946_v59, %v1945_v6  ;;  %v1950_v32 = vor.u32 %v1949_v39, %v1948_v60  ;;  %v1952_v22 = vshrl.u32 %v15709_v23, %v1940_v35 }
 0x211   : > { %v1783_v10 = vsub.s32 0, %v10197_v45  ;;  %v1954_v24 = vshll.u32 %v15709_v23, %v1939_v31  ;;  %v1955_v55 = vshrl.u32 %v15697_v21, %v1940_v35  ;;  %v1829_v53 = vor.u32 8388608, %v1828_v37 }
 0x212   : > { %v1831_v9 = vadd.s32 1, %v8100_v52  ;;  %v1690_v63 = vadd.s32 127, %v1689_v47  ;;  %v1941_v48 = vshrl.u32 %v15698_v62, %v1940_v35  ;;  %v1953_v17 = vor.u32 %v1952_v22, %v1951_v18 }
 0x213   : > { %v8097_v3 = vmin.u32 %v1783_v10, %v10197_v45  ;;  %v1956_v44 = vor.u32 %v1955_v55, %v1954_v24  ;;  %vm1957_vm6 = vcmp.lt.s32.totalorder %v1938_v14, 1  ;;  %vm1959_vm7 = vcmp.lt.s32.totalorder %v1938_v14, 3 }
 0x214   : > { %vm1960_vm9 = vcmp.lt.s32.totalorder %v1938_v14, 4  ;;  %v1965_v60 = vsel %vm1957_vm6, %v1944_v13, %v1947_v4  ;;  %v1685_v31 = vsub.s32 32, %v10175_v26  ;;  %vm1958_vm11 = vcmp.lt.s32.totalorder %v1938_v14, 2 }
 0x215   : > { %v1785_v6 = vclz %v8097_v3  ;;  %v1962_v59 = vsel %vm1960_vm9, %v1950_v32, 2102212464  ;;  %v1966_v39 = vsel %vm1960_vm9, %v1953_v17, 920167782  ;;  %vm1832_vm1 = vcmp.gt.s32.totalorder %v1831_v9, 0  ;;  %v10213_v52 = vpop.eup %8695 }
 0x216   : > { %v1967_v37 = vsel %vm1959_vm7, %v1950_v32, %v1966_v39  ;;  %15739 = vst [vmem:[#allocation41_spill] sm:$0xff] %v10213_v52  ;;  %v1961_v10 = vsel %vm1957_vm6, %v1941_v48, %v1944_v13  ;;  %v1969_v18 = vsel %vm1957_vm6, %v1947_v4, %v1950_v32  ;;  %v1963_v22 = vsel %vm1959_vm7, %v1947_v4, %v1962_v59 }
 0x217   : > { %v8098_v47 = vadd.s32 4294967294, %v1785_v6  ;;  %v1968_v35 = vsel %vm1958_vm11, %v1965_v60, %v1967_v37  ;;  %v1970_v24 = vsel %vm1960_vm9, %v1956_v44, 1326507024  ;;  %v1691_v39 = vshll.u32 %v1690_v63, 23  ;;  %v10232_v37 = vpop.f32.mrf.mxu1 }
 0x218   : > { %v10218_v55 = vmul.u32.u64.low %v10203_v49, %v1968_v35  ;;  %v10219_v3 = vmul.u32.u64.high %v10203_v49, %v1968_v35, %v10218_v55  ;;  %v1971_v50 = vsel %vm1959_vm7, %v1953_v17, %v1970_v24  ;;  %v1833_v32 = vsel %vm1832_vm1, %v1831_v9, 0 }
 0x219   : > { %vm8099_vm4 = vcmp.lt.s32.totalorder %v8098_v47, 0  ;;  %v1972_v13 = vsel %vm1958_vm11, %v1969_v18, %v1971_v50  ;;  %v10227_v48 = vshll.u32 %v1829_v53, 8  ;;  %v1964_v59 = vsel %vm1958_vm11, %v1961_v10, %v1963_v22 }
 0x21a   : > { %v1788_v6 = vsel %vm8099_vm4, 0, %v8098_v47  ;;  %v10230_v60 = vshrl.u32 %v1833_v32, 5  ;;  %v1687_v63 = vshrl.u32 %v10183_v12, %v1685_v31  ;;  %v1835_v47 = vand.u32 31, %v1833_v32 }
 0x21b   : > { %v1789_v4 = vsub.s32 32, %v1788_v6  ;;  %v1793_v44 = vsub.s32 4294967266, %v1788_v6  ;;  %v10236_v35 = vmul.u32.u64.low %v10203_v49, %v1972_v13  ;;  %v10237_v17 = vmul.u32.u64.high %v10203_v49, %v1972_v13, %v10236_v35 }
 0x21c   : > { %v10239_v50 = vor.u32 4788187, %v1691_v39  ;;  %v1983_v18 = vadd.s32 1, %v10219_v3  ;;  %v1790_v14 = vshll.u32 %v10197_v45, %v1788_v6  ;;  %v1980_v10 = vmul.u32 %v10203_v49, %v1964_v59 }
 0x21d   : > { %v1791_v53 = vshrl.u32 %v10186_v28, %v1789_v4  ;;  %v1794_v9 = vadd.s32 127, %v1793_v44  ;;  %v1836_v22 = vsub.s32 32, %v1835_v47  ;;  %v2032_v24 = vand.u32 2139095040, %v10232_v37 }
 0x21e   : > { %v1838_v31 = vshll.u32 %v15698_v62, %v1835_v47  ;;  %v1841_v13 = vshll.u32 %v15708_v29, %v1835_v47  ;;  %vm1853_vm10 = vcmp.lt.s32.totalorder %v10230_v60, 1  ;;  %vm1982_vm6 = vc.u32 %v10237_v17, %v10218_v55 }
 0x21f   : > { %v1795_v12 = vshll.u32 %v1794_v9, 23  ;;  %v1792_v39 = vor.u32 %v1791_v53, %v1790_v14  ;;  %v1839_v28 = vshrl.u32 %v15708_v29, %v1836_v22  ;;  %v1844_v45 = vshll.u32 %v15695_v43, %v1835_v47 }
 0x220   : > { %v1984_v49 = vsel %vm1982_vm6, %v1983_v18, %v10219_v3  ;;  %v1842_v32 = vshrl.u32 %v15695_v43, %v1836_v22  ;;  %v1847_v4 = vshll.u32 %v15696_v7, %v1835_v47  ;;  %v1845_v35 = vshrl.u32 %v15696_v7, %v1836_v22 }
 0x221   : > { %v1796_v6 = vor.u32 4788187, %v1795_v12  ;;  %v1985_v44 = vadd.s32 %v1984_v49, %v1980_v10  ;;  %v1840_v59 = vor.u32 %v1839_v28, %v1838_v31  ;;  %v1848_v53 = vshrl.u32 %v15709_v23, %v1836_v22 }
 0x222   : > { %v1837_v9 = vshrl.u32 %v15698_v62, %v1836_v22  ;;  %v1843_v14 = vor.u32 %v1842_v32, %v1841_v13  ;;  %v1850_v25 = vshll.u32 %v15709_v23, %v1835_v47  ;;  %v1851_v0 = vshrl.u32 %v15697_v21, %v1836_v22 }
 0x223   : > { %v1797_v12 = vand.u32 2147483647, %v1796_v6  ;;  %v1986_v52 = vadd.s32 536870912, %v1985_v44  ;;  %v1846_v3 = vor.u32 %v1845_v35, %v1844_v45  ;;  %v1849_v18 = vor.u32 %v1848_v53, %v1847_v4 }
 0x224   : > { %vm15469_vm7 = vcmp.lt.s32.totalorder %v9800_v46, 0  ;;  %v1799_v5 = vcvt.s32.f32 %v1792_v39  ;;  %v1852_v10 = vor.u32 %v1851_v0, %v1850_v25  ;;  %vm1856_vm9 = vcmp.lt.s32.totalorder %v10230_v60, 4 }
 0x225   : > { %v1861_v31 = vsel %vm1853_vm10, %v1840_v59, %v1843_v14  ;;  %v10265_v28 = vshrl.u32 %v1986_v52, 30  ;;  %vm1855_vm11 = vcmp.lt.s32.totalorder %v10230_v60, 3  ;;  %v1858_v47 = vsel %vm1856_vm9, %v1846_v3, 2102212464 }
 0x226   : > { %v1862_v13 = vsel %vm1856_vm9, %v1849_v18, 920167782  ;;  %vm1854_vm1 = vcmp.lt.s32.totalorder %v10230_v60, 2  ;;  %v1865_v45 = vsel %vm1853_vm10, %v1843_v14, %v1846_v3  ;;  %v1866_v6 = vsel %vm1856_vm9, %v1852_v10, 1326507024 }
 0x227   : > { %v1863_v22 = vsel %vm1855_vm11, %v1846_v3, %v1862_v13  ;;  %v15740_v25 = vand.u32 2147483647, %v9800_v46  ;;  %v1800_v39 = vmul.f32 %v1799_v5, %v1797_v12  ;;  %v1988_v52 = vshll.u32 %v10265_v28, 30 }
 0x228   : > { %v1857_v49 = vsel %vm1853_vm10, %v1837_v9, %v1840_v59  ;;  %v1864_v32 = vsel %vm1854_vm1, %v1861_v31, %v1863_v22  ;;  %v1859_v4 = vsel %vm1855_vm11, %v1843_v14, %v1858_v47  ;;  %v1867_v35 = vsel %vm1855_vm11, %v1849_v18, %v1866_v6 }
 0x229   : > { %vm10273_vm4 = vcmp.le.f32.partialorder %v15740_v25, 0.7853982  ;;  %v10283_v53 = vmul.u32.u64.low %v10227_v48, %v1864_v32  ;;  %v10284_v3 = vmul.u32.u64.high %v10227_v48, %v1864_v32, %v10283_v53  ;;  %v1589_v10 = vand.u32 2147483647, %v10173_v40 }
 0x22a   : > { %v1489_v13 = vxor.u32 2147483648, %v10179_v11  ;;  %v10289_v5 = vsub.s32 %v1985_v44, %v1988_v52  ;;  %v1868_v12 = vsel %vm1854_vm1, %v1865_v45, %v1867_v35  ;;  %v1591_v59 = vcvt.s32.f32 %v10171_v58 }
 0x22b   : > { %v15743_v9 = vshll.u32 %v10124_v57, %v10175_v26  ;;  %v10298_v18 = vmul.u32.u64.low %v10227_v48, %v1868_v12  ;;  %v10299_v31 = vmul.u32.u64.high %v10227_v48, %v1868_v12, %v10298_v18  ;;  %v1801_v47 = vxor.u32 2147483648, %v1800_v39 }
 0x22c   : > { %v1991_v40 = vsub.s32 0, %v10289_v5  ;;  %v1860_v44 = vsel %vm1854_vm1, %v1857_v49, %v1859_v4  ;;  %v2033_v22 = vshrl.u32 %v2032_v24, 23  ;;  %8697 = vcosq.f32 %v10169_v61 }
 0x22d   : > { %v1688_v14 = vor.u32 %v1687_v63, %v15743_v9  ;;  %v1693_v45 = vand.u32 2147483647, %v10239_v50  ;;  %vm15470_vm10 = vcmp.lt.s32.totalorder %v9983_v20, 0  ;;  %v1879_v57 = vadd.s32 1, %v10284_v3 }
 0x22e   : > { %v10308_v58 = vmul.f32 %v1591_v59, %v1589_v10  ;;  %v1490_v26 = vsel %vm15469_vm7, %v1489_v13, %v10179_v11  ;;  %v8105_v63 = vmin.u32 %v1991_v40, %v10289_v5  ;;  %v8108_v6 = vadd.s32 4294967169, %v2033_v22 }
 0x22f   : > { %v1695_v60 = vcvt.s32.f32 %v1688_v14  ;;  %v1876_v24 = vmul.u32 %v10227_v48, %v1860_v44  ;;  %vm1878_vm6 = vc.u32 %v10299_v31, %v10283_v53  ;;  %v15466_v50 = vand.u32 2147483647, %v10232_v37 }
 0x230   : > { %v1802_v25 = vsel %vm15470_vm10, %v1801_v47, %v1800_v39  ;;  %v1993_v52 = vclz %v8105_v63  ;;  %v1880_v49 = vsel %vm1878_vm6, %v1879_v57, %v10284_v3  ;;  %v2039_v32 = vadd.s32 1, %v8108_v6 }
 0x231   : > { %v10324_v11 = vsel %vm10273_vm4, %v9800_v46, %v1490_v26  ;;  %v10326_v4 = vmul.f32 %v1695_v60, %v1693_v45  ;;  %v15744_v48 = vand.u32 2147483647, %v9983_v20  ;;  %v1881_v10 = vadd.s32 %v1880_v49, %v1876_v24 }
 0x232   : > { %v8106_v3 = vadd.s32 4294967294, %v1993_v52  ;;  %vm2040_vm11 = vcmp.gt.s32.totalorder %v2039_v32, 0  ;;  %v2036_v9 = vand.u32 8388607, %v15466_v50  ;;  %8699 = vcosq.f32 %v10324_v11 }
 0x233   : > { %vm10330_vm9 = vcmp.le.f32.partialorder %v15744_v48, 0.7853982  ;;  %v1882_v59 = vadd.s32 536870912, %v1881_v10  ;;  %v2041_v14 = vsel %vm2040_vm11, %v2039_v32, 0  ;;  %v1981_v44 = vadd.s32 %v10218_v55, %v10237_v17 }
 0x234   : > { %v1805_v12 = vsel %vm10330_vm9, %v9983_v20, %v1802_v25  ;;  %vm8107_vm1 = vcmp.lt.s32.totalorder %v8106_v3, 0  ;;  %v2043_v47 = vand.u32 31, %v2041_v14  ;;  %v2037_v60 = vor.u32 8388608, %v2036_v9 }
 0x235   : > { %v1996_v22 = vsel %vm8107_vm1, 0, %v8106_v3  ;;  %v10346_v45 = vshrl.u32 %v1882_v59, 30  ;;  %8701 = vcosq.f32 %v1805_v12  ;;  %v10349_v24 = vshrl.u32 %v2041_v14, 5 }
 0x236   : > { %v1997_v57 = vsub.s32 32, %v1996_v22  ;;  %v2001_v26 = vsub.s32 4294967266, %v1996_v22  ;;  %v2044_v63 = vsub.s32 32, %v2043_v47  ;;  %8703 = vsinq.f32 %v1805_v12 }
 0x237   : > { %v1884_v6 = vshll.u32 %v10346_v45, 30  ;;  %v1998_v25 = vshll.u32 %v10289_v5, %v1996_v22  ;;  %v2046_v17 = vshll.u32 %v15698_v62, %v2043_v47  ;;  %v2049_v48 = vshll.u32 %v15708_v29, %v2043_v47 }
 0x238   : > { %v1999_v52 = vshrl.u32 %v1981_v44, %v1997_v57  ;;  %v2002_v49 = vadd.s32 127, %v2001_v26  ;;  %v2047_v32 = vshrl.u32 %v15708_v29, %v2044_v63  ;;  %v2050_v3 = vshrl.u32 %v15695_v43, %v2044_v63 }
 0x239   : > { %v10353_v55 = vsub.s32 %v1881_v10, %v1884_v6  ;;  %v10358_v12 = vpop.eup %8697  ;;  %v2052_v14 = vshll.u32 %v15695_v43, %v2043_v47  ;;  %v2053_v5 = vshrl.u32 %v15696_v7, %v2044_v63  ;;  %v2055_v22 = vshll.u32 %v15696_v7, %v2043_v47 }
 0x23a   : > { %v2000_v59 = vor.u32 %v1999_v52, %v1998_v25  ;;  %v2003_v9 = vshll.u32 %v2002_v49, 23  ;;  %v2056_v10 = vshrl.u32 %v15709_v23, %v2044_v63  ;;  %v10365_v57 = vshll.u32 %v2037_v60, 8 }
 0x23b   : > { %v1887_v44 = vsub.s32 0, %v10353_v55  ;;  %v2048_v6 = vor.u32 %v2047_v32, %v2046_v17  ;;  %v2051_v50 = vor.u32 %v2050_v3, %v2049_v48  ;;  %v2054_v39 = vor.u32 %v2053_v5, %v2052_v14 }
 0x23c   : > { %v2004_v26 = vor.u32 4788187, %v2003_v9  ;;  %v2057_v52 = vor.u32 %v2056_v10, %v2055_v22  ;;  %v2058_v49 = vshll.u32 %v15709_v23, %v2043_v47  ;;  %v2059_v13 = vshrl.u32 %v15697_v21, %v2044_v63 }
 0x23d   : > { %v8101_v25 = vmin.u32 %v1887_v44, %v10353_v55  ;;  %v2007_v18 = vcvt.s32.f32 %v2000_v59  ;;  %v2045_v7 = vshrl.u32 %v15698_v62, %v2044_v63  ;;  %vm2064_vm11 = vcmp.lt.s32.totalorder %v10349_v24, 4 }
 0x23e   : > { %v2005_v40 = vand.u32 2147483647, %v2004_v26  ;;  %v2060_v43 = vor.u32 %v2059_v13, %v2058_v49  ;;  %vm2061_vm1 = vcmp.lt.s32.totalorder %v10349_v24, 1  ;;  %v2066_v32 = vsel %vm2064_vm11, %v2054_v39, 2102212464 }
 0x23f   : > { %v1889_v60 = vclz %v8101_v25  ;;  %v15747_v17 = vand.u32 2147483647, %v9898_v51  ;;  %vm2062_vm6 = vcmp.lt.s32.totalorder %v10349_v24, 2  ;;  %vm2063_vm10 = vcmp.lt.s32.totalorder %v10349_v24, 3  ;;  %v10386_v13 = vpop.eup %8699 }
 0x240   : > { %v2069_v47 = vsel %vm2061_vm1, %v2048_v6, %v2051_v50  ;;  %v2070_v63 = vsel %vm2064_vm11, %v2057_v52, 920167782  ;;  %v2065_v59 = vsel %vm2061_vm1, %v2045_v7, %v2048_v6  ;;  %v2073_v14 = vsel %vm2061_vm1, %v2051_v50, %v2054_v39 }
 0x241   : > { %vm10378_vm7 = vcmp.le.f32.partialorder %v15747_v17, 0.7853982  ;;  %v8102_v3 = vadd.s32 4294967294, %v1889_v60  ;;  %v2071_v9 = vsel %vm2063_vm10, %v2054_v39, %v2070_v63  ;;  %vm1511_vm14 = vcmp.lt.s32.totalorder %v9696_v54, 0 }
 0x242   : > { %v2008_v5 = vmul.f32 %v2007_v18, %v2005_v40  ;;  %v2067_v44 = vsel %vm2063_vm10, %v2051_v50, %v2066_v32  ;;  %v2072_v22 = vsel %vm2062_vm6, %v2069_v47, %v2071_v9  ;;  %v2074_v10 = vsel %vm2064_vm11, %v2060_v43, 1326507024  ;;  %v10393_v26 = vpop.eup %8701  ;;  %v15780_v47 = vld [vmem:[#allocation39_spill] sm:$0xff] }
 0x243   : > { %vm8103_vm0 = vcmp.lt.s32.totalorder %v8102_v3, 0  ;;  %v2075_v25 = vsel %vm2063_vm10, %v2057_v52, %v2074_v10  ;;  %v10396_v49 = vmul.u32.u64.low %v10365_v57, %v2072_v22  ;;  %v10397_v60 = vmul.u32.u64.high %v10365_v57, %v2072_v22, %v10396_v49  ;;  %v10400_v7 = vpop.eup %8703 }
 0x244   : > { %8705 = vsinq.f32 %v10324_v11  ;;  %v15750_v50 = vsub.s32 4, %v10177_v56  ;;  %vm15751_vm1 = vcmp.lt.s32.totalorder %v9983_v20, 0  ;;  %v1892_v43 = vsel %vm8103_vm0, 0, %v8102_v3 }
 0x245   : > { %v2076_v18 = vsel %vm2062_vm6, %v2073_v14, %v2075_v25  ;;  %v15752_v40 = vxor.u32 2147483648, %v10326_v4  ;;  %vm15753_vm10 = vcmp.lt.s32.totalorder %v9898_v51, 0  ;;  %v1877_v52 = vadd.s32 %v10283_v53, %v10299_v31 }
 0x246   : > { %v1804_v39 = vsel %vm15751_vm1, %v15750_v50, %v10177_v56  ;;  %v1893_v11 = vsub.s32 32, %v1892_v43  ;;  %v1897_v32 = vsub.s32 4294967266, %v1892_v43  ;;  %v15754_v17 = vand.u32 2147483647, %v9696_v54 }
 0x247   : > { %v1698_v6 = vsel %vm15753_vm10, %v15752_v40, %v10326_v4  ;;  %v2009_v56 = vxor.u32 2147483648, %v2008_v5  ;;  %v2068_v63 = vsel %vm2062_vm6, %v2065_v59, %v2067_v44  ;;  %v1894_v4 = vshll.u32 %v10353_v55, %v1892_v43 }
 0x248   : > { %vm10419_vm11 = vcmp.le.f32.partialorder %v15754_v17, 0.7853982  ;;  %v10426_v3 = vmul.u32.u64.low %v10365_v57, %v2076_v18  ;;  %v10427_v9 = vmul.u32.u64.high %v10365_v57, %v2076_v18, %v10426_v3  ;;  %v1895_v14 = vshrl.u32 %v1877_v52, %v1893_v11 }
 0x249   : > { %v1898_v53 = vadd.s32 127, %v1897_v32  ;;  %v2087_v31 = vadd.s32 1, %v10397_v60  ;;  %8707 = vsinq.f32 %v10169_v61  ;;  %v1595_v22 = vsub.s32 4, %v9900_v38 }
 0x24a   : > { %v15757_v10 = vsub.s32 4, %v10012_v42  ;;  %vm15758_vm0 = vcmp.lt.s32.totalorder %v9800_v46, 0  ;;  %vm1927_vm6 = vcmp.lt.s32.totalorder %v10128_v33, 0  ;;  %v1701_v55 = vsel %vm10378_vm7, %v9898_v51, %v1698_v6 }
 0x24b   : > { %v1806_v59 = vsel %vm10330_vm9, 0, %v1804_v39  ;;  %v1896_v44 = vor.u32 %v1895_v14, %v1894_v4  ;;  %v1899_v25 = vshll.u32 %v1898_v53, 23  ;;  %v2010_v61 = vsel %vm1927_vm6, %v2009_v56, %v2008_v5 }
 0x24c   : > { %v1492_v24 = vsel %vm15758_vm0, %v15757_v10, %v10012_v42  ;;  %v1907_v50 = vsub.s32 4, %v10346_v45  ;;  %v2084_v43 = vmul.u32 %v10365_v57, %v2068_v63  ;;  %vm2086_vm1 = vc.u32 %v10427_v9, %v10396_v49 }
 0x24d   : > { %v15759_v42 = vxor.u32 2147483648, %v10308_v58  ;;  %v15760_v35 = vand.u32 2147483647, %v10128_v33  ;;  %v1900_v5 = vor.u32 4788187, %v1899_v25  ;;  %v2088_v40 = vsel %vm2086_vm1, %v2087_v31, %v10397_v60 }
 0x24e   : > { %v2011_v57 = vsub.s32 4, %v10265_v28  ;;  %vm1823_vm10 = vcmp.lt.s32.totalorder %v10146_v41, 0  ;;  %v2089_v6 = vadd.s32 %v2088_v40, %v2084_v43  ;;  %v1810_v52 = vadd.s32 3, %v1806_v59 }
 0x24f   : > { %v1594_v18 = vsel %vm1511_vm14, %v15759_v42, %v10308_v58  ;;  %vm10457_vm9 = vcmp.le.f32.partialorder %v15760_v35, 0.7853982  ;;  %8709 = vsinq.f32 %v1701_v55  ;;  %v1901_v11 = vand.u32 2147483647, %v1900_v5 }
 0x250   : > { %v2013_v58 = vsel %vm10457_vm9, %v10128_v33, %v2010_v61  ;;  %v1903_v32 = vcvt.s32.f32 %v1896_v44  ;;  %v10470_v17 = vsel %vm1511_vm14, %v1595_v22, %v9900_v38  ;;  %8711 = vcosq.f32 %v1701_v55 }
 0x251   : > { %v1908_v60 = vsel %vm1823_vm10, %v1907_v50, %v10346_v45  ;;  %v2090_v56 = vadd.s32 536870912, %v2089_v6  ;;  %v1597_v63 = vsel %vm10419_vm11, %v9696_v54, %v1594_v18  ;;  %v15763_v3 = vand.u32 2147483647, %v10146_v41  ;;  %v8706_v22 = vpop.eup %8705 }
 0x252   : > { %v1904_v14 = vmul.f32 %v1903_v32, %v1901_v11  ;;  %v1494_v38 = vsel %vm10273_vm4, 0, %v1492_v24  ;;  %v2012_v53 = vsel %vm1927_vm6, %v2011_v57, %v10265_v28  ;;  %8713 = vcosq.f32 %v2013_v58 }
 0x253   : > { %vm10480_vm0 = vcmp.le.f32.partialorder %v15763_v3, 0.7853982  ;;  %v10489_v45 = vshrl.u32 %v2090_v56, 30  ;;  %v1811_v31 = vand.u32 3, %v1810_v52  ;;  %v1699_v10 = vsub.s32 4, %v10114_v19 }
 0x254   : > { %v1905_v55 = vxor.u32 2147483648, %v1904_v14  ;;  %v1910_v59 = vsel %vm10480_vm0, 0, %v1908_v60  ;;  %v1814_v44 = vxor.u32 2147483648, %v10400_v7  ;;  %8715 = vcosq.f32 %v1597_v63  ;;  %v15784_v60 = vld [vmem:[#allocation19_spill] sm:$0xff] }
 0x255   : > { %v2092_v0 = vshll.u32 %v10489_v45, 30  ;;  %v1817_v24 = vxor.u32 2147483648, %v10393_v26  ;;  %v1498_v25 = vadd.s32 3, %v1494_v38  ;;  %v1598_v28 = vsel %vm10419_vm11, 0, %v10470_v17 }
 0x256   : > { %v2014_v61 = vsel %vm10457_vm9, 0, %v2012_v53  ;;  %8717 = vsinq.f32 %v2013_v58  ;;  %v1906_v50 = vsel %vm1823_vm10, %v1905_v55, %v1904_v14  ;;  %v1914_v18 = vadd.s32 3, %v1910_v59  ;;  %v10509_v35 = vpop.eup %8707 }
 0x257   : > { %v1909_v43 = vsel %vm10480_vm0, %v10146_v41, %v1906_v50  ;;  %v10507_v42 = vsub.s32 %v2089_v6, %v2092_v0  ;;  %vm1813_vm14 = vcmp.eq.s32.totalorder %v1811_v31, 0  ;;  %vm15766_vm4 = vcmp.lt.s32.totalorder %v9898_v51, 0 }
 0x258   : > { %v1700_v5 = vsel %vm15766_vm4, %v1699_v10, %v10114_v19  ;;  %8719 = vcosq.f32 %v1909_v43  ;;  %v1815_v39 = vsel %vm1813_vm14, %v10393_v26, %v1814_v44  ;;  %vm1816_vm6 = vcmp.eq.s32.totalorder %v1811_v31, 2 }
 0x259   : > { %8721 = vsinq.f32 %v1909_v43  ;;  %v2095_v40 = vsub.s32 0, %v10507_v42  ;;  %v1818_v57 = vsel %vm1816_vm6, %v1817_v24, %v10400_v7  ;;  %v1499_v52 = vand.u32 3, %v1498_v25 }
 0x25a   : > { %8723 = vsinq.f32 %v1597_v63  ;;  %v2018_v6 = vadd.s32 3, %v2014_v61  ;;  %v1502_v58 = vxor.u32 2147483648, %v8706_v22  ;;  %v1505_v11 = vxor.u32 2147483648, %v10386_v13 }
 0x25b   : > { %v15767_v32 = vand.u32 2147483647, %v10232_v37  ;;  %v8109_v19 = vmin.u32 %v2095_v40, %v10507_v42  ;;  %v10525_v26 = vand.u32 3, %v1914_v18  ;;  %vm1812_vm9 = vcmp.lt.s32.totalorder %v1811_v31, 2 }
 0x25c   : > { %v1702_v7 = vsel %vm10378_vm7, 0, %v1700_v5  ;;  %vm15473_vm10 = vcmp.lt.s32.totalorder %v10232_v37, 0  ;;  %vm1809_vm0 = vweird.f32 %v9983_v20  ;;  %v1819_v56 = vsel %vm1812_vm9, %v1815_v39, %v1818_v57  ;;  %v10535_v4 = vpop.eup %8709 }
 0x25d   : > { %vm10520_vm1 = vcmp.le.f32.partialorder %v15767_v32, 0.7853982  ;;  %v15770_v63 = vsel %vm10045_vm15, 0, %v10009_v34  ;;  %v2097_v14 = vclz %v8109_v19  ;;  %v2115_v38 = vsub.s32 4, %v10489_v45  ;;  %v10538_v53 = vpop.eup %8711 }
 0x25e   : > { %v1394_v3 = vadd.s32 3, %v15770_v63  ;;  %vm1501_vm14 = vcmp.eq.s32.totalorder %v1499_v52, 0  ;;  %vm1504_vm4 = vcmp.eq.s32.totalorder %v1499_v52, 2  ;;  %v10540_v48 = vand.u32 3, %v2018_v6 }
 0x25f   : > { %v1503_v31 = vsel %vm1501_vm14, %v10386_v13, %v1502_v58  ;;  %v1506_v10 = vsel %vm1504_vm4, %v1505_v11, %v8706_v22  ;;  %v1706_v55 = vadd.s32 3, %v1702_v7  ;;  %v2085_v15 = vadd.s32 %v10396_v49, %v10427_v9  ;;  %v10550_v44 = vpop.eup %8713 }
 0x260   : > { %v8110_v34 = vadd.s32 4294967294, %v2097_v14  ;;  %vm1920_vm15 = vcmp.eq.s32.totalorder %v10525_v26, 2  ;;  %v10548_v59 = vsel %vm1809_vm0, nan, %v1819_v56  ;;  %vm1917_vm7 = vcmp.eq.s32.totalorder %v10525_v26, 0 }
 0x261   : > { %vm1500_vm6 = vcmp.lt.s32.totalorder %v1499_v52, 2  ;;  %v1710_v0 = vxor.u32 2147483648, %v10535_v4  ;;  %v1395_v13 = vand.u32 3, %v1394_v3  ;;  %v1078_v22 = vsel %vm9918_vm2, 0, %v9995_v2  ;;  %v10563_v24 = vpop.eup %8715 }
 0x262   : > { %vm8111_vm9 = vcmp.lt.s32.totalorder %v8110_v34, 0  ;;  %v2116_v49 = vsel %vm15473_vm10, %v2115_v38, %v10489_v45  ;;  %vm1916_vm0 = vcmp.lt.s32.totalorder %v10525_v26, 2  ;;  %v1507_v20 = vsel %vm1500_vm6, %v1503_v31, %v1506_v10 }
 0x263   : > { %v1713_v9 = vxor.u32 2147483648, %v10538_v53  ;;  %v2100_v25 = vsel %vm8111_vm9, 0, %v8110_v34  ;;  %v10566_v61 = vand.u32 3, %v1706_v55  ;;  %v1398_v36 = vxor.u32 2147483648, %v10509_v35  ;;  %v8718_v50 = vpop.eup %8717 }
 0x264   : > { %v1082_v2 = vadd.s32 3, %v1078_v22  ;;  %v2101_v43 = vsub.s32 32, %v2100_v25  ;;  %v2105_v45 = vsub.s32 4294967266, %v2100_v25  ;;  %v2025_v18 = vxor.u32 2147483648, %v10550_v44 }
 0x265   : > { %v1401_v5 = vxor.u32 2147483648, %v10358_v12  ;;  %v2118_v39 = vsel %vm10520_vm1, 0, %v2116_v49  ;;  %vm1397_vm6 = vcmp.eq.s32.totalorder %v1395_v13, 0  ;;  %v1086_v57 = vxor.u32 2147483648, %v10130_v1  ;;  %v8720_v52 = vpop.eup %8719 }
 0x266   : > { %v1083_v40 = vand.u32 3, %v1082_v2  ;;  %v2102_v6 = vshll.u32 %v10507_v42, %v2100_v25  ;;  %v2103_v58 = vshrl.u32 %v2085_v15, %v2101_v43  ;;  %v2106_v11 = vadd.s32 127, %v2105_v45  ;;  %v8722_v19 = vpop.eup %8721 }
 0x267   : > { %v1089_v32 = vxor.u32 2147483648, %v10065_v8  ;;  %v1921_v7 = vxor.u32 2147483648, %v8720_v52  ;;  %vm2020_vm10 = vcmp.lt.s32.totalorder %v10540_v48, 2  ;;  %v2022_v56 = vxor.u32 2147483648, %v8718_v50  ;;  %v10581_v3 = vpop.eup %8723 }
 0x268   : > { %v1399_v63 = vsel %vm1397_vm6, %v10358_v12, %v1398_v36  ;;  %vm1400_vm2 = vcmp.eq.s32.totalorder %v1395_v13, 2  ;;  %v2104_v14 = vor.u32 %v2103_v58, %v2102_v6  ;;  %v2107_v38 = vshll.u32 %v2106_v11, 23  ;;  %v15783_v58 = vld [vmem:[#allocation12_spill] sm:$0xff] }
 0x269   : > { %v1918_v31 = vxor.u32 2147483648, %v8722_v19  ;;  %v1402_v42 = vsel %vm1400_vm2, %v1401_v5, %v10509_v35  ;;  %v1922_v10 = vsel %vm1920_vm15, %v1921_v7, %v8722_v19  ;;  %vm1396_vm9 = vcmp.lt.s32.totalorder %v1395_v13, 2  ;;  %v15777_v5 = vld [vmem:[#allocation34_spill] sm:$0xff] }
 0x26a   : > { %vm1085_vm4 = vcmp.eq.s32.totalorder %v1083_v40, 0  ;;  %vm1088_vm14 = vcmp.eq.s32.totalorder %v1083_v40, 2  ;;  %v2108_v55 = vor.u32 4788187, %v2107_v38  ;;  %v2122_v49 = vadd.s32 3, %v2118_v39 }
 0x26b   : > { %v1919_v15 = vsel %vm1917_vm7, %v8720_v52, %v1918_v31  ;;  %v1087_v12 = vsel %vm1085_vm4, %v10065_v8, %v1086_v57  ;;  %v1090_v34 = vsel %vm1088_vm14, %v1089_v32, %v10130_v1  ;;  %vm15771_vm2 = vweird.f32 %v9800_v46 }
 0x26c   : > { %v1923_v22 = vsel %vm1916_vm0, %v1919_v15, %v1922_v10  ;;  %v1508_v35 = vsel %vm15771_vm2, nan, %v1507_v20  ;;  %v1403_v25 = vsel %vm1396_vm9, %v1399_v63, %v1402_v42  ;;  %v2109_v36 = vand.u32 2147483647, %v2108_v55  ;;  %v15786_v42 = vld [vmem:[#allocation29_spill] sm:$0xff]  ;;  %v15787_v55 = vld [vmem:[#allocation27_spill] sm:$0xff] }
 0x26d   : > { %v2111_v13 = vcvt.s32.f32 %v2104_v14  ;;  %vm15772_vm15 = vweird.f32 %v10146_v41  ;;  %vm1084_vm6 = vcmp.lt.s32.totalorder %v1083_v40, 2  ;;  %vm2017_vm7 = vweird.f32 %v10128_v33  ;;  %v15776_v41 = vld [vmem:[#allocation35_spill] sm:$0xff] }
 0x26e   : > { %v1924_v2 = vsel %vm15772_vm15, nan, %v1923_v22  ;;  %vm15773_vm14 = vcmp.eq.s32.totalorder %v10540_v48, 0  ;;  %vm15774_vm0 = vcmp.eq.s32.totalorder %v10540_v48, 2  ;;  %v1091_v26 = vsel %vm1084_vm6, %v1087_v12, %v1090_v34 }
 0x26f   : > { %2198 = vmatprep.subr.mxu0 %v1924_v2  ;;  %v2023_v8 = vsel %vm15773_vm14, %v10550_v44, %v2022_v56  ;;  %v2026_v1 = vsel %vm15774_vm0, %v2025_v18, %v8718_v50  ;;  %v15775_v46 = vsel %vm9820_vm12, 0, %v9784_v16  ;;  %v2112_v43 = vmul.f32 %v2111_v13, %v2109_v36  ;;  %v15779_v16 = vld [vmem:[#allocation14_spill] sm:$0xff]  ;;  %v15791_v36 = vld [vmem:[#allocation16_spill] sm:$0xff] }
 0x270   : > { %v978_v20 = vadd.s32 3, %v15775_v46  ;;  %2199 = vmatpush1.msra.mxu0 %v10548_v59  ;;  %vm1709_vm4 = vcmp.eq.s32.totalorder %v10566_v61, 0  ;;  %v982_v45 = vxor.u32 2147483648, %v15776_v41  ;;  %v985_v39 = vxor.u32 2147483648, %v15777_v5  ;;  %v15794_v46 = vld [vmem:[#allocation21_spill] sm:$0xff] }
 0x271   : > { %2200 = vmatprep.subr.mxu0 %v1508_v35  ;;  %vm15778_vm9 = vweird.f32 %v9587_v30  ;;  %v1602_v27 = vadd.s32 3, %v1598_v28  ;;  %vm1081_vm12 = vweird.f32 %v15779_v16  ;;  %v2113_v18 = vxor.u32 2147483648, %v2112_v43  ;;  %v15800_v16 = vld [vmem:[#allocation41_spill] sm:$0xff]  ;;  %v15810_v35 = vld [vmem:[#allocation32_spill] sm:$0xff] }
 0x272   : > { %v1404_v44 = vsel %vm15778_vm9, nan, %v1403_v25  ;;  %v979_v50 = vand.u32 3, %v978_v20  ;;  %v2027_v59 = vsel %vm2020_vm10, %v2023_v8, %v2026_v1  ;;  %vm1712_vm2 = vcmp.eq.s32.totalorder %v10566_v61, 2  ;;  %v15793_v8 = vld [vmem:[#allocation23_spill] sm:$0xff] }
 0x273   : > { %2201 = vmatpush1.msra.mxu0 %v1404_v44  ;;  %v1092_v40 = vsel %vm1081_vm12, nan, %v1091_v26  ;;  %v1711_v30 = vsel %vm1709_vm4, %v10538_v53, %v1710_v0  ;;  %v1286_v17 = vsel %vm10039_vm13, 0, %v15780_v47  ;;  %vm15782_vm6 = vcmp.lt.s32.totalorder %v10232_v37, 0  ;;  %v15799_v44 = vld [vmem:[#allocation10_spill] sm:$0xff] }
 0x274   : > { %2202 = vmatprep.subr.mxu0 %v1092_v40  ;;  %vm981_vm11 = vcmp.eq.s32.totalorder %v979_v50, 0  ;;  %vm984_vm15 = vcmp.eq.s32.totalorder %v979_v50, 2  ;;  %v2114_v28 = vsel %vm15782_vm6, %v2113_v18, %v2112_v43  ;;  %vm980_vm14 = vcmp.lt.s32.totalorder %v979_v50, 2  ;;  %v15801_v18 = vld [vmem:[#allocation40_spill] sm:$0xff] }
 0x275   : > { %v983_v48 = vsel %vm981_vm11, %v15777_v5, %v982_v45  ;;  %v986_v52 = vsel %vm984_vm15, %v985_v39, %v15776_v41  ;;  %v2117_v6 = vsel %vm10520_vm1, %v10232_v37, %v2114_v28  ;;  %v1603_v0 = vand.u32 3, %v1602_v27  ;;  %v15795_v41 = vld [vmem:[#allocation31_spill] sm:$0xff]  ;;  %v15797_v45 = vld [vmem:[#allocation30_spill] sm:$0xff]  ;;  %v15804_v28 = vld [vmem:[#allocation17_spill] sm:$0xff] }
 0x276   : > { %vm977_vm10 = vweird.f32 %v15783_v58  ;;  %v987_v11 = vsel %vm980_vm14, %v983_v48, %v986_v52  ;;  %8725 = vcosq.f32 %v2117_v6  ;;  %v1714_v32 = vsel %vm1712_vm2, %v1713_v9, %v10535_v4 }
 0x277   : > { %v1606_v19 = vxor.u32 2147483648, %v10581_v3  ;;  %v988_v7 = vsel %vm977_vm10, nan, %v987_v11  ;;  %8727 = vsinq.f32 %v2117_v6  ;;  %v1609_v56 = vxor.u32 2147483648, %v10563_v24  ;;  %v10698_v11 = vld [vmem:[%s15404_s2] sm:$0xff] }
 0x278   : > { %v1290_v63 = vadd.s32 3, %v1286_v17  ;;  %2203 = vmatpush1.msra.mxu0 %v988_v7  ;;  %v662_v38 = vsel %vm9576_vm3, 0, %v15784_v60  ;;  %v10644_v31 = vand.u32 3, %v2122_v49  ;;  %v10648_v53 = vsel %vm2017_vm7, nan, %v2027_v59  ;;  %v15788_v49 = vld [vmem:[#allocation25_spill] sm:$0xff]  ;;  %v15802_v17 = vld [vmem:[#allocation18_spill] sm:$0xff] }
 0x279   : > { %vm1708_vm13 = vcmp.lt.s32.totalorder %v10566_v61, 2  ;;  %v666_v4 = vadd.s32 3, %v662_v38  ;;  %vm1605_vm1 = vcmp.eq.s32.totalorder %v1603_v0, 0  ;;  %v670_v10 = vxor.u32 2147483648, %v15786_v42  ;;  %v15807_v7 = vld [vmem:[#allocation38_spill] sm:$0xff] }
 0x27a   : > { %v10651_v9 = vsel %vm1708_vm13, %v1711_v30, %v1714_v32  ;;  %v673_v15 = vxor.u32 2147483648, %v15787_v55  ;;  %vm1604_vm0 = vcmp.lt.s32.totalorder %v1603_v0, 2  ;;  %v1607_v12 = vsel %vm1605_vm1, %v10563_v24, %v1606_v19  ;;  %v2140_v32 = vld [vmem:[%s15405_s3 + $0x18] sm:$0xff] }
 0x27b   : > { %vm1608_vm3 = vcmp.eq.s32.totalorder %v1603_v0, 2  ;;  %v667_v34 = vand.u32 3, %v666_v4  ;;  %v10657_v33 = vand.u32 3, %v1290_v63  ;;  %v870_v61 = vsel %vm9729_vm8, 0, %v15788_v49  ;;  %v15806_v0 = vld [vmem:[#allocation8_spill] sm:$0xff] }
 0x27c   : > { %v1610_v22 = vsel %vm1608_vm3, %v1609_v56, %v10581_v3  ;;  %v15792_v13 = vsel %vm9469_vm5, 0, %v15791_v36  ;;  %v566_v24 = vxor.u32 2147483648, %v15793_v8  ;;  %vm2128_vm12 = vcmp.eq.s32.totalorder %v10644_v31, 2 }
 0x27d   : > { %v562_v2 = vadd.s32 3, %v15792_v13  ;;  %vm668_vm7 = vcmp.lt.s32.totalorder %v667_v34, 2  ;;  %vm669_vm4 = vcmp.eq.s32.totalorder %v667_v34, 0  ;;  %vm672_vm9 = vcmp.eq.s32.totalorder %v667_v34, 2  ;;  %v2138_v34 = vld [vmem:[%s15405_s3 + $0x8] sm:$0xff]  ;;  %v15811_v13 = vld [vmem:[#allocation26_spill] sm:$0xff] }
 0x27e   : > { %v671_v3 = vsel %vm669_vm4, %v15787_v55, %v670_v10  ;;  %v674_v1 = vsel %vm672_vm9, %v673_v15, %v15786_v42  ;;  %v569_v20 = vxor.u32 2147483648, %v15794_v46  ;;  %vm2125_vm8 = vcmp.eq.s32.totalorder %v10644_v31, 0  ;;  %v15808_v42 = vld [vmem:[#allocation36_spill] sm:$0xff]  ;;  %v15809_v55 = vld [vmem:[#allocation33_spill] sm:$0xff] }
 0x27f   : > { %v563_v26 = vand.u32 3, %v562_v2  ;;  %v10673_v43 = vsel %vm1604_vm0, %v1607_v12, %v1610_v22  ;;  %vm15796_vm5 = vnez %v15795_v41  ;;  %vm665_vm2 = vweird.f32 %v15799_v44 }
 0x280   : > { %v15798_v5 = vsel %vm15796_vm5, 0, %v15797_v45  ;;  %v675_v27 = vsel %vm668_vm7, %v671_v3, %v674_v1  ;;  %vm2124_vm11 = vcmp.lt.s32.totalorder %v10644_v31, 2  ;;  %v1294_v50 = vxor.u32 2147483648, %v15800_v16  ;;  %v10726_v1 = vld [vmem:[%s15404_s2 + $0x8] sm:$0xff] }
 0x281   : > { %v1186_v39 = vadd.s32 3, %v15798_v5  ;;  %v1297_v59 = vxor.u32 2147483648, %v15801_v18  ;;  %v676_v40 = vsel %vm665_vm2, nan, %v675_v27  ;;  %v874_v30 = vadd.s32 3, %v870_v61 }
 0x282   : > { %vm2121_vm15 = vweird.f32 %v10232_v37  ;;  %vm1293_vm6 = vcmp.eq.s32.totalorder %v10657_v33, 0  ;;  %vm1296_vm14 = vcmp.eq.s32.totalorder %v10657_v33, 2  ;;  %2204 = vmatprep.subr.mxu0 %v676_v40  ;;  %vm565_vm10 = vcmp.eq.s32.totalorder %v563_v26, 0  ;;  %v2135_v37 = vld [vmem:[%s15404_s2 + $0x10] sm:$0xff]  ;;  %v15814_v40 = vld [vmem:[#allocation20_spill] sm:$0xff] }
 0x283   : > { %vm568_vm13 = vcmp.eq.s32.totalorder %v563_v26, 2  ;;  %vm1292_vm1 = vcmp.lt.s32.totalorder %v10657_v33, 2  ;;  %vm564_vm0 = vcmp.lt.s32.totalorder %v563_v26, 2  ;;  %v567_v47 = vsel %vm565_vm10, %v15794_v46, %v566_v24  ;;  %v8726_v19 = vpop.eup %8725  ;;  %v2139_v26 = vld [vmem:[%s15405_s3 + $0x10] sm:$0xff] }
 0x284   : > { %v570_v57 = vsel %vm568_vm13, %v569_v20, %v15793_v8  ;;  %vm15803_vm3 = vnez %v15802_v17  ;;  %vm1705_vm7 = vweird.f32 %v9898_v51  ;;  %v1187_v6 = vand.u32 3, %v1186_v39  ;;  %v8728_v14 = vpop.eup %8727  ;;  %v15812_v8 = vld [vmem:[#allocation24_spill] sm:$0xff]  ;;  %v15815_v51 = vld [vmem:[#allocation13_spill] sm:$0xff]  ;;  %v2136_v17 = vld [vmem:[%s15404_s2 + $0x18] sm:$0xff] }
 0x285   : > { %v15805_v48 = vsel %vm15803_vm3, 0, %v15804_v28  ;;  %vm561_vm4 = vweird.f32 %v15806_v0  ;;  %v571_v58 = vsel %vm564_vm0, %v567_v47, %v570_v57  ;;  %vm15507_vm9 = vcmask 261120   ;;  %v2137_v39 = vld [vmem:[%s15405_s3] sm:$0xff]  ;;  %v15816_v57 = vld [vmem:[#allocation11_spill] sm:$0xff] }
 0x286   : > { %v770_v52 = vadd.s32 3, %v15805_v48  ;;  %v1190_v56 = vxor.u32 2147483648, %v15807_v7  ;;  %v875_v63 = vand.u32 3, %v874_v30  ;;  %v572_v60 = vsel %vm561_vm4, nan, %v571_v58  ;;  %v15817_v48 = vld [vmem:[#allocation9_spill] sm:$0xff]  ;;  %v8188_v0 = vld [vmem:[%s15405_s3 + $0x20] sm:$0xff] }
 0x287   : > { %v2129_v38 = vxor.u32 2147483648, %v8726_v19  ;;  %v1295_v4 = vsel %vm1293_vm6, %v15801_v18, %v1294_v50  ;;  %v1193_v10 = vxor.u32 2147483648, %v15808_v42  ;;  %v878_v15 = vxor.u32 2147483648, %v15809_v55  ;;  %2205 = vmatpush1.msra.mxu0 %v572_v60  ;;  %v8271_v58 = vld [vmem:[%s15405_s3 + $0x58] sm:$0xff] }
 0x288   : > { %v9023_v12 = vmov 0   ;;  %v2126_v22 = vxor.u32 2147483648, %v8728_v14  ;;  %v1298_v49 = vsel %vm1296_vm14, %v1297_v59, %v15800_v16  ;;  %v881_v61 = vxor.u32 2147483648, %v15810_v35  ;;  %8112 = vmatmul.mubr.msk.f32.vlgmr.msra.gmra.mxu0 %vm15507_vm9, %v10698_v11 }
 0x289   : > { %8663 = vset.pattern.permute.xlu0 %v9023_v12  ;;  %v771_v25 = vand.u32 3, %v770_v52  ;;  %v2130_v36 = vsel %vm2128_vm12, %v2129_v38, %v8728_v14  ;;  %vm1189_vm5 = vcmp.eq.s32.totalorder %v1187_v6, 0  ;;  %v774_v2 = vxor.u32 2147483648, %v15811_v13  ;;  %8664 = vset.pattern.permute.xlu1 %v9023_v12 }
 0x28a   : > { %2158 = vperm.xlu0 %8663, %v2140_v32   ;;  %v777_v24 = vxor.u32 2147483648, %v15812_v8  ;;  %v15813_v3 = vmov 0.0   ;;  %v2127_v46 = vsel %vm2125_vm8, %v8726_v19, %v2126_v22  ;;  %v1191_v20 = vsel %vm1189_vm5, %v15808_v42, %v1190_v56  ;;  %2148 = vperm.xlu1 %8664, %v2138_v34   ;;  %v8270_v32 = vld [vmem:[%s15405_s3 + $0x50] sm:$0xff]  ;;  %v8268_v19 = vld [vmem:[%s15405_s3 + $0x40] sm:$0xff] }
 0x28b   : > { %2244 = vmatprep.mubr.f32.mxu0 %v15813_v3  ;;  %vm1192_vm12 = vcmp.eq.s32.totalorder %v1187_v6, 2  ;;  %vm877_vm2 = vcmp.eq.s32.totalorder %v875_v63, 0  ;;  %v2131_v41 = vsel %vm2124_vm11, %v2127_v46, %v2130_v36  ;;  %vm880_vm6 = vcmp.eq.s32.totalorder %v875_v63, 2 }
 0x28c   : > { %v1194_v45 = vsel %vm1192_vm12, %v1193_v10, %v15807_v7  ;;  %v879_v5 = vsel %vm877_vm2, %v15810_v35, %v878_v15  ;;  %v2132_v44 = vsel %vm2121_vm15, nan, %v2131_v41  ;;  %v882_v27 = vsel %vm880_vm6, %v881_v61, %v15809_v55  ;;  %8113 = vmatmul.mubr.msk.f32.gmra.mxu0 %vm15507_vm9, %v10726_v1  ;;  %v7785_v7 = vld [vmem:[%s15407_s5] sm:$0x7] }
 0x28d   : > { %vm773_vm8 = vcmp.eq.s32.totalorder %v771_v25, 0  ;;  %vm776_vm14 = vcmp.eq.s32.totalorder %v771_v25, 2  ;;  %2287 = vmatprep.subr.mxu1 %v2132_v44  ;;  %v1299_v31 = vsel %vm1292_vm1, %v1295_v4, %v1298_v49  ;;  %vm1188_vm11 = vcmp.lt.s32.totalorder %v1187_v6, 2  ;;  %2250 = vmatprep.mubr.f32.mxu0 %v15813_v3  ;;  %v8189_v6 = vld [vmem:[%s15405_s3 + $0x28] sm:$0xff] }
 0x28e   : > { %2153 = vperm.xlu0 %8663, %v2139_v26   ;;  %v775_v16 = vsel %vm773_vm8, %v15812_v8, %v774_v2  ;;  %v778_v50 = vsel %vm776_vm14, %v777_v24, %v15811_v13  ;;  %2288 = vmatpush1.msra.mxu1 %v10648_v53  ;;  %v1716_v18 = vsel %vm1705_vm7, nan, %v10651_v9  ;;  %vm1601_vm15 = vweird.f32 %v9696_v54  ;;  %v8191_v53 = vld [vmem:[%s15405_s3 + $0x38] sm:$0xff]  ;;  %v8190_v54 = vld [vmem:[%s15405_s3 + $0x30] sm:$0xff] }
 0x28f   : > { %v1195_v33 = vsel %vm1188_vm11, %v1191_v20, %v1194_v45  ;;  %vm876_vm10 = vcmp.lt.s32.totalorder %v875_v63, 2  ;;  %2143 = vperm.xlu1 %8664, %v2137_v39   ;;  %2289 = vmatprep.subr.mxu1 %v1716_v18  ;;  %v1612_v59 = vsel %vm1601_vm15, nan, %v10673_v43  ;;  %vm1289_vm13 = vweird.f32 %v15814_v40 }
 0x290   : > { %v883_v30 = vsel %vm876_vm10, %v879_v5, %v882_v27  ;;  %vm772_vm1 = vcmp.lt.s32.totalorder %v771_v25, 2  ;;  %2290 = vmatpush1.msra.mxu1 %v1612_v59  ;;  %v1300_v47 = vsel %vm1289_vm13, nan, %v1299_v31  ;;  %vm1185_vm0 = vweird.f32 %v15815_v51  ;;  %8114 = vmatmul.mubr.msk.f32.gmra.mxu0 %vm15507_vm9, %v2135_v37 }
 0x291   : > { %v779_v9 = vsel %vm772_vm1, %v775_v16, %v778_v50  ;;  %2291 = vmatprep.subr.mxu1 %v1300_v47  ;;  %v1196_v43 = vsel %vm1185_vm0, nan, %v1195_v33  ;;  %vm873_vm3 = vweird.f32 %v15816_v57  ;;  %2256 = vmatprep.mubr.f32.mxu0 %v15813_v3  ;;  %vm769_vm7 = vweird.f32 %v15817_v48 }
 0x292   : > { %2292 = vmatpush1.msra.mxu1 %v1196_v43  ;;  %v884_v28 = vsel %vm873_vm3, nan, %v883_v30  ;;  %4043 = vperm.xlu0 %8663, %v8191_v53   ;;  %v780_v52 = vsel %vm769_vm7, nan, %v779_v9  ;;  %v15822_v39 = vmov 2131351028   ;;  %v15823_v16 = vmov 2102212464  }
 0x293   : > { %2293 = vmatprep.subr.mxu1 %v884_v28  ;;  %4038 = vperm.xlu1 %8664, %v8190_v54  }
 0x294   : > { %2294 = vmatpush1.msra.mxu1 %v780_v52  ;;  %8115 = vmatmul.mubr.msk.f32.gmra.mxu0 %vm15507_vm9, %v2136_v17 }
 0x295   : > { %8116 = vmatmul.mubr.msk.f32.vlgmr.msra.gmra.mxu1 %vm15507_vm9, %v10698_v11  ;;  %4122 = vmatprep.mubr.f32.mxu0 %v15813_v3  ;;  %v8269_v11 = vld [vmem:[%s15405_s3 + $0x48] sm:$0xff] }
 0x296   : > { %2333 = vmatprep.mubr.f32.mxu1 %v15813_v3  ;;  %4033 = vperm.xlu0 %8663, %v8189_v6  }
 0x297   : > { %4028 = vperm.xlu1 %8664, %v8188_v0  }
 0x299   : > { %8117 = vmatmul.mubr.msk.f32.gmra.mxu1 %vm15507_vm9, %v10726_v1 }
 0x29a   : > { %2339 = vmatprep.mubr.f32.mxu1 %v15813_v3  ;;  %5927 = vperm.xlu0 %8663, %v8271_v58  }
 0x29b   : > { %5922 = vperm.xlu1 %8664, %v8270_v32  }
 0x29d   : > { %8118 = vmatmul.mubr.msk.f32.gmra.mxu1 %vm15507_vm9, %v2135_v37 }
 0x29e   : > { %2345 = vmatprep.mubr.f32.mxu1 %v15813_v3  ;;  %5917 = vperm.xlu0 %8663, %v8269_v11  }
 0x29f   : > { %5912 = vperm.xlu1 %8664, %v8268_v19  }
 0x2a1   : > { %8119 = vmatmul.mubr.msk.f32.gmra.mxu1 %vm15507_vm9, %v2136_v17 }
 0x2a2   : > { %7788 = vperm.xlu0 %8663, %v7785_v7   ;;  %4211 = vmatprep.mubr.f32.mxu1 %v15813_v3 }
 0x305   : > { %v10808_v56 = vpop.permute.xlu1 %2148 }
 0x30a   : > { %v10810_v63 = vpop.permute.xlu1 %2143 }
 0x348   : > { %v2240_v60 = vpop.f32.mrf.mxu0 }
 0x349   : > { %v10813_v14 = vadd.f32 %v2240_v60, %v10810_v63 }
 0x34a   : > { %v2242_v38 = vpop.f32.mrf.mxu0 }
 0x34b   : > { %15818 = vst [vmem:[#allocation35_spill] sm:$0xff] %v10813_v14  ;;  %v2352_v4 = vand.u32 2147483647, %v10813_v14  ;;  %v2355_v42 = vand.u32 2139095040, %v10813_v14  ;;  %v10818_v10 = vadd.f32 %v2242_v38, %v10810_v63 }
 0x34c   : > { %v2246_v13 = vpop.f32.mrf.mxu0 }
 0x34d   : > { %15819 = vst [vmem:[#allocation34_spill] sm:$0xff] %v10818_v10  ;;  %v2356_v55 = vshrl.u32 %v2355_v42, 23  ;;  %v2459_v15 = vand.u32 2139095040, %v10818_v10  ;;  %v2359_v34 = vand.u32 8388607, %v2352_v4  ;;  %v10830_v41 = vadd.f32 %v2246_v13, %v10808_v56 }
 0x34e   : > { %v15475_v1 = vand.u32 2147483647, %v10818_v10 }
 0x34f   : > { %v8120_v12 = vadd.s32 4294967169, %v2356_v55  ;;  %v2460_v22 = vshrl.u32 %v2459_v15, 23  ;;  %v2360_v61 = vor.u32 8388608, %v2359_v34  ;;  %15821 = vst [vmem:[#allocation39_spill] sm:$0xff] %v10830_v41 }
 0x350   : > { %v10863_v34 = vand.u32 8388607, %v15475_v1 }
 0x351   : > { %v2362_v49 = vadd.s32 1, %v8120_v12  ;;  %v8124_v35 = vadd.s32 4294967169, %v2460_v22  ;;  %v10824_v46 = vshll.u32 %v2360_v61, 8 }
 0x353   : > { %vm2363_vm4 = vcmp.gt.s32.totalorder %v2362_v49, 0  ;;  %v2466_v36 = vadd.s32 1, %v8124_v35 }
 0x354   : > { %v2364_v25 = vsel %vm2363_vm4, %v2362_v49, 0 }
 0x355   : > { %v2366_v2 = vand.u32 31, %v2364_v25  ;;  %v2329_v8 = vpop.f32.mrf.mxu1  ;;  %v2365_v24 = vshrl.u32 %v2364_v25, 5  ;;  %vm2467_vm5 = vcmp.gt.s32.totalorder %v2466_v36, 0 }
 0x356   : > { %v10827_v20 = vadd.f32 %v2329_v8, %v10810_v63  ;;  %v2468_v22 = vsel %vm2467_vm5, %v2466_v36, 0  ;;  %v2771_v8 = vand.u32 2139095040, %v10830_v41  ;;  %v2464_v36 = vor.u32 8388608, %v10863_v34 }
 0x357   : > { %v2367_v26 = vsub.s32 32, %v2366_v2  ;;  %v2369_v45 = vshll.u32 %v15698_v62, %v2366_v2  ;;  %v2372_v5 = vshll.u32 %v15708_v29, %v2366_v2  ;;  %v2375_v44 = vshll.u32 %v15822_v39, %v2366_v2 }
 0x358   : > { %15820 = vst [vmem:[#allocation14_spill] sm:$0xff] %v10827_v20  ;;  %v2378_v37 = vshll.u32 %v15823_v16, %v2366_v2  ;;  %v2381_v33 = vshll.u32 %v15709_v23, %v2366_v2  ;;  %vm2384_vm12 = vcmp.lt.s32.totalorder %v2365_v24, 1  ;;  %vm2387_vm2 = vcmp.lt.s32.totalorder %v2365_v24, 4 }
 0x359   : > { %v2370_v27 = vshrl.u32 %v15708_v29, %v2367_v26  ;;  %v2373_v31 = vshrl.u32 %v15822_v39, %v2367_v26  ;;  %v2376_v50 = vshrl.u32 %v15823_v16, %v2367_v26  ;;  %v2379_v18 = vshrl.u32 %v15709_v23, %v2367_v26 }
 0x35a   : > { %v2382_v59 = vshrl.u32 %v15697_v21, %v2367_v26  ;;  %v2560_v9 = vand.u32 2147483647, %v10827_v20  ;;  %v2563_v54 = vand.u32 2139095040, %v10827_v20  ;;  %v2368_v43 = vshrl.u32 %v15698_v62, %v2367_v26 }
 0x35b   : > { %v2371_v40 = vor.u32 %v2370_v27, %v2369_v45  ;;  %v2374_v30 = vor.u32 %v2373_v31, %v2372_v5  ;;  %v2377_v53 = vor.u32 %v2376_v50, %v2375_v44  ;;  %v2380_v47 = vor.u32 %v2379_v18, %v2378_v37 }
 0x35c   : > { %v2383_v51 = vor.u32 %v2382_v59, %v2381_v33  ;;  %vm2385_vm6 = vcmp.lt.s32.totalorder %v2365_v24, 2  ;;  %vm2386_vm8 = vcmp.lt.s32.totalorder %v2365_v24, 3  ;;  %v2564_v32 = vshrl.u32 %v2563_v54, 23 }
 0x35d   : > { %v2389_v57 = vsel %vm2387_vm2, %v2377_v53, 2102212464  ;;  %v2392_v17 = vsel %vm2384_vm12, %v2371_v40, %v2374_v30  ;;  %v2396_v28 = vsel %vm2384_vm12, %v2374_v30, %v2377_v53  ;;  %v2393_v48 = vsel %vm2387_vm2, %v2380_v47, 920167782 }
 0x35e   : > { %v2397_v52 = vsel %vm2387_vm2, %v2383_v51, 1326507024  ;;  %v2388_v6 = vsel %vm2384_vm12, %v2368_v43, %v2371_v40  ;;  %v2394_v0 = vsel %vm2386_vm8, %v2377_v53, %v2393_v48  ;;  %v2390_v11 = vsel %vm2386_vm8, %v2374_v30, %v2389_v57 }
 0x35f   : > { %v2398_v58 = vsel %vm2386_vm8, %v2380_v47, %v2397_v52  ;;  %v2395_v19 = vsel %vm2385_vm6, %v2392_v17, %v2394_v0  ;;  %v2567_v60 = vand.u32 8388607, %v2560_v9  ;;  %v8128_v12 = vadd.s32 4294967169, %v2564_v32 }
 0x360   : > { %v2399_v7 = vsel %vm2385_vm6, %v2396_v28, %v2398_v58  ;;  %v10857_v55 = vmul.u32.u64.low %v10824_v46, %v2395_v19  ;;  %v10858_v15 = vmul.u32.u64.high %v10824_v46, %v2395_v19, %v10857_v55  ;;  %v2391_v49 = vsel %vm2385_vm6, %v2388_v6, %v2390_v11 }
 0x361   : > { %v10853_v38 = vmul.u32.u64.low %v10824_v46, %v2399_v7  ;;  %v10854_v42 = vmul.u32.u64.high %v10824_v46, %v2399_v7, %v10853_v38  ;;  %v2568_v35 = vor.u32 8388608, %v2567_v60  ;;  %v10867_v61 = vand.u32 31, %v2468_v22 }
 0x362   : > { %v2570_v25 = vadd.s32 1, %v8128_v12  ;;  %v2410_v13 = vadd.s32 1, %v10858_v15  ;;  %v2407_v26 = vmul.u32 %v10824_v46, %v2391_v49  ;;  %v10878_v24 = vshrl.u32 %v2468_v22, 5 }
 0x363   : > { %vm2409_vm14 = vc.u32 %v10854_v42, %v10857_v55  ;;  %v10873_v2 = vsub.s32 32, %v10867_v61  ;;  %v10881_v44 = vshll.u32 %v2568_v35, 8  ;;  %v2473_v27 = vshll.u32 %v15698_v62, %v10867_v61 }
 0x364   : > { %vm2571_vm11 = vcmp.gt.s32.totalorder %v2570_v25, 0  ;;  %v2411_v45 = vsel %vm2409_vm14, %v2410_v13, %v10858_v15  ;;  %v2476_v18 = vshll.u32 %v15708_v29, %v10867_v61  ;;  %v2479_v59 = vshll.u32 %v15822_v39, %v10867_v61 }
 0x365   : > { %v2572_v5 = vsel %vm2571_vm11, %v2570_v25, 0  ;;  %v2412_v31 = vadd.s32 %v2411_v45, %v2407_v26  ;;  %v2474_v46 = vshrl.u32 %v15708_v29, %v10873_v2  ;;  %v2477_v33 = vshrl.u32 %v15822_v39, %v10873_v2 }
 0x366   : > { %v2573_v50 = vshrl.u32 %v2572_v5, 5  ;;  %v2574_v37 = vand.u32 31, %v2572_v5  ;;  %v2480_v40 = vshrl.u32 %v15823_v16, %v10873_v2  ;;  %v2483_v51 = vshrl.u32 %v15709_v23, %v10873_v2 }
 0x367   : > { %v2413_v30 = vadd.s32 536870912, %v2412_v31  ;;  %vm2488_vm0 = vcmp.lt.s32.totalorder %v10878_v24, 1  ;;  %vm2491_vm3 = vcmp.lt.s32.totalorder %v10878_v24, 4  ;;  %vm2490_vm4 = vcmp.lt.s32.totalorder %v10878_v24, 3 }
 0x368   : > { %v2575_v53 = vsub.s32 32, %v2574_v37  ;;  %v2577_v47 = vshll.u32 %v15698_v62, %v2574_v37  ;;  %v2580_v54 = vshll.u32 %v15708_v29, %v2574_v37  ;;  %v2583_v43 = vshll.u32 %v15822_v39, %v2574_v37 }
 0x369   : > { %v2586_v57 = vshll.u32 %v15823_v16, %v2574_v37  ;;  %v2589_v17 = vshll.u32 %v15709_v23, %v2574_v37  ;;  %v10902_v28 = vshrl.u32 %v2413_v30, 30  ;;  %vm2592_vm15 = vcmp.lt.s32.totalorder %v2573_v50, 1 }
 0x36a   : > { %v2578_v48 = vshrl.u32 %v15708_v29, %v2575_v53  ;;  %v2581_v52 = vshrl.u32 %v15822_v39, %v2575_v53  ;;  %v2576_v6 = vshrl.u32 %v15698_v62, %v2575_v53  ;;  %v2584_v0 = vshrl.u32 %v15823_v16, %v2575_v53 }
 0x36b   : > { %15824 = vst [vmem:[#allocation37_spill] sm:$0xff] %v10902_v28  ;;  %v2587_v58 = vshrl.u32 %v15709_v23, %v2575_v53  ;;  %v2590_v32 = vshrl.u32 %v15697_v21, %v2575_v53  ;;  %v2415_v11 = vshll.u32 %v10902_v28, 30  ;;  %vm2593_vm10 = vcmp.lt.s32.totalorder %v2573_v50, 2 }
 0x36c   : > { %v2579_v19 = vor.u32 %v2578_v48, %v2577_v47  ;;  %v2582_v7 = vor.u32 %v2581_v52, %v2580_v54  ;;  %v2585_v60 = vor.u32 %v2584_v0, %v2583_v43  ;;  %vm2594_vm13 = vcmp.lt.s32.totalorder %v2573_v50, 3 }
 0x36d   : > { %v2588_v38 = vor.u32 %v2587_v58, %v2586_v57  ;;  %v2591_v15 = vor.u32 %v2590_v32, %v2589_v17  ;;  %v10911_v12 = vsub.s32 %v2412_v31, %v2415_v11  ;;  %vm2595_vm1 = vcmp.lt.s32.totalorder %v2573_v50, 4 }
 0x36e   : > { %v2596_v22 = vsel %vm2592_vm15, %v2576_v6, %v2579_v19  ;;  %v2600_v49 = vsel %vm2592_vm15, %v2579_v19, %v2582_v7  ;;  %v2597_v35 = vsel %vm2595_vm1, %v2585_v60, 2102212464  ;;  %v2604_v13 = vsel %vm2592_vm15, %v2582_v7, %v2585_v60 }
 0x36f   : > { %v2601_v25 = vsel %vm2595_vm1, %v2588_v38, 920167782  ;;  %v2605_v26 = vsel %vm2595_vm1, %v2591_v15, 1326507024  ;;  %v2418_v45 = vsub.s32 0, %v10911_v12  ;;  %v2598_v5 = vsel %vm2594_vm13, %v2582_v7, %v2597_v35 }
 0x370   : > { %v2602_v37 = vsel %vm2594_vm13, %v2585_v60, %v2601_v25  ;;  %v2606_v30 = vsel %vm2594_vm13, %v2588_v38, %v2605_v26  ;;  %v2475_v47 = vor.u32 %v2474_v46, %v2473_v27  ;;  %v2482_v54 = vshll.u32 %v15823_v16, %v10867_v61 }
 0x371   : > { %v2603_v53 = vsel %vm2593_vm10, %v2600_v49, %v2602_v37  ;;  %v2607_v31 = vsel %vm2593_vm10, %v2604_v13, %v2606_v30  ;;  %v8121_v43 = vmin.u32 %v2418_v45, %v10911_v12  ;;  %v2478_v48 = vor.u32 %v2477_v33, %v2476_v18 }
 0x372   : > { %v10923_v57 = vmul.u32.u64.low %v10881_v44, %v2607_v31  ;;  %v10924_v17 = vmul.u32.u64.high %v10881_v44, %v2607_v31, %v10923_v57  ;;  %v2599_v52 = vsel %vm2593_vm10, %v2596_v22, %v2598_v5  ;;  %v2484_v58 = vor.u32 %v2483_v51, %v2482_v54 }
 0x373   : > { %v10928_v6 = vmul.u32.u64.low %v10881_v44, %v2603_v53  ;;  %v10929_v0 = vmul.u32.u64.high %v10881_v44, %v2603_v53, %v10928_v6  ;;  %v2420_v32 = vclz %v8121_v43  ;;  %v2481_v27 = vor.u32 %v2480_v40, %v2479_v59  ;;  %v2331_v59 = vpop.f32.mrf.mxu1 }
 0x374   : > { %v2485_v46 = vshll.u32 %v15709_v23, %v10867_v61  ;;  %v2486_v11 = vshrl.u32 %v15697_v21, %v10873_v2  ;;  %v2472_v19 = vshrl.u32 %v15698_v62, %v10873_v2  ;;  %v2504_v50 = vshll.u32 %v2464_v36, 8 }
 0x375   : > { %v8122_v18 = vadd.s32 4294967294, %v2420_v32  ;;  %vm2617_vm7 = vc.u32 %v10924_v17, %v10928_v6  ;;  %v2496_v61 = vsel %vm2488_vm0, %v2475_v47, %v2478_v48  ;;  %v2615_v40 = vmul.u32 %v10881_v44, %v2599_v52 }
 0x376   : > { %v2487_v33 = vor.u32 %v2486_v11, %v2485_v46  ;;  %v2618_v2 = vadd.s32 1, %v10929_v0  ;;  %v2497_v51 = vsel %vm2491_vm3, %v2484_v58, 920167782  ;;  %vm2489_vm5 = vcmp.lt.s32.totalorder %v10878_v24, 2 }
 0x377   : > { %v2493_v34 = vsel %vm2491_vm3, %v2481_v27, 2102212464  ;;  %v2498_v36 = vsel %vm2490_vm4, %v2481_v27, %v2497_v51  ;;  %v2500_v15 = vsel %vm2488_vm0, %v2478_v48, %v2481_v27  ;;  %v10956_v44 = vadd.f32 %v2331_v59, %v10810_v63 }
 0x378   : > { %v2501_v7 = vsel %vm2491_vm3, %v2487_v33, 1326507024  ;;  %v2619_v60 = vsel %vm2617_vm7, %v2618_v2, %v10929_v0  ;;  %v2499_v38 = vsel %vm2489_vm5, %v2496_v61, %v2498_v36  ;;  %vm8123_vm12 = vcmp.lt.s32.totalorder %v8122_v18, 0 }
 0x379   : > { %15825 = vst [vmem:[#allocation12_spill] sm:$0xff] %v10956_v44  ;;  %v2620_v22 = vadd.s32 %v2619_v60, %v2615_v40  ;;  %v2492_v49 = vsel %vm2488_vm0, %v2472_v19, %v2475_v47  ;;  %v2494_v35 = vsel %vm2490_vm4, %v2478_v48, %v2493_v34  ;;  %v2502_v25 = vsel %vm2490_vm4, %v2484_v58, %v2501_v7  ;;  %v2248_v47 = vpop.f32.mrf.mxu0 }
 0x37a   : > { %v10960_v13 = vmul.u32.u64.low %v2504_v50, %v2499_v38  ;;  %v10961_v26 = vmul.u32.u64.high %v2504_v50, %v2499_v38, %v10960_v13  ;;  %v2503_v5 = vsel %vm2489_vm5, %v2500_v15, %v2502_v25  ;;  %v15478_v37 = vand.u32 2147483647, %v10830_v41 }
 0x37b   : > { %v2621_v45 = vadd.s32 536870912, %v2620_v22  ;;  %v2772_v63 = vshrl.u32 %v2771_v8, 23  ;;  %v10969_v30 = vmul.u32.u64.low %v2504_v50, %v2503_v5  ;;  %v10970_v53 = vmul.u32.u64.high %v2504_v50, %v2503_v5, %v10969_v30 }
 0x37c   : > { %v2667_v31 = vand.u32 2139095040, %v10956_v44  ;;  %v2423_v54 = vsel %vm8123_vm12, 0, %v8122_v18  ;;  %v2495_v57 = vsel %vm2489_vm5, %v2492_v49, %v2494_v35  ;;  %v2514_v48 = vadd.s32 1, %v10961_v26  ;;  %v2335_v49 = vpop.f32.mrf.mxu1 }
 0x37d   : > { %v10973_v43 = vshrl.u32 %v2621_v45, 30  ;;  %v8136_v58 = vadd.s32 4294967169, %v2772_v63  ;;  %v2775_v8 = vand.u32 8388607, %v15478_v37  ;;  %v10982_v32 = vadd.f32 %v2248_v47, %v10808_v56 }
 0x37e   : > { %v2668_v52 = vshrl.u32 %v2667_v31, 23  ;;  %v2424_v27 = vsub.s32 32, %v2423_v54  ;;  %v2511_v46 = vmul.u32 %v2504_v50, %v2495_v57  ;;  %vm2513_vm2 = vc.u32 %v10970_v53, %v10960_v13 }
 0x37f   : > { %15826 = vst [vmem:[#allocation19_spill] sm:$0xff] %v10973_v43  ;;  %v2623_v0 = vshll.u32 %v10973_v43, 30  ;;  %15827 = vst [vmem:[#allocation22_spill] sm:$0xff] %v10982_v32  ;;  %v2428_v24 = vsub.s32 4294967266, %v2423_v54  ;;  %v2515_v18 = vsel %vm2513_vm2, %v2514_v48, %v10961_v26  ;;  %v15474_v33 = vand.u32 2147483647, %v10956_v44 }
 0x380   : > { %v8132_v11 = vadd.s32 4294967169, %v2668_v52  ;;  %v2408_v61 = vadd.s32 %v10857_v55, %v10854_v42  ;;  %v2516_v59 = vadd.s32 %v2515_v18, %v2511_v46  ;;  %v2778_v51 = vadd.s32 1, %v8136_v58 }
 0x381   : > { %v10986_v19 = vsub.s32 %v2620_v22, %v2623_v0  ;;  %v2875_v50 = vand.u32 2139095040, %v10982_v32  ;;  %v2776_v7 = vor.u32 8388608, %v2775_v8  ;;  %v2429_v60 = vadd.s32 127, %v2428_v24 }
 0x382   : > { %v2674_v40 = vadd.s32 1, %v8132_v11  ;;  %v2426_v34 = vshrl.u32 %v2408_v61, %v2424_v27  ;;  %v2517_v36 = vadd.s32 536870912, %v2516_v59  ;;  %v2671_v15 = vand.u32 8388607, %v15474_v33 }
 0x383   : > { %v2626_v2 = vsub.s32 0, %v10986_v19  ;;  %v2425_v35 = vshll.u32 %v10911_v12, %v2423_v54  ;;  %vm2779_vm8 = vcmp.gt.s32.totalorder %v2778_v51, 0  ;;  %v11000_v26 = vshrl.u32 %v2875_v50, 23 }
 0x384   : > { %vm2675_vm6 = vcmp.gt.s32.totalorder %v2674_v40, 0  ;;  %v10997_v42 = vshrl.u32 %v2517_v36, 30  ;;  %v11003_v63 = vshll.u32 %v2776_v7, 8  ;;  %v11006_v30 = vadd.f32 %v2335_v49, %v10808_v56 }
 0x385   : > { %v8129_v38 = vmin.u32 %v2626_v2, %v10986_v19  ;;  %v2676_v22 = vsel %vm2675_vm6, %v2674_v40, 0  ;;  %v11008_v31 = vor.u32 %v2426_v34, %v2425_v35  ;;  %v2430_v47 = vshll.u32 %v2429_v60, 23 }
 0x386   : > { %15828 = vst [vmem:[#allocation29_spill] sm:$0xff] %v10997_v42  ;;  %v2678_v55 = vand.u32 31, %v2676_v22  ;;  %v2519_v45 = vshll.u32 %v10997_v42, 30  ;;  %15829 = vst [vmem:[#allocation27_spill] sm:$0xff] %v11006_v30  ;;  %v2672_v48 = vor.u32 8388608, %v2671_v15  ;;  %v2780_v0 = vsel %vm2779_vm8, %v2778_v51, 0 }
 0x387   : > { %v2628_v25 = vclz %v8129_v38  ;;  %v2616_v61 = vadd.s32 %v10928_v6, %v10924_v17  ;;  %v2677_v40 = vshrl.u32 %v2676_v22, 5  ;;  %v2782_v36 = vand.u32 31, %v2780_v0 }
 0x388   : > { %v2679_v5 = vsub.s32 32, %v2678_v55  ;;  %v11010_v52 = vsub.s32 %v2516_v59, %v2519_v45  ;;  %v2681_v12 = vshll.u32 %v15698_v62, %v2678_v55  ;;  %v2684_v58 = vshll.u32 %v15708_v29, %v2678_v55 }
 0x389   : > { %v8130_v57 = vadd.s32 4294967294, %v2628_v25  ;;  %v2690_v24 = vshll.u32 %v15823_v16, %v2678_v55  ;;  %v2687_v2 = vshll.u32 %v15822_v39, %v2678_v55  ;;  %v2431_v7 = vor.u32 4788187, %v2430_v47 }
 0x38a   : > { %v2682_v54 = vshrl.u32 %v15708_v29, %v2679_v5  ;;  %v2685_v8 = vshrl.u32 %v15822_v39, %v2679_v5  ;;  %v2688_v27 = vshrl.u32 %v15823_v16, %v2679_v5  ;;  %v2522_v11 = vsub.s32 0, %v11010_v52 }
 0x38b   : > { %vm8131_vm14 = vcmp.lt.s32.totalorder %v8130_v57, 0  ;;  %v2691_v18 = vshrl.u32 %v15709_v23, %v2679_v5  ;;  %v2693_v38 = vshll.u32 %v15709_v23, %v2678_v55  ;;  %v2694_v15 = vshrl.u32 %v15697_v21, %v2679_v5 }
 0x38c   : > { %v11017_v46 = vsel %vm8131_vm14, 0, %v8130_v57  ;;  %v2683_v51 = vor.u32 %v2682_v54, %v2681_v12  ;;  %v2686_v50 = vor.u32 %v2685_v8, %v2684_v58  ;;  %v2689_v60 = vor.u32 %v2688_v27, %v2687_v2 }
 0x38d   : > { %v2636_v59 = vsub.s32 4294967266, %v11017_v46  ;;  %v2692_v34 = vor.u32 %v2691_v18, %v2690_v24  ;;  %v2434_v49 = vcvt.s32.f32 %v11008_v31  ;;  %v8125_v35 = vmin.u32 %v2522_v11, %v11010_v52 }
 0x38e   : > { %v2712_v17 = vshll.u32 %v2672_v48, 8  ;;  %v11030_v6 = vshrl.u32 %v2780_v0, 5  ;;  %v2695_v25 = vor.u32 %v2694_v15, %v2693_v38  ;;  %vm2696_vm11 = vcmp.lt.s32.totalorder %v2677_v40, 1 }
 0x38f   : > { %v2637_v22 = vadd.s32 127, %v2636_v59  ;;  %vm2699_vm15 = vcmp.lt.s32.totalorder %v2677_v40, 4  ;;  %vm2698_vm10 = vcmp.lt.s32.totalorder %v2677_v40, 3  ;;  %v2704_v45 = vsel %vm2696_vm11, %v2683_v51, %v2686_v50 }
 0x390   : > { %v2705_v47 = vsel %vm2699_vm15, %v2692_v34, 920167782  ;;  %v2783_v57 = vsub.s32 32, %v2782_v36  ;;  %v2432_v55 = vand.u32 2147483647, %v2431_v7  ;;  %vm2697_vm13 = vcmp.lt.s32.totalorder %v2677_v40, 2 }
 0x391   : > { %v2706_v12 = vsel %vm2698_vm10, %v2689_v60, %v2705_v47  ;;  %v2785_v31 = vshll.u32 %v15698_v62, %v2782_v36  ;;  %v2680_v48 = vshrl.u32 %v15698_v62, %v2679_v5  ;;  %v2701_v54 = vsel %vm2699_vm15, %v2689_v60, 2102212464 }
 0x392   : > { %v2707_v0 = vsel %vm2697_vm13, %v2704_v45, %v2706_v12  ;;  %v2708_v58 = vsel %vm2696_vm11, %v2686_v50, %v2689_v60  ;;  %v2632_v8 = vsub.s32 32, %v11017_v46  ;;  %v2638_v27 = vshll.u32 %v2637_v22, 23 }
 0x393   : > { %v2524_v11 = vclz %v8125_v35  ;;  %v2709_v24 = vsel %vm2699_vm15, %v2695_v25, 1326507024  ;;  %v2700_v18 = vsel %vm2696_vm11, %v2680_v48, %v2683_v51  ;;  %v2786_v2 = vshrl.u32 %v15708_v29, %v2783_v57 }
 0x394   : > { %v2710_v59 = vsel %vm2698_vm10, %v2692_v34, %v2709_v24  ;;  %v2789_v5 = vshrl.u32 %v15822_v39, %v2783_v57  ;;  %vm2800_vm1 = vcmp.lt.s32.totalorder %v11030_v6, 1  ;;  %v2702_v7 = vsel %vm2698_vm10, %v2686_v50, %v2701_v54 }
 0x395   : > { %v2711_v60 = vsel %vm2697_vm13, %v2708_v58, %v2710_v59  ;;  %v11049_v38 = vmul.u32.u64.low %v2712_v17, %v2707_v0  ;;  %v11050_v15 = vmul.u32.u64.high %v2712_v17, %v2707_v0, %v11049_v38  ;;  %v2788_v51 = vshll.u32 %v15708_v29, %v2782_v36 }
 0x396   : > { %v11053_v35 = vmul.u32.u64.low %v2712_v17, %v2711_v60  ;;  %v11054_v22 = vmul.u32.u64.high %v2712_v17, %v2711_v60, %v11053_v35  ;;  %v2792_v34 = vshrl.u32 %v15823_v16, %v2783_v57  ;;  %v2634_v25 = vshrl.u32 %v2616_v61, %v2632_v8 }
 0x397   : > { %v2639_v45 = vor.u32 4788187, %v2638_v27  ;;  %v8126_v47 = vadd.s32 4294967294, %v2524_v11  ;;  %v2791_v12 = vshll.u32 %v15822_v39, %v2782_v36  ;;  %v2703_v50 = vsel %vm2697_vm13, %v2700_v18, %v2702_v7 }
 0x398   : > { %v2787_v48 = vor.u32 %v2786_v2, %v2785_v31  ;;  %v2790_v54 = vor.u32 %v2789_v5, %v2788_v51  ;;  %v2795_v0 = vshrl.u32 %v15709_v23, %v2783_v57  ;;  %v2722_v58 = vadd.s32 1, %v11050_v15 }
 0x399   : > { %v2794_v24 = vshll.u32 %v15823_v16, %v2782_v36  ;;  %v2797_v59 = vshll.u32 %v15709_v23, %v2782_v36  ;;  %v2798_v60 = vshrl.u32 %v15697_v21, %v2783_v57  ;;  %v2435_v35 = vmul.f32 %v2434_v49, %v2432_v55 }
 0x39a   : > { %v2633_v61 = vshll.u32 %v10986_v19, %v11017_v46  ;;  %v2793_v8 = vor.u32 %v2792_v34, %v2791_v12  ;;  %vm2801_vm0 = vcmp.lt.s32.totalorder %v11030_v6, 2  ;;  %v2719_v40 = vmul.u32 %v2712_v17, %v2703_v50 }
 0x39b   : > { %vm2721_vm3 = vc.u32 %v11054_v22, %v11049_v38  ;;  %v2796_v31 = vor.u32 %v2795_v0, %v2794_v24  ;;  %v2799_v27 = vor.u32 %v2798_v60, %v2797_v59  ;;  %vm8127_vm7 = vcmp.lt.s32.totalorder %v8126_v47, 0 }
 0x39c   : > { %v2635_v11 = vor.u32 %v2634_v25, %v2633_v61  ;;  %v2723_v18 = vsel %vm2721_vm3, %v2722_v58, %v11050_v15  ;;  %v2784_v36 = vshrl.u32 %v15698_v62, %v2783_v57  ;;  %v2640_v2 = vand.u32 2147483647, %v2639_v45 }
 0x39d   : > { %v2724_v49 = vadd.s32 %v2723_v18, %v2719_v40  ;;  %vm2803_vm4 = vcmp.lt.s32.totalorder %v11030_v6, 4  ;;  %v2808_v19 = vsel %vm2800_vm1, %v2787_v48, %v2790_v54  ;;  %vm2802_vm5 = vcmp.lt.s32.totalorder %v11030_v6, 3 }
 0x39e   : > { %v2805_v46 = vsel %vm2803_vm4, %v2793_v8, 2102212464  ;;  %v2809_v17 = vsel %vm2803_vm4, %v2796_v31, 920167782  ;;  %v2812_v55 = vsel %vm2800_vm1, %v2790_v54, %v2793_v8  ;;  %v11078_v5 = vsel %vm8127_vm7, 0, %v8126_v47 }
 0x39f   : > { %v2725_v7 = vadd.s32 536870912, %v2724_v49  ;;  %v2810_v15 = vsel %vm2802_vm5, %v2793_v8, %v2809_v17  ;;  %v2813_v51 = vsel %vm2803_vm4, %v2799_v27, 1326507024  ;;  %v2804_v57 = vsel %vm2800_vm1, %v2784_v36, %v2787_v48 }
 0x3a0   : > { %v2806_v34 = vsel %vm2802_vm5, %v2790_v54, %v2805_v46  ;;  %v2811_v25 = vsel %vm2801_vm0, %v2808_v19, %v2810_v15  ;;  %v2814_v45 = vsel %vm2802_vm5, %v2796_v31, %v2813_v51  ;;  %v2436_v58 = vxor.u32 2147483648, %v2435_v35 }
 0x3a1   : > { %v11084_v12 = vshrl.u32 %v2725_v7, 30  ;;  %v2815_v50 = vsel %vm2801_vm0, %v2812_v55, %v2814_v45  ;;  %v11089_v0 = vmul.u32.u64.low %v11003_v63, %v2811_v25  ;;  %v11090_v47 = vmul.u32.u64.high %v11003_v63, %v2811_v25, %v11089_v0 }
 0x3a2   : > { %v2642_v24 = vcvt.s32.f32 %v2635_v11  ;;  %v11094_v59 = vmul.u32.u64.low %v11003_v63, %v2815_v50  ;;  %v11095_v48 = vmul.u32.u64.high %v11003_v63, %v2815_v50, %v11094_v59  ;;  %v2532_v54 = vsub.s32 4294967266, %v11078_v5 }
 0x3a3   : > { %15830 = vst [vmem:[#allocation25_spill] sm:$0xff] %v11084_v12  ;;  %v2727_v60 = vshll.u32 %v11084_v12, 30  ;;  %v2807_v61 = vsel %vm2801_vm0, %v2804_v57, %v2806_v34  ;;  %v2979_v8 = vand.u32 2139095040, %v11006_v30  ;;  %vm15509_vm12 = vcmp.lt.s32.totalorder %v10813_v14, 0 }
 0x3a4   : > { %v2643_v40 = vmul.f32 %v2642_v24, %v2640_v2  ;;  %v8140_v31 = vadd.s32 4294967169, %v11000_v26  ;;  %v2826_v11 = vadd.s32 1, %v11090_v47  ;;  %v15476_v36 = vand.u32 2147483647, %v10982_v32 }
 0x3a5   : > { %v11104_v27 = vsub.s32 %v2724_v49, %v2727_v60  ;;  %v2980_v18 = vshrl.u32 %v2979_v8, 23  ;;  %v2437_v19 = vsel %vm15509_vm12, %v2436_v58, %v2435_v35  ;;  %v2528_v6 = vsub.s32 32, %v11078_v5  ;;  %v2337_v60 = vpop.f32.mrf.mxu1 }
 0x3a6   : > { %v2823_v46 = vmul.u32 %v11003_v63, %v2807_v61  ;;  %vm2825_vm2 = vc.u32 %v11095_v48, %v11089_v0  ;;  %v2533_v2 = vadd.s32 127, %v2532_v54  ;;  %v2882_v17 = vadd.s32 1, %v8140_v31 }
 0x3a7   : > { %v2827_v26 = vsel %vm2825_vm2, %v2826_v11, %v11090_v47  ;;  %v8144_v49 = vadd.s32 4294967169, %v2980_v18  ;;  %v2644_v55 = vxor.u32 2147483648, %v2643_v40  ;;  %v2730_v7 = vsub.s32 0, %v11104_v27 }
 0x3a8   : > { %v2828_v15 = vadd.s32 %v2827_v26, %v2823_v46  ;;  %vm11118_vm6 = vcmp.le.f32.partialorder %v2352_v4, 0.7853982  ;;  %v15831_v35 = vmov 0  ;;  %v2512_v63 = vadd.s32 %v10960_v13, %v10970_v53 }
 0x3a9   : > { %v15832_v35 = vsel %vm11118_vm6, 4294967295, %v15831_v35  ;;  %v15477_v51 = vand.u32 2147483647, %v11006_v30  ;;  %v2986_v57 = vadd.s32 1, %v8144_v49  ;;  %v2440_v34 = vsel %vm11118_vm6, %v10813_v14, %v2437_v19 }
 0x3aa   : > { %15833 = vst [vmem:[#allocation28_spill] sm:$0xff] %v15832_v35  ;;  %vm15508_vm8 = vcmp.lt.s32.totalorder %v10827_v20, 0  ;;  %v2829_v25 = vadd.s32 536870912, %v2828_v15  ;;  %v2879_v45 = vand.u32 8388607, %v15476_v36  ;;  %v2530_v4 = vshrl.u32 %v2512_v63, %v2528_v6 }
 0x3ab   : > { %v2534_v50 = vshll.u32 %v2533_v2, 23  ;;  %vm2987_vm14 = vcmp.gt.s32.totalorder %v2986_v57, 0  ;;  %vm2883_vm11 = vcmp.gt.s32.totalorder %v2882_v17, 0  ;;  %v2645_v13 = vsel %vm15508_vm8, %v2644_v55, %v2643_v40 }
 0x3ac   : > { %v8133_v53 = vmin.u32 %v2730_v7, %v11104_v27  ;;  %v11134_v47 = vshrl.u32 %v2829_v25, 30  ;;  %v2988_v58 = vsel %vm2987_vm14, %v2986_v57, 0  ;;  %8729 = vcosq.f32 %v2440_v34 }
 0x3ad   : > { %v2529_v24 = vshll.u32 %v11010_v52, %v11078_v5  ;;  %v2983_v59 = vand.u32 8388607, %v15477_v51  ;;  %v2990_v54 = vand.u32 31, %v2988_v58  ;;  %8731 = vsinq.f32 %v2440_v34 }
 0x3ae   : > { %15834 = vst [vmem:[#allocation15_spill] sm:$0xff] %v11134_v47  ;;  %vm11142_vm15 = vcmp.le.f32.partialorder %v2560_v9, 0.7853982  ;;  %v15835_v61 = vmov 0  ;;  %v2831_v8 = vshll.u32 %v11134_v47, 30  ;;  %v2884_v40 = vsel %vm2883_vm11, %v2882_v17, 0 }
 0x3af   : > { %v15836_v61 = vsel %vm11142_vm15, 4294967295, %v15835_v61  ;;  %v11150_v31 = vsel %vm11142_vm15, %v10827_v20, %v2645_v13  ;;  %v11152_v52 = vor.u32 %v2530_v4, %v2529_v24  ;;  %v11154_v5 = vor.u32 4788187, %v2534_v50 }
 0x3b0   : > { %15837 = vst [vmem:[#allocation16_spill] sm:$0xff] %v15836_v61  ;;  %v2991_v11 = vsub.s32 32, %v2990_v54  ;;  %v2732_v18 = vclz %v8133_v53  ;;  %v11156_v19 = vsub.s32 %v2828_v15, %v2831_v8  ;;  %v2880_v9 = vor.u32 8388608, %v2879_v45  ;;  %v11240_v61 = vpop.permute.xlu0 %2158 }
 0x3b1   : > { %v11159_v6 = vadd.f32 %v2337_v60, %v10808_v56  ;;  %v2984_v46 = vor.u32 8388608, %v2983_v59  ;;  %v2993_v2 = vshll.u32 %v15698_v62, %v2990_v54  ;;  %v2996_v26 = vshll.u32 %v15708_v29, %v2990_v54 }
 0x3b2   : > { %v11163_v49 = vand.u32 31, %v2884_v40  ;;  %v2834_v17 = vsub.s32 0, %v11156_v19  ;;  %v2994_v55 = vshrl.u32 %v15708_v29, %v2991_v11  ;;  %v2997_v7 = vshrl.u32 %v15822_v39, %v2991_v11 }
 0x3b3   : > { %15838 = vst [vmem:[#allocation23_spill] sm:$0xff] %v11159_v6  ;;  %v3000_v15 = vshrl.u32 %v15823_v16, %v2991_v11  ;;  %v2989_v63 = vshrl.u32 %v2988_v58, 5  ;;  %v2999_v57 = vshll.u32 %v15822_v39, %v2990_v54  ;;  %v3002_v56 = vshll.u32 %v15823_v16, %v2990_v54 }
 0x3b4   : > { %v3003_v34 = vshrl.u32 %v15709_v23, %v2991_v11  ;;  %v8134_v25 = vadd.s32 4294967294, %v2732_v18  ;;  %v8137_v45 = vmin.u32 %v2834_v17, %v11156_v19  ;;  %v2995_v4 = vor.u32 %v2994_v55, %v2993_v2 }
 0x3b5   : > { %v2998_v50 = vor.u32 %v2997_v7, %v2996_v26  ;;  %v3001_v13 = vor.u32 %v3000_v15, %v2999_v57  ;;  %v3005_v24 = vshll.u32 %v15709_v23, %v2990_v54  ;;  %v3006_v59 = vshrl.u32 %v15697_v21, %v2991_v11 }
 0x3b6   : > { %v3004_v53 = vor.u32 %v3003_v34, %v3002_v56  ;;  %v11177_v58 = vadd.s32 %v11049_v38, %v11054_v22  ;;  %v11181_v60 = vadd.s32 %v11089_v0, %v11095_v48  ;;  %v2836_v8 = vclz %v8137_v45 }
 0x3b7   : > { %v11183_v18 = vshll.u32 %v2880_v9, 8  ;;  %v3007_v17 = vor.u32 %v3006_v59, %v3005_v24  ;;  %vm3008_vm10 = vcmp.lt.s32.totalorder %v2989_v63, 1  ;;  %v3024_v2 = vshll.u32 %v2984_v46, 8 }
 0x3b8   : > { %v8138_v55 = vadd.s32 4294967294, %v2836_v8  ;;  %vm3011_vm13 = vcmp.lt.s32.totalorder %v2989_v63, 4  ;;  %v3016_v54 = vsel %vm3008_vm10, %v2995_v4, %v2998_v50  ;;  %v2887_v7 = vsub.s32 32, %v11163_v49 }
 0x3b9   : > { %vm8135_vm1 = vcmp.lt.s32.totalorder %v8134_v25, 0  ;;  %vm3010_vm0 = vcmp.lt.s32.totalorder %v2989_v63, 3  ;;  %v3017_v38 = vsel %vm3011_vm13, %v3004_v53, 920167782  ;;  %v3020_v22 = vsel %vm3008_vm10, %v2998_v50, %v3001_v13  ;;  %v11189_v0 = vpop.eup %8729 }
 0x3ba   : > { %15839 = vst [vmem:[#allocation21_spill] sm:$0xff] %v11189_v0  ;;  %vm3009_vm3 = vcmp.lt.s32.totalorder %v2989_v63, 2  ;;  %v3013_v48 = vsel %vm3011_vm13, %v3001_v13, 2102212464  ;;  %v3018_v9 = vsel %vm3010_vm0, %v3001_v13, %v3017_v38  ;;  %v3021_v46 = vsel %vm3011_vm13, %v3007_v17, 1326507024  ;;  %v11192_v15 = vpop.eup %8731 }
 0x3bb   : > { %15840 = vst [vmem:[#allocation31_spill] sm:$0xff] %v11192_v15  ;;  %vm8139_vm7 = vcmp.lt.s32.totalorder %v8138_v55, 0  ;;  %v2992_v57 = vshrl.u32 %v15698_v62, %v2991_v11  ;;  %v3019_v56 = vsel %vm3009_vm3, %v3016_v54, %v3018_v9  ;;  %v3022_v34 = vsel %vm3010_vm0, %v3004_v53, %v3021_v46 }
 0x3bc   : > { %v11197_v45 = vsel %vm8135_vm1, 0, %v8134_v25  ;;  %v3023_v24 = vsel %vm3009_vm3, %v3020_v22, %v3022_v34  ;;  %v11200_v59 = vshrl.u32 %v2884_v40, 5  ;;  %v2890_v8 = vshrl.u32 %v15708_v29, %v2887_v7 }
 0x3bd   : > { %v3012_v13 = vsel %vm3008_vm10, %v2992_v57, %v2995_v4  ;;  %v3014_v17 = vsel %vm3010_vm0, %v2998_v50, %v3013_v48  ;;  %v11205_v38 = vmul.u32.u64.low %v3024_v2, %v3023_v24  ;;  %v11206_v33 = vmul.u32.u64.high %v3024_v2, %v3023_v24, %v11205_v38 }
 0x3be   : > { %v11208_v11 = vsel %vm8139_vm7, 0, %v8138_v55  ;;  %v11210_v54 = vmul.u32.u64.low %v3024_v2, %v3019_v56  ;;  %v11211_v9 = vmul.u32.u64.high %v3024_v2, %v3019_v56, %v11210_v54  ;;  %v2893_v25 = vshrl.u32 %v15822_v39, %v2887_v7 }
 0x3bf   : > { %v2888_v40 = vshrl.u32 %v15698_v62, %v2887_v7  ;;  %v2889_v53 = vshll.u32 %v15698_v62, %v11163_v49  ;;  %v2892_v4 = vshll.u32 %v15708_v29, %v11163_v49  ;;  %v3083_v50 = vand.u32 2139095040, %v11159_v6 }
 0x3c0   : > { %v2736_v22 = vsub.s32 32, %v11197_v45  ;;  %v3015_v55 = vsel %vm3009_vm3, %v3012_v13, %v3014_v17  ;;  %v2895_v48 = vshll.u32 %v15822_v39, %v11163_v49  ;;  %v2896_v46 = vshrl.u32 %v15823_v16, %v2887_v7 }
 0x3c1   : > { %v2844_v57 = vsub.s32 4294967266, %v11208_v11  ;;  %vm3033_vm4 = vc.u32 %v11206_v33, %v11210_v54  ;;  %v2898_v56 = vshll.u32 %v15823_v16, %v11163_v49  ;;  %v2899_v34 = vshrl.u32 %v15709_v23, %v2887_v7 }
 0x3c2   : > { %v3034_v24 = vadd.s32 1, %v11211_v9  ;;  %v2891_v38 = vor.u32 %v2890_v8, %v2889_v53  ;;  %v2894_v63 = vor.u32 %v2893_v25, %v2892_v4  ;;  %v2897_v13 = vor.u32 %v2896_v46, %v2895_v48 }
 0x3c3   : > { %v3031_v17 = vmul.u32 %v3024_v2, %v3015_v55  ;;  %v2900_v1 = vor.u32 %v2899_v34, %v2898_v56  ;;  %v2901_v36 = vshll.u32 %v15709_v23, %v11163_v49  ;;  %v2902_v51 = vshrl.u32 %v15697_v21, %v2887_v7 }
 0x3c4   : > { %v2740_v37 = vsub.s32 4294967266, %v11197_v45  ;;  %v2840_v26 = vsub.s32 32, %v11208_v11  ;;  %v3035_v3 = vsel %vm3033_vm4, %v3034_v24, %v11211_v9  ;;  %vm2907_vm5 = vcmp.lt.s32.totalorder %v11200_v59, 4  ;;  %v2252_v24 = vpop.f32.mrf.mxu0 }
 0x3c5   : > { %v3036_v8 = vadd.s32 %v3035_v3, %v3031_v17  ;;  %v2903_v25 = vor.u32 %v2902_v51, %v2901_v36  ;;  %vm2904_vm2 = vcmp.lt.s32.totalorder %v11200_v59, 1  ;;  %v2909_v2 = vsel %vm2907_vm5, %v2897_v13, 2102212464 }
 0x3c6   : > { %v2845_v49 = vadd.s32 127, %v2844_v57  ;;  %vm2906_vm14 = vcmp.lt.s32.totalorder %v11200_v59, 3  ;;  %v2912_v7 = vsel %vm2904_vm2, %v2891_v38, %v2894_v63  ;;  %v2913_v53 = vsel %vm2907_vm5, %v2900_v1, 920167782 }
 0x3c7   : > { %v3037_v4 = vadd.s32 536870912, %v3036_v8  ;;  %vm2905_vm11 = vcmp.lt.s32.totalorder %v11200_v59, 2  ;;  %v2914_v9 = vsel %vm2906_vm14, %v2897_v13, %v2913_v53  ;;  %v2916_v55 = vsel %vm2904_vm2, %v2894_v63, %v2897_v13 }
 0x3c8   : > { %v2908_v48 = vsel %vm2904_vm2, %v2888_v40, %v2891_v38  ;;  %v2910_v3 = vsel %vm2906_vm14, %v2894_v63, %v2909_v2  ;;  %v2915_v36 = vsel %vm2905_vm11, %v2912_v7, %v2914_v9  ;;  %v2917_v51 = vsel %vm2907_vm5, %v2903_v25, 1326507024  ;;  %v11263_v63 = vpop.permute.xlu0 %2153 }
 0x3c9   : > { %v11253_v46 = vshrl.u32 %v3037_v4, 30  ;;  %v2918_v57 = vsel %vm2906_vm14, %v2900_v1, %v2917_v51  ;;  %v11256_v56 = vmul.u32.u64.low %v11183_v18, %v2915_v36  ;;  %v11257_v34 = vmul.u32.u64.high %v11183_v18, %v2915_v36, %v11256_v56 }
 0x3ca   : > { %v2741_v17 = vadd.s32 127, %v2740_v37  ;;  %v2842_v13 = vshrl.u32 %v11181_v60, %v2840_v26  ;;  %v2919_v40 = vsel %vm2905_vm11, %v2916_v55, %v2918_v57  ;;  %v3084_v38 = vshrl.u32 %v3083_v50, 23 }
 0x3cb   : > { %15841 = vst [vmem:[#allocation30_spill] sm:$0xff] %v11253_v46  ;;  %v2846_v2 = vshll.u32 %v2845_v49, 23  ;;  %v3039_v25 = vshll.u32 %v11253_v46, 30  ;;  %v11267_v1 = vmul.u32.u64.low %v11183_v18, %v2919_v40  ;;  %v11268_v7 = vmul.u32.u64.high %v11183_v18, %v2919_v40, %v11267_v1 }
 0x3cc   : > { %v2841_v53 = vshll.u32 %v11156_v19, %v11208_v11  ;;  %v2911_v37 = vsel %vm2905_vm11, %v2908_v48, %v2910_v3  ;;  %v8148_v60 = vadd.s32 4294967169, %v3084_v38  ;;  %v11275_v26 = vadd.f32 %v2252_v24, %v11263_v63 }
 0x3cd   : > { %v11278_v4 = vsub.s32 %v3036_v8, %v3039_v25  ;;  %v2930_v49 = vadd.s32 1, %v11257_v34  ;;  %v15842_v9 = vand.u32 2147483647, %v11159_v6  ;;  %v2738_v36 = vshrl.u32 %v11177_v58, %v2736_v22 }
 0x3ce   : > { %v2742_v51 = vshll.u32 %v2741_v17, 23  ;;  %v2843_v19 = vor.u32 %v2842_v13, %v2841_v53  ;;  %v3090_v11 = vadd.s32 1, %v8148_v60  ;;  %v2847_v59 = vor.u32 4788187, %v2846_v2 }
 0x3cf   : > { %v3087_v55 = vand.u32 8388607, %v15842_v9  ;;  %v3042_v48 = vsub.s32 0, %v11278_v4  ;;  %v2927_v3 = vmul.u32 %v11183_v18, %v2911_v37  ;;  %vm2929_vm10 = vc.u32 %v11268_v7, %v11256_v56 }
 0x3d0   : > { %v2737_v8 = vshll.u32 %v11104_v27, %v11197_v45  ;;  %v2931_v57 = vsel %vm2929_vm10, %v2930_v49, %v11257_v34  ;;  %vm3091_vm13 = vcmp.gt.s32.totalorder %v3090_v11, 0  ;;  %v3187_v24 = vand.u32 2139095040, %v11275_v26 }
 0x3d1   : > { %8733 = vcosq.f32 %v11150_v31  ;;  %v8145_v58 = vmin.u32 %v3042_v48, %v11278_v4  ;;  %v2932_v22 = vadd.s32 %v2931_v57, %v2927_v3  ;;  %v3092_v17 = vsel %vm3091_vm13, %v3090_v11, 0 }
 0x3d2   : > { %v11295_v18 = vor.u32 %v2738_v36, %v2737_v8  ;;  %v11297_v40 = vor.u32 4788187, %v2742_v51  ;;  %v3094_v38 = vand.u32 31, %v3092_v17  ;;  %v2848_v2 = vand.u32 2147483647, %v2847_v59 }
 0x3d3   : > { %v2850_v27 = vcvt.s32.f32 %v2843_v19  ;;  %v3044_v45 = vclz %v8145_v58  ;;  %v2933_v34 = vadd.s32 536870912, %v2932_v22  ;;  %v3088_v25 = vor.u32 8388608, %v3087_v55 }
 0x3d4   : > { %v3095_v1 = vsub.s32 32, %v3094_v38  ;;  %v3188_v37 = vshrl.u32 %v3187_v24, 23  ;;  %v3097_v9 = vshll.u32 %v15698_v62, %v3094_v38  ;;  %v3100_v36 = vshll.u32 %v15708_v29, %v3094_v38 }
 0x3d5   : > { %v8146_v60 = vadd.s32 4294967294, %v3044_v45  ;;  %v11300_v49 = vshrl.u32 %v2933_v34, 30  ;;  %v3103_v19 = vshll.u32 %v15822_v39, %v3094_v38  ;;  %v3093_v57 = vshrl.u32 %v3092_v17, 5 }
 0x3d6   : > { %v3098_v51 = vshrl.u32 %v15708_v29, %v3095_v1  ;;  %v3101_v11 = vshrl.u32 %v15822_v39, %v3095_v1  ;;  %v3104_v59 = vshrl.u32 %v15823_v16, %v3095_v1  ;;  %v3107_v48 = vshrl.u32 %v15709_v23, %v3095_v1 }
 0x3d7   : > { %15843 = vst [vmem:[#allocation10_spill] sm:$0xff] %v11300_v49  ;;  %vm8147_vm1 = vcmp.lt.s32.totalorder %v8146_v60, 0  ;;  %v2935_v55 = vshll.u32 %v11300_v49, 30  ;;  %v3110_v3 = vshrl.u32 %v15697_v21, %v3095_v1  ;;  %v3106_v24 = vshll.u32 %v15823_v16, %v3094_v38 }
 0x3d8   : > { %v11311_v8 = vsel %vm8147_vm1, 0, %v8146_v60  ;;  %v3109_v58 = vshll.u32 %v15709_v23, %v3094_v38  ;;  %v3099_v34 = vor.u32 %v3098_v51, %v3097_v9  ;;  %v3102_v50 = vor.u32 %v3101_v11, %v3100_v36 }
 0x3d9   : > { %v11315_v45 = vsub.s32 %v2932_v22, %v2935_v55  ;;  %v3105_v13 = vor.u32 %v3104_v59, %v3103_v19  ;;  %v2746_v53 = vcvt.s32.f32 %v11295_v18  ;;  %v3108_v20 = vor.u32 %v3107_v48, %v3106_v24 }
 0x3da   : > { %v3111_v0 = vor.u32 %v3110_v3, %v3109_v58  ;;  %v8152_v15 = vadd.s32 4294967169, %v3188_v37  ;;  %v2744_v43 = vand.u32 2147483647, %v11297_v40  ;;  %v2851_v35 = vmul.f32 %v2850_v27, %v2848_v2 }
 0x3db   : > { %v3052_v60 = vsub.s32 4294967266, %v11311_v8  ;;  %v2938_v17 = vsub.s32 0, %v11315_v45  ;;  %vm3112_vm0 = vcmp.lt.s32.totalorder %v3093_v57, 1  ;;  %vm3115_vm3 = vcmp.lt.s32.totalorder %v3093_v57, 4 }
 0x3dc   : > { %v3128_v38 = vshll.u32 %v3088_v25, 8  ;;  %v15844_v22 = vand.u32 2147483647, %v11275_v26  ;;  %v3096_v18 = vshrl.u32 %v15698_v62, %v3095_v1  ;;  %v3117_v51 = vsel %vm3115_vm3, %v3105_v13, 2102212464 }
 0x3dd   : > { %v8141_v36 = vmin.u32 %v2938_v17, %v11315_v45  ;;  %v3120_v37 = vsel %vm3112_vm0, %v3099_v34, %v3102_v50  ;;  %v3121_v40 = vsel %vm3115_vm3, %v3108_v20, 920167782  ;;  %v3124_v2 = vsel %vm3112_vm0, %v3102_v50, %v3105_v13 }
 0x3de   : > { %v3191_v9 = vand.u32 8388607, %v15844_v22  ;;  %v11326_v11 = vpop.eup %8733  ;;  %v3125_v27 = vsel %vm3115_vm3, %v3111_v0, 1326507024  ;;  %v3194_v19 = vadd.s32 1, %v8152_v15  ;;  %vm15529_vm7 = vcmp.lt.s32.totalorder %v10830_v41, 0  ;;  %v2341_v0 = vpop.f32.mrf.mxu1 }
 0x3df   : > { %15845 = vst [vmem:[#allocation41_spill] sm:$0xff] %v11326_v11  ;;  %v3048_v25 = vsub.s32 32, %v11311_v8  ;;  %v3053_v59 = vadd.s32 127, %v3052_v60  ;;  %vm3113_vm4 = vcmp.lt.s32.totalorder %v3093_v57, 2  ;;  %vm3114_vm5 = vcmp.lt.s32.totalorder %v3093_v57, 3 }
 0x3e0   : > { %v3116_v55 = vsel %vm3112_vm0, %v3096_v18, %v3099_v34  ;;  %v3122_v1 = vsel %vm3114_vm5, %v3105_v13, %v3121_v40  ;;  %v3126_v48 = vsel %vm3114_vm5, %v3108_v20, %v3125_v27  ;;  %vm3195_vm2 = vcmp.gt.s32.totalorder %v3194_v19, 0 }
 0x3e1   : > { %v2940_v3 = vclz %v8141_v36  ;;  %v3118_v24 = vsel %vm3114_vm5, %v3102_v50, %v3117_v51  ;;  %v3123_v58 = vsel %vm3113_vm4, %v3120_v37, %v3122_v1  ;;  %v3127_v17 = vsel %vm3113_vm4, %v3124_v2, %v3126_v48 }
 0x3e2   : > { %v11334_v15 = vmul.u32.u64.low %v3128_v38, %v3127_v17  ;;  %v11335_v22 = vmul.u32.u64.high %v3128_v38, %v3127_v17, %v11334_v15  ;;  %v11337_v11 = vmul.u32.u64.low %v3128_v38, %v3123_v58  ;;  %v11338_v14 = vmul.u32.u64.high %v3128_v38, %v3123_v58, %v11337_v11 }
 0x3e3   : > { %v15846_v60 = vand.u32 2147483647, %v11154_v5  ;;  %v15847_v13 = vcvt.s32.f32 %v11152_v52  ;;  %v11347_v34 = vmul.f32 %v2746_v53, %v2744_v43  ;;  %v3032_v50 = vadd.s32 %v11210_v54, %v11206_v33  ;;  %v2254_v53 = vpop.f32.mrf.mxu0 }
 0x3e4   : > { %v3196_v36 = vsel %vm3195_vm2, %v3194_v19, 0  ;;  %v2852_v18 = vxor.u32 2147483648, %v2851_v35  ;;  %v3119_v51 = vsel %vm3113_vm4, %v3116_v55, %v3118_v24  ;;  %v11353_v40 = vadd.f32 %v2341_v0, %v11263_v63 }
 0x3e5   : > { %v11345_v20 = vmul.f32 %v15847_v13, %v15846_v60  ;;  %v3198_v37 = vand.u32 31, %v3196_v36  ;;  %8735 = vsinq.f32 %v11150_v31  ;;  %v3050_v5 = vshrl.u32 %v3032_v50, %v3048_v25 }
 0x3e6   : > { %v3054_v2 = vshll.u32 %v3053_v59, 23  ;;  %v3192_v52 = vor.u32 8388608, %v3191_v9  ;;  %v8142_v27 = vadd.s32 4294967294, %v2940_v3  ;;  %vm3137_vm14 = vc.u32 %v11335_v22, %v11337_v11 }
 0x3e7   : > { %v3138_v43 = vadd.s32 1, %v11338_v14  ;;  %v3199_v33 = vsub.s32 32, %v3198_v37  ;;  %v2540_v54 = vxor.u32 2147483648, %v11345_v20  ;;  %v3049_v57 = vshll.u32 %v11278_v4, %v11311_v8 }
 0x3e8   : > { %v3135_v19 = vmul.u32 %v3128_v38, %v3119_v51  ;;  %v11365_v31 = vsel %vm15529_vm7, %v2852_v18, %v2851_v35  ;;  %v15491_v59 = vand.u32 2147483647, %v11353_v40  ;;  %v3201_v48 = vshll.u32 %v15698_v62, %v3198_v37 }
 0x3e9   : > { %v3139_v9 = vsel %vm3137_vm14, %v3138_v43, %v11338_v14  ;;  %v3202_v25 = vshrl.u32 %v15708_v29, %v3199_v33  ;;  %v3051_v55 = vor.u32 %v3050_v5, %v3049_v57  ;;  %v11371_v3 = vshll.u32 %v3192_v52, 8 }
 0x3ea   : > { %v3140_v1 = vadd.s32 %v3139_v9, %v3135_v19  ;;  %v3055_v24 = vor.u32 4788187, %v3054_v2  ;;  %vm8143_vm11 = vcmp.lt.s32.totalorder %v8142_v27, 0  ;;  %v3204_v4 = vshll.u32 %v15708_v29, %v3198_v37 }
 0x3eb   : > { %v3205_v8 = vshrl.u32 %v15822_v39, %v3199_v33  ;;  %v3197_v38 = vshrl.u32 %v3196_v36, 5  ;;  %v3203_v58 = vor.u32 %v3202_v25, %v3201_v48  ;;  %v3207_v14 = vshll.u32 %v15822_v39, %v3198_v37 }
 0x3ec   : > { %v3141_v35 = vadd.s32 536870912, %v3140_v1  ;;  %v3208_v0 = vshrl.u32 %v15823_v16, %v3199_v33  ;;  %v3210_v15 = vshll.u32 %v15823_v16, %v3198_v37  ;;  %v3211_v60 = vshrl.u32 %v15709_v23, %v3199_v33 }
 0x3ed   : > { %v3206_v17 = vor.u32 %v3205_v8, %v3204_v4  ;;  %vm15511_vm10 = vcmp.lt.s32.totalorder %v10818_v10, 0  ;;  %v3058_v13 = vcvt.s32.f32 %v3051_v55  ;;  %v3213_v18 = vshll.u32 %v15709_v23, %v3198_v37 }
 0x3ee   : > { %v11380_v50 = vshrl.u32 %v3141_v35, 30  ;;  %v3214_v51 = vshrl.u32 %v15697_v21, %v3199_v33  ;;  %v3056_v36 = vand.u32 2147483647, %v3055_v24  ;;  %v3209_v5 = vor.u32 %v3208_v0, %v3207_v14 }
 0x3ef   : > { %v3212_v2 = vor.u32 %v3211_v60, %v3210_v15  ;;  %v3395_v52 = vand.u32 2139095040, %v11353_v40  ;;  %vm15510_vm13 = vcmp.lt.s32.totalorder %v10956_v44, 0  ;;  %v15849_v43 = vand.u32 2147483647, %v10830_v41 }
 0x3f0   : > { %15848 = vst [vmem:[#allocation40_spill] sm:$0xff] %v11380_v50  ;;  %v15850_v57 = vmov 0  ;;  %v11393_v19 = vsel %vm8143_vm11, 0, %v8142_v27  ;;  %v3143_v37 = vshll.u32 %v11380_v50, 30  ;;  %v3215_v9 = vor.u32 %v3214_v51, %v3213_v18 }
 0x3f1   : > { %vm11388_vm1 = vcmp.le.f32.partialorder %v15849_v43, 0.7853982  ;;  %vm3216_vm0 = vcmp.lt.s32.totalorder %v3197_v38, 1  ;;  %v3200_v25 = vshrl.u32 %v15698_v62, %v3199_v33  ;;  %vm3217_vm3 = vcmp.lt.s32.totalorder %v3197_v38, 2 }
 0x3f2   : > { %v15851_v57 = vsel %vm11388_vm1, 4294967295, %v15850_v57  ;;  %vm3219_vm4 = vcmp.lt.s32.totalorder %v3197_v38, 4  ;;  %v3224_v55 = vsel %vm3216_vm0, %v3203_v58, %v3206_v17  ;;  %v11398_v48 = vsub.s32 %v3140_v1, %v3143_v37  ;;  %v11400_v8 = vpop.eup %8735 }
 0x3f3   : > { %15852 = vst [vmem:[#allocation18_spill] sm:$0xff] %v15851_v57  ;;  %vm3218_vm5 = vcmp.lt.s32.totalorder %v3197_v38, 3  ;;  %v3221_v24 = vsel %vm3219_vm4, %v3209_v5, 2102212464  ;;  %v3225_v4 = vsel %vm3219_vm4, %v3212_v2, 920167782  ;;  %v3228_v27 = vsel %vm3216_vm0, %v3206_v17, %v3209_v5 }
 0x3f4   : > { %15853 = vst [vmem:[#allocation17_spill] sm:$0xff] %v11400_v8  ;;  %v3226_v35 = vsel %vm3218_vm5, %v3209_v5, %v3225_v4  ;;  %v3229_v14 = vsel %vm3219_vm4, %v3215_v9, 1326507024  ;;  %v3396_v0 = vshrl.u32 %v3395_v52, 23  ;;  %v3059_v15 = vmul.f32 %v3058_v13, %v3056_v36 }
 0x3f5   : > { %v3146_v60 = vsub.s32 0, %v11398_v48  ;;  %v3220_v33 = vsel %vm3216_vm0, %v3200_v25, %v3203_v58  ;;  %v3227_v18 = vsel %vm3217_vm3, %v3224_v55, %v3226_v35  ;;  %v3222_v51 = vsel %vm3218_vm5, %v3206_v17, %v3221_v24 }
 0x3f6   : > { %v3230_v1 = vsel %vm3218_vm5, %v3212_v2, %v3229_v14  ;;  %v11407_v43 = vmul.u32.u64.low %v11371_v3, %v3227_v18  ;;  %v11408_v37 = vmul.u32.u64.high %v11371_v3, %v3227_v18, %v11407_v43  ;;  %v2948_v4 = vsub.s32 4294967266, %v11393_v19 }
 0x3f7   : > { %v8149_v5 = vmin.u32 %v3146_v60, %v11398_v48  ;;  %v3231_v13 = vsel %vm3217_vm3, %v3228_v27, %v3230_v1  ;;  %v8160_v36 = vadd.s32 4294967169, %v3396_v0  ;;  %v11419_v58 = vsel %vm15511_vm10, %v2540_v54, %v11345_v20 }
 0x3f8   : > { %15854 = vst [vmem:[#allocation8_spill] sm:$0xff] %v11419_v58  ;;  %v11422_v17 = vmul.u32.u64.low %v11371_v3, %v3231_v13  ;;  %v11423_v2 = vmul.u32.u64.high %v11371_v3, %v3231_v13, %v11422_v17  ;;  %v3399_v52 = vand.u32 8388607, %v15491_v59  ;;  %vm15528_vm2 = vcmp.lt.s32.totalorder %v11006_v30, 0 }
 0x3f9   : > { %v3223_v9 = vsel %vm3217_vm3, %v3220_v33, %v3222_v51  ;;  %v3402_v25 = vadd.s32 1, %v8160_v36  ;;  %v11430_v55 = vadd.f32 %v2254_v53, %v11263_v63  ;;  %v15855_v24 = vxor.u32 2147483648, %v11347_v34 }
 0x3fa   : > { %v2856_v54 = vsel %vm11388_vm1, %v10830_v41, %v11365_v31  ;;  %v3060_v35 = vxor.u32 2147483648, %v3059_v15  ;;  %v3242_v38 = vadd.s32 1, %v11408_v37  ;;  %v2944_v27 = vsub.s32 32, %v11393_v19 }
 0x3fb   : > { %v11437_v20 = vsel %vm15510_vm13, %v15855_v24, %v11347_v34  ;;  %v11445_v14 = vadd.s32 127, %v2948_v4  ;;  %v3148_v53 = vclz %v8149_v5  ;;  %vm3403_vm14 = vcmp.gt.s32.totalorder %v3402_v25, 0 }
 0x3fc   : > { %15856 = vst [vmem:[#allocation38_spill] sm:$0xff] %v11437_v20  ;;  %v3239_v0 = vmul.u32 %v11371_v3, %v3223_v9  ;;  %vm3241_vm11 = vc.u32 %v11423_v2, %v11407_v43  ;;  %v3400_v34 = vor.u32 8388608, %v3399_v52  ;;  %v3404_v60 = vsel %vm3403_vm14, %v3402_v25, 0 }
 0x3fd   : > { %8737 = vcosq.f32 %v2856_v54  ;;  %v3243_v33 = vsel %vm3241_vm11, %v3242_v38, %v11408_v37  ;;  %v3406_v31 = vand.u32 31, %v3404_v60  ;;  %v3291_v18 = vand.u32 2139095040, %v11430_v55 }
 0x3fe   : > { %8739 = vsinq.f32 %v2856_v54  ;;  %v2928_v51 = vadd.s32 %v11256_v56, %v11268_v7  ;;  %v3244_v4 = vadd.s32 %v3243_v33, %v3239_v0  ;;  %v3061_v3 = vsel %vm15528_vm2, %v3060_v35, %v3059_v15 }
 0x3ff   : > { %v11460_v5 = vadd.s32 %v11337_v11, %v11335_v22  ;;  %v8150_v13 = vadd.s32 4294967294, %v3148_v53  ;;  %v3407_v37 = vsub.s32 32, %v3406_v31  ;;  %v2950_v17 = vshll.u32 %v11445_v14, 23 }
 0x400   : > { %v2946_v36 = vshrl.u32 %v2928_v51, %v2944_v27  ;;  %v3245_v52 = vadd.s32 536870912, %v3244_v4  ;;  %v11463_v9 = vshll.u32 %v3400_v34, 8  ;;  %v3409_v56 = vshll.u32 %v15698_v62, %v3406_v31 }
 0x401   : > { %v3410_v7 = vshrl.u32 %v15708_v29, %v3407_v37  ;;  %v3412_v25 = vshll.u32 %v15708_v29, %v3406_v31  ;;  %v3292_v24 = vshrl.u32 %v3291_v18, 23  ;;  %v3413_v11 = vshrl.u32 %v15822_v39, %v3407_v37 }
 0x402   : > { %v11468_v15 = vshrl.u32 %v3245_v52, 30  ;;  %v3415_v22 = vshll.u32 %v15822_v39, %v3406_v31  ;;  %v3416_v54 = vshrl.u32 %v15823_v16, %v3407_v37  ;;  %vm8151_vm0 = vcmp.lt.s32.totalorder %v8150_v13, 0 }
 0x403   : > { %v3405_v35 = vshrl.u32 %v3404_v60, 5  ;;  %v3418_v38 = vshll.u32 %v15823_v16, %v3406_v31  ;;  %v3419_v27 = vshrl.u32 %v15709_v23, %v3407_v37  ;;  %v15857_v14 = vand.u32 2147483647, %v11006_v30 }
 0x404   : > { %v15858_v53 = vmov 0  ;;  %v3247_v0 = vshll.u32 %v11468_v15, 30  ;;  %v3411_v34 = vor.u32 %v3410_v7, %v3409_v56  ;;  %v3414_v33 = vor.u32 %v3413_v11, %v3412_v25 }
 0x405   : > { %vm11477_vm3 = vcmp.le.f32.partialorder %v15857_v14, 0.7853982  ;;  %v3417_v18 = vor.u32 %v3416_v54, %v3415_v22  ;;  %v3420_v51 = vor.u32 %v3419_v27, %v3418_v38  ;;  %v3421_v52 = vshll.u32 %v15709_v23, %v3406_v31 }
 0x406   : > { %v15859_v53 = vsel %vm11477_vm3, 4294967295, %v15858_v53  ;;  %v3422_v60 = vshrl.u32 %v15697_v21, %v3407_v37  ;;  %v11485_v1 = vsel %vm8151_vm0, 0, %v8150_v13  ;;  %v11487_v8 = vsub.s32 %v3244_v4, %v3247_v0  ;;  %v2343_v4 = vpop.f32.mrf.mxu1 }
 0x407   : > { %15860 = vst [vmem:[#allocation36_spill] sm:$0xff] %v15859_v53  ;;  %v3408_v14 = vshrl.u32 %v15698_v62, %v3407_v37  ;;  %v8156_v28 = vadd.s32 4294967169, %v3292_v24  ;;  %vm3424_vm4 = vcmp.lt.s32.totalorder %v3405_v35, 1  ;;  %vm3426_vm5 = vcmp.lt.s32.totalorder %v3405_v35, 3 }
 0x408   : > { %v3423_v20 = vor.u32 %v3422_v60, %v3421_v52  ;;  %vm3427_vm14 = vcmp.lt.s32.totalorder %v3405_v35, 4  ;;  %v3250_v56 = vsub.s32 0, %v11487_v8  ;;  %v3432_v25 = vsel %vm3424_vm4, %v3411_v34, %v3414_v33 }
 0x409   : > { %v3429_v7 = vsel %vm3427_vm14, %v3417_v18, 2102212464  ;;  %v3433_v31 = vsel %vm3427_vm14, %v3420_v51, 920167782  ;;  %v3156_v11 = vsub.s32 4294967266, %v11485_v1  ;;  %vm3425_vm11 = vcmp.lt.s32.totalorder %v3405_v35, 2 }
 0x40a   : > { %v3434_v13 = vsel %vm3426_vm5, %v3417_v18, %v3433_v31  ;;  %v3436_v22 = vsel %vm3424_vm4, %v3414_v33, %v3417_v18  ;;  %v11493_v54 = vpop.eup %8737  ;;  %v8153_v37 = vmin.u32 %v3250_v56, %v11487_v8  ;;  %v3428_v24 = vsel %vm3424_vm4, %v3408_v14, %v3411_v34 }
 0x40b   : > { %15861 = vst [vmem:[#allocation33_spill] sm:$0xff] %v11493_v54  ;;  %v3435_v38 = vsel %vm3425_vm11, %v3432_v25, %v3434_v13  ;;  %v3437_v27 = vsel %vm3427_vm14, %v3423_v20, 1326507024  ;;  %v11497_v0 = vpop.eup %8739  ;;  %v3430_v52 = vsel %vm3426_vm5, %v3414_v33, %v3429_v7  ;;  %v15863_v56 = vand.u32 2147483647, %v11430_v55 }
 0x40c   : > { %15862 = vst [vmem:[#allocation32_spill] sm:$0xff] %v11497_v0  ;;  %v3438_v60 = vsel %vm3426_vm5, %v3420_v51, %v3437_v27  ;;  %v11502_v59 = vmul.u32.u64.low %v11463_v9, %v3435_v38  ;;  %v11503_v12 = vmul.u32.u64.high %v11463_v9, %v3435_v38, %v11502_v59  ;;  %v3252_v18 = vclz %v8153_v37  ;;  %v2258_v27 = vpop.f32.mrf.mxu0 }
 0x40d   : > { %v3439_v31 = vsel %vm3425_vm11, %v3436_v22, %v3438_v60  ;;  %v3295_v34 = vand.u32 8388607, %v15863_v56  ;;  %v11510_v14 = vadd.f32 %v2343_v4, %v11263_v63  ;;  %v11515_v20 = vsel %vm11477_vm3, %v11006_v30, %v3061_v3 }
 0x40e   : > { %v11518_v33 = vmul.u32.u64.low %v11463_v9, %v3439_v31  ;;  %v11519_v51 = vmul.u32.u64.high %v11463_v9, %v3439_v31, %v11518_v33  ;;  %v3298_v7 = vadd.s32 1, %v8156_v28  ;;  %v15864_v25 = vshll.u32 %v11315_v45, %v11393_v19 }
 0x40f   : > { %v11526_v22 = vor.u32 4788187, %v2950_v17  ;;  %v8154_v37 = vadd.s32 4294967294, %v3252_v18  ;;  %v3431_v63 = vsel %vm3425_vm11, %v3428_v24, %v3430_v52  ;;  %v3152_v4 = vsub.s32 32, %v11485_v1 }
 0x410   : > { %v11524_v13 = vor.u32 %v2946_v36, %v15864_v25  ;;  %v11530_v38 = vadd.s32 127, %v3156_v11  ;;  %v3450_v3 = vadd.s32 1, %v11503_v12  ;;  %vm3299_vm0 = vcmp.gt.s32.totalorder %v3298_v7, 0 }
 0x411   : > { %vm8155_vm4 = vcmp.lt.s32.totalorder %v8154_v37, 0  ;;  %v3296_v28 = vor.u32 8388608, %v3295_v34  ;;  %v3300_v60 = vsel %vm3299_vm0, %v3298_v7, 0  ;;  %v3499_v45 = vand.u32 2139095040, %v11510_v14 }
 0x412   : > { %v11534_v19 = vsel %vm8155_vm4, 0, %v8154_v37  ;;  %v3447_v36 = vmul.u32 %v11463_v9, %v3431_v63  ;;  %vm3449_vm5 = vc.u32 %v11519_v51, %v11502_v59  ;;  %v11539_v17 = vshrl.u32 %v3300_v60, 5 }
 0x413   : > { %v3260_v11 = vsub.s32 4294967266, %v11534_v19  ;;  %v3451_v24 = vsel %vm3449_vm5, %v3450_v3, %v11503_v12  ;;  %v11545_v52 = vadd.f32 %v2258_v27, %v11240_v61  ;;  %v3240_v18 = vadd.s32 %v11407_v43, %v11423_v2 }
 0x414   : > { %v3452_v31 = vadd.s32 %v3451_v24, %v3447_v36  ;;  %v3302_v56 = vand.u32 31, %v3300_v60  ;;  %v11551_v34 = vshrl.u32 %v11460_v5, %v3152_v4  ;;  %v3158_v33 = vshll.u32 %v11530_v38, 23 }
 0x415   : > { %v11554_v7 = vshll.u32 %v3296_v28, 8  ;;  %v3500_v25 = vshrl.u32 %v3499_v45, 23  ;;  %v3256_v12 = vsub.s32 32, %v11534_v19  ;;  %vm3320_vm14 = vcmp.lt.s32.totalorder %v11539_v17, 1 }
 0x416   : > { %v3453_v37 = vadd.s32 536870912, %v3452_v31  ;;  %v3303_v63 = vsub.s32 32, %v3302_v56  ;;  %v3261_v3 = vadd.s32 127, %v3260_v11  ;;  %v3305_v43 = vshll.u32 %v15698_v62, %v3302_v56 }
 0x417   : > { %vm3321_vm11 = vcmp.lt.s32.totalorder %v11539_v17, 2  ;;  %vm3322_vm0 = vcmp.lt.s32.totalorder %v11539_v17, 3  ;;  %v3308_v4 = vshll.u32 %v15708_v29, %v3302_v56  ;;  %v3311_v27 = vshll.u32 %v15822_v39, %v3302_v56 }
 0x418   : > { %v11561_v2 = vshrl.u32 %v3453_v37, 30  ;;  %v3306_v5 = vshrl.u32 %v15708_v29, %v3303_v63  ;;  %v3309_v38 = vshrl.u32 %v15822_v39, %v3303_v63  ;;  %v3312_v28 = vshrl.u32 %v15823_v16, %v3303_v63 }
 0x419   : > { %v3314_v60 = vshll.u32 %v15823_v16, %v3302_v56  ;;  %v3315_v45 = vshrl.u32 %v15709_v23, %v3303_v63  ;;  %vm3323_vm4 = vcmp.lt.s32.totalorder %v11539_v17, 4  ;;  %v3317_v9 = vshll.u32 %v15709_v23, %v3302_v56 }
 0x41a   : > { %v3455_v36 = vshll.u32 %v11561_v2, 30  ;;  %v3307_v11 = vor.u32 %v3306_v5, %v3305_v43  ;;  %v3310_v24 = vor.u32 %v3309_v38, %v3308_v4  ;;  %v3313_v37 = vor.u32 %v3312_v28, %v3311_v27 }
 0x41b   : > { %v3316_v35 = vor.u32 %v3315_v45, %v3314_v60  ;;  %v3318_v44 = vshrl.u32 %v15697_v21, %v3303_v63  ;;  %v3262_v58 = vshll.u32 %v3261_v3, 23  ;;  %v3304_v53 = vshrl.u32 %v15698_v62, %v3303_v63 }
 0x41c   : > { %v11574_v42 = vsub.s32 %v3452_v31, %v3455_v36  ;;  %v3328_v10 = vsel %vm3320_vm14, %v3307_v11, %v3310_v24  ;;  %v3325_v43 = vsel %vm3323_vm4, %v3313_v37, 2102212464  ;;  %v8164_v4 = vadd.s32 4294967169, %v3500_v25 }
 0x41d   : > { %v3319_v30 = vor.u32 %v3318_v44, %v3317_v9  ;;  %v3329_v5 = vsel %vm3323_vm4, %v3316_v35, 920167782  ;;  %v3258_v38 = vshrl.u32 %v3240_v18, %v3256_v12  ;;  %v3332_v63 = vsel %vm3320_vm14, %v3310_v24, %v3313_v37 }
 0x41e   : > { %v3458_v56 = vsub.s32 0, %v11574_v42  ;;  %v3330_v31 = vsel %vm3322_vm0, %v3313_v37, %v3329_v5  ;;  %v3324_v3 = vsel %vm3320_vm14, %v3304_v53, %v3307_v11  ;;  %v3326_v44 = vsel %vm3322_vm0, %v3310_v24, %v3325_v43 }
 0x41f   : > { %v3331_v9 = vsel %vm3321_vm11, %v3328_v10, %v3330_v31  ;;  %v3333_v18 = vsel %vm3323_vm4, %v3319_v30, 1326507024  ;;  %v3257_v53 = vshll.u32 %v11487_v8, %v11534_v19  ;;  %v3263_v60 = vor.u32 4788187, %v3262_v58 }
 0x420   : > { %v8161_v25 = vmin.u32 %v3458_v56, %v11574_v42  ;;  %v3334_v12 = vsel %vm3322_vm0, %v3316_v35, %v3333_v18  ;;  %v11600_v27 = vmul.u32.u64.low %v11554_v7, %v3331_v9  ;;  %v11601_v28 = vmul.u32.u64.high %v11554_v7, %v3331_v9, %v11600_v27 }
 0x421   : > { %v3335_v10 = vsel %vm3321_vm11, %v3332_v63, %v3334_v12  ;;  %v3506_v45 = vadd.s32 1, %v8164_v4  ;;  %v11608_v36 = vor.u32 4788187, %v3158_v33  ;;  %v3153_v35 = vshll.u32 %v11398_v48, %v11485_v1 }
 0x422   : > { %v3460_v30 = vclz %v8161_v25  ;;  %v11611_v11 = vmul.u32.u64.low %v11554_v7, %v3335_v10  ;;  %v11612_v24 = vmul.u32.u64.high %v11554_v7, %v3335_v10, %v11611_v11  ;;  %v3259_v37 = vor.u32 %v3258_v38, %v3257_v53 }
 0x423   : > { %v3327_v43 = vsel %vm3321_vm11, %v3324_v3, %v3326_v44  ;;  %vm3507_vm5 = vcmp.gt.s32.totalorder %v3506_v45, 0  ;;  %v3346_v58 = vadd.s32 1, %v11601_v28  ;;  %v15865_v19 = vand.u32 2147483647, %v11510_v14 }
 0x424   : > { %v8162_v8 = vadd.s32 4294967294, %v3460_v30  ;;  %v3508_v5 = vsel %vm3507_vm5, %v3506_v45, 0  ;;  %v2952_v4 = vand.u32 2147483647, %v11526_v22  ;;  %v11623_v56 = vor.u32 %v11551_v34, %v3153_v35 }
 0x425   : > { %v3503_v33 = vand.u32 8388607, %v15865_v19  ;;  %v3264_v31 = vand.u32 2147483647, %v3263_v60  ;;  %v3510_v63 = vand.u32 31, %v3508_v5  ;;  %v3343_v1 = vmul.u32 %v11554_v7, %v3327_v43 }
 0x426   : > { %vm8163_vm14 = vcmp.lt.s32.totalorder %v8162_v8, 0  ;;  %vm3345_vm11 = vc.u32 %v11612_v24, %v11600_v27  ;;  %v3266_v17 = vcvt.s32.f32 %v3259_v37  ;;  %v3448_v7 = vadd.s32 %v11502_v59, %v11519_v51 }
 0x427   : > { %v11629_v38 = vsel %vm8163_vm14, 0, %v8162_v8  ;;  %v3347_v3 = vsel %vm3345_vm11, %v3346_v58, %v11601_v28  ;;  %v3511_v44 = vsub.s32 32, %v3510_v63  ;;  %v3504_v18 = vor.u32 8388608, %v3503_v33 }
 0x428   : > { %v3468_v9 = vsub.s32 4294967266, %v11629_v38  ;;  %v3348_v34 = vadd.s32 %v3347_v3, %v3343_v1  ;;  %v11634_v12 = vmul.f32 %v3266_v17, %v3264_v31  ;;  %v3464_v10 = vsub.s32 32, %v11629_v38 }
 0x429   : > { %v3514_v53 = vshrl.u32 %v15708_v29, %v3511_v44  ;;  %v3517_v60 = vshrl.u32 %v15822_v39, %v3511_v44  ;;  %v3509_v28 = vshrl.u32 %v3508_v5, 5  ;;  %v3513_v30 = vshll.u32 %v15698_v62, %v3510_v63 }
 0x42a   : > { %v3349_v45 = vadd.s32 536870912, %v3348_v34  ;;  %v3469_v11 = vadd.s32 127, %v3468_v9  ;;  %v3516_v35 = vshll.u32 %v15708_v29, %v3510_v63  ;;  %v3519_v37 = vshll.u32 %v15822_v39, %v3510_v63 }
 0x42b   : > { %v3520_v43 = vshrl.u32 %v15823_v16, %v3511_v44  ;;  %v3515_v59 = vor.u32 %v3514_v53, %v3513_v30  ;;  %v3522_v51 = vshll.u32 %v15823_v16, %v3510_v63  ;;  %v3523_v58 = vshrl.u32 %v15709_v23, %v3511_v44 }
 0x42c   : > { %v11645_v8 = vshrl.u32 %v3349_v45, 30  ;;  %v3518_v19 = vor.u32 %v3517_v60, %v3516_v35  ;;  %v3525_v5 = vshll.u32 %v15709_v23, %v3510_v63  ;;  %v3526_v31 = vshrl.u32 %v15697_v21, %v3511_v44 }
 0x42d   : > { %v3521_v33 = vor.u32 %v3520_v43, %v3519_v37  ;;  %v3524_v17 = vor.u32 %v3523_v58, %v3522_v51  ;;  %v3544_v3 = vshll.u32 %v3504_v18, 8  ;;  %v3603_v9 = vand.u32 2139095040, %v11545_v52 }
 0x42e   : > { %v3351_v1 = vshll.u32 %v11645_v8, 30  ;;  %v3465_v45 = vshll.u32 %v11574_v42, %v11629_v38  ;;  %v3470_v53 = vshll.u32 %v3469_v11, 23  ;;  %v3512_v30 = vshrl.u32 %v15698_v62, %v3511_v44 }
 0x42f   : > { %v3527_v25 = vor.u32 %v3526_v31, %v3525_v5  ;;  %v3466_v48 = vshrl.u32 %v3448_v7, %v3464_v10  ;;  %vm3528_vm0 = vcmp.lt.s32.totalorder %v3509_v28, 1  ;;  %vm3531_vm4 = vcmp.lt.s32.totalorder %v3509_v28, 4 }
 0x430   : > { %v11656_v60 = vsub.s32 %v3348_v34, %v3351_v1  ;;  %vm3530_vm5 = vcmp.lt.s32.totalorder %v3509_v28, 3  ;;  %v3533_v63 = vsel %vm3531_vm4, %v3521_v33, 2102212464  ;;  %v3536_v35 = vsel %vm3528_vm0, %v3515_v59, %v3518_v19 }
 0x431   : > { %v3537_v37 = vsel %vm3531_vm4, %v3524_v17, 920167782  ;;  %vm3529_vm14 = vcmp.lt.s32.totalorder %v3509_v28, 2  ;;  %v3540_v42 = vsel %vm3528_vm0, %v3518_v19, %v3521_v33  ;;  %vm3186_vm11 = vcmp.lt.s32.totalorder %v11275_v26, 0 }
 0x432   : > { %v3354_v18 = vsub.s32 0, %v11656_v60  ;;  %v3538_v43 = vsel %vm3530_vm5, %v3521_v33, %v3537_v37  ;;  %v3471_v38 = vor.u32 4788187, %v3470_v53  ;;  %v3541_v34 = vsel %vm3531_vm4, %v3527_v25, 1326507024 }
 0x433   : > { %v3539_v44 = vsel %vm3529_vm14, %v3536_v35, %v3538_v43  ;;  %v3604_v7 = vshrl.u32 %v3603_v9, 23  ;;  %v3532_v11 = vsel %vm3528_vm0, %v3512_v30, %v3515_v59  ;;  %v3534_v51 = vsel %vm3530_vm5, %v3518_v19, %v3533_v63 }
 0x434   : > { %v8157_v10 = vmin.u32 %v3354_v18, %v11656_v60  ;;  %v3542_v58 = vsel %vm3530_vm5, %v3524_v17, %v3541_v34  ;;  %v11669_v31 = vmul.u32.u64.low %v3544_v3, %v3539_v44  ;;  %v11670_v1 = vmul.u32.u64.high %v3544_v3, %v3539_v44, %v11669_v31 }
 0x435   : > { %v3543_v5 = vsel %vm3529_vm14, %v3540_v42, %v3542_v58  ;;  %v8168_v33 = vadd.s32 4294967169, %v3604_v7  ;;  %v3162_v53 = vcvt.s32.f32 %v11623_v56  ;;  %8741 = vcosq.f32 %v11515_v20 }
 0x436   : > { %v3356_v35 = vclz %v8157_v10  ;;  %v11674_v25 = vmul.u32.u64.low %v3544_v3, %v3543_v5  ;;  %v11675_v9 = vmul.u32.u64.high %v3544_v3, %v3543_v5, %v11674_v25  ;;  %v3467_v59 = vor.u32 %v3466_v48, %v3465_v45  ;;  %v2347_v45 = vpop.f32.mrf.mxu1 }
 0x437   : > { %v3535_v19 = vsel %vm3529_vm14, %v3532_v11, %v3534_v51  ;;  %v3610_v30 = vadd.s32 1, %v8168_v33  ;;  %v15866_v17 = vcvt.s32.f32 %v11524_v13  ;;  %v15867_v37 = vand.u32 2147483647, %v11608_v36 }
 0x438   : > { %v3268_v56 = vxor.u32 2147483648, %v11634_v12  ;;  %v8158_v43 = vadd.s32 4294967294, %v3356_v35  ;;  %v3472_v42 = vand.u32 2147483647, %v3471_v38  ;;  %v3554_v44 = vadd.s32 1, %v11670_v1 }
 0x439   : > { %v11683_v63 = vmul.f32 %v15866_v17, %v2952_v4  ;;  %v11687_v18 = vmul.f32 %v3162_v53, %v15867_v37  ;;  %v15868_v48 = vand.u32 2147483647, %v11545_v52  ;;  %vm3611_vm0 = vcmp.gt.s32.totalorder %v3610_v30, 0 }
 0x43a   : > { %vm8159_vm4 = vcmp.lt.s32.totalorder %v8158_v43, 0  ;;  %v3551_v22 = vmul.u32 %v3544_v3, %v3535_v19  ;;  %vm3553_vm5 = vc.u32 %v11675_v9, %v11669_v31  ;;  %v3612_v13 = vsel %vm3611_vm0, %v3610_v30, 0 }
 0x43b   : > { %v3607_v28 = vand.u32 8388607, %v15868_v48  ;;  %v3474_v36 = vcvt.s32.f32 %v3467_v59  ;;  %v11695_v4 = vsel %vm8159_vm4, 0, %v8158_v43  ;;  %v3555_v34 = vsel %vm3553_vm5, %v3554_v44, %v11670_v1 }
 0x43c   : > { %v3614_v7 = vand.u32 31, %v3612_v13  ;;  %v11701_v38 = vsel %vm3186_vm11, %v3268_v56, %v11634_v12  ;;  %v3344_v10 = vadd.s32 %v11600_v27, %v11612_v24  ;;  %v3556_v11 = vadd.s32 %v3555_v34, %v3551_v22 }
 0x43d   : > { %v11706_v3 = vadd.f32 %v2347_v45, %v11240_v61  ;;  %v11708_v51 = vmul.f32 %v3474_v36, %v3472_v42  ;;  %v3360_v58 = vsub.s32 32, %v11695_v4  ;;  %v3608_v5 = vor.u32 8388608, %v3607_v28 }
 0x43e   : > { %v3615_v33 = vsub.s32 32, %v3614_v7  ;;  %v3364_v1 = vsub.s32 4294967266, %v11695_v4  ;;  %v3557_v53 = vadd.s32 536870912, %v3556_v11  ;;  %v3617_v35 = vshll.u32 %v15698_v62, %v3614_v7 }
 0x43f   : > { %v3620_v12 = vshll.u32 %v15708_v29, %v3614_v7  ;;  %v3623_v24 = vshll.u32 %v15822_v39, %v3614_v7  ;;  %v3613_v30 = vshrl.u32 %v3612_v13, 5  ;;  %v3626_v17 = vshll.u32 %v15823_v16, %v3614_v7 }
 0x440   : > { %v3618_v25 = vshrl.u32 %v15708_v29, %v3615_v33  ;;  %v3621_v27 = vshrl.u32 %v15822_v39, %v3615_v33  ;;  %v3624_v59 = vshrl.u32 %v15823_v16, %v3615_v33  ;;  %v11718_v19 = vshrl.u32 %v3557_v53, 30 }
 0x441   : > { %v3627_v37 = vshrl.u32 %v15709_v23, %v3615_v33  ;;  %v11722_v44 = vshll.u32 %v3608_v5, 8  ;;  %v15512_v45 = vand.u32 2147483647, %v11706_v3  ;;  %v3811_v22 = vand.u32 2139095040, %v11706_v3 }
 0x442   : > { %v3619_v56 = vor.u32 %v3618_v25, %v3617_v35  ;;  %v3622_v43 = vor.u32 %v3621_v27, %v3620_v12  ;;  %v3625_v42 = vor.u32 %v3624_v59, %v3623_v24  ;;  %v3559_v48 = vshll.u32 %v11718_v19, 30  ;;  %v11729_v54 = vpop.eup %8741 }
 0x443   : > { %v3628_v28 = vor.u32 %v3627_v37, %v3626_v17  ;;  %v3362_v36 = vshrl.u32 %v3344_v10, %v3360_v58  ;;  %v3365_v34 = vadd.s32 127, %v3364_v1  ;;  %v3629_v13 = vshll.u32 %v15709_v23, %v3614_v7  ;;  %15869 = vst [vmem:[#allocation26_spill] sm:$0xff] %v11729_v54 }
 0x444   : > { %v3630_v53 = vshrl.u32 %v15697_v21, %v3615_v33  ;;  %v11731_v35 = vsub.s32 %v3556_v11, %v3559_v48  ;;  %vm3632_vm14 = vcmp.lt.s32.totalorder %v3613_v30, 1  ;;  %vm3634_vm0 = vcmp.lt.s32.totalorder %v3613_v30, 3 }
 0x445   : > { %vm3635_vm4 = vcmp.lt.s32.totalorder %v3613_v30, 4  ;;  %v15870_v5 = vand.u32 2147483647, %v11275_v26  ;;  %vm15536_vm9 = vcmp.lt.s32.totalorder %v11353_v40, 0  ;;  %v3640_v7 = vsel %vm3632_vm14, %v3619_v56, %v3622_v43 }
 0x446   : > { %v3631_v10 = vor.u32 %v3630_v53, %v3629_v13  ;;  %v3637_v58 = vsel %vm3635_vm4, %v3625_v42, 2102212464  ;;  %v3641_v1 = vsel %vm3635_vm4, %v3628_v28, 920167782  ;;  %v3562_v25 = vsub.s32 0, %v11731_v35 }
 0x447   : > { %vm11735_vm5 = vcmp.le.f32.partialorder %v15870_v5, 0.7853982  ;;  %v3616_v11 = vshrl.u32 %v15698_v62, %v3615_v33  ;;  %vm3633_vm8 = vcmp.lt.s32.totalorder %v3613_v30, 2  ;;  %v3642_v27 = vsel %vm3634_vm0, %v3625_v42, %v3641_v1 }
 0x448   : > { %vm15535_vm12 = vcmp.lt.s32.totalorder %v10982_v32, 0  ;;  %v3366_v24 = vshll.u32 %v3365_v34, 23  ;;  %v3643_v59 = vsel %vm3633_vm8, %v3640_v7, %v3642_v27  ;;  %v3644_v17 = vsel %vm3632_vm14, %v3622_v43, %v3625_v42 }
 0x449   : > { %v3645_v37 = vsel %vm3635_vm4, %v3631_v10, 1326507024  ;;  %vm15534_vm13 = vcmp.lt.s32.totalorder %v11159_v6, 0  ;;  %v8165_v48 = vmin.u32 %v3562_v25, %v11731_v35  ;;  %v3636_v13 = vsel %vm3632_vm14, %v3616_v11, %v3619_v56 }
 0x44a   : > { %v3638_v53 = vsel %vm3634_vm0, %v3622_v43, %v3637_v58  ;;  %v3646_v33 = vsel %vm3634_vm0, %v3628_v28, %v3645_v37  ;;  %v15873_v5 = vand.u32 2147483647, %v11353_v40  ;;  %v3812_v7 = vshrl.u32 %v3811_v22, 23 }
 0x44b   : > { %v3647_v34 = vsel %vm3633_vm8, %v3644_v17, %v3646_v33  ;;  %v11760_v42 = vmul.u32.u64.low %v11722_v44, %v3643_v59  ;;  %v11761_v10 = vmul.u32.u64.high %v11722_v44, %v3643_v59, %v11760_v42  ;;  %v3476_v25 = vxor.u32 2147483648, %v11708_v51 }
 0x44c   : > { %vm11754_vm10 = vcmp.le.f32.partialorder %v15873_v5, 0.7853982  ;;  %v3564_v56 = vclz %v8165_v48  ;;  %v11765_v43 = vmul.u32.u64.low %v11722_v44, %v3647_v34  ;;  %v11766_v58 = vmul.u32.u64.high %v11722_v44, %v3647_v34, %v11765_v43 }
 0x44d   : > { %v3361_v28 = vshll.u32 %v11656_v60, %v11695_v4  ;;  %v3367_v11 = vor.u32 4788187, %v3366_v24  ;;  %v3639_v27 = vsel %vm3633_vm8, %v3636_v13, %v3638_v53  ;;  %v8176_v37 = vadd.s32 4294967169, %v3812_v7  ;;  %v2260_v43 = vpop.f32.mrf.mxu0 }
 0x44e   : > { %8743 = vsinq.f32 %v11515_v20  ;;  %v2956_v59 = vxor.u32 2147483648, %v11683_v63  ;;  %v8166_v17 = vadd.s32 4294967294, %v3564_v56  ;;  %v3815_v22 = vand.u32 8388607, %v15512_v45 }
 0x44f   : > { %v3164_v48 = vxor.u32 2147483648, %v11687_v18  ;;  %v3363_v33 = vor.u32 %v3362_v36, %v3361_v28  ;;  %v3658_v5 = vadd.s32 1, %v11761_v10  ;;  %v3818_v34 = vadd.s32 1, %v8176_v37 }
 0x450   : > { %v3272_v60 = vsel %vm11735_vm5, %v11275_v26, %v11701_v38  ;;  %v3477_v20 = vsel %vm15536_vm9, %v3476_v25, %v11708_v51  ;;  %v3655_v4 = vmul.u32 %v11722_v44, %v3639_v27  ;;  %vm3657_vm8 = vc.u32 %v11766_v58, %v11760_v42  ;;  %v2349_v51 = vpop.f32.mrf.mxu1 }
 0x451   : > { %v3368_v30 = vand.u32 2147483647, %v3367_v11  ;;  %vm8167_vm14 = vcmp.lt.s32.totalorder %v8166_v17, 0  ;;  %v3659_v36 = vsel %vm3657_vm8, %v3658_v5, %v11761_v10  ;;  %vm3819_vm0 = vcmp.gt.s32.totalorder %v3818_v34, 0 }
 0x452   : > { %v11790_v24 = vsel %vm15535_vm12, %v2956_v59, %v11683_v63  ;;  %v3660_v13 = vadd.s32 %v3659_v36, %v3655_v4  ;;  %v3816_v38 = vor.u32 8388608, %v3815_v22  ;;  %v11793_v53 = vadd.f32 %v2260_v43, %v11240_v61 }
 0x453   : > { %15876 = vst [vmem:[#allocation24_spill] sm:$0xff] %v11790_v24  ;;  %v11798_v44 = vsel %vm15534_vm13, %v3164_v48, %v11687_v18  ;;  %8745 = vcosq.f32 %v3272_v60  ;;  %v3370_v7 = vcvt.s32.f32 %v3363_v33  ;;  %v3820_v10 = vsel %vm3819_vm0, %v3818_v34, 0 }
 0x454   : > { %15877 = vst [vmem:[#allocation20_spill] sm:$0xff] %v11798_v44  ;;  %8747 = vsinq.f32 %v3272_v60  ;;  %v11803_v63 = vsel %vm11754_vm10, %v11353_v40, %v3477_v20  ;;  %v11805_v25 = vsel %vm8167_vm14, 0, %v8166_v17  ;;  %v3661_v56 = vadd.s32 536870912, %v3660_v13 }
 0x455   : > { %v11807_v28 = vmul.f32 %v3370_v7, %v3368_v30  ;;  %v3552_v11 = vadd.s32 %v11669_v31, %v11675_v9  ;;  %v3822_v27 = vand.u32 31, %v3820_v10  ;;  %v11812_v18 = vadd.f32 %v2349_v51, %v11240_v61 }
 0x456   : > { %v11815_v37 = vadd.s32 %v11760_v42, %v11766_v58  ;;  %v11817_v59 = vshrl.u32 %v3661_v56, 30  ;;  %v11819_v22 = vshll.u32 %v3816_v38, 8  ;;  %v3568_v48 = vsub.s32 32, %v11805_v25 }
 0x457   : > { %v3823_v5 = vsub.s32 32, %v3822_v27  ;;  %v3707_v31 = vand.u32 2139095040, %v11793_v53  ;;  %v3821_v9 = vshrl.u32 %v3820_v10, 5  ;;  %v3825_v42 = vshll.u32 %v15698_v62, %v3822_v27 }
 0x458   : > { %v3663_v61 = vshll.u32 %v11817_v59, 30  ;;  %v3828_v58 = vshll.u32 %v15708_v29, %v3822_v27  ;;  %v3831_v60 = vshll.u32 %v15822_v39, %v3822_v27  ;;  %v3834_v30 = vshll.u32 %v15823_v16, %v3822_v27 }
 0x459   : > { %v3826_v34 = vshrl.u32 %v15708_v29, %v3823_v5  ;;  %v3829_v43 = vshrl.u32 %v15822_v39, %v3823_v5  ;;  %v3832_v20 = vshrl.u32 %v15823_v16, %v3823_v5  ;;  %v3835_v36 = vshrl.u32 %v15709_v23, %v3823_v5 }
 0x45a   : > { %v11833_v4 = vsub.s32 %v3660_v13, %v3663_v61  ;;  %v3837_v38 = vshll.u32 %v15709_v23, %v3822_v27  ;;  %v3838_v45 = vshrl.u32 %v15697_v21, %v3823_v5  ;;  %v3572_v33 = vsub.s32 4294967266, %v11805_v25 }
 0x45b   : > { %v11838_v51 = vpop.eup %8743  ;;  %v3827_v7 = vor.u32 %v3826_v34, %v3825_v42  ;;  %v3830_v10 = vor.u32 %v3829_v43, %v3828_v58  ;;  %v3833_v56 = vor.u32 %v3832_v20, %v3831_v60  ;;  %v3836_v54 = vor.u32 %v3835_v36, %v3834_v30 }
 0x45c   : > { %15878 = vst [vmem:[#allocation13_spill] sm:$0xff] %v11838_v51  ;;  %v3666_v17 = vsub.s32 0, %v11833_v4  ;;  %v3708_v13 = vshrl.u32 %v3707_v31, 23  ;;  %v3824_v61 = vshrl.u32 %v15698_v62, %v3823_v5  ;;  %v3839_v0 = vor.u32 %v3838_v45, %v3837_v38 }
 0x45d   : > { %vm3840_vm4 = vcmp.lt.s32.totalorder %v3821_v9, 1  ;;  %vm3843_vm8 = vcmp.lt.s32.totalorder %v3821_v9, 4  ;;  %vm3841_vm14 = vcmp.lt.s32.totalorder %v3821_v9, 2  ;;  %vm3842_vm0 = vcmp.lt.s32.totalorder %v3821_v9, 3 }
 0x45e   : > { %v8169_v27 = vmin.u32 %v3666_v17, %v11833_v4  ;;  %v3845_v51 = vsel %vm3843_vm8, %v3833_v56, 2102212464  ;;  %v3848_v42 = vsel %vm3840_vm4, %v3827_v7, %v3830_v10  ;;  %v3849_v58 = vsel %vm3843_vm8, %v3836_v54, 920167782 }
 0x45f   : > { %v3852_v34 = vsel %vm3840_vm4, %v3830_v10, %v3833_v56  ;;  %v3853_v43 = vsel %vm3843_vm8, %v3839_v0, 1326507024  ;;  %v3844_v46 = vsel %vm3840_vm4, %v3824_v61, %v3827_v7  ;;  %v3846_v30 = vsel %vm3842_vm0, %v3830_v10, %v3845_v51 }
 0x460   : > { %v11845_v60 = vpop.eup %8745  ;;  %v3668_v20 = vclz %v8169_v27  ;;  %v3850_v31 = vsel %vm3842_vm0, %v3833_v56, %v3849_v58  ;;  %v3854_v5 = vsel %vm3842_vm0, %v3836_v54, %v3853_v43  ;;  %v8172_v38 = vadd.s32 4294967169, %v3708_v13 }
 0x461   : > { %v11847_v36 = vpop.eup %8747  ;;  %v3851_v45 = vsel %vm3841_vm14, %v3848_v42, %v3850_v31  ;;  %v15879_v17 = vand.u32 2147483647, %v11793_v53  ;;  %v3855_v47 = vsel %vm3841_vm14, %v3852_v34, %v3854_v5  ;;  %v3847_v51 = vsel %vm3841_vm14, %v3844_v46, %v3846_v30 }
 0x462   : > { %v8170_v41 = vadd.s32 4294967294, %v3668_v20  ;;  %v11854_v0 = vmul.u32.u64.low %v11819_v22, %v3851_v45  ;;  %v11855_v44 = vmul.u32.u64.high %v11819_v22, %v3851_v45, %v11854_v0  ;;  %v3714_v56 = vadd.s32 1, %v8172_v38 }
 0x463   : > { %v3711_v57 = vand.u32 8388607, %v15879_v17  ;;  %v11860_v7 = vmul.u32.u64.low %v11819_v22, %v3855_v47  ;;  %v11861_v10 = vmul.u32.u64.high %v11819_v22, %v3855_v47, %v11860_v7  ;;  %v11863_v54 = vshrl.u32 %v3552_v11, %v3568_v48 }
 0x464   : > { %vm8171_vm4 = vcmp.lt.s32.totalorder %v8170_v41, 0  ;;  %v15523_v13 = vand.u32 2147483647, %v11812_v18  ;;  %v3915_v61 = vand.u32 2139095040, %v11812_v18  ;;  %v11867_v27 = vadd.s32 127, %v3572_v33 }
 0x465   : > { %v3671_v42 = vsel %vm8171_vm4, 0, %v8170_v41  ;;  %v3712_v58 = vor.u32 8388608, %v3711_v57  ;;  %vm3715_vm8 = vcmp.gt.s32.totalorder %v3714_v56, 0  ;;  %v3863_v46 = vmul.u32 %v11819_v22, %v3847_v51 }
 0x466   : > { %v3672_v34 = vsub.s32 32, %v3671_v42  ;;  %v3676_v9 = vsub.s32 4294967266, %v3671_v42  ;;  %v3866_v47 = vadd.s32 1, %v11855_v44  ;;  %v3673_v43 = vshll.u32 %v11833_v4, %v3671_v42 }
 0x467   : > { %vm3865_vm14 = vc.u32 %v11861_v10, %v11854_v0  ;;  %v3716_v11 = vsel %vm3715_vm8, %v3714_v56, 0  ;;  %v3916_v48 = vshrl.u32 %v3915_v61, 23  ;;  %v11876_v45 = vshll.u32 %v3712_v58, 8 }
 0x468   : > { %v3674_v20 = vshrl.u32 %v11815_v37, %v3672_v34  ;;  %v3677_v33 = vadd.s32 127, %v3676_v9  ;;  %v3867_v41 = vsel %vm3865_vm14, %v3866_v47, %v11855_v44  ;;  %v3717_v57 = vshrl.u32 %v3716_v11, 5 }
 0x469   : > { %v3868_v30 = vadd.s32 %v3867_v41, %v3863_v46  ;;  %v3718_v31 = vand.u32 31, %v3716_v11  ;;  %v11880_v22 = vand.u32 8388607, %v15523_v13  ;;  %v8180_v38 = vadd.s32 4294967169, %v3916_v48 }
 0x46a   : > { %v3675_v4 = vor.u32 %v3674_v20, %v3673_v43  ;;  %v3678_v5 = vshll.u32 %v3677_v33, 23  ;;  %vm3736_vm0 = vcmp.lt.s32.totalorder %v3717_v57, 1  ;;  %vm3602_vm4 = vcmp.lt.s32.totalorder %v11545_v52, 0 }
 0x46b   : > { %v3869_v17 = vadd.s32 536870912, %v3868_v30  ;;  %v3719_v37 = vsub.s32 32, %v3718_v31  ;;  %v3721_v51 = vshll.u32 %v15698_v62, %v3718_v31  ;;  %vm3737_vm8 = vcmp.lt.s32.totalorder %v3717_v57, 2 }
 0x46c   : > { %v3679_v44 = vor.u32 4788187, %v3678_v5  ;;  %v3682_v7 = vcvt.s32.f32 %v3675_v4  ;;  %v3724_v56 = vshll.u32 %v15708_v29, %v3718_v31  ;;  %v3727_v61 = vshll.u32 %v15822_v39, %v3718_v31 }
 0x46d   : > { %v15880_v42 = vand.u32 2147483647, %v11545_v52  ;;  %v11892_v34 = vshrl.u32 %v3869_v17, 30  ;;  %v3722_v9 = vshrl.u32 %v15708_v29, %v3719_v37  ;;  %v3725_v46 = vshrl.u32 %v15822_v39, %v3719_v37 }
 0x46e   : > { %v3730_v47 = vshll.u32 %v15823_v16, %v3718_v31  ;;  %v3680_v43 = vand.u32 2147483647, %v3679_v44  ;;  %v3728_v11 = vshrl.u32 %v15823_v16, %v3719_v37  ;;  %v3731_v48 = vshrl.u32 %v15709_v23, %v3719_v37 }
 0x46f   : > { %vm11888_vm14 = vcmp.le.f32.partialorder %v15880_v42, 0.7853982  ;;  %v3733_v20 = vshll.u32 %v15709_v23, %v3718_v31  ;;  %v3871_v33 = vshll.u32 %v11892_v34, 30  ;;  %v3723_v41 = vor.u32 %v3722_v9, %v3721_v51 }
 0x470   : > { %v3726_v4 = vor.u32 %v3725_v46, %v3724_v56  ;;  %v3734_v5 = vshrl.u32 %v15697_v21, %v3719_v37  ;;  %v3683_v17 = vmul.f32 %v3682_v7, %v3680_v43  ;;  %v3720_v42 = vshrl.u32 %v15698_v62, %v3719_v37 }
 0x471   : > { %v3729_v13 = vor.u32 %v3728_v11, %v3727_v61  ;;  %v3732_v50 = vor.u32 %v3731_v48, %v3730_v47  ;;  %v11903_v6 = vsub.s32 %v3868_v30, %v3871_v33  ;;  %vm3738_vm2 = vcmp.lt.s32.totalorder %v3717_v57, 3 }
 0x472   : > { %v3735_v44 = vor.u32 %v3734_v5, %v3733_v20  ;;  %vm3739_vm7 = vcmp.lt.s32.totalorder %v3717_v57, 4  ;;  %v3684_v24 = vxor.u32 2147483648, %v3683_v17  ;;  %v3744_v31 = vsel %vm3736_vm0, %v3723_v41, %v3726_v4 }
 0x473   : > { %v3741_v49 = vsel %vm3739_vm7, %v3729_v13, 2102212464  ;;  %v3745_v32 = vsel %vm3739_vm7, %v3732_v50, 920167782  ;;  %v3874_v51 = vsub.s32 0, %v11903_v6  ;;  %v3740_v56 = vsel %vm3736_vm0, %v3720_v42, %v3723_v41 }
 0x474   : > { %v3746_v7 = vsel %vm3738_vm2, %v3729_v13, %v3745_v32  ;;  %v3748_v37 = vsel %vm3736_vm0, %v3726_v4, %v3729_v13  ;;  %v3685_v30 = vsel %vm3602_vm4, %v3684_v24, %v3683_v17  ;;  %v3742_v61 = vsel %vm3738_vm2, %v3726_v4, %v3741_v49 }
 0x475   : > { %v3747_v9 = vsel %vm3737_vm8, %v3744_v31, %v3746_v7  ;;  %v3749_v46 = vsel %vm3739_vm7, %v3735_v44, 1326507024  ;;  %v3574_v47 = vshll.u32 %v11867_v27, 23  ;;  %v8177_v43 = vmin.u32 %v3874_v51, %v11903_v6 }
 0x476   : > { %v3750_v11 = vsel %vm3738_vm2, %v3732_v50, %v3749_v46  ;;  %v3920_v48 = vor.u32 8388608, %v11880_v22  ;;  %v3688_v32 = vsel %vm11888_vm14, %v11545_v52, %v3685_v30  ;;  %v3743_v27 = vsel %vm3737_vm8, %v3740_v56, %v3742_v61 }
 0x477   : > { %v3751_v13 = vsel %vm3737_vm8, %v3748_v37, %v3750_v11  ;;  %v11923_v24 = vmul.u32.u64.low %v11876_v45, %v3747_v9  ;;  %v11924_v49 = vmul.u32.u64.high %v11876_v45, %v3747_v9, %v11923_v24  ;;  %v3876_v20 = vclz %v8177_v43 }
 0x478   : > { %v11929_v33 = vmul.u32.u64.low %v11876_v45, %v3751_v13  ;;  %v11930_v41 = vmul.u32.u64.high %v11876_v45, %v3751_v13, %v11929_v33  ;;  %8749 = vcosq.f32 %v11803_v63  ;;  %v3372_v50 = vxor.u32 2147483648, %v11807_v28 }
 0x479   : > { %v15883_v22 = vshll.u32 %v11731_v35, %v11805_v25  ;;  %v3922_v5 = vadd.s32 1, %v8180_v38  ;;  %v11940_v17 = vor.u32 4788187, %v3574_v47  ;;  %8751 = vcosq.f32 %v3688_v32 }
 0x47a   : > { %v3864_v57 = vadd.s32 %v11854_v0, %v11861_v10  ;;  %v8178_v42 = vadd.s32 4294967294, %v3876_v20  ;;  %8753 = vsinq.f32 %v3688_v32  ;;  %v3759_v44 = vmul.u32 %v11876_v45, %v3743_v27 }
 0x47b   : > { %v11938_v4 = vor.u32 %v11863_v54, %v15883_v22  ;;  %v3762_v31 = vadd.s32 1, %v11924_v49  ;;  %vm3923_vm7 = vcmp.gt.s32.totalorder %v3922_v5, 0  ;;  %vm3761_vm0 = vc.u32 %v11930_v41, %v11923_v24 }
 0x47c   : > { %vm8179_vm2 = vcmp.lt.s32.totalorder %v8178_v42, 0  ;;  %v3924_v35 = vsel %vm3923_vm7, %v3922_v5, 0  ;;  %v11948_v25 = vshll.u32 %v3920_v48, 8  ;;  %v3686_v0 = vsub.s32 4, %v11817_v59 }
 0x47d   : > { %v3879_v54 = vsel %vm8179_vm2, 0, %v8178_v42  ;;  %v3763_v38 = vsel %vm3761_vm0, %v3762_v31, %v11924_v49  ;;  %v3926_v51 = vand.u32 31, %v3924_v35  ;;  %v11952_v45 = vshrl.u32 %v3924_v35, 5 }
 0x47e   : > { %v3880_v10 = vsub.s32 32, %v3879_v54  ;;  %v3884_v56 = vsub.s32 4294967266, %v3879_v54  ;;  %v3764_v7 = vadd.s32 %v3763_v38, %v3759_v44  ;;  %v3881_v37 = vshll.u32 %v11903_v6, %v3879_v54 }
 0x47f   : > { %v3927_v30 = vsub.s32 32, %v3926_v51  ;;  %v3929_v61 = vshll.u32 %v15698_v62, %v3926_v51  ;;  %v3932_v9 = vshll.u32 %v15708_v29, %v3926_v51  ;;  %v3935_v11 = vshll.u32 %v15822_v39, %v3926_v51 }
 0x480   : > { %v3882_v46 = vshrl.u32 %v3864_v57, %v3880_v10  ;;  %v3885_v47 = vadd.s32 127, %v3884_v56  ;;  %v3765_v43 = vadd.s32 536870912, %v3764_v7  ;;  %v3938_v49 = vshll.u32 %v15823_v16, %v3926_v51 }
 0x481   : > { %v3930_v48 = vshrl.u32 %v15708_v29, %v3927_v30  ;;  %v3933_v32 = vshrl.u32 %v15822_v39, %v3927_v30  ;;  %v3936_v13 = vshrl.u32 %v15823_v16, %v3927_v30  ;;  %vm3290_vm8 = vcmp.lt.s32.totalorder %v11430_v55, 0 }
 0x482   : > { %v3883_v6 = vor.u32 %v3882_v46, %v3881_v37  ;;  %v3886_v20 = vshll.u32 %v3885_v47, 23  ;;  %v11963_v27 = vshrl.u32 %v3765_v43, 30  ;;  %v3939_v33 = vshrl.u32 %v15709_v23, %v3927_v30 }
 0x483   : > { %vm3810_vm7 = vcmp.lt.s32.totalorder %v11706_v3, 0  ;;  %v3931_v22 = vor.u32 %v3930_v48, %v3929_v61  ;;  %v3934_v5 = vor.u32 %v3933_v32, %v3932_v9  ;;  %v3937_v57 = vor.u32 %v3936_v13, %v3935_v11 }
 0x484   : > { %v3687_v42 = vsel %vm3602_vm4, %v3686_v0, %v11817_v59  ;;  %v15884_v44 = vand.u32 2147483647, %v11706_v3  ;;  %v3887_v35 = vor.u32 4788187, %v3886_v20  ;;  %v3767_v54 = vshll.u32 %v11963_v27, 30 }
 0x485   : > { %v3928_v38 = vshrl.u32 %v15698_v62, %v3927_v30  ;;  %v3940_v10 = vor.u32 %v3939_v33, %v3938_v49  ;;  %v3890_v56 = vcvt.s32.f32 %v3883_v6  ;;  %v3941_v37 = vshll.u32 %v15709_v23, %v3926_v51  ;;  %v11981_v59 = vpop.eup %8749 }
 0x486   : > { %vm11972_vm2 = vcmp.le.f32.partialorder %v15884_v44, 0.7853982  ;;  %v3942_v61 = vshrl.u32 %v15697_v21, %v3927_v30  ;;  %vm3944_vm0 = vcmp.lt.s32.totalorder %v11952_v45, 1  ;;  %v3888_v0 = vand.u32 2147483647, %v3887_v35  ;;  %v11987_v46 = vpop.eup %8751 }
 0x487   : > { %v11983_v9 = vsub.s32 %v3764_v7, %v3767_v54  ;;  %vm3946_vm4 = vcmp.lt.s32.totalorder %v11952_v45, 3  ;;  %vm3947_vm13 = vcmp.lt.s32.totalorder %v11952_v45, 4  ;;  %v3952_v51 = vsel %vm3944_vm0, %v3931_v22, %v3934_v5  ;;  %v11991_v30 = vpop.eup %8753 }
 0x488   : > { %v3943_v47 = vor.u32 %v3942_v61, %v3941_v37  ;;  %v3949_v43 = vsel %vm3947_vm13, %v3937_v57, 2102212464  ;;  %v3953_v11 = vsel %vm3947_vm13, %v3940_v10, 920167782  ;;  %v3891_v48 = vmul.f32 %v3890_v56, %v3888_v0 }
 0x489   : > { %v3770_v32 = vsub.s32 0, %v11983_v9  ;;  %vm3945_vm12 = vcmp.lt.s32.totalorder %v11952_v45, 2  ;;  %v3954_v7 = vsel %vm3946_vm4, %v3937_v57, %v3953_v11  ;;  %v3948_v13 = vsel %vm3944_vm0, %v3928_v38, %v3931_v22 }
 0x48a   : > { %v3955_v49 = vsel %vm3945_vm12, %v3952_v51, %v3954_v7  ;;  %v3956_v6 = vsel %vm3944_vm0, %v3934_v5, %v3937_v57  ;;  %v3957_v20 = vsel %vm3947_vm13, %v3943_v47, 1326507024  ;;  %v3892_v33 = vxor.u32 2147483648, %v3891_v48 }
 0x48b   : > { %v8173_v44 = vmin.u32 %v3770_v32, %v11983_v9  ;;  %v3950_v35 = vsel %vm3946_vm4, %v3934_v5, %v3949_v43  ;;  %v3958_v54 = vsel %vm3946_vm4, %v3940_v10, %v3957_v20  ;;  %v3373_v22 = vsel %vm3290_vm8, %v3372_v50, %v11807_v28 }
 0x48c   : > { %v3959_v38 = vsel %vm3945_vm12, %v3956_v6, %v3958_v54  ;;  %v12016_v57 = vmul.u32.u64.low %v11948_v25, %v3955_v49  ;;  %v12017_v56 = vmul.u32.u64.high %v11948_v25, %v3955_v49, %v12016_v57  ;;  %v3893_v5 = vsel %vm3810_vm7, %v3892_v33, %v3891_v48 }
 0x48d   : > { %v3772_v37 = vclz %v8173_v44  ;;  %v12023_v10 = vmul.u32.u64.low %v11948_v25, %v3959_v38  ;;  %v12024_v61 = vmul.u32.u64.high %v11948_v25, %v3959_v38, %v12023_v10  ;;  %v3576_v0 = vand.u32 2147483647, %v11940_v17 }
 0x48e   : > { %v3896_v28 = vsel %vm11972_vm2, %v11706_v3, %v3893_v5  ;;  %v3951_v50 = vsel %vm3945_vm12, %v3948_v13, %v3950_v35  ;;  %v3689_v47 = vsel %vm11888_vm14, 0, %v3687_v42  ;;  %v3578_v43 = vcvt.s32.f32 %v11938_v4 }
 0x48f   : > { %vm3706_vm13 = vcmp.lt.s32.totalorder %v11793_v53, 0  ;;  %v8174_v51 = vadd.s32 4294967294, %v3772_v37  ;;  %v15887_v11 = vand.u32 2147483647, %v11430_v55  ;;  %v3970_v17 = vadd.s32 1, %v12017_v56 }
 0x490   : > { %v3790_v32 = vsub.s32 4, %v11963_v27  ;;  %v3693_v45 = vadd.s32 3, %v3689_v47  ;;  %v3894_v7 = vsub.s32 4, %v11892_v34  ;;  %8755 = vcosq.f32 %v3896_v28 }
 0x491   : > { %vm12038_vm0 = vcmp.le.f32.partialorder %v15887_v11, 0.7853982  ;;  %vm8175_vm12 = vcmp.lt.s32.totalorder %v8174_v51, 0  ;;  %v3967_v58 = vmul.u32 %v11948_v25, %v3951_v50  ;;  %vm3969_vm14 = vc.u32 %v12024_v61, %v12016_v57 }
 0x492   : > { %v3579_v4 = vmul.f32 %v3578_v43, %v3576_v0  ;;  %8757 = vsinq.f32 %v3896_v28  ;;  %v3775_v42 = vsel %vm8175_vm12, 0, %v8174_v51  ;;  %v3971_v13 = vsel %vm3969_vm14, %v3970_v17, %v12017_v56 }
 0x493   : > { %v3760_v49 = vadd.s32 %v11923_v24, %v11930_v41  ;;  %v3776_v6 = vsub.s32 32, %v3775_v42  ;;  %v3780_v20 = vsub.s32 4294967266, %v3775_v42  ;;  %v3972_v33 = vadd.s32 %v3971_v13, %v3967_v58 }
 0x494   : > { %v3791_v44 = vsel %vm3706_vm13, %v3790_v32, %v11963_v27  ;;  %v3694_v35 = vand.u32 3, %v3693_v45  ;;  %v3895_v25 = vsel %vm3810_vm7, %v3894_v7, %v11892_v34  ;;  %v3376_v54 = vsel %vm12038_vm0, %v11430_v55, %v3373_v22 }
 0x495   : > { %vm3498_vm4 = vcmp.lt.s32.totalorder %v11510_v14, 0  ;;  %v3777_v24 = vshll.u32 %v11983_v9, %v3775_v42  ;;  %v3778_v41 = vshrl.u32 %v3760_v49, %v3776_v6  ;;  %v3781_v38 = vadd.s32 127, %v3780_v20 }
 0x496   : > { %v3973_v56 = vadd.s32 536870912, %v3972_v33  ;;  %v15890_v5 = vand.u32 2147483647, %v11793_v53  ;;  %v3697_v37 = vxor.u32 2147483648, %v11991_v30  ;;  %v3700_v34 = vxor.u32 2147483648, %v11987_v46 }
 0x497   : > { %v3374_v10 = vsub.s32 4, %v11645_v8  ;;  %v3779_v22 = vor.u32 %v3778_v41, %v3777_v24  ;;  %v3782_v0 = vshll.u32 %v3781_v38, 23  ;;  %8759 = vcosq.f32 %v3376_v54 }
 0x498   : > { %vm12064_vm12 = vcmp.le.f32.partialorder %v15890_v5, 0.7853982  ;;  %v3974_v28 = vshrl.u32 %v3973_v56, 30  ;;  %v3580_v9 = vxor.u32 2147483648, %v3579_v4  ;;  %v3897_v47 = vsel %vm11972_vm2, 0, %v3895_v25 }
 0x499   : > { %v3793_v50 = vsel %vm12064_vm12, 0, %v3791_v44  ;;  %8761 = vsinq.f32 %v3376_v54  ;;  %v3783_v43 = vor.u32 4788187, %v3782_v0  ;;  %vm3696_vm7 = vcmp.eq.s32.totalorder %v3694_v35, 0 }
 0x49a   : > { %v3975_v51 = vshll.u32 %v3974_v28, 30  ;;  %vm3699_vm14 = vcmp.eq.s32.totalorder %v3694_v35, 2  ;;  %v3998_v11 = vsub.s32 4, %v3974_v28  ;;  %v3698_v17 = vsel %vm3696_vm7, %v11987_v46, %v3697_v37 }
 0x49b   : > { %v3701_v32 = vsel %vm3699_vm14, %v3700_v34, %v11991_v30  ;;  %v3375_v45 = vsel %vm3290_vm8, %v3374_v10, %v11645_v8  ;;  %v3784_v7 = vand.u32 2147483647, %v3783_v43  ;;  %v3786_v58 = vcvt.s32.f32 %v3779_v22 }
 0x49c   : > { %v12080_v42 = vsub.s32 %v3972_v33, %v3975_v51  ;;  %v3901_v31 = vadd.s32 3, %v3897_v47  ;;  %8763 = vsinq.f32 %v11803_v63  ;;  %vm15537_vm2 = vcmp.lt.s32.totalorder %v11812_v18, 0 }
 0x49d   : > { %v3797_v13 = vadd.s32 3, %v3793_v50  ;;  %vm3695_vm9 = vcmp.lt.s32.totalorder %v3694_v35, 2  ;;  %v3787_v49 = vmul.f32 %v3786_v58, %v3784_v7  ;;  %v3377_v30 = vsel %vm12038_vm0, 0, %v3375_v45  ;;  %v8756_v20 = vpop.eup %8755 }
 0x49e   : > { %v3978_v46 = vsub.s32 0, %v12080_v42  ;;  %v3702_v6 = vsel %vm3695_vm9, %v3698_v17, %v3701_v32  ;;  %v3581_v8 = vsel %vm3498_vm4, %v3580_v9, %v3579_v4  ;;  %v3999_v33 = vsel %vm15537_vm2, %v3998_v11, %v3974_v28 }
 0x49f   : > { %vm3692_vm8 = vweird.f32 %v11545_v52  ;;  %v3582_v63 = vsub.s32 4, %v11718_v19  ;;  %v8758_v44 = vpop.eup %8757  ;;  %v3788_v35 = vxor.u32 2147483648, %v3787_v49  ;;  %v15893_v54 = vand.u32 2147483647, %v11812_v18 }
 0x4a0   : > { %v8181_v25 = vmin.u32 %v3978_v46, %v12080_v42  ;;  %v3902_v24 = vand.u32 3, %v3901_v31  ;;  %v3968_v4 = vadd.s32 %v12016_v57, %v12024_v61  ;;  %v12102_v41 = vand.u32 3, %v3797_v13 }
 0x4a1   : > { %vm12096_vm9 = vcmp.le.f32.partialorder %v15893_v54, 0.7853982  ;;  %v12104_v38 = vsel %vm3692_vm8, nan, %v3702_v6  ;;  %v3381_v52 = vadd.s32 3, %v3377_v30  ;;  %v3789_v56 = vsel %vm3706_vm13, %v3788_v35, %v3787_v49 }
 0x4a2   : > { %v3980_v5 = vclz %v8181_v25  ;;  %v4001_v37 = vsel %vm12096_vm9, 0, %v3999_v33  ;;  %v3908_v34 = vxor.u32 2147483648, %v8756_v20  ;;  %v3792_v10 = vsel %vm12064_vm12, %v11793_v53, %v3789_v56 }
 0x4a3   : > { %v3905_v22 = vxor.u32 2147483648, %v8758_v44  ;;  %v15896_v57 = vand.u32 2147483647, %v11510_v14  ;;  %v3583_v0 = vsel %vm3498_vm4, %v3582_v63, %v11718_v19  ;;  %8765 = vcosq.f32 %v3792_v10 }
 0x4a4   : > { %v8182_v28 = vadd.s32 4294967294, %v3980_v5  ;;  %vm3900_vm13 = vweird.f32 %v11706_v3  ;;  %vm3904_vm7 = vcmp.eq.s32.totalorder %v3902_v24, 0  ;;  %v8760_v9 = vpop.eup %8759  ;;  %8767 = vsinq.f32 %v3792_v10 }
 0x4a5   : > { %vm12115_vm0 = vcmp.le.f32.partialorder %v15896_v57, 0.7853982  ;;  %v4005_v50 = vadd.s32 3, %v4001_v37  ;;  %vm3907_vm12 = vcmp.eq.s32.totalorder %v3902_v24, 2  ;;  %v3270_v47 = vsub.s32 4, %v11468_v15  ;;  %v15904_v57 = vld [vmem:[#allocation10_spill] sm:$0xff] }
 0x4a6   : > { %v3584_v27 = vsel %vm12115_vm0, %v11510_v14, %v3581_v8  ;;  %v8762_v43 = vpop.eup %8761  ;;  %vm8183_vm14 = vcmp.lt.s32.totalorder %v8182_v28, 0  ;;  %v3382_v51 = vand.u32 3, %v3381_v52  ;;  %v3585_v19 = vsel %vm12115_vm0, 0, %v3583_v0 }
 0x4a7   : > { %8769 = vcosq.f32 %v3584_v27  ;;  %v3983_v11 = vsel %vm8183_vm14, 0, %v8182_v28  ;;  %v3906_v17 = vsel %vm3904_vm7, %v8756_v20, %v3905_v22  ;;  %v3909_v32 = vsel %vm3907_vm12, %v3908_v34, %v8758_v44  ;;  %v15900_v34 = vld [vmem:[#allocation22_spill] sm:$0xff] }
 0x4a8   : > { %8771 = vsinq.f32 %v3584_v27  ;;  %v3984_v45 = vsub.s32 32, %v3983_v11  ;;  %v3988_v7 = vsub.s32 4294967266, %v3983_v11  ;;  %vm3903_vm4 = vcmp.lt.s32.totalorder %v3902_v24, 2 }
 0x4a9   : > { %v3388_v58 = vxor.u32 2147483648, %v8760_v9  ;;  %v12129_v31 = vand.u32 3, %v4005_v50  ;;  %v3385_v13 = vxor.u32 2147483648, %v8762_v43  ;;  %v3589_v49 = vadd.s32 3, %v3585_v19  ;;  %v12134_v6 = vpop.eup %8763 }
 0x4aa   : > { %v3271_v46 = vsel %vm3186_vm11, %v3270_v47, %v11468_v15  ;;  %v3985_v30 = vshll.u32 %v12080_v42, %v3983_v11  ;;  %v3986_v8 = vshrl.u32 %v3968_v4, %v3984_v45  ;;  %v3989_v20 = vadd.s32 127, %v3988_v7 }
 0x4ab   : > { %v3910_v33 = vsel %vm3903_vm4, %v3906_v17, %v3909_v32  ;;  %vm3803_vm8 = vcmp.eq.s32.totalorder %v12102_v41, 2  ;;  %vm3383_vm0 = vcmp.lt.s32.totalorder %v3382_v51, 2  ;;  %vm3384_vm7 = vcmp.eq.s32.totalorder %v3382_v51, 0 }
 0x4ac   : > { %vm3387_vm12 = vcmp.eq.s32.totalorder %v3382_v51, 2  ;;  %v3273_v63 = vsel %vm11735_vm5, 0, %v3271_v46  ;;  %v3987_v44 = vor.u32 %v3986_v8, %v3985_v30  ;;  %v3990_v35 = vshll.u32 %v3989_v20, 23 }
 0x4ad   : > { %vm3800_vm14 = vcmp.eq.s32.totalorder %v12102_v41, 0  ;;  %v3277_v15 = vadd.s32 3, %v3273_v63  ;;  %v3478_v25 = vsub.s32 4, %v11561_v2  ;;  %v12145_v42 = vsel %vm3900_vm13, nan, %v3910_v33 }
 0x4ae   : > { %v3386_v54 = vsel %vm3384_vm7, %v8760_v9, %v3385_v13  ;;  %v3389_v24 = vsel %vm3387_vm12, %v3388_v58, %v8762_v43  ;;  %v3590_v4 = vand.u32 3, %v3589_v49  ;;  %v3991_v52 = vor.u32 4788187, %v3990_v35 }
 0x4af   : > { %v3278_v12 = vand.u32 3, %v3277_v15  ;;  %v3281_v56 = vxor.u32 2147483648, %v11847_v36  ;;  %vm15899_vm5 = vcmp.lt.s32.totalorder %v11353_v40, 0  ;;  %v3284_v37 = vxor.u32 2147483648, %v11845_v60 }
 0x4b0   : > { %v3479_v5 = vsel %vm15899_vm5, %v3478_v25, %v11561_v2  ;;  %v15901_v10 = vand.u32 2147483647, %v15900_v34  ;;  %v2958_v61 = vsub.s32 4, %v15904_v57  ;;  %v3992_v0 = vand.u32 2147483647, %v3991_v52  ;;  %v15905_v2 = vld [vmem:[#allocation24_spill] sm:$0xff]  ;;  %v8766_v9 = vpop.eup %8765 }
 0x4b1   : > { %v3481_v3 = vsel %vm11754_vm10, 0, %v3479_v5  ;;  %v3994_v28 = vcvt.s32.f32 %v3987_v44  ;;  %vm3380_vm7 = vweird.f32 %v11430_v55  ;;  %v3390_v27 = vsel %vm3383_vm0, %v3386_v54, %v3389_v24  ;;  %v8768_v50 = vpop.eup %8767  ;;  %v15910_v24 = vld [vmem:[#allocation23_spill] sm:$0xff]  ;;  %v15915_v5 = vld [vmem:[#allocation40_spill] sm:$0xff] }
 0x4b2   : > { %vm12157_vm13 = vcmp.le.f32.partialorder %v15901_v10, 0.7853982  ;;  %vm3276_vm12 = vweird.f32 %v11275_v26  ;;  %vm3592_vm5 = vcmp.eq.s32.totalorder %v3590_v4, 0  ;;  %vm3595_vm4 = vcmp.eq.s32.totalorder %v3590_v4, 2 }
 0x4b3   : > { %v2960_v1 = vsel %vm12157_vm13, %v15900_v34, %v15905_v2  ;;  %vm3280_vm11 = vcmp.eq.s32.totalorder %v3278_v12, 0  ;;  %vm3283_vm2 = vcmp.eq.s32.totalorder %v3278_v12, 2  ;;  %v3995_v47 = vmul.f32 %v3994_v28, %v3992_v0  ;;  %v15919_v28 = vld [vmem:[#allocation39_spill] sm:$0xff]  ;;  %v15922_v2 = vld [vmem:[#allocation30_spill] sm:$0xff] }
 0x4b4   : > { %v3804_v43 = vxor.u32 2147483648, %v8766_v9  ;;  %v3485_v19 = vadd.s32 3, %v3481_v3  ;;  %vm15906_vm0 = vcmp.lt.s32.totalorder %v15900_v34, 0  ;;  %v8770_v11 = vpop.eup %8769  ;;  %v3801_v17 = vxor.u32 2147483648, %v8768_v50  ;;  %v15917_v3 = vld [vmem:[#allocation15_spill] sm:$0xff] }
 0x4b5   : > { %v2959_v51 = vsel %vm15906_vm0, %v2958_v61, %v15904_v57  ;;  %v3282_v32 = vsel %vm3280_vm11, %v11845_v60, %v3281_v56  ;;  %v3285_v45 = vsel %vm3283_vm2, %v3284_v37, %v11847_v36  ;;  %8773 = vcosq.f32 %v2960_v1  ;;  %v8772_v7 = vpop.eup %8771 }
 0x4b6   : > { %v3996_v58 = vxor.u32 2147483648, %v3995_v47  ;;  %v3805_v13 = vsel %vm3803_vm8, %v3804_v43, %v8768_v50  ;;  %v3596_v49 = vxor.u32 2147483648, %v8770_v11  ;;  %8775 = vsinq.f32 %v2960_v1 }
 0x4b7   : > { %v3802_v46 = vsel %vm3800_vm14, %v8766_v9, %v3801_v17  ;;  %v3593_v30 = vxor.u32 2147483648, %v8772_v7  ;;  %vm3279_vm10 = vcmp.lt.s32.totalorder %v3278_v12, 2  ;;  %v2961_v8 = vsel %vm12157_vm13, 0, %v2959_v51 }
 0x4b8   : > { %vm15907_vm11 = vcmp.lt.s32.totalorder %v11812_v18, 0  ;;  %vm15908_vm2 = vcmp.lt.s32.totalorder %v12102_v41, 2  ;;  %v3286_v20 = vsel %vm3279_vm10, %v3282_v32, %v3285_v45  ;;  %v12184_v33 = vand.u32 3, %v3485_v19  ;;  %v15924_v19 = vld [vmem:[#allocation33_spill] sm:$0xff]  ;;  %v15927_v32 = vld [vmem:[#allocation34_spill] sm:$0xff] }
 0x4b9   : > { %v3997_v60 = vsel %vm15907_vm11, %v3996_v58, %v3995_v47  ;;  %v3806_v36 = vsel %vm15908_vm2, %v3802_v46, %v3805_v13  ;;  %vm15909_vm8 = vweird.f32 %v11793_v53  ;;  %v3594_v35 = vsel %vm3592_vm5, %v8770_v11, %v3593_v30  ;;  %v15923_v47 = vld [vmem:[#allocation32_spill] sm:$0xff]  ;;  %v15925_v11 = vld [vmem:[#allocation27_spill] sm:$0xff] }
 0x4ba   : > { %v3807_v63 = vsel %vm15909_vm8, nan, %v3806_v36  ;;  %v4000_v44 = vsel %vm12096_vm9, %v11812_v18, %v3997_v60  ;;  %v3597_v15 = vsel %vm3595_vm4, %v3596_v49, %v8772_v7  ;;  %v3489_v25 = vxor.u32 2147483648, %v12134_v6 }
 0x4bb   : > { %4082 = vmatprep.subr.mxu0 %v3807_v63  ;;  %8777 = vcosq.f32 %v4000_v44  ;;  %v3492_v41 = vxor.u32 2147483648, %v11981_v59  ;;  %v2965_v54 = vadd.s32 3, %v2961_v8  ;;  %v3391_v53 = vsel %vm3380_vm7, nan, %v3390_v27  ;;  %v15932_v8 = vld [vmem:[#allocation29_spill] sm:$0xff] }
 0x4bc   : > { %8779 = vsinq.f32 %v4000_v44  ;;  %4083 = vmatpush1.msra.mxu0 %v12104_v38  ;;  %v3287_v48 = vsel %vm3276_vm12, nan, %v3286_v20  ;;  %v15911_v52 = vand.u32 2147483647, %v15910_v24  ;;  %vm15914_vm14 = vcmp.lt.s32.totalorder %v3590_v4, 2  ;;  %v15916_v38 = vld [vmem:[#allocation20_spill] sm:$0xff]  ;;  %v15933_v63 = vld [vmem:[#allocation13_spill] sm:$0xff] }
 0x4bd   : > { %4084 = vmatprep.subr.mxu0 %v3391_v53  ;;  %v3598_v56 = vsel %vm15914_vm14, %v3594_v35, %v3597_v15  ;;  %vm3488_vm4 = vcmp.eq.s32.totalorder %v12184_v33, 0  ;;  %v3166_v37 = vsub.s32 4, %v15915_v5  ;;  %vm3491_vm13 = vcmp.eq.s32.totalorder %v12184_v33, 2  ;;  %v15934_v35 = vld [vmem:[#allocation8_spill] sm:$0xff] }
 0x4be   : > { %vm12202_vm9 = vcmp.le.f32.partialorder %v15911_v52, 0.7853982  ;;  %4085 = vmatpush1.msra.mxu0 %v3287_v48  ;;  %v2966_v26 = vand.u32 3, %v2965_v54  ;;  %v2854_v10 = vsub.s32 4, %v15917_v3  ;;  %vm3588_vm7 = vweird.f32 %v11510_v14 }
 0x4bf   : > { %v3168_v55 = vsel %vm12202_vm9, %v15910_v24, %v15916_v38  ;;  %v3490_v4 = vsel %vm3488_vm4, %v11981_v59, %v3489_v25  ;;  %v3493_v22 = vsel %vm3491_vm13, %v3492_v41, %v12134_v6  ;;  %vm15918_vm12 = vcmp.lt.s32.totalorder %v15910_v24, 0 }
 0x4c0   : > { %8781 = vcosq.f32 %v3168_v55  ;;  %v3167_v57 = vsel %vm15918_vm12, %v3166_v37, %v15915_v5  ;;  %v12221_v61 = vsel %vm3588_vm7, nan, %v3598_v56  ;;  %vm2964_vm10 = vweird.f32 %v15900_v34 }
 0x4c1   : > { %v3169_v0 = vsel %vm12202_vm9, 0, %v3167_v57  ;;  %8783 = vsinq.f32 %v3168_v55  ;;  %vm15920_vm5 = vcmp.lt.s32.totalorder %v15919_v28, 0  ;;  %vm3487_vm0 = vcmp.lt.s32.totalorder %v12184_v33, 2 }
 0x4c2   : > { %v2855_v14 = vsel %vm15920_vm5, %v2854_v10, %v15917_v3  ;;  %v3173_v59 = vadd.s32 3, %v3169_v0  ;;  %vm2860_vm11 = vweird.f32 %v15919_v28  ;;  %v3062_v1 = vsub.s32 4, %v15922_v2  ;;  %v8774_v50 = vpop.eup %8773  ;;  %v15936_v10 = vld [vmem:[#allocation26_spill] sm:$0xff] }
 0x4c3   : > { %v2857_v27 = vsel %vm11388_vm1, 0, %v2855_v14  ;;  %vm4011_vm2 = vcmp.eq.s32.totalorder %v12129_v31, 2  ;;  %vm2967_vm8 = vcmp.lt.s32.totalorder %v2966_v26, 2  ;;  %vm2968_vm14 = vcmp.eq.s32.totalorder %v2966_v26, 0  ;;  %v8776_v58 = vpop.eup %8775 }
 0x4c4   : > { %vm2971_vm9 = vcmp.eq.s32.totalorder %v2966_v26, 2  ;;  %v2861_v9 = vadd.s32 3, %v2857_v27  ;;  %vm4008_vm4 = vcmp.eq.s32.totalorder %v12129_v31, 0  ;;  %v2865_v43 = vxor.u32 2147483648, %v15923_v47 }
 0x4c5   : > { %v2868_v51 = vxor.u32 2147483648, %v15924_v19  ;;  %vm15926_vm1 = vcmp.lt.s32.totalorder %v15925_v11, 0  ;;  %v15928_v45 = vand.u32 2147483647, %v15927_v32  ;;  %v2972_v13 = vxor.u32 2147483648, %v8774_v50 }
 0x4c6   : > { %v3063_v17 = vsel %vm15926_vm1, %v3062_v1, %v15922_v2  ;;  %v2862_v49 = vand.u32 3, %v2861_v9  ;;  %v2542_v60 = vsub.s32 4, %v15932_v8  ;;  %v2969_v36 = vxor.u32 2147483648, %v8776_v58 }
 0x4c7   : > { %vm12243_vm13 = vcmp.le.f32.partialorder %v15928_v45, 0.7853982  ;;  %v3065_v30 = vsel %vm11477_vm3, 0, %v3063_v17  ;;  %v3174_v20 = vand.u32 3, %v3173_v59  ;;  %v3073_v44 = vxor.u32 2147483648, %v15933_v63  ;;  %v15944_v45 = vld [vmem:[#allocation38_spill] sm:$0xff] }
 0x4c8   : > { %v2544_v15 = vsel %vm12243_vm13, %v15927_v32, %v15934_v35  ;;  %v2973_v25 = vsel %vm2971_vm9, %v2972_v13, %v8776_v58  ;;  %vm2863_vm5 = vcmp.lt.s32.totalorder %v2862_v49, 2  ;;  %vm2864_vm1 = vcmp.eq.s32.totalorder %v2862_v49, 0  ;;  %v8778_v52 = vpop.eup %8777  ;;  %v15945_v13 = vld [vmem:[#allocation37_spill] sm:$0xff] }
 0x4c9   : > { %vm2867_vm7 = vcmp.eq.s32.totalorder %v2862_v49, 2  ;;  %v2970_v41 = vsel %vm2968_vm14, %v8774_v50, %v2969_v36  ;;  %v2866_v54 = vsel %vm2864_vm1, %v15924_v19, %v2865_v43  ;;  %v3069_v48 = vadd.s32 3, %v3065_v30  ;;  %v8780_v37 = vpop.eup %8779 }
 0x4ca   : > { %v2869_v53 = vsel %vm2867_vm7, %v2868_v51, %v15923_v47  ;;  %vm3484_vm3 = vweird.f32 %v11353_v40  ;;  %v2974_v12 = vsel %vm2967_vm8, %v2970_v41, %v2973_v25  ;;  %vm15935_vm12 = vcmp.lt.s32.totalorder %v15927_v32, 0  ;;  %v15939_v47 = vld [vmem:[#allocation12_spill] sm:$0xff]  ;;  %v15943_v51 = vld [vmem:[#allocation25_spill] sm:$0xff]  ;;  %v15951_v25 = vld [vmem:[#allocation31_spill] sm:$0xff] }
 0x4cb   : > { %v2870_v56 = vsel %vm2863_vm5, %v2866_v54, %v2869_v53  ;;  %v2543_v5 = vsel %vm15935_vm12, %v2542_v60, %v15932_v8  ;;  %8785 = vcosq.f32 %v2544_v15  ;;  %v4012_v38 = vxor.u32 2147483648, %v8778_v52  ;;  %v15947_v60 = vld [vmem:[#allocation35_spill] sm:$0xff] }
 0x4cc   : > { %v2975_v55 = vsel %vm2964_vm10, nan, %v2974_v12  ;;  %v3070_v3 = vand.u32 3, %v3069_v48  ;;  %v3076_v57 = vxor.u32 2147483648, %v15936_v10  ;;  %v4009_v0 = vxor.u32 2147483648, %v8780_v37  ;;  %v15952_v48 = vld [vmem:[#allocation21_spill] sm:$0xff]  ;;  %v15953_v12 = vld [vmem:[#allocation14_spill] sm:$0xff] }
 0x4cd   : > { %v3494_v14 = vsel %vm3487_vm0, %v3490_v4, %v3493_v22  ;;  %4086 = vmatprep.subr.mxu0 %v2975_v55  ;;  %v2871_v26 = vsel %vm2860_vm11, nan, %v2870_v56  ;;  %8787 = vsinq.f32 %v2544_v15  ;;  %v8782_v59 = vpop.eup %8781  ;;  %v4013_v6 = vsel %vm4011_vm2, %v4012_v38, %v8780_v37 }
 0x4ce   : > { %vm3175_vm8 = vcmp.lt.s32.totalorder %v3174_v20, 2  ;;  %vm3176_vm14 = vcmp.eq.s32.totalorder %v3174_v20, 0  ;;  %4087 = vmatpush1.msra.mxu0 %v2871_v26  ;;  %v2545_v34 = vsel %vm12243_vm13, 0, %v2543_v5  ;;  %v4010_v27 = vsel %vm4008_vm4, %v8778_v52, %v4009_v0  ;;  %v8784_v4 = vpop.eup %8783 }
 0x4cf   : > { %v3180_v33 = vxor.u32 2147483648, %v8782_v59  ;;  %vm3072_vm10 = vcmp.eq.s32.totalorder %v3070_v3, 0  ;;  %vm3075_vm0 = vcmp.eq.s32.totalorder %v3070_v3, 2  ;;  %vm15937_vm11 = vcmp.lt.s32.totalorder %v12129_v31, 2 }
 0x4d0   : > { %v4014_v22 = vsel %vm15937_vm11, %v4010_v27, %v4013_v6  ;;  %vm3179_vm9 = vcmp.eq.s32.totalorder %v3174_v20, 2  ;;  %v3074_v28 = vsel %vm3072_vm10, %v15936_v10, %v3073_v44  ;;  %v3077_v2 = vsel %vm3075_vm0, %v3076_v57, %v15933_v63  ;;  %v15950_v44 = vld [vmem:[#allocation19_spill] sm:$0xff]  ;;  %v15956_v57 = vld [vmem:[#allocation17_spill] sm:$0xff] }
 0x4d1   : > { %vm15938_vm2 = vweird.f32 %v11812_v18  ;;  %v3177_v9 = vxor.u32 2147483648, %v8784_v4  ;;  %v3181_v50 = vsel %vm3179_vm9, %v3180_v33, %v8784_v4  ;;  %v15940_v43 = vand.u32 2147483647, %v15939_v47  ;;  %v15957_v4 = vld [vmem:[#allocation41_spill] sm:$0xff] }
 0x4d2   : > { %v4015_v1 = vsel %vm15938_vm2, nan, %v4014_v22  ;;  %vm3071_vm13 = vcmp.lt.s32.totalorder %v3070_v3, 2  ;;  %v2549_v31 = vadd.s32 3, %v2545_v34  ;;  %v2750_v17 = vsub.s32 4, %v15943_v51 }
 0x4d3   : > { %vm12287_vm4 = vcmp.le.f32.partialorder %v15940_v43, 0.7853982  ;;  %4171 = vmatprep.subr.mxu1 %v4015_v1  ;;  %v3178_v18 = vsel %vm3176_vm14, %v8782_v59, %v3177_v9  ;;  %v3078_v58 = vsel %vm3071_vm13, %v3074_v28, %v3077_v2  ;;  %v2438_v49 = vsub.s32 4, %v15945_v13  ;;  %v8184_v1 = vld [vmem:[%s15404_s2 + $0x20] sm:$0xff] }
 0x4d4   : > { %v2752_v7 = vsel %vm12287_vm4, %v15939_v47, %v15944_v45  ;;  %4172 = vmatpush1.msra.mxu1 %v12145_v42  ;;  %v3495_v46 = vsel %vm3484_vm3, nan, %v3494_v14  ;;  %vm3172_vm7 = vweird.f32 %v15910_v24  ;;  %v3182_v30 = vsel %vm3175_vm8, %v3178_v18, %v3181_v50 }
 0x4d5   : > { %8789 = vcosq.f32 %v2752_v7  ;;  %4173 = vmatprep.subr.mxu1 %v12221_v61  ;;  %vm3068_vm12 = vweird.f32 %v15925_v11  ;;  %v3183_v8 = vsel %vm3172_vm7, nan, %v3182_v30  ;;  %vm15946_vm5 = vcmp.lt.s32.totalorder %v15939_v47, 0 }
 0x4d6   : > { %4174 = vmatpush1.msra.mxu1 %v3495_v46  ;;  %v2751_v42 = vsel %vm15946_vm5, %v2750_v17, %v15943_v51  ;;  %8791 = vsinq.f32 %v2752_v7  ;;  %vm15948_vm1 = vcmp.lt.s32.totalorder %v15947_v60, 0  ;;  %v3079_v40 = vsel %vm3068_vm12, nan, %v3078_v58  ;;  %v8185_v7 = vld [vmem:[%s15404_s2 + $0x28] sm:$0xff]  ;;  %v8186_v46 = vld [vmem:[%s15404_s2 + $0x30] sm:$0xff] }
 0x4d7   : > { %v2439_v61 = vsel %vm15948_vm1, %v2438_v49, %v15945_v13  ;;  %4175 = vmatprep.subr.mxu1 %v3183_v8  ;;  %v2550_v36 = vand.u32 3, %v2549_v31  ;;  %v2753_v11 = vsel %vm12287_vm4, 0, %v2751_v42  ;;  %v2646_v35 = vsub.s32 4, %v15950_v44  ;;  %v12363_v8 = vpop.permute.xlu1 %4038 }
 0x4d8   : > { %v2441_v24 = vsel %vm11118_vm6, 0, %v2439_v61  ;;  %4176 = vmatpush1.msra.mxu1 %v3079_v40  ;;  %v8786_v15 = vpop.eup %8785  ;;  %v2449_v41 = vxor.u32 2147483648, %v15951_v25  ;;  %v2452_v52 = vxor.u32 2147483648, %v15952_v48  ;;  %vm15954_vm3 = vcmp.lt.s32.totalorder %v15953_v12, 0 }
 0x4d9   : > { %v2445_v20 = vadd.s32 3, %v2441_v24  ;;  %v2556_v54 = vxor.u32 2147483648, %v8786_v15  ;;  %v2647_v56 = vsel %vm15954_vm3, %v2646_v35, %v15950_v44  ;;  %vm2548_vm6 = vweird.f32 %v15927_v32 }
 0x4da   : > { %v8788_v5 = vpop.eup %8787  ;;  %vm2555_vm8 = vcmp.eq.s32.totalorder %v2550_v36, 2  ;;  %v2757_v37 = vadd.s32 3, %v2753_v11  ;;  %v2649_v55 = vsel %vm11142_vm15, 0, %v2647_v56  ;;  %vm2551_vm14 = vcmp.lt.s32.totalorder %v2550_v36, 2 }
 0x4db   : > { %v2446_v53 = vand.u32 3, %v2445_v20  ;;  %vm2552_vm10 = vcmp.eq.s32.totalorder %v2550_v36, 0  ;;  %v2553_v3 = vxor.u32 2147483648, %v8788_v5  ;;  %v2557_v10 = vsel %vm2555_vm8, %v2556_v54, %v8788_v5  ;;  %v12365_v42 = vpop.permute.xlu1 %4028 }
 0x4dc   : > { %v2657_v0 = vxor.u32 2147483648, %v15956_v57  ;;  %v2653_v6 = vadd.s32 3, %v2649_v55  ;;  %v2758_v27 = vand.u32 3, %v2757_v37  ;;  %v2660_v22 = vxor.u32 2147483648, %v15957_v4 }
 0x4dd   : > { %vm2447_vm0 = vcmp.lt.s32.totalorder %v2446_v53, 2  ;;  %vm2448_vm11 = vcmp.eq.s32.totalorder %v2446_v53, 0  ;;  %vm2451_vm9 = vcmp.eq.s32.totalorder %v2446_v53, 2  ;;  %v2554_v14 = vsel %vm2552_vm10, %v8786_v15, %v2553_v3  ;;  %v12379_v15 = vpop.permute.xlu0 %4043 }
 0x4de   : > { %v2450_v26 = vsel %vm2448_vm11, %v15952_v48, %v2449_v41  ;;  %v2453_v59 = vsel %vm2451_vm9, %v2452_v52, %v15951_v25  ;;  %v2558_v34 = vsel %vm2551_vm14, %v2554_v14, %v2557_v10  ;;  %vm2444_vm15 = vweird.f32 %v15947_v60 }
 0x4df   : > { %v2454_v33 = vsel %vm2447_vm0, %v2450_v26, %v2453_v59  ;;  %v2559_v28 = vsel %vm2548_vm6, nan, %v2558_v34  ;;  %v2654_v2 = vand.u32 3, %v2653_v6  ;;  %vm2763_vm13 = vcmp.eq.s32.totalorder %v2758_v27, 2 }
 0x4e0   : > { %4088 = vmatprep.subr.mxu0 %v2559_v28  ;;  %v2455_v50 = vsel %vm2444_vm15, nan, %v2454_v33  ;;  %vm15958_vm7 = vcmask 261120   ;;  %v15959_v45 = vmov 0.0   ;;  %vm2760_vm12 = vcmp.eq.s32.totalorder %v2758_v27, 0 }
 0x4e1   : > { %4089 = vmatpush1.msra.mxu0 %v2455_v50  ;;  %vm2656_vm2 = vcmp.eq.s32.totalorder %v2654_v2, 0  ;;  %vm2659_vm4 = vcmp.eq.s32.totalorder %v2654_v2, 2  ;;  %vm2655_vm5 = vcmp.lt.s32.totalorder %v2654_v2, 2  ;;  %vm2759_vm1 = vcmp.lt.s32.totalorder %v2758_v27, 2  ;;  %vm15960_vm6 = vmmov %vm15958_vm7  ;;  %v12390_v10 = vpop.permute.xlu0 %4033 }
 0x4e2   : > { %v8790_v9 = vpop.eup %8789  ;;  %v2658_v31 = vsel %vm2656_vm2, %v15957_v4, %v2657_v0  ;;  %v2661_v32 = vsel %vm2659_vm4, %v2660_v22, %v15956_v57  ;;  %8192 = vmatmul.mubr.msk.f32.vlgmr.msra.gmra.mxu0 %vm15958_vm7, %v8184_v1  ;;  %vm2756_vm3 = vweird.f32 %v15939_v47  ;;  %vm2652_vm8 = vweird.f32 %v15953_v12  ;;  %vm15961_vm14 = vmmov %vm15960_vm6  ;;  %v8187_v47 = vld [vmem:[%s15404_s2 + $0x38] sm:$0xff] }
 0x4e3   : > { %v2764_v43 = vxor.u32 2147483648, %v8790_v9  ;;  %v8792_v19 = vpop.eup %8791  ;;  %4128 = vmatprep.mubr.f32.mxu0 %v15959_v45  ;;  %v2662_v58 = vsel %vm2655_vm5, %v2658_v31, %v2661_v32  ;;  %vm15962_vm10 = vmmov %vm15960_vm6 }
 0x4e4   : > { %v2761_v51 = vxor.u32 2147483648, %v8792_v19  ;;  %v2663_v30 = vsel %vm2652_vm8, nan, %v2662_v58  ;;  %vm15963_vm0 = vmmov %vm15960_vm6 }
 0x4e5   : > { %v2765_v17 = vsel %vm2763_vm13, %v2764_v43, %v8792_v19  ;;  %vm15964_vm11 = vmmov %vm15963_vm0 }
 0x4e6   : > { %v2762_v18 = vsel %vm2760_vm12, %v8790_v9, %v2761_v51  ;;  %8193 = vmatmul.mubr.msk.f32.gmra.mxu0 %vm15960_vm6, %v8185_v7  ;;  %vm15965_vm9 = vmmov %vm15963_vm0 }
 0x4e7   : > { %v2766_v13 = vsel %vm2759_vm1, %v2762_v18, %v2765_v17  ;;  %4134 = vmatprep.mubr.f32.mxu0 %v15959_v45  ;;  %vm15966_vm15 = vmmov %vm15963_vm0 }
 0x4e8   : > { %v2767_v49 = vsel %vm2756_vm3, nan, %v2766_v13 }
 0x4e9   : > { %4177 = vmatprep.subr.mxu1 %v2767_v49 }
 0x4ea   : > { %4178 = vmatpush1.msra.mxu1 %v2663_v30  ;;  %8194 = vmatmul.mubr.msk.f32.gmra.mxu0 %vm15962_vm10, %v8186_v46 }
 0x4eb   : > { %8196 = vmatmul.mubr.msk.f32.vlgmr.msra.gmra.mxu1 %vm15961_vm14, %v8184_v1  ;;  %4140 = vmatprep.mubr.f32.mxu0 %v15959_v45 }
 0x4ec   : > { %4217 = vmatprep.mubr.f32.mxu1 %v15959_v45 }
 0x4ee   : > { %8195 = vmatmul.mubr.msk.f32.gmra.mxu0 %vm15964_vm11, %v8187_v47 }
 0x4ef   : > { %8197 = vmatmul.mubr.msk.f32.gmra.mxu1 %vm15963_vm0, %v8185_v7  ;;  %6006 = vmatprep.mubr.f32.mxu0 %v15959_v45 }
 0x4f0   : > { %4223 = vmatprep.mubr.f32.mxu1 %v15959_v45 }
 0x4f3   : > { %8198 = vmatmul.mubr.msk.f32.gmra.mxu1 %vm15965_vm9, %v8186_v46 }
 0x4f4   : > { %4229 = vmatprep.mubr.f32.mxu1 %v15959_v45 }
 0x4f7   : > { %8199 = vmatmul.mubr.msk.f32.gmra.mxu1 %vm15966_vm15, %v8187_v47 }
 0x4f8   : > { %6095 = vmatprep.mubr.f32.mxu1 %v15959_v45 }
 0x5a2   : > { %v4124_v60 = vpop.f32.mrf.mxu0 }
 0x5a3   : > { %v12368_v61 = vadd.f32 %v4124_v60, %v12365_v42 }
 0x5a4   : > { %v4126_v40 = vpop.f32.mrf.mxu0 }
 0x5a5   : > { %15967 = vst [vmem:[#allocation11_spill] sm:$0xff] %v12368_v61  ;;  %v4236_v36 = vand.u32 2147483647, %v12368_v61  ;;  %v4239_v63 = vand.u32 2139095040, %v12368_v61  ;;  %v12373_v24 = vadd.f32 %v4126_v40, %v12365_v42 }
 0x5a6   : > { %v4130_v38 = vpop.f32.mrf.mxu0 }
 0x5a7   : > { %15968 = vst [vmem:[#allocation9_spill] sm:$0xff] %v12373_v24  ;;  %v4240_v11 = vshrl.u32 %v4239_v63, 23  ;;  %v4243_v20 = vand.u32 8388607, %v4236_v36  ;;  %v15539_v44 = vand.u32 2147483647, %v12373_v24  ;;  %v12396_v6 = vadd.f32 %v4130_v38, %v12390_v10 }
 0x5a8   : > { %v4343_v35 = vand.u32 2139095040, %v12373_v24 }
 0x5a9   : > { %v8200_v25 = vadd.s32 4294967169, %v4240_v11  ;;  %v4244_v52 = vor.u32 8388608, %v4243_v20  ;;  %v12386_v56 = vand.u32 8388607, %v15539_v44  ;;  %15970 = vst [vmem:[#allocation10_spill] sm:$0xff] %v12396_v6 }
 0x5aa   : > { %v4344_v54 = vshrl.u32 %v4343_v35, 23 }
 0x5ab   : > { %v4213_v41 = vpop.f32.mrf.mxu1  ;;  %v4246_v53 = vadd.s32 1, %v8200_v25  ;;  %v12392_v14 = vshll.u32 %v4244_v52, 8  ;;  %v4348_v59 = vor.u32 8388608, %v12386_v56 }
 0x5ac   : > { %v12382_v48 = vadd.f32 %v4213_v41, %v12365_v42  ;;  %v8204_v12 = vadd.s32 4294967169, %v4344_v54 }
 0x5ad   : > { %vm4247_vm2 = vcmp.gt.s32.totalorder %v4246_v53, 0  ;;  %v4215_v52 = vpop.f32.mrf.mxu1 }
 0x5ae   : > { %15969 = vst [vmem:[#allocation22_spill] sm:$0xff] %v12382_v48  ;;  %v4444_v5 = vand.u32 2147483647, %v12382_v48  ;;  %v4447_v37 = vand.u32 2139095040, %v12382_v48  ;;  %v4248_v55 = vsel %vm4247_vm2, %v4246_v53, 0  ;;  %v4350_v3 = vadd.s32 1, %v8204_v12 }
 0x5af   : > { %v4249_v57 = vshrl.u32 %v4248_v55, 5  ;;  %v4250_v0 = vand.u32 31, %v4248_v55 }
 0x5b0   : > { %v4448_v26 = vshrl.u32 %v4447_v37, 23  ;;  %v4451_v33 = vand.u32 8388607, %v4444_v5  ;;  %vm4351_vm4 = vcmp.gt.s32.totalorder %v4350_v3, 0 }
 0x5b1   : > { %v4251_v34 = vsub.s32 32, %v4250_v0  ;;  %v4253_v27 = vshll.u32 %v15698_v62, %v4250_v0  ;;  %v4256_v4 = vshll.u32 %v15708_v29, %v4250_v0  ;;  %v4259_v22 = vshll.u32 %v15822_v39, %v4250_v0 }
 0x5b2   : > { %v4262_v28 = vshll.u32 %v15823_v16, %v4250_v0  ;;  %v4265_v2 = vshll.u32 %v15709_v23, %v4250_v0  ;;  %vm4268_vm13 = vcmp.lt.s32.totalorder %v4249_v57, 1  ;;  %vm4269_vm7 = vcmp.lt.s32.totalorder %v4249_v57, 2 }
 0x5b3   : > { %v4254_v1 = vshrl.u32 %v15708_v29, %v4251_v34  ;;  %v4257_v9 = vshrl.u32 %v15822_v39, %v4251_v34  ;;  %v4260_v50 = vshrl.u32 %v15823_v16, %v4251_v34  ;;  %v4252_v43 = vshrl.u32 %v15698_v62, %v4251_v34 }
 0x5b4   : > { %v4263_v19 = vshrl.u32 %v15709_v23, %v4251_v34  ;;  %v4266_v31 = vshrl.u32 %v15697_v21, %v4251_v34  ;;  %v8208_v7 = vadd.s32 4294967169, %v4448_v26  ;;  %vm4270_vm12 = vcmp.lt.s32.totalorder %v4249_v57, 3 }
 0x5b5   : > { %v4255_v32 = vor.u32 %v4254_v1, %v4253_v27  ;;  %v4258_v51 = vor.u32 %v4257_v9, %v4256_v4  ;;  %v4261_v17 = vor.u32 %v4260_v50, %v4259_v22  ;;  %vm4271_vm5 = vcmp.lt.s32.totalorder %v4249_v57, 4 }
 0x5b6   : > { %v4264_v18 = vor.u32 %v4263_v19, %v4262_v28  ;;  %v4267_v58 = vor.u32 %v4266_v31, %v4265_v2  ;;  %v4454_v63 = vadd.s32 1, %v8208_v7  ;;  %v4452_v35 = vor.u32 8388608, %v4451_v33 }
 0x5b7   : > { %v4272_v13 = vsel %vm4268_vm13, %v4252_v43, %v4255_v32  ;;  %v4273_v49 = vsel %vm4271_vm5, %v4261_v17, 2102212464  ;;  %v4276_v46 = vsel %vm4268_vm13, %v4255_v32, %v4258_v51  ;;  %v4280_v30 = vsel %vm4268_vm13, %v4258_v51, %v4261_v17 }
 0x5b8   : > { %v4274_v47 = vsel %vm4270_vm12, %v4258_v51, %v4273_v49  ;;  %v4277_v60 = vsel %vm4271_vm5, %v4264_v18, 920167782  ;;  %v4281_v40 = vsel %vm4271_vm5, %v4267_v58, 1326507024  ;;  %v4352_v25 = vsel %vm4351_vm4, %v4350_v3, 0 }
 0x5b9   : > { %v4278_v11 = vsel %vm4270_vm12, %v4261_v17, %v4277_v60  ;;  %v4282_v20 = vsel %vm4270_vm12, %v4264_v18, %v4281_v40  ;;  %v4275_v41 = vsel %vm4269_vm7, %v4272_v13, %v4274_v47  ;;  %vm4455_vm1 = vcmp.gt.s32.totalorder %v4454_v63, 0 }
 0x5ba   : > { %v4279_v54 = vsel %vm4269_vm7, %v4276_v46, %v4278_v11  ;;  %v4283_v53 = vsel %vm4269_vm7, %v4280_v30, %v4282_v20  ;;  %v4456_v55 = vsel %vm4455_vm1, %v4454_v63, 0  ;;  %v12427_v0 = vand.u32 31, %v4352_v25 }
 0x5bb   : > { %v12419_v12 = vmul.u32.u64.low %v12392_v14, %v4283_v53  ;;  %v12420_v56 = vmul.u32.u64.high %v12392_v14, %v4283_v53, %v12419_v12  ;;  %v12423_v37 = vmul.u32.u64.low %v12392_v14, %v4279_v54  ;;  %v12424_v38 = vmul.u32.u64.high %v12392_v14, %v4279_v54, %v12423_v37 }
 0x5bc   : > { %v4655_v3 = vand.u32 2139095040, %v12396_v6  ;;  %v4458_v26 = vand.u32 31, %v4456_v55  ;;  %v12430_v34 = vshll.u32 %v4452_v35, 8  ;;  %v12432_v57 = vshll.u32 %v4348_v59, 8 }
 0x5bd   : > { %v12435_v27 = vadd.f32 %v4215_v52, %v12365_v42  ;;  %v4291_v33 = vmul.u32 %v12392_v14, %v4275_v41  ;;  %v4457_v4 = vshrl.u32 %v4456_v55, 5  ;;  %v12438_v22 = vshrl.u32 %v4352_v25, 5 }
 0x5be   : > { %v12441_v28 = vsub.s32 32, %v12427_v0  ;;  %vm4293_vm3 = vc.u32 %v12420_v56, %v12423_v37  ;;  %v4294_v2 = vadd.s32 1, %v12424_v38  ;;  %v4459_v1 = vsub.s32 32, %v4458_v26 }
 0x5bf   : > { %15971 = vst [vmem:[#allocation24_spill] sm:$0xff] %v12435_v27  ;;  %v4357_v59 = vshll.u32 %v15698_v62, %v12427_v0  ;;  %v4461_v42 = vshll.u32 %v15698_v62, %v4458_v26  ;;  %v4464_v9 = vshll.u32 %v15708_v29, %v4458_v26  ;;  %v4467_v14 = vshll.u32 %v15822_v39, %v4458_v26 }
 0x5c0   : > { %v4470_v50 = vshll.u32 %v15823_v16, %v4458_v26  ;;  %v4295_v43 = vsel %vm4293_vm3, %v4294_v2, %v12424_v38  ;;  %v4460_v19 = vshrl.u32 %v15698_v62, %v4459_v1  ;;  %v4462_v31 = vshrl.u32 %v15708_v29, %v4459_v1 }
 0x5c1   : > { %v4465_v32 = vshrl.u32 %v15822_v39, %v4459_v1  ;;  %v4296_v51 = vadd.s32 %v4295_v43, %v4291_v33  ;;  %v4468_v17 = vshrl.u32 %v15823_v16, %v4459_v1  ;;  %v4471_v7 = vshrl.u32 %v15709_v23, %v4459_v1 }
 0x5c2   : > { %v4473_v18 = vshll.u32 %v15709_v23, %v4458_v26  ;;  %v4463_v58 = vor.u32 %v4462_v31, %v4461_v42  ;;  %v4474_v49 = vshrl.u32 %v15697_v21, %v4459_v1  ;;  %vm4476_vm6 = vcmp.lt.s32.totalorder %v4457_v4, 1 }
 0x5c3   : > { %v4466_v13 = vor.u32 %v4465_v32, %v4464_v9  ;;  %v4297_v46 = vadd.s32 536870912, %v4296_v51  ;;  %v4469_v30 = vor.u32 %v4468_v17, %v4467_v14  ;;  %v4472_v47 = vor.u32 %v4471_v7, %v4470_v50 }
 0x5c4   : > { %vm4477_vm8 = vcmp.lt.s32.totalorder %v4457_v4, 2  ;;  %v4475_v60 = vor.u32 %v4474_v49, %v4473_v18  ;;  %vm4478_vm14 = vcmp.lt.s32.totalorder %v4457_v4, 3  ;;  %vm4479_vm10 = vcmp.lt.s32.totalorder %v4457_v4, 4 }
 0x5c5   : > { %v4480_v40 = vsel %vm4476_vm6, %v4460_v19, %v4463_v58  ;;  %v12460_v63 = vshrl.u32 %v4297_v46, 30  ;;  %v4481_v11 = vsel %vm4479_vm10, %v4469_v30, 2102212464  ;;  %v4484_v20 = vsel %vm4476_vm6, %v4463_v58, %v4466_v13 }
 0x5c6   : > { %v4485_v35 = vsel %vm4479_vm10, %v4472_v47, 920167782  ;;  %v4482_v25 = vsel %vm4478_vm14, %v4466_v13, %v4481_v11  ;;  %v4488_v54 = vsel %vm4476_vm6, %v4466_v13, %v4469_v30  ;;  %v4489_v53 = vsel %vm4479_vm10, %v4475_v60, 1326507024 }
 0x5c7   : > { %15972 = vst [vmem:[#allocation23_spill] sm:$0xff] %v12460_v63  ;;  %v4486_v41 = vsel %vm4478_vm14, %v4469_v30, %v4485_v35  ;;  %v4299_v52 = vshll.u32 %v12460_v63, 30  ;;  %v4490_v38 = vsel %vm4478_vm14, %v4472_v47, %v4489_v53  ;;  %v4360_v55 = vshll.u32 %v15708_v29, %v12427_v0 }
 0x5c8   : > { %v4487_v12 = vsel %vm4477_vm8, %v4484_v20, %v4486_v41  ;;  %v4491_v26 = vsel %vm4477_vm8, %v4488_v54, %v4490_v38  ;;  %v4363_v1 = vshll.u32 %v15822_v39, %v12427_v0  ;;  %v4483_v9 = vsel %vm4477_vm8, %v4480_v40, %v4482_v25 }
 0x5c9   : > { %v12468_v33 = vmul.u32.u64.low %v12430_v34, %v4487_v12  ;;  %v12469_v2 = vmul.u32.u64.high %v12430_v34, %v4487_v12, %v12468_v33  ;;  %v12474_v42 = vsub.s32 %v4296_v51, %v4299_v52  ;;  %v4358_v43 = vshrl.u32 %v15708_v29, %v12441_v28 }
 0x5ca   : > { %v12478_v14 = vmul.u32.u64.low %v12430_v34, %v4491_v26  ;;  %v12479_v50 = vmul.u32.u64.high %v12430_v34, %v4491_v26, %v12478_v14  ;;  %v4361_v19 = vshrl.u32 %v15822_v39, %v12441_v28  ;;  %v4364_v31 = vshrl.u32 %v15823_v16, %v12441_v28 }
 0x5cb   : > { %v4366_v32 = vshll.u32 %v15823_v16, %v12427_v0  ;;  %v4302_v51 = vsub.s32 0, %v12474_v42  ;;  %v4367_v4 = vshrl.u32 %v15709_v23, %v12441_v28  ;;  %v4369_v17 = vshll.u32 %v15709_v23, %v12427_v0 }
 0x5cc   : > { %v4370_v7 = vshrl.u32 %v15697_v21, %v12441_v28  ;;  %v4502_v18 = vadd.s32 1, %v12469_v2  ;;  %v4359_v58 = vor.u32 %v4358_v43, %v4357_v59  ;;  %v4362_v13 = vor.u32 %v4361_v19, %v4360_v55 }
 0x5cd   : > { %v4365_v49 = vor.u32 %v4364_v31, %v4363_v1  ;;  %v8201_v46 = vmin.u32 %v4302_v51, %v12474_v42  ;;  %v4499_v30 = vmul.u32 %v12430_v34, %v4483_v9  ;;  %vm4501_vm0 = vc.u32 %v12479_v50, %v12468_v33 }
 0x5ce   : > { %v4368_v47 = vor.u32 %v4367_v4, %v4366_v32  ;;  %v4503_v60 = vsel %vm4501_vm0, %v4502_v18, %v12469_v2  ;;  %v4356_v0 = vshrl.u32 %v15698_v62, %v12441_v28  ;;  %v4371_v40 = vor.u32 %v4370_v7, %v4369_v17 }
 0x5cf   : > { %v4551_v11 = vand.u32 2139095040, %v12435_v27  ;;  %v4304_v20 = vclz %v8201_v46  ;;  %v4504_v59 = vadd.s32 %v4503_v60, %v4499_v30  ;;  %vm4372_vm11 = vcmp.lt.s32.totalorder %v12438_v22, 1 }
 0x5d0   : > { %vm4375_vm9 = vcmp.lt.s32.totalorder %v12438_v22, 4  ;;  %vm4374_vm15 = vcmp.lt.s32.totalorder %v12438_v22, 3  ;;  %v4380_v35 = vsel %vm4372_vm11, %v4359_v58, %v4362_v13  ;;  %vm4373_vm2 = vcmp.lt.s32.totalorder %v12438_v22, 2 }
 0x5d1   : > { %v4377_v34 = vsel %vm4375_vm9, %v4365_v49, 2102212464  ;;  %v4381_v25 = vsel %vm4375_vm9, %v4368_v47, 920167782  ;;  %v8202_v41 = vadd.s32 4294967294, %v4304_v20  ;;  %v4505_v54 = vadd.s32 536870912, %v4504_v59 }
 0x5d2   : > { %v4382_v53 = vsel %vm4374_vm15, %v4365_v49, %v4381_v25  ;;  %v4376_v28 = vsel %vm4372_vm11, %v4356_v0, %v4359_v58  ;;  %v4384_v12 = vsel %vm4372_vm11, %v4362_v13, %v4365_v49  ;;  %v4385_v38 = vsel %vm4375_vm9, %v4371_v40, 1326507024 }
 0x5d3   : > { %v4383_v52 = vsel %vm4373_vm2, %v4380_v35, %v4382_v53  ;;  %vm8203_vm4 = vcmp.lt.s32.totalorder %v8202_v41, 0  ;;  %v12511_v55 = vshrl.u32 %v4505_v54, 30  ;;  %v4378_v26 = vsel %vm4374_vm15, %v4362_v13, %v4377_v34 }
 0x5d4   : > { %v4386_v2 = vsel %vm4374_vm15, %v4368_v47, %v4385_v38  ;;  %v4307_v1 = vsel %vm8203_vm4, 0, %v8202_v41  ;;  %v12516_v14 = vmul.u32.u64.low %v12432_v57, %v4383_v52  ;;  %v12517_v43 = vmul.u32.u64.high %v12432_v57, %v4383_v52, %v12516_v14 }
 0x5d5   : > { %15973 = vst [vmem:[#allocation40_spill] sm:$0xff] %v12511_v55  ;;  %v4387_v9 = vsel %vm4373_vm2, %v4384_v12, %v4386_v2  ;;  %v4507_v19 = vshll.u32 %v12511_v55, 30  ;;  %v4656_v31 = vshrl.u32 %v4655_v3, 23  ;;  %v4552_v4 = vshrl.u32 %v4551_v11, 23 }
 0x5d6   : > { %v12524_v32 = vmul.u32.u64.low %v12432_v57, %v4387_v9  ;;  %v12525_v51 = vmul.u32.u64.high %v12432_v57, %v4387_v9, %v12524_v32  ;;  %v4312_v17 = vsub.s32 4294967266, %v4307_v1  ;;  %v4379_v18 = vsel %vm4373_vm2, %v4376_v28, %v4378_v26 }
 0x5d7   : > { %v12527_v7 = vsub.s32 %v4504_v59, %v4507_v19  ;;  %v4398_v58 = vadd.s32 1, %v12517_v43  ;;  %v8212_v13 = vadd.s32 4294967169, %v4552_v4  ;;  %v8216_v46 = vadd.s32 4294967169, %v4656_v31 }
 0x5d8   : > { %v4395_v30 = vmul.u32 %v12432_v57, %v4379_v18  ;;  %vm4397_vm13 = vc.u32 %v12525_v51, %v12516_v14  ;;  %v15538_v3 = vand.u32 2147483647, %v12435_v27  ;;  %v4308_v60 = vsub.s32 32, %v4307_v1 }
 0x5d9   : > { %v4510_v49 = vsub.s32 0, %v12527_v7  ;;  %v4558_v47 = vadd.s32 1, %v8212_v13  ;;  %v4313_v0 = vadd.s32 127, %v4312_v17  ;;  %v4399_v22 = vsel %vm4397_vm13, %v4398_v58, %v12517_v43 }
 0x5da   : > { %v4400_v11 = vadd.s32 %v4399_v22, %v4395_v30  ;;  %v4292_v20 = vadd.s32 %v12423_v37, %v12420_v56  ;;  %v4662_v57 = vadd.s32 1, %v8216_v46  ;;  %v15542_v41 = vand.u32 2147483647, %v12396_v6 }
 0x5db   : > { %v8209_v40 = vmin.u32 %v4510_v49, %v12527_v7  ;;  %vm4559_vm7 = vcmp.gt.s32.totalorder %v4558_v47, 0  ;;  %v4314_v53 = vshll.u32 %v4313_v0, 23  ;;  %v4555_v52 = vand.u32 8388607, %v15538_v3 }
 0x5dc   : > { %v4560_v34 = vsel %vm4559_vm7, %v4558_v47, 0  ;;  %v4401_v35 = vadd.s32 536870912, %v4400_v11  ;;  %v4310_v54 = vshrl.u32 %v4292_v20, %v4308_v60  ;;  %v4309_v26 = vshll.u32 %v12474_v42, %v4307_v1 }
 0x5dd   : > { %v4512_v59 = vclz %v8209_v40  ;;  %v4562_v25 = vand.u32 31, %v4560_v34  ;;  %vm4663_vm5 = vcmp.gt.s32.totalorder %v4662_v57, 0  ;;  %v4500_v56 = vadd.s32 %v12468_v33, %v12479_v50 }
 0x5de   : > { %v12544_v12 = vshrl.u32 %v4401_v35, 30  ;;  %v12554_v9 = vand.u32 8388607, %v15542_v41  ;;  %v4311_v43 = vor.u32 %v4310_v54, %v4309_v26  ;;  %v4315_v19 = vor.u32 4788187, %v4314_v53 }
 0x5df   : > { %v8210_v28 = vadd.s32 4294967294, %v4512_v59  ;;  %v4563_v38 = vsub.s32 32, %v4562_v25  ;;  %v4556_v31 = vor.u32 8388608, %v4555_v52  ;;  %v4561_v42 = vshrl.u32 %v4560_v34, 5 }
 0x5e0   : > { %15974 = vst [vmem:[#allocation20_spill] sm:$0xff] %v12544_v12  ;;  %v4403_v2 = vshll.u32 %v12544_v12, 30  ;;  %v4664_v17 = vsel %vm4663_vm5, %v4662_v57, 0  ;;  %v4565_v50 = vshll.u32 %v15698_v62, %v4562_v25  ;;  %v4568_v18 = vshll.u32 %v15708_v29, %v4562_v25 }
 0x5e1   : > { %vm8211_vm12 = vcmp.lt.s32.totalorder %v8210_v28, 0  ;;  %v4566_v32 = vshrl.u32 %v15708_v29, %v4563_v38  ;;  %v4569_v1 = vshrl.u32 %v15822_v39, %v4563_v38  ;;  %v4572_v58 = vshrl.u32 %v15823_v16, %v4563_v38 }
 0x5e2   : > { %v12549_v37 = vsel %vm8211_vm12, 0, %v8210_v28  ;;  %v12557_v4 = vsub.s32 %v4400_v11, %v4403_v2  ;;  %v4571_v49 = vshll.u32 %v15822_v39, %v4562_v25  ;;  %v4574_v46 = vshll.u32 %v15823_v16, %v4562_v25 }
 0x5e3   : > { %v4520_v33 = vsub.s32 4294967266, %v12549_v37  ;;  %v4575_v30 = vshrl.u32 %v15709_v23, %v4563_v38  ;;  %v4318_v47 = vcvt.s32.f32 %v4311_v43  ;;  %v4567_v60 = vor.u32 %v4566_v32, %v4565_v50 }
 0x5e4   : > { %v4406_v13 = vsub.s32 0, %v12557_v4  ;;  %v4570_v0 = vor.u32 %v4569_v1, %v4568_v18  ;;  %v12568_v40 = vshll.u32 %v4556_v31, 8  ;;  %v4573_v22 = vor.u32 %v4572_v58, %v4571_v49 }
 0x5e5   : > { %v4576_v11 = vor.u32 %v4575_v30, %v4574_v46  ;;  %v4577_v20 = vshll.u32 %v15709_v23, %v4562_v25  ;;  %v4578_v59 = vshrl.u32 %v15697_v21, %v4563_v38  ;;  %v4316_v34 = vand.u32 2147483647, %v4315_v19 }
 0x5e6   : > { %v4521_v57 = vadd.s32 127, %v4520_v33  ;;  %v8205_v35 = vmin.u32 %v4406_v13, %v12557_v4  ;;  %v4666_v54 = vand.u32 31, %v4664_v17  ;;  %v4564_v53 = vshrl.u32 %v15698_v62, %v4563_v38  ;;  %v4132_v33 = vpop.f32.mrf.mxu0 }
 0x5e7   : > { %v4579_v28 = vor.u32 %v4578_v59, %v4577_v20  ;;  %vm4580_vm1 = vcmp.lt.s32.totalorder %v4561_v42, 1  ;;  %vm4583_vm3 = vcmp.lt.s32.totalorder %v4561_v42, 4  ;;  %v4516_v52 = vsub.s32 32, %v12549_v37 }
 0x5e8   : > { %vm4582_vm6 = vcmp.lt.s32.totalorder %v4561_v42, 3  ;;  %v4588_v26 = vsel %vm4580_vm1, %v4567_v60, %v4570_v0  ;;  %v4589_v2 = vsel %vm4583_vm3, %v4576_v11, 920167782  ;;  %vm4581_vm8 = vcmp.lt.s32.totalorder %v4561_v42, 2 }
 0x5e9   : > { %v4585_v25 = vsel %vm4583_vm3, %v4573_v22, 2102212464  ;;  %v4590_v43 = vsel %vm4582_vm6, %v4573_v22, %v4589_v2  ;;  %v4592_v19 = vsel %vm4580_vm1, %v4570_v0, %v4573_v22  ;;  %v4522_v31 = vshll.u32 %v4521_v57, 23  ;;  %v4219_v57 = vpop.f32.mrf.mxu1 }
 0x5ea   : > { %v4408_v32 = vclz %v8205_v35  ;;  %v4591_v1 = vsel %vm4581_vm8, %v4588_v26, %v4590_v43  ;;  %v4593_v38 = vsel %vm4583_vm3, %v4579_v28, 1326507024  ;;  %v4660_v13 = vor.u32 8388608, %v12554_v9 }
 0x5eb   : > { %v4594_v50 = vsel %vm4582_vm6, %v4576_v11, %v4593_v38  ;;  %v12581_v18 = vmul.u32.u64.low %v12568_v40, %v4591_v1  ;;  %v12582_v58 = vmul.u32.u64.high %v12568_v40, %v4591_v1, %v12581_v18  ;;  %v4319_v49 = vmul.f32 %v4318_v47, %v4316_v34 }
 0x5ec   : > { %v4584_v46 = vsel %vm4580_vm1, %v4564_v53, %v4567_v60  ;;  %v4586_v30 = vsel %vm4582_vm6, %v4570_v0, %v4585_v25  ;;  %v4595_v22 = vsel %vm4581_vm8, %v4592_v19, %v4594_v50  ;;  %vm15573_vm14 = vcmp.lt.s32.totalorder %v12368_v61, 0 }
 0x5ed   : > { %v4518_v20 = vshrl.u32 %v4500_v56, %v4516_v52  ;;  %v4667_v59 = vsub.s32 32, %v4666_v54  ;;  %v12591_v11 = vadd.f32 %v4132_v33, %v12390_v10  ;;  %v4523_v35 = vor.u32 4788187, %v4522_v31 }
 0x5ee   : > { %v8206_v28 = vadd.s32 4294967294, %v4408_v32  ;;  %v12594_v26 = vmul.u32.u64.low %v12568_v40, %v4595_v22  ;;  %v12595_v9 = vmul.u32.u64.high %v12568_v40, %v4595_v22, %v12594_v26  ;;  %v4517_v47 = vshll.u32 %v12527_v7, %v12549_v37 }
 0x5ef   : > { %15975 = vst [vmem:[#allocation15_spill] sm:$0xff] %v12591_v11  ;;  %v4587_v60 = vsel %vm4581_vm8, %v4584_v46, %v4586_v30  ;;  %v4606_v0 = vadd.s32 1, %v12582_v58  ;;  %v12601_v34 = vshll.u32 %v4660_v13, 8  ;;  %v4320_v56 = vxor.u32 2147483648, %v4319_v49 }
 0x5f0   : > { %v4665_v53 = vshrl.u32 %v4664_v17, 5  ;;  %v4670_v52 = vshrl.u32 %v15708_v29, %v4667_v59  ;;  %v12605_v2 = vadd.f32 %v4219_v57, %v12390_v10  ;;  %v4519_v25 = vor.u32 %v4518_v20, %v4517_v47 }
 0x5f1   : > { %v4669_v43 = vshll.u32 %v15698_v62, %v4666_v54  ;;  %v4672_v19 = vshll.u32 %v15708_v29, %v4666_v54  ;;  %v4673_v7 = vshrl.u32 %v15822_v39, %v4667_v59  ;;  %v4524_v37 = vand.u32 2147483647, %v4523_v35 }
 0x5f2   : > { %15976 = vst [vmem:[#allocation39_spill] sm:$0xff] %v12605_v2  ;;  %vm8207_vm10 = vcmp.lt.s32.totalorder %v8206_v28, 0  ;;  %v4603_v42 = vmul.u32 %v12568_v40, %v4587_v60  ;;  %vm4605_vm0 = vc.u32 %v12595_v9, %v12581_v18  ;;  %v4675_v1 = vshll.u32 %v15822_v39, %v4666_v54 }
 0x5f3   : > { %v4607_v17 = vsel %vm4605_vm0, %v4606_v0, %v12582_v58  ;;  %v4671_v31 = vor.u32 %v4670_v52, %v4669_v43  ;;  %v4674_v32 = vor.u32 %v4673_v7, %v4672_v19  ;;  %v4676_v33 = vshrl.u32 %v15823_v16, %v4667_v59 }
 0x5f4   : > { %v4608_v38 = vadd.s32 %v4607_v17, %v4603_v42  ;;  %v4678_v50 = vshll.u32 %v15823_v16, %v4666_v54  ;;  %v4679_v13 = vshrl.u32 %v15709_v23, %v4667_v59  ;;  %v4526_v46 = vcvt.s32.f32 %v4519_v25 }
 0x5f5   : > { %v12618_v30 = vsel %vm8207_vm10, 0, %v8206_v28  ;;  %v4681_v40 = vshll.u32 %v15709_v23, %v4666_v54  ;;  %v4682_v22 = vshrl.u32 %v15697_v21, %v4667_v59  ;;  %v4321_v58 = vsel %vm15573_vm14, %v4320_v56, %v4319_v49 }
 0x5f6   : > { %v4609_v20 = vadd.s32 536870912, %v4608_v38  ;;  %v4677_v57 = vor.u32 %v4676_v33, %v4675_v1  ;;  %v4680_v35 = vor.u32 %v4679_v13, %v4678_v50  ;;  %v4527_v26 = vmul.f32 %v4526_v46, %v4524_v37 }
 0x5f7   : > { %v4683_v47 = vor.u32 %v4682_v22, %v4681_v40  ;;  %vm4684_vm11 = vcmp.lt.s32.totalorder %v4665_v53, 1  ;;  %vm4687_vm9 = vcmp.lt.s32.totalorder %v4665_v53, 4  ;;  %v4416_v60 = vsub.s32 4294967266, %v12618_v30 }
 0x5f8   : > { %v12625_v0 = vshrl.u32 %v4609_v20, 30  ;;  %v4689_v28 = vsel %vm4687_vm9, %v4677_v57, 2102212464  ;;  %v4692_v52 = vsel %vm4684_vm11, %v4671_v31, %v4674_v32  ;;  %v4668_v54 = vshrl.u32 %v15698_v62, %v4667_v59 }
 0x5f9   : > { %vm4686_vm15 = vcmp.lt.s32.totalorder %v4665_v53, 3  ;;  %v4693_v25 = vsel %vm4687_vm9, %v4680_v35, 920167782  ;;  %v4696_v43 = vsel %vm4684_vm11, %v4674_v32, %v4677_v57  ;;  %vm4685_vm2 = vcmp.lt.s32.totalorder %v4665_v53, 2 }
 0x5fa   : > { %15977 = vst [vmem:[#allocation18_spill] sm:$0xff] %v12625_v0  ;;  %v4611_v49 = vshll.u32 %v12625_v0, 30  ;;  %v4694_v56 = vsel %vm4686_vm15, %v4677_v57, %v4693_v25  ;;  %v4697_v19 = vsel %vm4687_vm9, %v4683_v47, 1326507024  ;;  %v4688_v7 = vsel %vm4684_vm11, %v4668_v54, %v4671_v31 }
 0x5fb   : > { %v4690_v37 = vsel %vm4686_vm15, %v4674_v32, %v4689_v28  ;;  %v4695_v42 = vsel %vm4685_vm2, %v4692_v52, %v4694_v56  ;;  %v4698_v17 = vsel %vm4686_vm15, %v4680_v35, %v4697_v19  ;;  %vm12637_vm4 = vcmp.le.f32.partialorder %v4236_v36, 0.7853982 }
 0x5fc   : > { %v12629_v1 = vsub.s32 %v4608_v38, %v4611_v49  ;;  %v4699_v33 = vsel %vm4685_vm2, %v4696_v43, %v4698_v17  ;;  %v12632_v50 = vmul.u32.u64.low %v12601_v34, %v4695_v42  ;;  %v12633_v13 = vmul.u32.u64.high %v12601_v34, %v4695_v42, %v12632_v50  ;;  %v4221_v42 = vpop.f32.mrf.mxu1 }
 0x5fd   : > { %v15978_v59 = vmov 0  ;;  %v4412_v53 = vsub.s32 32, %v12618_v30  ;;  %v12643_v31 = vmul.u32.u64.low %v12601_v34, %v4699_v33  ;;  %v12644_v32 = vmul.u32.u64.high %v12601_v34, %v4699_v33, %v12643_v31 }
 0x5fe   : > { %v15979_v59 = vsel %vm12637_vm4, 4294967295, %v15978_v59  ;;  %v4417_v46 = vadd.s32 127, %v4416_v60  ;;  %v4691_v38 = vsel %vm4685_vm2, %v4688_v7, %v4690_v37  ;;  %v15541_v40 = vand.u32 2147483647, %v12605_v2 }
 0x5ff   : > { %15980 = vst [vmem:[#allocation30_spill] sm:$0xff] %v15979_v59  ;;  %v4863_v22 = vand.u32 2139095040, %v12605_v2  ;;  %v4324_v20 = vsel %vm12637_vm4, %v12368_v61, %v4321_v58  ;;  %v4396_v36 = vadd.s32 %v12516_v14, %v12525_v51  ;;  %v4759_v57 = vand.u32 2139095040, %v12591_v11 }
 0x600   : > { %v4528_v35 = vxor.u32 2147483648, %v4527_v26  ;;  %v4614_v47 = vsub.s32 0, %v12629_v1  ;;  %v4710_v28 = vadd.s32 1, %v12633_v13  ;;  %v4707_v54 = vmul.u32 %v12601_v34, %v4691_v38 }
 0x601   : > { %v4864_v60 = vshrl.u32 %v4863_v22, 23  ;;  %v4414_v52 = vshrl.u32 %v4396_v36, %v4412_v53  ;;  %vm4709_vm13 = vc.u32 %v12644_v32, %v12632_v50  ;;  %v4760_v25 = vshrl.u32 %v4759_v57, 23 }
 0x602   : > { %v4418_v43 = vshll.u32 %v4417_v46, 23  ;;  %v4711_v58 = vsel %vm4709_vm13, %v4710_v28, %v12633_v13  ;;  %v4867_v14 = vand.u32 8388607, %v15541_v40  ;;  %vm15568_vm7 = vcmp.lt.s32.totalorder %v12382_v48, 0 }
 0x603   : > { %v8224_v49 = vadd.s32 4294967169, %v4864_v60  ;;  %v4712_v51 = vadd.s32 %v4711_v58, %v4707_v54  ;;  %v15540_v56 = vand.u32 2147483647, %v12591_v11  ;;  %v4413_v19 = vshll.u32 %v12557_v4, %v12618_v30 }
 0x604   : > { %v8213_v34 = vmin.u32 %v4614_v47, %v12629_v1  ;;  %v8220_v37 = vadd.s32 4294967169, %v4760_v25  ;;  %8793 = vcosq.f32 %v4324_v20  ;;  %v4529_v17 = vsel %vm15568_vm7, %v4528_v35, %v4527_v26 }
 0x605   : > { %v4870_v7 = vadd.s32 1, %v8224_v49  ;;  %v4713_v33 = vadd.s32 536870912, %v4712_v51  ;;  %v12668_v13 = vor.u32 %v4414_v52, %v4413_v19  ;;  %v12670_v53 = vor.u32 4788187, %v4418_v43 }
 0x606   : > { %v4868_v31 = vor.u32 8388608, %v4867_v14  ;;  %v12676_v4 = vand.u32 8388607, %v15540_v56  ;;  %v12679_v30 = vadd.f32 %v4221_v42, %v12390_v10  ;;  %8795 = vsinq.f32 %v4324_v20 }
 0x607   : > { %vm4871_vm12 = vcmp.gt.s32.totalorder %v4870_v7, 0  ;;  %v12672_v46 = vshrl.u32 %v4713_v33, 30  ;;  %vm12683_vm5 = vcmp.le.f32.partialorder %v4444_v5, 0.7853982  ;;  %v15983_v26 = vmov 0 }
 0x608   : > { %v4872_v38 = vsel %vm4871_vm12, %v4870_v7, 0  ;;  %15982 = vst [vmem:[#allocation33_spill] sm:$0xff] %v12679_v30  ;;  %v15984_v26 = vsel %vm12683_vm5, 4294967295, %v15983_v26  ;;  %v4616_v22 = vclz %v8213_v34  ;;  %v4766_v36 = vadd.s32 1, %v8220_v37 }
 0x609   : > { %15981 = vst [vmem:[#allocation32_spill] sm:$0xff] %v12672_v46  ;;  %15985 = vst [vmem:[#allocation27_spill] sm:$0xff] %v15984_v26  ;;  %v12690_v57 = vsel %vm12683_vm5, %v12382_v48, %v4529_v17  ;;  %v12694_v35 = vadd.s32 %v12581_v18, %v12595_v9  ;;  %v4715_v10 = vshll.u32 %v12672_v46, 30  ;;  %v4874_v20 = vand.u32 31, %v4872_v38 }
 0x60a   : > { %v12700_v28 = vadd.s32 %v12632_v50, %v12644_v32  ;;  %v12702_v60 = vshll.u32 %v4868_v31, 8  ;;  %v4764_v25 = vor.u32 8388608, %v12676_v4  ;;  %v8214_v9 = vadd.s32 4294967294, %v4616_v22 }
 0x60b   : > { %v12704_v52 = vsub.s32 %v4712_v51, %v4715_v10  ;;  %v4875_v54 = vsub.s32 32, %v4874_v20  ;;  %v4873_v43 = vshrl.u32 %v4872_v38, 5  ;;  %v4877_v58 = vshll.u32 %v15698_v62, %v4874_v20 }
 0x60c   : > { %vm4767_vm1 = vcmp.gt.s32.totalorder %v4766_v36, 0  ;;  %v4880_v50 = vshll.u32 %v15708_v29, %v4874_v20  ;;  %v4883_v51 = vshll.u32 %v15822_v39, %v4874_v20  ;;  %v4886_v34 = vshll.u32 %v15823_v16, %v4874_v20 }
 0x60d   : > { %v4718_v49 = vsub.s32 0, %v12704_v52  ;;  %v4878_v14 = vshrl.u32 %v15708_v29, %v4875_v54  ;;  %v4881_v32 = vshrl.u32 %v15822_v39, %v4875_v54  ;;  %v4884_v19 = vshrl.u32 %v15823_v16, %v4875_v54 }
 0x60e   : > { %v4887_v7 = vshrl.u32 %v15709_v23, %v4875_v54  ;;  %v4768_v33 = vsel %vm4767_vm1, %v4766_v36, 0  ;;  %v4889_v4 = vshll.u32 %v15709_v23, %v4874_v20  ;;  %v4890_v22 = vshrl.u32 %v15697_v21, %v4875_v54 }
 0x60f   : > { %v8217_v37 = vmin.u32 %v4718_v49, %v12704_v52  ;;  %v4879_v42 = vor.u32 %v4878_v14, %v4877_v58  ;;  %v4882_v17 = vor.u32 %v4881_v32, %v4880_v50  ;;  %v4885_v31 = vor.u32 %v4884_v19, %v4883_v51 }
 0x610   : > { %v4888_v38 = vor.u32 %v4887_v7, %v4886_v34  ;;  %vm4892_vm3 = vcmp.lt.s32.totalorder %v4873_v43, 1  ;;  %vm4893_vm6 = vcmp.lt.s32.totalorder %v4873_v43, 2  ;;  %vm4895_vm8 = vcmp.lt.s32.totalorder %v4873_v43, 4 }
 0x611   : > { %v4720_v10 = vclz %v8217_v37  ;;  %v12720_v3 = vpop.eup %8793  ;;  %v4876_v44 = vshrl.u32 %v15698_v62, %v4875_v54  ;;  %v4891_v56 = vor.u32 %v4890_v22, %v4889_v4  ;;  %v4897_v40 = vsel %vm4895_vm8, %v4885_v31, 2102212464 }
 0x612   : > { %15986 = vst [vmem:[#allocation34_spill] sm:$0xff] %v12720_v3  ;;  %v4900_v49 = vsel %vm4892_vm3, %v4879_v42, %v4882_v17  ;;  %vm4894_vm10 = vcmp.lt.s32.totalorder %v4873_v43, 3  ;;  %v4901_v36 = vsel %vm4895_vm8, %v4888_v38, 920167782  ;;  %v4904_v14 = vsel %vm4892_vm3, %v4882_v17, %v4885_v31 }
 0x613   : > { %v8218_v58 = vadd.s32 4294967294, %v4720_v10  ;;  %v4896_v50 = vsel %vm4892_vm3, %v4876_v44, %v4879_v42  ;;  %v4898_v32 = vsel %vm4894_vm10, %v4882_v17, %v4897_v40  ;;  %v4902_v20 = vsel %vm4894_vm10, %v4885_v31, %v4901_v36  ;;  %v12723_v19 = vpop.eup %8795 }
 0x614   : > { %v4905_v51 = vsel %vm4895_vm8, %v4891_v56, 1326507024  ;;  %15987 = vst [vmem:[#allocation36_spill] sm:$0xff] %v12723_v19  ;;  %v4903_v34 = vsel %vm4893_vm6, %v4900_v49, %v4902_v20  ;;  %v4967_v37 = vand.u32 2139095040, %v12679_v30  ;;  %vm8215_vm11 = vcmp.lt.s32.totalorder %v8214_v9, 0 }
 0x615   : > { %vm8219_vm0 = vcmp.lt.s32.totalorder %v8218_v58, 0  ;;  %v4906_v7 = vsel %vm4894_vm10, %v4888_v38, %v4905_v51  ;;  %v12728_v22 = vshll.u32 %v4764_v25, 8  ;;  %v4899_v44 = vsel %vm4893_vm6, %v4896_v50, %v4898_v32 }
 0x616   : > { %v4723_v54 = vsel %vm8219_vm0, 0, %v8218_v58  ;;  %v4907_v4 = vsel %vm4893_vm6, %v4904_v14, %v4906_v7  ;;  %v4770_v40 = vand.u32 31, %v4768_v33  ;;  %v12740_v38 = vsel %vm8215_vm11, 0, %v8214_v9 }
 0x617   : > { %v4724_v10 = vsub.s32 32, %v4723_v54  ;;  %v4728_v41 = vsub.s32 4294967266, %v4723_v54  ;;  %v12732_v56 = vmul.u32.u64.low %v12702_v60, %v4907_v4  ;;  %v12733_v42 = vmul.u32.u64.high %v12702_v60, %v4907_v4, %v12732_v56 }
 0x618   : > { %v12736_v17 = vmul.u32.u64.low %v12702_v60, %v4903_v34  ;;  %v12737_v31 = vmul.u32.u64.high %v12702_v60, %v4903_v34, %v12736_v17  ;;  %v4771_v58 = vsub.s32 32, %v4770_v40  ;;  %v4968_v25 = vshrl.u32 %v4967_v37, 23 }
 0x619   : > { %v4729_v49 = vadd.s32 127, %v4728_v41  ;;  %v4725_v36 = vshll.u32 %v12704_v52, %v4723_v54  ;;  %v4726_v43 = vshrl.u32 %v12700_v28, %v4724_v10  ;;  %v4915_v14 = vmul.u32 %v12702_v60, %v4899_v44 }
 0x61a   : > { %v4769_v50 = vshrl.u32 %v4768_v33, 5  ;;  %v4773_v32 = vshll.u32 %v15698_v62, %v4770_v40  ;;  %v4774_v20 = vshrl.u32 %v15708_v29, %v4771_v58  ;;  %v4776_v51 = vshll.u32 %v15708_v29, %v4770_v40 }
 0x61b   : > { %v4779_v34 = vshll.u32 %v15822_v39, %v4770_v40  ;;  %v4730_v9 = vshll.u32 %v4729_v49, 23  ;;  %vm4917_vm9 = vc.u32 %v12733_v42, %v12736_v17  ;;  %v4918_v41 = vadd.s32 1, %v12737_v31 }
 0x61c   : > { %v4777_v52 = vshrl.u32 %v15822_v39, %v4771_v58  ;;  %v4775_v28 = vor.u32 %v4774_v20, %v4773_v32  ;;  %v4780_v60 = vshrl.u32 %v15823_v16, %v4771_v58  ;;  %v4782_v33 = vshll.u32 %v15823_v16, %v4770_v40 }
 0x61d   : > { %v4785_v7 = vshll.u32 %v15709_v23, %v4770_v40  ;;  %v4919_v37 = vsel %vm4917_vm9, %v4918_v41, %v12737_v31  ;;  %v4783_v4 = vshrl.u32 %v15709_v23, %v4771_v58  ;;  %v4786_v10 = vshrl.u32 %v15697_v21, %v4771_v58 }
 0x61e   : > { %v4778_v54 = vor.u32 %v4777_v52, %v4776_v51  ;;  %v4624_v44 = vsub.s32 4294967266, %v12740_v38  ;;  %v4920_v56 = vadd.s32 %v4919_v37, %v4915_v14  ;;  %v4781_v49 = vor.u32 %v4780_v60, %v4779_v34 }
 0x61f   : > { %v8228_v18 = vadd.s32 4294967169, %v4968_v25  ;;  %v4727_v5 = vor.u32 %v4726_v43, %v4725_v36  ;;  %v4731_v32 = vor.u32 4788187, %v4730_v9  ;;  %v4784_v20 = vor.u32 %v4783_v4, %v4782_v33  ;;  %v4136_v36 = vpop.f32.mrf.mxu0 }
 0x620   : > { %v4787_v47 = vor.u32 %v4786_v10, %v4785_v7  ;;  %v4921_v45 = vadd.s32 536870912, %v4920_v56  ;;  %v4772_v3 = vshrl.u32 %v15698_v62, %v4771_v58  ;;  %vm4788_vm15 = vcmp.lt.s32.totalorder %v4769_v50, 1 }
 0x621   : > { %vm4791_vm2 = vcmp.lt.s32.totalorder %v4769_v50, 4  ;;  %vm4790_vm13 = vcmp.lt.s32.totalorder %v4769_v50, 3  ;;  %v4796_v31 = vsel %vm4788_vm15, %v4775_v28, %v4778_v54  ;;  %vm4789_vm12 = vcmp.lt.s32.totalorder %v4769_v50, 2  ;;  %v4138_v55 = vpop.f32.mrf.mxu0 }
 0x622   : > { %v4793_v40 = vsel %vm4791_vm2, %v4781_v49, 2102212464  ;;  %v4797_v51 = vsel %vm4791_vm2, %v4784_v20, 920167782  ;;  %v12762_v41 = vshrl.u32 %v4921_v45, 30  ;;  %v4800_v25 = vsel %vm4788_vm15, %v4778_v54, %v4781_v49 }
 0x623   : > { %v4798_v14 = vsel %vm4790_vm13, %v4781_v49, %v4797_v51  ;;  %v4625_v43 = vadd.s32 127, %v4624_v44  ;;  %v4732_v34 = vand.u32 2147483647, %v4731_v32  ;;  %v4801_v58 = vsel %vm4791_vm2, %v4787_v47, 1326507024 }
 0x624   : > { %15988 = vst [vmem:[#allocation29_spill] sm:$0xff] %v12762_v41  ;;  %v4799_v9 = vsel %vm4789_vm12, %v4796_v31, %v4798_v14  ;;  %v4923_v52 = vshll.u32 %v12762_v41, 30  ;;  %v4792_v60 = vsel %vm4788_vm15, %v4772_v3, %v4775_v28  ;;  %v4794_v33 = vsel %vm4790_vm13, %v4778_v54, %v4793_v40 }
 0x625   : > { %v4802_v45 = vsel %vm4790_vm13, %v4784_v20, %v4801_v58  ;;  %v12773_v37 = vmul.u32.u64.low %v12728_v22, %v4799_v9  ;;  %v12774_v4 = vmul.u32.u64.high %v12728_v22, %v4799_v9, %v12773_v37  ;;  %v12778_v10 = vadd.f32 %v4136_v36, %v12363_v8 }
 0x626   : > { %v4803_v7 = vsel %vm4789_vm12, %v4800_v25, %v4802_v45  ;;  %v4734_v44 = vcvt.s32.f32 %v4727_v5  ;;  %v12780_v47 = vsub.s32 %v4920_v56, %v4923_v52  ;;  %v4620_v28 = vsub.s32 32, %v12740_v38 }
 0x627   : > { %v12783_v49 = vmul.u32.u64.low %v12728_v22, %v4803_v7  ;;  %v12784_v3 = vmul.u32.u64.high %v12728_v22, %v4803_v7, %v12783_v49  ;;  %v4626_v54 = vshll.u32 %v4625_v43, 23  ;;  %v4795_v32 = vsel %vm4789_vm12, %v4792_v60, %v4794_v33 }
 0x628   : > { %v4974_v20 = vadd.s32 1, %v8228_v18  ;;  %v15989_v40 = vand.u32 2147483647, %v12670_v53  ;;  %v15990_v31 = vcvt.s32.f32 %v12668_v13  ;;  %v12794_v14 = vmul.f32 %v4734_v44, %v4732_v34 }
 0x629   : > { %v4926_v5 = vsub.s32 0, %v12780_v47  ;;  %v15991_v56 = vand.u32 2147483647, %v12679_v30  ;;  %v4814_v50 = vadd.s32 1, %v12774_v4  ;;  %v4811_v13 = vmul.u32 %v12728_v22, %v4795_v32 }
 0x62a   : > { %v12792_v51 = vmul.f32 %v15990_v31, %v15989_v40  ;;  %vm4975_vm1 = vcmp.gt.s32.totalorder %v4974_v20, 0  ;;  %vm4813_vm3 = vc.u32 %v12784_v3, %v12773_v37  ;;  %v12808_v34 = vshrl.u32 %v12694_v35, %v4620_v28 }
 0x62b   : > { %v4971_v25 = vand.u32 8388607, %v15991_v56  ;;  %v8225_v53 = vmin.u32 %v4926_v5, %v12780_v47  ;;  %v4976_v43 = vsel %vm4975_vm1, %v4974_v20, 0  ;;  %v12810_v9 = vor.u32 4788187, %v4626_v54 }
 0x62c   : > { %v4815_v58 = vsel %vm4813_vm3, %v4814_v50, %v12774_v4  ;;  %v4978_v52 = vand.u32 31, %v4976_v43  ;;  %v4916_v33 = vadd.s32 %v12736_v17, %v12733_v42  ;;  %v12816_v44 = vshrl.u32 %v4976_v43, 5 }
 0x62d   : > { %v4928_v45 = vclz %v8225_v53  ;;  %v4816_v7 = vadd.s32 %v4815_v58, %v4811_v13  ;;  %v4972_v22 = vor.u32 8388608, %v4971_v25  ;;  %v5071_v32 = vand.u32 2139095040, %v12778_v10 }
 0x62e   : > { %v4979_v49 = vsub.s32 32, %v4978_v52  ;;  %v4981_v54 = vshll.u32 %v15698_v62, %v4978_v52  ;;  %v4984_v4 = vshll.u32 %v15708_v29, %v4978_v52  ;;  %v4987_v42 = vshll.u32 %v15822_v39, %v4978_v52 }
 0x62f   : > { %v8226_v35 = vadd.s32 4294967294, %v4928_v45  ;;  %v4817_v28 = vadd.s32 536870912, %v4816_v7  ;;  %v4990_v53 = vshll.u32 %v15823_v16, %v4978_v52  ;;  %v4993_v13 = vshll.u32 %v15709_v23, %v4978_v52 }
 0x630   : > { %v4982_v20 = vshrl.u32 %v15708_v29, %v4979_v49  ;;  %v4985_v40 = vshrl.u32 %v15822_v39, %v4979_v49  ;;  %v4988_v17 = vshrl.u32 %v15823_v16, %v4979_v49  ;;  %v4991_v5 = vshrl.u32 %v15709_v23, %v4979_v49 }
 0x631   : > { %vm8227_vm6 = vcmp.lt.s32.totalorder %v8226_v35, 0  ;;  %v12825_v31 = vshrl.u32 %v4817_v28, 30  ;;  %v4994_v56 = vshrl.u32 %v15697_v21, %v4979_v49  ;;  %v12832_v19 = vshll.u32 %v4972_v22, 8 }
 0x632   : > { %v4931_v25 = vsel %vm8227_vm6, 0, %v8226_v35  ;;  %v4983_v50 = vor.u32 %v4982_v20, %v4981_v54  ;;  %v4986_v45 = vor.u32 %v4985_v40, %v4984_v4  ;;  %v4989_v18 = vor.u32 %v4988_v17, %v4987_v42 }
 0x633   : > { %15992 = vst [vmem:[#allocation13_spill] sm:$0xff] %v12825_v31  ;;  %v4936_v43 = vsub.s32 4294967266, %v4931_v25  ;;  %v4819_v58 = vshll.u32 %v12825_v31, 30  ;;  %v4992_v60 = vor.u32 %v4991_v5, %v4990_v53  ;;  %v4995_v36 = vor.u32 %v4994_v56, %v4993_v13 }
 0x634   : > { %v5072_v28 = vshrl.u32 %v5071_v32, 23  ;;  %v4932_v26 = vsub.s32 32, %v4931_v25  ;;  %v4980_v35 = vshrl.u32 %v15698_v62, %v4979_v49  ;;  %v4933_v54 = vshll.u32 %v12780_v47, %v4931_v25 }
 0x635   : > { %v4937_v48 = vadd.s32 127, %v4936_v43  ;;  %v12834_v59 = vsub.s32 %v4816_v7, %v4819_v58  ;;  %vm4996_vm8 = vcmp.lt.s32.totalorder %v12816_v44, 1  ;;  %vm4997_vm10 = vcmp.lt.s32.totalorder %v12816_v44, 2 }
 0x636   : > { %vm4999_vm0 = vcmp.lt.s32.totalorder %v12816_v44, 4  ;;  %v5004_v20 = vsel %vm4996_vm8, %v4983_v50, %v4986_v45  ;;  %v5008_v40 = vsel %vm4996_vm8, %v4986_v45, %v4989_v18  ;;  %v8232_v7 = vadd.s32 4294967169, %v5072_v28 }
 0x637   : > { %v4938_v52 = vshll.u32 %v4937_v48, 23  ;;  %v4822_v4 = vsub.s32 0, %v12834_v59  ;;  %v5001_v22 = vsel %vm4999_vm0, %v4989_v18, 2102212464  ;;  %v5005_v32 = vsel %vm4999_vm0, %v4992_v60, 920167782 }
 0x638   : > { %v5009_v42 = vsel %vm4999_vm0, %v4995_v36, 1326507024  ;;  %vm15575_vm11 = vcmp.lt.s32.totalorder %v12373_v24, 0  ;;  %v4934_v49 = vshrl.u32 %v4916_v33, %v4932_v26  ;;  %vm4998_vm9 = vcmp.lt.s32.totalorder %v12816_v44, 3 }
 0x639   : > { %v8221_v47 = vmin.u32 %v4822_v4, %v12834_v59  ;;  %v5000_v17 = vsel %vm4996_vm8, %v4980_v35, %v4983_v50  ;;  %v5002_v5 = vsel %vm4998_vm9, %v4986_v45, %v5001_v22  ;;  %v5006_v56 = vsel %vm4998_vm9, %v4989_v18, %v5005_v32 }
 0x63a   : > { %v5010_v25 = vsel %vm4998_vm9, %v4992_v60, %v5009_v42  ;;  %v5078_v48 = vadd.s32 1, %v8232_v7  ;;  %v4939_v53 = vor.u32 4788187, %v4938_v52  ;;  %v5007_v43 = vsel %vm4997_vm10, %v5004_v20, %v5006_v56  ;;  %v4225_v7 = vpop.f32.mrf.mxu1 }
 0x63b   : > { %v4824_v13 = vclz %v8221_v47  ;;  %v5011_v36 = vsel %vm4997_vm10, %v5008_v40, %v5010_v25  ;;  %v12854_v33 = vmul.u32.u64.low %v12832_v19, %v5007_v43  ;;  %v12855_v28 = vmul.u32.u64.high %v12832_v19, %v5007_v43, %v12854_v33 }
 0x63c   : > { %v12850_v58 = vmul.u32.u64.low %v12832_v19, %v5011_v36  ;;  %v12851_v26 = vmul.u32.u64.high %v12832_v19, %v5011_v36, %v12850_v58  ;;  %8797 = vcosq.f32 %v12690_v57  ;;  %v15993_v18 = vshll.u32 %v12629_v1, %v12740_v38 }
 0x63d   : > { %vm15593_vm15 = vcmp.lt.s32.totalorder %v12396_v6, 0  ;;  %vm5079_vm2 = vcmp.gt.s32.totalorder %v5078_v48, 0  ;;  %v4424_v50 = vxor.u32 2147483648, %v12792_v51  ;;  %v4935_v45 = vor.u32 %v4934_v49, %v4933_v54 }
 0x63e   : > { %v4623_v60 = vor.u32 %v12808_v34, %v15993_v18  ;;  %v5003_v35 = vsel %vm4997_vm10, %v5000_v17, %v5002_v5  ;;  %v5080_v52 = vsel %vm5079_vm2, %v5078_v48, 0  ;;  %v4628_v4 = vand.u32 2147483647, %v12810_v9 }
 0x63f   : > { %v15994_v22 = vxor.u32 2147483648, %v12794_v14  ;;  %v8222_v38 = vadd.s32 4294967294, %v4824_v13  ;;  %v5082_v34 = vand.u32 31, %v5080_v52  ;;  %v4940_v20 = vand.u32 2147483647, %v4939_v53 }
 0x640   : > { %vm5021_vm13 = vc.u32 %v12851_v26, %v12854_v33  ;;  %v5022_v54 = vadd.s32 1, %v12855_v28  ;;  %v15995_v44 = vand.u32 2147483647, %v12778_v10  ;;  %8799 = vsinq.f32 %v12690_v57 }
 0x641   : > { %v4737_v1 = vsel %vm15593_vm15, %v15994_v22, %v12794_v14  ;;  %v4630_v9 = vcvt.s32.f32 %v4623_v60  ;;  %v15996_v40 = vand.u32 2147483647, %v12396_v6  ;;  %v15997_v42 = vmov 0 }
 0x642   : > { %v5075_v32 = vand.u32 8388607, %v15995_v44  ;;  %v5019_v14 = vmul.u32 %v12832_v19, %v5003_v35  ;;  %v12889_v49 = vsel %vm15575_vm11, %v4424_v50, %v12792_v51  ;;  %v4942_v47 = vcvt.s32.f32 %v4935_v45 }
 0x643   : > { %vm12881_vm12 = vcmp.le.f32.partialorder %v15996_v40, 0.7853982  ;;  %16000 = vst [vmem:[#allocation26_spill] sm:$0xff] %v12889_v49  ;;  %v5023_v17 = vsel %vm5021_vm13, %v5022_v54, %v12855_v28  ;;  %v5083_v5 = vsub.s32 32, %v5082_v34  ;;  %v12892_v57 = vmul.f32 %v4630_v9, %v4628_v4 }
 0x644   : > { %v15998_v42 = vsel %vm12881_vm12, 4294967295, %v15997_v42  ;;  %v12897_v56 = vsel %vm12881_vm12, %v12396_v6, %v4737_v1  ;;  %vm8223_vm1 = vcmp.lt.s32.totalorder %v8222_v38, 0  ;;  %v5024_v25 = vadd.s32 %v5023_v17, %v5019_v14 }
 0x645   : > { %15999 = vst [vmem:[#allocation8_spill] sm:$0xff] %v15998_v42  ;;  %v12899_v19 = vmul.f32 %v4942_v47, %v4940_v20  ;;  %v5076_v48 = vor.u32 8388608, %v5075_v32  ;;  %v5086_v53 = vshrl.u32 %v15708_v29, %v5083_v5  ;;  %v12903_v51 = vadd.f32 %v4225_v7, %v12363_v8 }
 0x646   : > { %v5025_v13 = vadd.s32 536870912, %v5024_v25  ;;  %v5085_v43 = vshll.u32 %v15698_v62, %v5082_v34  ;;  %v5088_v36 = vshll.u32 %v15708_v29, %v5082_v34  ;;  %v5089_v58 = vshrl.u32 %v15822_v39, %v5083_v5 }
 0x647   : > { %v12908_v28 = vsel %vm8223_vm1, 0, %v8222_v38  ;;  %v5081_v18 = vshrl.u32 %v5080_v52, 5  ;;  %v5091_v60 = vshll.u32 %v15822_v39, %v5082_v34  ;;  %v5092_v50 = vshrl.u32 %v15823_v16, %v5083_v5 }
 0x648   : > { %v12912_v45 = vshrl.u32 %v5025_v13, 30  ;;  %v5087_v35 = vor.u32 %v5086_v53, %v5085_v43  ;;  %v5090_v4 = vor.u32 %v5089_v58, %v5088_v36  ;;  %v5094_v22 = vshll.u32 %v15823_v16, %v5082_v34 }
 0x649   : > { %v5093_v1 = vor.u32 %v5092_v50, %v5091_v60  ;;  %v5095_v20 = vshrl.u32 %v15709_v23, %v5083_v5  ;;  %v5097_v54 = vshll.u32 %v15709_v23, %v5082_v34  ;;  %v5098_v44 = vshrl.u32 %v15697_v21, %v5083_v5  ;;  %v12923_v40 = vpop.eup %8797 }
 0x64a   : > { %16001 = vst [vmem:[#allocation12_spill] sm:$0xff] %v12912_v45  ;;  %v5027_v38 = vshll.u32 %v12912_v45, 30  ;;  %v12919_v52 = vshll.u32 %v5076_v48, 8  ;;  %v5279_v9 = vand.u32 2139095040, %v12903_v51  ;;  %16002 = vst [vmem:[#allocation25_spill] sm:$0xff] %v12923_v40  ;;  %vm15592_vm3 = vcmp.lt.s32.totalorder %v12605_v2, 0 }
 0x64b   : > { %v4944_v14 = vxor.u32 2147483648, %v12899_v19  ;;  %v4828_v7 = vsub.s32 32, %v12908_v28  ;;  %v5096_v47 = vor.u32 %v5095_v20, %v5094_v22  ;;  %v5099_v34 = vor.u32 %v5098_v44, %v5097_v54 }
 0x64c   : > { %v12928_v17 = vsub.s32 %v5024_v25, %v5027_v38  ;;  %v5084_v53 = vshrl.u32 %v15698_v62, %v5083_v5  ;;  %vm5100_vm6 = vcmp.lt.s32.totalorder %v5081_v18, 1  ;;  %vm5103_vm8 = vcmp.lt.s32.totalorder %v5081_v18, 4 }
 0x64d   : > { %vm5102_vm10 = vcmp.lt.s32.totalorder %v5081_v18, 3  ;;  %v5105_v48 = vsel %vm5103_vm8, %v5093_v1, 2102212464  ;;  %v5108_v13 = vsel %vm5100_vm6, %v5087_v35, %v5090_v4  ;;  %v5109_v43 = vsel %vm5103_vm8, %v5096_v47, 920167782  ;;  %v12936_v25 = vpop.eup %8799 }
 0x64e   : > { %vm15574_vm0 = vcmp.lt.s32.totalorder %v12435_v27, 0  ;;  %v5030_v36 = vsub.s32 0, %v12928_v17  ;;  %vm5101_vm9 = vcmp.lt.s32.totalorder %v5081_v18, 2  ;;  %v5110_v58 = vsel %vm5102_vm10, %v5093_v1, %v5109_v43  ;;  %16003 = vst [vmem:[#allocation38_spill] sm:$0xff] %v12936_v25 }
 0x64f   : > { %v5112_v60 = vsel %vm5100_vm6, %v5090_v4, %v5093_v1  ;;  %v16004_v5 = vand.u32 2147483647, %v12605_v2  ;;  %v16005_v50 = vmov 0  ;;  %v4832_v22 = vsub.s32 4294967266, %v12908_v28 }
 0x650   : > { %v5111_v20 = vsel %vm5101_vm9, %v5108_v13, %v5110_v58  ;;  %v5113_v54 = vsel %vm5103_vm8, %v5099_v34, 1326507024  ;;  %v5280_v44 = vshrl.u32 %v5279_v9, 23  ;;  %v8229_v38 = vmin.u32 %v5030_v36, %v12928_v17 }
 0x651   : > { %vm12940_vm2 = vcmp.le.f32.partialorder %v16004_v5, 0.7853982  ;;  %v5104_v43 = vsel %vm5100_vm6, %v5084_v53, %v5087_v35  ;;  %v5106_v1 = vsel %vm5102_vm10, %v5090_v4, %v5105_v48  ;;  %v5114_v32 = vsel %vm5102_vm10, %v5096_v47, %v5113_v54 }
 0x652   : > { %v16006_v50 = vsel %vm12940_vm2, 4294967295, %v16005_v50  ;;  %v5115_v40 = vsel %vm5101_vm9, %v5112_v60, %v5114_v32  ;;  %v12952_v5 = vmul.u32.u64.low %v12919_v52, %v5111_v20  ;;  %v12953_v25 = vmul.u32.u64.high %v12919_v52, %v5111_v20, %v12952_v5 }
 0x653   : > { %16007 = vst [vmem:[#allocation37_spill] sm:$0xff] %v16006_v50  ;;  %v8240_v61 = vadd.s32 4294967169, %v5280_v44  ;;  %v4812_v9 = vadd.s32 %v12773_v37, %v12784_v3  ;;  %v5032_v34 = vclz %v8229_v38  ;;  %v4632_v4 = vxor.u32 2147483648, %v12892_v57 }
 0x654   : > { %v12959_v13 = vmul.u32.u64.low %v12919_v52, %v5115_v40  ;;  %v12960_v35 = vmul.u32.u64.high %v12919_v52, %v5115_v40, %v12959_v13  ;;  %8801 = vcosq.f32 %v12897_v56  ;;  %v5107_v32 = vsel %vm5101_vm9, %v5104_v43, %v5106_v1 }
 0x655   : > { %v5286_v47 = vadd.s32 1, %v8240_v61  ;;  %v4945_v53 = vsel %vm15592_vm3, %v4944_v14, %v12899_v19  ;;  %v4829_v48 = vshll.u32 %v12834_v59, %v12908_v28  ;;  %v4830_v37 = vshrl.u32 %v4812_v9, %v4828_v7 }
 0x656   : > { %v12971_v3 = vadd.f32 %v4138_v55, %v12363_v8  ;;  %v4833_v40 = vadd.s32 127, %v4832_v22  ;;  %v5126_v36 = vadd.s32 1, %v12953_v25  ;;  %v16008_v58 = vand.u32 2147483647, %v12903_v51 }
 0x657   : > { %vm5287_vm13 = vcmp.gt.s32.totalorder %v5286_v47, 0  ;;  %v8230_v18 = vadd.s32 4294967294, %v5032_v34  ;;  %v5123_v61 = vmul.u32 %v12919_v52, %v5107_v32  ;;  %vm5125_vm1 = vc.u32 %v12960_v35, %v12952_v5 }
 0x658   : > { %v5283_v60 = vand.u32 8388607, %v16008_v58  ;;  %v5288_v19 = vsel %vm5287_vm13, %v5286_v47, 0  ;;  %v12982_v59 = vsel %vm15574_vm0, %v4632_v4, %v12892_v57  ;;  %8803 = vsinq.f32 %v12897_v56 }
 0x659   : > { %16009 = vst [vmem:[#allocation35_spill] sm:$0xff] %v12982_v59  ;;  %v5127_v55 = vsel %vm5125_vm1, %v5126_v36, %v12953_v25  ;;  %v5290_v28 = vand.u32 31, %v5288_v19  ;;  %v12989_v14 = vsel %vm12940_vm2, %v12605_v2, %v4945_v53  ;;  %v12991_v52 = vor.u32 %v4830_v37, %v4829_v48 }
 0x65a   : > { %v12995_v7 = vadd.s32 %v12854_v33, %v12851_v26  ;;  %v5128_v22 = vadd.s32 %v5127_v55, %v5123_v61  ;;  %v4834_v20 = vshll.u32 %v4833_v40, 23  ;;  %v5284_v57 = vor.u32 8388608, %v5283_v60 }
 0x65b   : > { %v5291_v54 = vsub.s32 32, %v5290_v28  ;;  %v5175_v56 = vand.u32 2139095040, %v12971_v3  ;;  %vm8231_vm6 = vcmp.lt.s32.totalorder %v8230_v18, 0  ;;  %v5293_v44 = vshll.u32 %v15698_v62, %v5290_v28 }
 0x65c   : > { %v5129_v25 = vadd.s32 536870912, %v5128_v22  ;;  %v5296_v38 = vshll.u32 %v15708_v29, %v5290_v28  ;;  %v5299_v9 = vshll.u32 %v15822_v39, %v5290_v28  ;;  %v5289_v34 = vshrl.u32 %v5288_v19, 5 }
 0x65d   : > { %v5294_v43 = vshrl.u32 %v15708_v29, %v5291_v54  ;;  %v5297_v1 = vshrl.u32 %v15822_v39, %v5291_v54  ;;  %v5300_v26 = vshrl.u32 %v15823_v16, %v5291_v54  ;;  %v5302_v13 = vshll.u32 %v15823_v16, %v5290_v28 }
 0x65e   : > { %v13004_v33 = vshrl.u32 %v5129_v25, 30  ;;  %v5303_v4 = vshrl.u32 %v15709_v23, %v5291_v54  ;;  %v13008_v32 = vor.u32 4788187, %v4834_v20  ;;  %v5324_v36 = vshll.u32 %v5284_v57, 8 }
 0x65f   : > { %v5295_v47 = vor.u32 %v5294_v43, %v5293_v44  ;;  %v5298_v53 = vor.u32 %v5297_v1, %v5296_v38  ;;  %v5301_v48 = vor.u32 %v5300_v26, %v5299_v9  ;;  %v13013_v60 = vsel %vm8231_vm6, 0, %v8230_v18 }
 0x660   : > { %v5131_v37 = vshll.u32 %v13004_v33, 30  ;;  %v5304_v40 = vor.u32 %v5303_v4, %v5302_v13  ;;  %v5305_v61 = vshll.u32 %v15709_v23, %v5290_v28  ;;  %v5306_v19 = vshrl.u32 %v15697_v21, %v5291_v54 }
 0x661   : > { %v5176_v55 = vshrl.u32 %v5175_v56, 23  ;;  %v13017_v25 = vpop.eup %8801  ;;  %vm5308_vm8 = vcmp.lt.s32.totalorder %v5289_v34, 1  ;;  %vm5310_vm10 = vcmp.lt.s32.totalorder %v5289_v34, 3  ;;  %vm5311_vm9 = vcmp.lt.s32.totalorder %v5289_v34, 4 }
 0x662   : > { %16010 = vst [vmem:[#allocation28_spill] sm:$0xff] %v13017_v25  ;;  %v13019_v20 = vsub.s32 %v5128_v22, %v5131_v37  ;;  %v5307_v44 = vor.u32 %v5306_v19, %v5305_v61  ;;  %v5313_v38 = vsel %vm5311_vm9, %v5301_v48, 2102212464  ;;  %v5316_v57 = vsel %vm5308_vm8, %v5295_v47, %v5298_v53 }
 0x663   : > { %v5317_v43 = vsel %vm5311_vm9, %v5304_v40, 920167782  ;;  %v5292_v1 = vshrl.u32 %v15698_v62, %v5291_v54  ;;  %vm5309_vm13 = vcmp.lt.s32.totalorder %v5289_v34, 2  ;;  %v5040_v56 = vsub.s32 4294967266, %v13013_v60 }
 0x664   : > { %v5134_v18 = vsub.s32 0, %v13019_v20  ;;  %v5318_v28 = vsel %vm5310_vm10, %v5301_v48, %v5317_v43  ;;  %v5320_v9 = vsel %vm5308_vm8, %v5298_v53, %v5301_v48  ;;  %v5321_v26 = vsel %vm5311_vm9, %v5307_v44, 1326507024  ;;  %v4142_v48 = vpop.f32.mrf.mxu0 }
 0x665   : > { %v5319_v22 = vsel %vm5309_vm13, %v5316_v57, %v5318_v28  ;;  %v13028_v13 = vpop.eup %8803  ;;  %v5312_v37 = vsel %vm5308_vm8, %v5292_v1, %v5295_v47  ;;  %v5314_v61 = vsel %vm5310_vm10, %v5298_v53, %v5313_v38  ;;  %v5322_v54 = vsel %vm5310_vm10, %v5304_v40, %v5321_v26  ;;  %v4227_v28 = vpop.f32.mrf.mxu1 }
 0x666   : > { %16011 = vst [vmem:[#allocation19_spill] sm:$0xff] %v13028_v13  ;;  %v8233_v4 = vmin.u32 %v5134_v18, %v13019_v20  ;;  %v5323_v19 = vsel %vm5309_vm13, %v5320_v9, %v5322_v54  ;;  %v13035_v43 = vmul.u32.u64.low %v5324_v36, %v5319_v22  ;;  %v13036_v58 = vmul.u32.u64.high %v5324_v36, %v5319_v22, %v13035_v43 }
 0x667   : > { %v8236_v57 = vadd.s32 4294967169, %v5176_v55  ;;  %v13040_v59 = vmul.u32.u64.low %v5324_v36, %v5323_v19  ;;  %v13041_v18 = vmul.u32.u64.high %v5324_v36, %v5323_v19, %v13040_v59  ;;  %v5315_v53 = vsel %vm5309_vm13, %v5312_v37, %v5314_v61 }
 0x668   : > { %v5136_v63 = vclz %v8233_v4  ;;  %v16012_v40 = vand.u32 2147483647, %v12971_v3  ;;  %v5124_v22 = vadd.s32 %v12952_v5, %v12960_v35  ;;  %v13050_v9 = vadd.f32 %v4227_v28, %v12363_v8 }
 0x669   : > { %v5182_v1 = vadd.s32 1, %v8236_v57  ;;  %v13053_v26 = vadd.f32 %v4142_v48, %v12379_v15  ;;  %v13056_v4 = vadd.s32 127, %v5040_v56  ;;  %v5334_v34 = vadd.s32 1, %v13036_v58 }
 0x66a   : > { %v5179_v38 = vand.u32 8388607, %v16012_v40  ;;  %v8234_v55 = vadd.s32 4294967294, %v5136_v63  ;;  %v5331_v37 = vmul.u32 %v5324_v36, %v5315_v53  ;;  %vm5333_vm8 = vc.u32 %v13041_v18, %v13035_v43 }
 0x66b   : > { %vm5183_vm1 = vcmp.gt.s32.totalorder %v5182_v1, 0  ;;  %v5335_v8 = vsel %vm5333_vm8, %v5334_v34, %v13036_v58  ;;  %8805 = vcosq.f32 %v12989_v14  ;;  %vm15596_vm11 = vcmp.lt.s32.totalorder %v12679_v30, 0 }
 0x66c   : > { %vm8235_vm6 = vcmp.lt.s32.totalorder %v8234_v55, 0  ;;  %v5184_v5 = vsel %vm5183_vm1, %v5182_v1, 0  ;;  %v5180_v35 = vor.u32 8388608, %v5179_v38  ;;  %v5336_v57 = vadd.s32 %v5335_v8, %v5331_v37 }
 0x66d   : > { %v5139_v63 = vsel %vm8235_vm6, 0, %v8234_v55  ;;  %v5186_v61 = vand.u32 31, %v5184_v5  ;;  %v5185_v48 = vshrl.u32 %v5184_v5, 5  ;;  %8807 = vsinq.f32 %v12989_v14 }
 0x66e   : > { %v5140_v54 = vsub.s32 32, %v5139_v63  ;;  %v5144_v19 = vsub.s32 4294967266, %v5139_v63  ;;  %v5141_v28 = vshll.u32 %v13019_v20, %v5139_v63  ;;  %v5337_v44 = vadd.s32 536870912, %v5336_v57 }
 0x66f   : > { %v5187_v40 = vsub.s32 32, %v5186_v61  ;;  %v5189_v36 = vshll.u32 %v15698_v62, %v5186_v61  ;;  %v5192_v1 = vshll.u32 %v15708_v29, %v5186_v61  ;;  %v5195_v55 = vshll.u32 %v15822_v39, %v5186_v61 }
 0x670   : > { %v5142_v53 = vshrl.u32 %v5124_v22, %v5140_v54  ;;  %v5145_v59 = vadd.s32 127, %v5144_v19  ;;  %v13070_v8 = vshrl.u32 %v5337_v44, 30  ;;  %v5198_v20 = vshll.u32 %v15823_v16, %v5186_v61 }
 0x671   : > { %v5190_v58 = vshrl.u32 %v15708_v29, %v5187_v40  ;;  %v5193_v38 = vshrl.u32 %v15822_v39, %v5187_v40  ;;  %v5196_v34 = vshrl.u32 %v15823_v16, %v5187_v40  ;;  %v5199_v5 = vshrl.u32 %v15709_v23, %v5187_v40 }
 0x672   : > { %v5146_v37 = vshll.u32 %v5145_v59, 23  ;;  %v5383_v19 = vand.u32 2139095040, %v13050_v9  ;;  %v5143_v56 = vor.u32 %v5142_v53, %v5141_v28  ;;  %v5339_v47 = vshll.u32 %v13070_v8, 30 }
 0x673   : > { %v5191_v22 = vor.u32 %v5190_v58, %v5189_v36  ;;  %v5194_v63 = vor.u32 %v5193_v38, %v5192_v1  ;;  %v5197_v54 = vor.u32 %v5196_v34, %v5195_v55  ;;  %v5200_v0 = vor.u32 %v5199_v5, %v5198_v20 }
 0x674   : > { %v5220_v27 = vshll.u32 %v5180_v35, 8  ;;  %v5147_v49 = vor.u32 4788187, %v5146_v37  ;;  %v5188_v12 = vshrl.u32 %v15698_v62, %v5187_v40  ;;  %v5201_v44 = vshll.u32 %v15709_v23, %v5186_v61 }
 0x675   : > { %v5202_v59 = vshrl.u32 %v15697_v21, %v5187_v40  ;;  %v13079_v24 = vsub.s32 %v5336_v57, %v5339_v47  ;;  %vm5204_vm10 = vcmp.lt.s32.totalorder %v5185_v48, 1  ;;  %vm5206_vm9 = vcmp.lt.s32.totalorder %v5185_v48, 3 }
 0x676   : > { %vm5207_vm13 = vcmp.lt.s32.totalorder %v5185_v48, 4  ;;  %v5212_v28 = vsel %vm5204_vm10, %v5191_v22, %v5194_v63  ;;  %v5150_v58 = vcvt.s32.f32 %v5143_v56  ;;  %vm5205_vm1 = vcmp.lt.s32.totalorder %v5185_v48, 2 }
 0x677   : > { %v5203_v36 = vor.u32 %v5202_v59, %v5201_v44  ;;  %v5209_v1 = vsel %vm5207_vm13, %v5197_v54, 2102212464  ;;  %v5213_v53 = vsel %vm5207_vm13, %v5200_v0, 920167782  ;;  %v5342_v35 = vsub.s32 0, %v13079_v24 }
 0x678   : > { %v5214_v38 = vsel %vm5206_vm9, %v5197_v54, %v5213_v53  ;;  %v5148_v55 = vand.u32 2147483647, %v5147_v49  ;;  %v5216_v47 = vsel %vm5204_vm10, %v5194_v63, %v5197_v54  ;;  %v5208_v34 = vsel %vm5204_vm10, %v5188_v12, %v5191_v22 }
 0x679   : > { %v5215_v61 = vsel %vm5205_vm1, %v5212_v28, %v5214_v38  ;;  %v5217_v57 = vsel %vm5207_vm13, %v5203_v36, 1326507024  ;;  %v8241_v40 = vmin.u32 %v5342_v35, %v13079_v24  ;;  %v5210_v37 = vsel %vm5206_vm9, %v5194_v63, %v5209_v1 }
 0x67a   : > { %v5218_v20 = vsel %vm5206_vm9, %v5200_v0, %v5217_v57  ;;  %v13091_v5 = vmul.u32.u64.low %v5220_v27, %v5215_v61  ;;  %v13092_v44 = vmul.u32.u64.high %v5220_v27, %v5215_v61, %v13091_v5  ;;  %v5384_v49 = vshrl.u32 %v5383_v19, 23 }
 0x67b   : > { %v5219_v56 = vsel %vm5205_vm1, %v5216_v47, %v5218_v20  ;;  %v5042_v59 = vshll.u32 %v13056_v4, 23  ;;  %v5344_v28 = vclz %v8241_v40  ;;  %v5151_v12 = vmul.f32 %v5150_v58, %v5148_v55 }
 0x67c   : > { %v13096_v54 = vmul.u32.u64.low %v5220_v27, %v5219_v56  ;;  %v13097_v36 = vmul.u32.u64.high %v5220_v27, %v5219_v56, %v13096_v54  ;;  %v5211_v22 = vsel %vm5205_vm1, %v5208_v34, %v5210_v37  ;;  %v8244_v63 = vadd.s32 4294967169, %v5384_v49 }
 0x67d   : > { %v16013_v0 = vand.u32 2147483647, %v13008_v32  ;;  %v16014_v1 = vcvt.s32.f32 %v12991_v52  ;;  %v5037_v19 = vshll.u32 %v12928_v17, %v13013_v60  ;;  %v8242_v4 = vadd.s32 4294967294, %v5344_v28 }
 0x67e   : > { %v16015_v35 = vand.u32 2147483647, %v13050_v9  ;;  %v16016_v61 = vsub.s32 32, %v13013_v60  ;;  %v5230_v48 = vadd.s32 1, %v13092_v44  ;;  %v5390_v55 = vadd.s32 1, %v8244_v63 }
 0x67f   : > { %v13105_v53 = vmul.f32 %v16014_v1, %v16013_v0  ;;  %v5487_v32 = vand.u32 2139095040, %v13053_v26  ;;  %v13116_v47 = vor.u32 4788187, %v5042_v59  ;;  %vm8243_vm6 = vcmp.lt.s32.totalorder %v8242_v4, 0 }
 0x680   : > { %v5387_v38 = vand.u32 8388607, %v16015_v35  ;;  %v5038_v58 = vshrl.u32 %v12995_v7, %v16016_v61  ;;  %v5227_v52 = vmul.u32 %v5220_v27, %v5211_v22  ;;  %vm5229_vm8 = vc.u32 %v13097_v36, %v13091_v5 }
 0x681   : > { %v5152_v17 = vxor.u32 2147483648, %v5151_v12  ;;  %v13120_v57 = vsel %vm8243_vm6, 0, %v8242_v4  ;;  %v5231_v40 = vsel %vm5229_vm8, %v5230_v48, %v13092_v44  ;;  %vm5391_vm10 = vcmp.gt.s32.totalorder %v5390_v55, 0 }
 0x682   : > { %v5352_v7 = vsub.s32 4294967266, %v13120_v57  ;;  %v5232_v60 = vadd.s32 %v5231_v40, %v5227_v52  ;;  %v5388_v34 = vor.u32 8388608, %v5387_v38  ;;  %v15566_v37 = vand.u32 2147483647, %v13053_v26 }
 0x683   : > { %vm15599_vm9 = vcmp.lt.s32.totalorder %v12778_v10, 0  ;;  %v5392_v27 = vsel %vm5391_vm10, %v5390_v55, 0  ;;  %v5488_v20 = vshrl.u32 %v5487_v32, 23  ;;  %v13128_v49 = vor.u32 %v5038_v58, %v5037_v19 }
 0x684   : > { %v5353_v59 = vadd.s32 127, %v5352_v7  ;;  %v5233_v28 = vadd.s32 536870912, %v5232_v60  ;;  %v13133_v54 = vsel %vm15599_vm9, %v5152_v17, %v5151_v12  ;;  %v5332_v22 = vadd.s32 %v13035_v43, %v13041_v18  ;;  %v13155_v17 = vpop.eup %8805 }
 0x685   : > { %v5394_v14 = vand.u32 31, %v5392_v27  ;;  %v5348_v63 = vsub.s32 32, %v13120_v57  ;;  %v13140_v1 = vshll.u32 %v5388_v34, 8  ;;  %v13144_v19 = vand.u32 8388607, %v15566_v37  ;;  %16017 = vst [vmem:[#allocation31_spill] sm:$0xff] %v13155_v17 }
 0x686   : > { %v13138_v0 = vshrl.u32 %v5233_v28, 30  ;;  %v5349_v4 = vshll.u32 %v13079_v24, %v13120_v57  ;;  %v5393_v35 = vshrl.u32 %v5392_v27, 5  ;;  %v8248_v38 = vadd.s32 4294967169, %v5488_v20 }
 0x687   : > { %v5395_v12 = vsub.s32 32, %v5394_v14  ;;  %v5354_v61 = vshll.u32 %v5353_v59, 23  ;;  %v5397_v18 = vshll.u32 %v15698_v62, %v5394_v14  ;;  %v5400_v58 = vshll.u32 %v15708_v29, %v5394_v14 }
 0x688   : > { %v5235_v43 = vshll.u32 %v13138_v0, 30  ;;  %v5403_v32 = vshll.u32 %v15822_v39, %v5394_v14  ;;  %v5406_v57 = vshll.u32 %v15823_v16, %v5394_v14  ;;  %v5409_v7 = vshll.u32 %v15709_v23, %v5394_v14 }
 0x689   : > { %v5398_v48 = vshrl.u32 %v15708_v29, %v5395_v12  ;;  %v5401_v55 = vshrl.u32 %v15822_v39, %v5395_v12  ;;  %v5404_v52 = vshrl.u32 %v15823_v16, %v5395_v12  ;;  %v5407_v40 = vshrl.u32 %v15709_v23, %v5395_v12 }
 0x68a   : > { %v13157_v24 = vsub.s32 %v5232_v60, %v5235_v43  ;;  %v5410_v59 = vshrl.u32 %v15697_v21, %v5395_v12  ;;  %v5350_v28 = vshrl.u32 %v5332_v22, %v5348_v63  ;;  %v5494_v56 = vadd.s32 1, %v8248_v38 }
 0x68b   : > { %v5399_v34 = vor.u32 %v5398_v48, %v5397_v18  ;;  %v5402_v27 = vor.u32 %v5401_v55, %v5400_v58  ;;  %v5405_v20 = vor.u32 %v5404_v52, %v5403_v32  ;;  %v5408_v44 = vor.u32 %v5407_v40, %v5406_v57  ;;  %v13173_v32 = vpop.eup %8807 }
 0x68c   : > { %v5238_v37 = vsub.s32 0, %v13157_v24  ;;  %vm15597_vm13 = vcmp.lt.s32.totalorder %v12591_v11, 0  ;;  %v16018_v60 = vand.u32 2147483647, %v12778_v10  ;;  %v5355_v17 = vor.u32 4788187, %v5354_v61 }
 0x68d   : > { %v5396_v14 = vshrl.u32 %v15698_v62, %v5395_v12  ;;  %v5411_v18 = vor.u32 %v5410_v59, %v5409_v7  ;;  %vm5412_vm6 = vcmp.lt.s32.totalorder %v5393_v35, 1  ;;  %vm5414_vm8 = vcmp.lt.s32.totalorder %v5393_v35, 3  ;;  %16021 = vst [vmem:[#allocation21_spill] sm:$0xff] %v13173_v32  ;;  %v4231_v59 = vpop.f32.mrf.mxu1 }
 0x68e   : > { %vm13167_vm1 = vcmp.le.f32.partialorder %v16018_v60, 0.7853982  ;;  %v8237_v58 = vmin.u32 %v5238_v37, %v13157_v24  ;;  %vm5415_vm10 = vcmp.lt.s32.totalorder %v5393_v35, 4  ;;  %v5420_v22 = vsel %vm5412_vm6, %v5399_v34, %v5402_v27 }
 0x68f   : > { %v5417_v63 = vsel %vm5415_vm10, %v5405_v20, 2102212464  ;;  %v5421_v38 = vsel %vm5415_vm10, %v5408_v44, 920167782  ;;  %v5424_v48 = vsel %vm5412_vm6, %v5402_v27, %v5405_v20  ;;  %v5425_v55 = vsel %vm5415_vm10, %v5411_v18, 1326507024 }
 0x690   : > { %v5240_v52 = vclz %v8237_v58  ;;  %vm5413_vm7 = vcmp.lt.s32.totalorder %v5393_v35, 2  ;;  %v5422_v57 = vsel %vm5414_vm8, %v5405_v20, %v5421_v38  ;;  %v5492_v61 = vor.u32 8388608, %v13144_v19 }
 0x691   : > { %v5351_v12 = vor.u32 %v5350_v28, %v5349_v4  ;;  %v5416_v40 = vsel %vm5412_vm6, %v5396_v14, %v5399_v34  ;;  %v5423_v7 = vsel %vm5413_vm7, %v5420_v22, %v5422_v57  ;;  %v5426_v37 = vsel %vm5414_vm8, %v5408_v44, %v5425_v55 }
 0x692   : > { %v8238_v60 = vadd.s32 4294967294, %v5240_v52  ;;  %v5418_v50 = vsel %vm5414_vm8, %v5402_v27, %v5417_v63  ;;  %v5427_v18 = vsel %vm5413_vm7, %v5424_v48, %v5426_v37  ;;  %vm5495_vm10 = vcmp.gt.s32.totalorder %v5494_v56, 0 }
 0x693   : > { %v5356_v32 = vand.u32 2147483647, %v5355_v17  ;;  %v13182_v58 = vmul.u32.u64.low %v13140_v1, %v5427_v18  ;;  %v13183_v2 = vmul.u32.u64.high %v13140_v1, %v5427_v18, %v13182_v58  ;;  %v5496_v20 = vsel %vm5495_vm10, %v5494_v56, 0 }
 0x694   : > { %v5046_v19 = vcvt.s32.f32 %v13128_v49  ;;  %v13187_v4 = vmul.u32.u64.low %v13140_v1, %v5423_v7  ;;  %v13188_v34 = vmul.u32.u64.high %v13140_v1, %v5423_v7, %v13187_v4  ;;  %v13192_v44 = vadd.f32 %v4231_v59, %v12379_v15 }
 0x695   : > { %v5358_v27 = vcvt.s32.f32 %v5351_v12  ;;  %vm8239_vm6 = vcmp.lt.s32.totalorder %v8238_v60, 0  ;;  %v5419_v28 = vsel %vm5413_vm7, %v5416_v40, %v5418_v50  ;;  %v5498_v17 = vand.u32 31, %v5496_v20 }
 0x696   : > { %v16022_v14 = vxor.u32 2147483648, %v13105_v53  ;;  %v16024_v49 = vand.u32 2147483647, %v13116_v47  ;;  %v13210_v63 = vsel %vm13167_vm1, %v12778_v10, %v13133_v54  ;;  %v5228_v50 = vadd.s32 %v13091_v5, %v13097_v36 }
 0x697   : > { %v5359_v35 = vmul.f32 %v5358_v27, %v5356_v32  ;;  %vm5437_vm7 = vc.u32 %v13183_v2, %v13187_v4  ;;  %v5499_v38 = vsub.s32 32, %v5498_v17  ;;  %v13218_v48 = vsel %vm8239_vm6, 0, %v8238_v60 }
 0x698   : > { %v13200_v56 = vsel %vm15597_vm13, %v16022_v14, %v13105_v53  ;;  %v13204_v22 = vmul.f32 %v5046_v19, %v16024_v49  ;;  %v13216_v53 = vshll.u32 %v5492_v61, 8  ;;  %v5435_v47 = vmul.u32 %v13140_v1, %v5419_v28 }
 0x699   : > { %16023 = vst [vmem:[#allocation14_spill] sm:$0xff] %v13200_v56  ;;  %v5438_v55 = vadd.s32 1, %v13188_v34  ;;  %v5497_v54 = vshrl.u32 %v5496_v20, 5  ;;  %v5501_v57 = vshll.u32 %v15698_v62, %v5498_v17  ;;  %v5502_v5 = vshrl.u32 %v15708_v29, %v5499_v38 }
 0x69a   : > { %v5505_v36 = vshrl.u32 %v15822_v39, %v5499_v38  ;;  %v5504_v61 = vshll.u32 %v15708_v29, %v5498_v17  ;;  %v5507_v12 = vshll.u32 %v15822_v39, %v5498_v17  ;;  %v5508_v40 = vshrl.u32 %v15823_v16, %v5499_v38 }
 0x69b   : > { %v5439_v32 = vsel %vm5437_vm7, %v5438_v55, %v13188_v34  ;;  %vm15598_vm8 = vcmp.lt.s32.totalorder %v12903_v51, 0  ;;  %v5360_v1 = vxor.u32 2147483648, %v5359_v35  ;;  %v5248_v7 = vsub.s32 4294967266, %v13218_v48 }
 0x69c   : > { %v5440_v37 = vadd.s32 %v5439_v32, %v5435_v47  ;;  %v5503_v59 = vor.u32 %v5502_v5, %v5501_v57  ;;  %v5506_v60 = vor.u32 %v5505_v36, %v5504_v61  ;;  %v5509_v18 = vor.u32 %v5508_v40, %v5507_v12 }
 0x69d   : > { %v5510_v58 = vshll.u32 %v15823_v16, %v5498_v17  ;;  %v5511_v20 = vshrl.u32 %v15709_v23, %v5499_v38  ;;  %v5513_v34 = vshll.u32 %v15709_v23, %v5498_v17  ;;  %v5514_v27 = vshrl.u32 %v15697_v21, %v5499_v38 }
 0x69e   : > { %v5441_v19 = vadd.s32 536870912, %v5440_v37  ;;  %v5695_v28 = vand.u32 2139095040, %v13192_v44  ;;  %v5244_v14 = vsub.s32 32, %v13218_v48  ;;  %vm5516_vm10 = vcmp.lt.s32.totalorder %v5497_v54, 1 }
 0x69f   : > { %v5512_v49 = vor.u32 %v5511_v20, %v5510_v58  ;;  %vm5519_vm6 = vcmp.lt.s32.totalorder %v5497_v54, 4  ;;  %v16025_v47 = vand.u32 2147483647, %v12903_v51  ;;  %v5249_v57 = vadd.s32 127, %v5248_v7 }
 0x6a0   : > { %v13244_v5 = vshrl.u32 %v5441_v19, 30  ;;  %v5515_v36 = vor.u32 %v5514_v27, %v5513_v34  ;;  %v5521_v17 = vsel %vm5519_vm6, %v5509_v18, 2102212464  ;;  %v5500_v32 = vshrl.u32 %v15698_v62, %v5499_v38 }
 0x6a1   : > { %vm13240_vm7 = vcmp.le.f32.partialorder %v16025_v47, 0.7853982  ;;  %vm5518_vm14 = vcmp.lt.s32.totalorder %v5497_v54, 3  ;;  %v5524_v61 = vsel %vm5516_vm10, %v5503_v59, %v5506_v60  ;;  %v5525_v12 = vsel %vm5519_vm6, %v5512_v49, 920167782 }
 0x6a2   : > { %v5443_v40 = vshll.u32 %v13244_v5, 30  ;;  %vm5517_vm0 = vcmp.lt.s32.totalorder %v5497_v54, 2  ;;  %v5526_v58 = vsel %vm5518_vm14, %v5509_v18, %v5525_v12  ;;  %v5528_v20 = vsel %vm5516_vm10, %v5506_v60, %v5509_v18 }
 0x6a3   : > { %v5520_v47 = vsel %vm5516_vm10, %v5500_v32, %v5503_v59  ;;  %v5522_v52 = vsel %vm5518_vm14, %v5506_v60, %v5521_v17  ;;  %v5527_v7 = vsel %vm5517_vm0, %v5524_v61, %v5526_v58  ;;  %v5529_v19 = vsel %vm5519_vm6, %v5515_v36, 1326507024  ;;  %v4144_v17 = vpop.f32.mrf.mxu0 }
 0x6a4   : > { %v13253_v34 = vsub.s32 %v5440_v37, %v5443_v40  ;;  %v5530_v38 = vsel %vm5518_vm14, %v5512_v49, %v5529_v19  ;;  %v13256_v27 = vmul.u32.u64.low %v13216_v53, %v5527_v7  ;;  %v13257_v25 = vmul.u32.u64.high %v13216_v53, %v5527_v7, %v13256_v27 }
 0x6a5   : > { %v5361_v12 = vsel %vm15598_vm8, %v5360_v1, %v5359_v35  ;;  %v5246_v18 = vshrl.u32 %v5228_v50, %v5244_v14  ;;  %v5531_v59 = vsel %vm5517_vm0, %v5528_v20, %v5530_v38  ;;  %v5696_v60 = vshrl.u32 %v5695_v28, 23  ;;  %v4233_v20 = vpop.f32.mrf.mxu1 }
 0x6a6   : > { %v5250_v32 = vshll.u32 %v5249_v57, 23  ;;  %v5446_v36 = vsub.s32 0, %v13253_v34  ;;  %v13265_v37 = vmul.u32.u64.low %v13216_v53, %v5531_v59  ;;  %v13266_v61 = vmul.u32.u64.high %v13216_v53, %v5531_v59, %v13265_v37 }
 0x6a7   : > { %v5245_v49 = vshll.u32 %v13157_v24, %v13218_v48  ;;  %v5523_v40 = vsel %vm5517_vm0, %v5520_v47, %v5522_v52  ;;  %v8256_v58 = vadd.s32 4294967169, %v5696_v60  ;;  %v16028_v35 = vand.u32 2147483647, %v13192_v44 }
 0x6a8   : > { %v5048_v1 = vxor.u32 2147483648, %v13204_v22  ;;  %v8245_v28 = vmin.u32 %v5446_v36, %v13253_v34  ;;  %v5542_v14 = vadd.s32 1, %v13257_v25  ;;  %v13277_v57 = vadd.f32 %v4144_v17, %v12379_v15 }
 0x6a9   : > { %v5699_v50 = vand.u32 8388607, %v16028_v35  ;;  %8809 = vcosq.f32 %v13210_v63  ;;  %v13283_v24 = vsel %vm13240_vm7, %v12903_v51, %v5361_v12  ;;  %v13285_v48 = vor.u32 %v5246_v18, %v5245_v49 }
 0x6aa   : > { %v5702_v52 = vadd.s32 1, %v8256_v58  ;;  %v13287_v54 = vor.u32 4788187, %v5250_v32  ;;  %v5448_v47 = vclz %v8245_v28  ;;  %v5539_v7 = vmul.u32 %v13216_v53, %v5523_v40 }
 0x6ab   : > { %vm5541_vm14 = vc.u32 %v13266_v61, %v13256_v27  ;;  %v5700_v38 = vor.u32 8388608, %v5699_v50  ;;  %v13294_v59 = vadd.f32 %v4233_v20, %v12379_v15  ;;  %v15577_v17 = vand.u32 2147483647, %v13277_v57 }
 0x6ac   : > { %v5543_v19 = vsel %vm5541_vm14, %v5542_v14, %v13257_v25  ;;  %vm5703_vm0 = vcmp.gt.s32.totalorder %v5702_v52, 0  ;;  %v8246_v12 = vadd.s32 4294967294, %v5448_v47  ;;  %v13300_v32 = vsel %vm15596_vm11, %v5048_v1, %v13204_v22 }
 0x6ad   : > { %v5544_v60 = vadd.s32 %v5543_v19, %v5539_v7  ;;  %v5704_v18 = vsel %vm5703_vm0, %v5702_v52, 0  ;;  %16029 = vst [vmem:[#allocation16_spill] sm:$0xff] %v13300_v32  ;;  %8811 = vsinq.f32 %v13210_v63  ;;  %v5591_v25 = vand.u32 2139095040, %v13277_v57 }
 0x6ae   : > { %v5706_v53 = vand.u32 31, %v5704_v18  ;;  %8813 = vcosq.f32 %v13283_v24  ;;  %v13307_v15 = vadd.s32 %v13187_v4, %v13183_v2  ;;  %vm8247_vm10 = vcmp.lt.s32.totalorder %v8246_v12, 0 }
 0x6af   : > { %v5545_v36 = vadd.s32 536870912, %v5544_v60  ;;  %v13311_v22 = vshll.u32 %v5700_v38, 8  ;;  %v13313_v58 = vsel %vm8247_vm10, 0, %v8246_v12  ;;  %v13319_v35 = vand.u32 8388607, %v15577_v17 }
 0x6b0   : > { %v5707_v40 = vsub.s32 32, %v5706_v53  ;;  %v5709_v4 = vshll.u32 %v15698_v62, %v5706_v53  ;;  %v5592_v28 = vshrl.u32 %v5591_v25, 23  ;;  %v5712_v20 = vshll.u32 %v15708_v29, %v5706_v53 }
 0x6b1   : > { %v13315_v63 = vshrl.u32 %v5545_v36, 30  ;;  %v5715_v52 = vshll.u32 %v15822_v39, %v5706_v53  ;;  %v5456_v7 = vsub.s32 4294967266, %v13313_v58  ;;  %v5705_v19 = vshrl.u32 %v5704_v18, 5 }
 0x6b2   : > { %v5710_v50 = vshrl.u32 %v15708_v29, %v5707_v40  ;;  %v5713_v1 = vshrl.u32 %v15822_v39, %v5707_v40  ;;  %v5716_v47 = vshrl.u32 %v15823_v16, %v5707_v40  ;;  %v5718_v38 = vshll.u32 %v15823_v16, %v5706_v53 }
 0x6b3   : > { %v5547_v14 = vshll.u32 %v13315_v63, 30  ;;  %v5719_v12 = vshrl.u32 %v15709_v23, %v5707_v40  ;;  %v5540_v37 = vadd.s32 %v13256_v27, %v13266_v61  ;;  %v5721_v13 = vshll.u32 %v15709_v23, %v5706_v53 }
 0x6b4   : > { %v5711_v17 = vor.u32 %v5710_v50, %v5709_v4  ;;  %v5714_v49 = vor.u32 %v5713_v1, %v5712_v20  ;;  %v5717_v25 = vor.u32 %v5716_v47, %v5715_v52  ;;  %v5722_v41 = vshrl.u32 %v15697_v21, %v5707_v40 }
 0x6b5   : > { %v13332_v36 = vsub.s32 %v5544_v60, %v5547_v14  ;;  %v5720_v2 = vor.u32 %v5719_v12, %v5718_v38  ;;  %v8252_v6 = vadd.s32 4294967169, %v5592_v28  ;;  %v5596_v46 = vor.u32 8388608, %v13319_v35 }
 0x6b6   : > { %v13338_v42 = vpop.eup %8809  ;;  %v5799_v60 = vand.u32 2139095040, %v13294_v59  ;;  %v5708_v4 = vshrl.u32 %v15698_v62, %v5707_v40  ;;  %v5723_v50 = vor.u32 %v5722_v41, %v5721_v13  ;;  %vm5724_vm6 = vcmp.lt.s32.totalorder %v5705_v19, 1 }
 0x6b7   : > { %v5550_v18 = vsub.s32 0, %v13332_v36  ;;  %vm5727_vm14 = vcmp.lt.s32.totalorder %v5705_v19, 4  ;;  %v5457_v27 = vadd.s32 127, %v5456_v7  ;;  %v5732_v1 = vsel %vm5724_vm6, %v5711_v17, %v5714_v49 }
 0x6b8   : > { %v5729_v53 = vsel %vm5727_vm14, %v5717_v25, 2102212464  ;;  %vm5726_vm0 = vcmp.lt.s32.totalorder %v5705_v19, 3  ;;  %v5733_v14 = vsel %vm5727_vm14, %v5720_v2, 920167782  ;;  %v5736_v20 = vsel %vm5724_vm6, %v5714_v49, %v5717_v25 }
 0x6b9   : > { %v8249_v61 = vmin.u32 %v5550_v18, %v13332_v36  ;;  %v5737_v52 = vsel %vm5727_vm14, %v5723_v50, 1326507024  ;;  %vm5725_vm10 = vcmp.lt.s32.totalorder %v5705_v19, 2  ;;  %v5728_v35 = vsel %vm5724_vm6, %v5708_v4, %v5711_v17 }
 0x6ba   : > { %v13345_v47 = vpop.eup %8811  ;;  %v5734_v38 = vsel %vm5726_vm0, %v5717_v25, %v5733_v14  ;;  %v5730_v41 = vsel %vm5726_vm0, %v5714_v49, %v5729_v53  ;;  %v5738_v40 = vsel %vm5726_vm0, %v5720_v2, %v5737_v52  ;;  %v5598_v7 = vadd.s32 1, %v8252_v6 }
 0x6bb   : > { %v5552_v28 = vclz %v8249_v61  ;;  %v13347_v12 = vpop.eup %8813  ;;  %v5735_v13 = vsel %vm5725_vm10, %v5732_v1, %v5734_v38  ;;  %v5452_v18 = vsub.s32 32, %v13313_v58  ;;  %v5458_v32 = vshll.u32 %v5457_v27, 23 }
 0x6bc   : > { %v5739_v30 = vsel %vm5725_vm10, %v5736_v20, %v5738_v40  ;;  %v13355_v61 = vmul.u32.u64.low %v13311_v22, %v5735_v13  ;;  %v13356_v19 = vmul.u32.u64.high %v13311_v22, %v5735_v13, %v13355_v61  ;;  %v5731_v17 = vsel %vm5725_vm10, %v5728_v35, %v5730_v41 }
 0x6bd   : > { %v8250_v45 = vadd.s32 4294967294, %v5552_v28  ;;  %v13351_v56 = vmul.u32.u64.low %v13311_v22, %v5739_v30  ;;  %v13352_v50 = vmul.u32.u64.high %v13311_v22, %v5739_v30, %v13351_v56  ;;  %vm5599_vm14 = vcmp.gt.s32.totalorder %v5598_v7, 0 }
 0x6be   : > { %v5800_v49 = vshrl.u32 %v5799_v60, 23  ;;  %v5600_v6 = vsel %vm5599_vm14, %v5598_v7, 0  ;;  %v13359_v25 = vshll.u32 %v5596_v46, 8  ;;  %v16030_v4 = vand.u32 2147483647, %v13294_v59 }
 0x6bf   : > { %vm8251_vm6 = vcmp.lt.s32.totalorder %v8250_v45, 0  ;;  %v13366_v30 = vshrl.u32 %v13307_v15, %v5452_v18  ;;  %v13368_v56 = vor.u32 4788187, %v5458_v32  ;;  %v5747_v14 = vmul.u32 %v13311_v22, %v5731_v17 }
 0x6c0   : > { %v5555_v2 = vsel %vm8251_vm6, 0, %v8250_v45  ;;  %v13363_v27 = vand.u32 8388607, %v16030_v4  ;;  %vm5749_vm0 = vc.u32 %v13352_v50, %v13355_v61  ;;  %v5750_v45 = vadd.s32 1, %v13356_v19 }
 0x6c1   : > { %v5556_v53 = vsub.s32 32, %v5555_v2  ;;  %v5560_v1 = vsub.s32 4294967266, %v5555_v2  ;;  %v5602_v46 = vand.u32 31, %v5600_v6  ;;  %v5557_v60 = vshll.u32 %v13332_v36, %v5555_v2 }
 0x6c2   : > { %v8260_v28 = vadd.s32 4294967169, %v5800_v49  ;;  %v5751_v15 = vsel %vm5749_vm0, %v5750_v45, %v13356_v19  ;;  %v5601_v35 = vshrl.u32 %v5600_v6, 5  ;;  %vm5486_vm10 = vcmp.lt.s32.totalorder %v13053_v26, 0 }
 0x6c3   : > { %v5558_v20 = vshrl.u32 %v5540_v37, %v5556_v53  ;;  %v5561_v52 = vadd.s32 127, %v5560_v1  ;;  %v5603_v32 = vsub.s32 32, %v5602_v46  ;;  %v5605_v38 = vshll.u32 %v15698_v62, %v5602_v46 }
 0x6c4   : > { %v5752_v22 = vadd.s32 %v5751_v15, %v5747_v14  ;;  %v5608_v40 = vshll.u32 %v15708_v29, %v5602_v46  ;;  %v5611_v37 = vshll.u32 %v15822_v39, %v5602_v46  ;;  %v5614_v2 = vshll.u32 %v15823_v16, %v5602_v46 }
 0x6c5   : > { %v5559_v41 = vor.u32 %v5558_v20, %v5557_v60  ;;  %v5562_v13 = vshll.u32 %v5561_v52, 23  ;;  %v5606_v7 = vshrl.u32 %v15708_v29, %v5603_v32  ;;  %v5609_v36 = vshrl.u32 %v15822_v39, %v5603_v32 }
 0x6c6   : > { %v5612_v18 = vshrl.u32 %v15823_v16, %v5603_v32  ;;  %v5753_v49 = vadd.s32 536870912, %v5752_v22  ;;  %v16031_v6 = vand.u32 2147483647, %v13053_v26  ;;  %v5615_v45 = vshrl.u32 %v15709_v23, %v5603_v32 }
 0x6c7   : > { %v5563_v19 = vor.u32 4788187, %v5562_v13  ;;  %v5566_v17 = vcvt.s32.f32 %v5559_v41  ;;  %v5607_v53 = vor.u32 %v5606_v7, %v5605_v38  ;;  %v5610_v1 = vor.u32 %v5609_v36, %v5608_v40 }
 0x6c8   : > { %vm13386_vm6 = vcmp.le.f32.partialorder %v16031_v6, 0.7853982  ;;  %v5613_v14 = vor.u32 %v5612_v18, %v5611_v37  ;;  %v13391_v20 = vshrl.u32 %v5753_v49, 30  ;;  %v5617_v52 = vshll.u32 %v15709_v23, %v5602_v46 }
 0x6c9   : > { %v5564_v60 = vand.u32 2147483647, %v5563_v19  ;;  %v5618_v15 = vshrl.u32 %v15697_v21, %v5603_v32  ;;  %v5604_v41 = vshrl.u32 %v15698_v62, %v5603_v32  ;;  %v5616_v13 = vor.u32 %v5615_v45, %v5614_v2 }
 0x6ca   : > { %vm5620_vm14 = vcmp.lt.s32.totalorder %v5601_v35, 1  ;;  %vm5621_vm0 = vcmp.lt.s32.totalorder %v5601_v35, 2  ;;  %v5755_v31 = vshll.u32 %v13391_v20, 30  ;;  %vm5623_vm3 = vcmp.lt.s32.totalorder %v5601_v35, 4 }
 0x6cb   : > { %v5567_v6 = vmul.f32 %v5566_v17, %v5564_v60  ;;  %v5619_v38 = vor.u32 %v5618_v15, %v5617_v52  ;;  %vm5622_vm15 = vcmp.lt.s32.totalorder %v5601_v35, 3  ;;  %v5625_v40 = vsel %vm5623_vm3, %v5613_v14, 2102212464 }
 0x6cc   : > { %v5628_v7 = vsel %vm5620_vm14, %v5607_v53, %v5610_v1  ;;  %v5629_v36 = vsel %vm5623_vm3, %v5616_v13, 920167782  ;;  %v13397_v18 = vsub.s32 %v5752_v22, %v5755_v31  ;;  %v5632_v19 = vsel %vm5620_vm14, %v5610_v1, %v5613_v14 }
 0x6cd   : > { %v5568_v37 = vxor.u32 2147483648, %v5567_v6  ;;  %v5630_v46 = vsel %vm5622_vm15, %v5613_v14, %v5629_v36  ;;  %v5624_v49 = vsel %vm5620_vm14, %v5604_v41, %v5607_v53  ;;  %v5633_v2 = vsel %vm5623_vm3, %v5619_v38, 1326507024 }
 0x6ce   : > { %v5631_v32 = vsel %vm5621_vm0, %v5628_v7, %v5630_v46  ;;  %v5806_v45 = vadd.s32 1, %v8260_v28  ;;  %v5758_v60 = vsub.s32 0, %v13397_v18  ;;  %v5626_v52 = vsel %vm5622_vm15, %v5610_v1, %v5625_v40 }
 0x6cf   : > { %v5569_v17 = vsel %vm5486_vm10, %v5568_v37, %v5567_v6  ;;  %v5634_v15 = vsel %vm5622_vm15, %v5616_v13, %v5633_v2  ;;  %v5453_v11 = vshll.u32 %v13253_v34, %v13313_v58  ;;  %v16034_v13 = vand.u32 2147483647, %v13287_v54 }
 0x6d0   : > { %v5635_v31 = vsel %vm5621_vm0, %v5632_v19, %v5634_v15  ;;  %v13407_v22 = vmul.u32.u64.low %v13359_v25, %v5631_v32  ;;  %v13408_v14 = vmul.u32.u64.high %v13359_v25, %v5631_v32, %v13407_v22  ;;  %v5572_v28 = vsel %vm13386_vm6, %v13053_v26, %v5569_v17 }
 0x6d1   : > { %v8257_v53 = vmin.u32 %v5758_v60, %v13397_v18  ;;  %v13416_v41 = vmul.u32.u64.low %v13359_v25, %v5635_v31  ;;  %v13417_v1 = vmul.u32.u64.high %v13359_v25, %v5635_v31, %v13416_v41  ;;  %v16035_v34 = vcvt.s32.f32 %v13285_v48 }
 0x6d2   : > { %v13426_v6 = vor.u32 %v13366_v30, %v5453_v11  ;;  %v5627_v38 = vsel %vm5621_vm0, %v5624_v49, %v5626_v52  ;;  %vm5807_vm15 = vcmp.gt.s32.totalorder %v5806_v45, 0  ;;  %8815 = vcosq.f32 %v5572_v28 }
 0x6d3   : > { %v13423_v58 = vmul.f32 %v16035_v34, %v16034_v13  ;;  %v5760_v7 = vclz %v8257_v53  ;;  %v5808_v37 = vsel %vm5807_vm15, %v5806_v45, 0  ;;  %v5748_v54 = vadd.s32 %v13355_v61, %v13352_v50 }
 0x6d4   : > { %v5646_v48 = vadd.s32 1, %v13408_v14  ;;  %v5810_v46 = vand.u32 31, %v5808_v37  ;;  %8817 = vsinq.f32 %v5572_v28  ;;  %v5643_v11 = vmul.u32 %v13359_v25, %v5627_v38 }
 0x6d5   : > { %v8258_v19 = vadd.s32 4294967294, %v5760_v7  ;;  %vm5645_vm3 = vc.u32 %v13417_v1, %v13407_v22  ;;  %v13438_v35 = vshrl.u32 %v5808_v37, 5  ;;  %v5570_v32 = vsub.s32 4, %v13315_v63 }
 0x6d6   : > { %v5647_v30 = vsel %vm5645_vm3, %v5646_v48, %v13408_v14  ;;  %v5811_v49 = vsub.s32 32, %v5810_v46  ;;  %v5813_v50 = vshll.u32 %v15698_v62, %v5810_v46  ;;  %v5816_v61 = vshll.u32 %v15708_v29, %v5810_v46 }
 0x6d7   : > { %vm8259_vm14 = vcmp.lt.s32.totalorder %v8258_v19, 0  ;;  %v5648_v2 = vadd.s32 %v5647_v30, %v5643_v11  ;;  %v5819_v60 = vshll.u32 %v15822_v39, %v5810_v46  ;;  %v5822_v14 = vshll.u32 %v15823_v16, %v5810_v46 }
 0x6d8   : > { %v5763_v45 = vsel %vm8259_vm14, 0, %v8258_v19  ;;  %v5814_v17 = vshrl.u32 %v15708_v29, %v5811_v49  ;;  %v5817_v25 = vshrl.u32 %v15822_v39, %v5811_v49  ;;  %v5820_v41 = vshrl.u32 %v15823_v16, %v5811_v49 }
 0x6d9   : > { %v5764_v52 = vsub.s32 32, %v5763_v45  ;;  %v5768_v15 = vsub.s32 4294967266, %v5763_v45  ;;  %v5649_v31 = vadd.s32 536870912, %v5648_v2  ;;  %v5765_v28 = vshll.u32 %v13397_v18, %v5763_v45 }
 0x6da   : > { %v5815_v53 = vor.u32 %v5814_v17, %v5813_v50  ;;  %v5823_v13 = vshrl.u32 %v15709_v23, %v5811_v49  ;;  %v5818_v37 = vor.u32 %v5817_v25, %v5816_v61  ;;  %v5821_v48 = vor.u32 %v5820_v41, %v5819_v60 }
 0x6db   : > { %v5766_v34 = vshrl.u32 %v5748_v54, %v5764_v52  ;;  %v5769_v38 = vadd.s32 127, %v5768_v15  ;;  %v13450_v7 = vshrl.u32 %v5649_v31, 30  ;;  %v5825_v11 = vshll.u32 %v15709_v23, %v5810_v46 }
 0x6dc   : > { %v5824_v19 = vor.u32 %v5823_v13, %v5822_v14  ;;  %v5826_v30 = vshrl.u32 %v15697_v21, %v5811_v49  ;;  %v5571_v50 = vsel %vm5486_vm10, %v5570_v32, %v13315_v63  ;;  %v5812_v54 = vshrl.u32 %v15698_v62, %v5811_v49 }
 0x6dd   : > { %v5767_v40 = vor.u32 %v5766_v34, %v5765_v28  ;;  %v5770_v36 = vshll.u32 %v5769_v38, 23  ;;  %v5651_v18 = vshll.u32 %v13450_v7, 30  ;;  %vm5828_vm0 = vcmp.lt.s32.totalorder %v13438_v35, 1 }
 0x6de   : > { %v5827_v45 = vor.u32 %v5826_v30, %v5825_v11  ;;  %vm5829_vm15 = vcmp.lt.s32.totalorder %v13438_v35, 2  ;;  %vm5830_vm3 = vcmp.lt.s32.totalorder %v13438_v35, 3  ;;  %vm5831_vm14 = vcmp.lt.s32.totalorder %v13438_v35, 4 }
 0x6df   : > { %v5771_v61 = vor.u32 4788187, %v5770_v36  ;;  %v13461_v17 = vsub.s32 %v5648_v2, %v5651_v18  ;;  %v5774_v46 = vcvt.s32.f32 %v5767_v40  ;;  %v5833_v25 = vsel %vm5831_vm14, %v5821_v48, 2102212464  ;;  %v13467_v32 = vpop.eup %8815 }
 0x6e0   : > { %v5836_v60 = vsel %vm5828_vm0, %v5815_v53, %v5818_v37  ;;  %v5837_v63 = vsel %vm5831_vm14, %v5824_v19, 920167782  ;;  %v5840_v2 = vsel %vm5828_vm0, %v5818_v37, %v5821_v48  ;;  %v5832_v40 = vsel %vm5828_vm0, %v5812_v54, %v5815_v53 }
 0x6e1   : > { %v5772_v49 = vand.u32 2147483647, %v5771_v61  ;;  %v5654_v52 = vsub.s32 0, %v13461_v17  ;;  %v5838_v36 = vsel %vm5830_vm3, %v5821_v48, %v5837_v63  ;;  %v13474_v15 = vpop.eup %8817  ;;  %v5841_v14 = vsel %vm5831_vm14, %v5827_v45, 1326507024 }
 0x6e2   : > { %v5839_v31 = vsel %vm5829_vm15, %v5836_v60, %v5838_v36  ;;  %v16036_v28 = vor.u32 8388608, %v13363_v27  ;;  %vm5174_vm10 = vcmp.lt.s32.totalorder %v12971_v3, 0  ;;  %v5834_v38 = vsel %vm5830_vm3, %v5818_v37, %v5833_v25 }
 0x6e3   : > { %v5775_v13 = vmul.f32 %v5774_v46, %v5772_v49  ;;  %v8253_v34 = vmin.u32 %v5654_v52, %v13461_v17  ;;  %v5842_v48 = vsel %vm5830_vm3, %v5824_v19, %v5841_v14  ;;  %v5573_v27 = vsel %vm13386_vm6, 0, %v5571_v50 }
 0x6e4   : > { %v5844_v41 = vshll.u32 %v16036_v28, 8  ;;  %v5843_v53 = vsel %vm5829_vm15, %v5840_v2, %v5842_v48  ;;  %8819 = vsinq.f32 %v13283_v24  ;;  %v16037_v37 = vand.u32 2147483647, %v13192_v44 }
 0x6e5   : > { %v5776_v18 = vxor.u32 2147483648, %v5775_v13  ;;  %v5656_v54 = vclz %v8253_v34  ;;  %vm5694_vm3 = vcmp.lt.s32.totalorder %v13192_v44, 0  ;;  %v5835_v46 = vsel %vm5829_vm15, %v5832_v40, %v5834_v38 }
 0x6e6   : > { %v13490_v11 = vmul.u32.u64.low %v5844_v41, %v5839_v31  ;;  %v13491_v30 = vmul.u32.u64.high %v5844_v41, %v5839_v31, %v13490_v11  ;;  %v13496_v45 = vmul.u32.u64.low %v5844_v41, %v5843_v53  ;;  %v13497_v61 = vmul.u32.u64.high %v5844_v41, %v5843_v53, %v13496_v45 }
 0x6e7   : > { %vm13502_vm0 = vcmp.le.f32.partialorder %v16037_v37, 0.7853982  ;;  %v5256_v4 = vxor.u32 2147483648, %v13423_v58  ;;  %v5462_v50 = vcvt.s32.f32 %v13426_v6  ;;  %v5777_v25 = vsel %vm5694_vm3, %v5776_v18, %v5775_v13 }
 0x6e8   : > { %v8254_v60 = vadd.s32 4294967294, %v5656_v54  ;;  %v5780_v24 = vsel %vm13502_vm0, %v13192_v44, %v5777_v25  ;;  %v5854_v63 = vadd.s32 1, %v13491_v30  ;;  %v5577_v49 = vadd.s32 3, %v5573_v27 }
 0x6e9   : > { %v5778_v52 = vsub.s32 4, %v13391_v20  ;;  %v16040_v35 = vand.u32 2147483647, %v13368_v56  ;;  %v5851_v2 = vmul.u32 %v5844_v41, %v5835_v46  ;;  %vm5853_vm15 = vc.u32 %v13497_v61, %v13490_v11 }
 0x6ea   : > { %vm8255_vm6 = vcmp.lt.s32.totalorder %v8254_v60, 0  ;;  %v5644_v6 = vadd.s32 %v13407_v22, %v13417_v1  ;;  %v5855_v31 = vsel %vm5853_vm15, %v5854_v63, %v13491_v30  ;;  %v5674_v14 = vsub.s32 4, %v13450_v7 }
 0x6eb   : > { %v5463_v36 = vmul.f32 %v5462_v50, %v16040_v35  ;;  %v5659_v40 = vsel %vm8255_vm6, 0, %v8254_v60  ;;  %8821 = vsinq.f32 %v5780_v24  ;;  %v5856_v34 = vadd.s32 %v5855_v31, %v5851_v2 }
 0x6ec   : > { %v5660_v28 = vsub.s32 32, %v5659_v40  ;;  %v5664_v13 = vsub.s32 4294967266, %v5659_v40  ;;  %v5257_v56 = vsel %vm5174_vm10, %v5256_v4, %v13423_v58  ;;  %8823 = vcosq.f32 %v5780_v24 }
 0x6ed   : > { %v5578_v41 = vand.u32 3, %v5577_v49  ;;  %v5779_v38 = vsel %vm5694_vm3, %v5778_v52, %v13391_v20  ;;  %vm5382_vm14 = vcmp.lt.s32.totalorder %v13050_v9, 0  ;;  %v5661_v22 = vshll.u32 %v13461_v17, %v5659_v40 }
 0x6ee   : > { %v5662_v1 = vshrl.u32 %v5644_v6, %v5660_v28  ;;  %v5665_v48 = vadd.s32 127, %v5664_v13  ;;  %v5857_v53 = vadd.s32 536870912, %v5856_v34  ;;  %v5464_v30 = vxor.u32 2147483648, %v5463_v36 }
 0x6ef   : > { %vm5590_vm6 = vcmp.lt.s32.totalorder %v13277_v57, 0  ;;  %vm15600_vm15 = vcmp.lt.s32.totalorder %v13294_v59, 0  ;;  %v5581_v58 = vxor.u32 2147483648, %v13474_v15  ;;  %v16041_v45 = vand.u32 2147483647, %v13277_v57 }
 0x6f0   : > { %v5663_v27 = vor.u32 %v5662_v1, %v5661_v22  ;;  %v5666_v18 = vshll.u32 %v5665_v48, 23  ;;  %v5858_v54 = vshrl.u32 %v5857_v53, 30  ;;  %v5675_v20 = vsel %vm5590_vm6, %v5674_v14, %v13450_v7 }
 0x6f1   : > { %vm13542_vm3 = vcmp.le.f32.partialorder %v16041_v45, 0.7853982  ;;  %v5584_v37 = vxor.u32 2147483648, %v13467_v32  ;;  %v5781_v46 = vsel %vm13502_vm0, 0, %v5779_v38  ;;  %v5258_v4 = vsub.s32 4, %v13138_v0  ;;  %v13560_v19 = vpop.eup %8819 }
 0x6f2   : > { %v5667_v50 = vor.u32 4788187, %v5666_v18  ;;  %v5859_v25 = vshll.u32 %v5858_v54, 30  ;;  %v5882_v60 = vsub.s32 4, %v5858_v54  ;;  %vm5580_vm11 = vcmp.eq.s32.totalorder %v5578_v41, 0 }
 0x6f3   : > { %v5677_v7 = vsel %vm13542_vm3, 0, %v5675_v20  ;;  %vm5576_vm13 = vweird.f32 %v13053_v26  ;;  %v5582_v24 = vsel %vm5580_vm11, %v13467_v32, %v5581_v58  ;;  %vm5583_vm8 = vcmp.eq.s32.totalorder %v5578_v41, 2 }
 0x6f4   : > { %v16044_v63 = vand.u32 2147483647, %v12971_v3  ;;  %v5668_v52 = vand.u32 2147483647, %v5667_v50  ;;  %v5670_v35 = vcvt.s32.f32 %v5663_v27  ;;  %v13562_v2 = vsub.s32 %v5856_v34, %v5859_v25 }
 0x6f5   : > { %v5259_v6 = vsel %vm5174_vm10, %v5258_v4, %v13138_v0  ;;  %v5883_v32 = vsel %vm15600_vm15, %v5882_v60, %v5858_v54  ;;  %v5585_v40 = vsel %vm5583_vm8, %v5584_v37, %v13474_v15  ;;  %v5785_v31 = vadd.s32 3, %v5781_v46 }
 0x6f6   : > { %vm13556_vm9 = vcmp.le.f32.partialorder %v16044_v63, 0.7853982  ;;  %v5671_v28 = vmul.f32 %v5670_v35, %v5668_v52  ;;  %v5862_v13 = vsub.s32 0, %v13562_v2  ;;  %v5465_v0 = vsel %vm5382_vm14, %v5464_v30, %v5463_v36 }
 0x6f7   : > { %v5260_v14 = vsel %vm13556_vm9, %v12971_v3, %v5257_v56  ;;  %v5261_v34 = vsel %vm13556_vm9, 0, %v5259_v6  ;;  %v5681_v38 = vadd.s32 3, %v5677_v7  ;;  %v16047_v22 = vand.u32 2147483647, %v13294_v59 }
 0x6f8   : > { %8825 = vcosq.f32 %v5260_v14  ;;  %v5672_v1 = vxor.u32 2147483648, %v5671_v28  ;;  %v8261_v56 = vmin.u32 %v5862_v13, %v13562_v2  ;;  %vm5579_vm8 = vcmp.lt.s32.totalorder %v5578_v41, 2  ;;  %v8822_v53 = vpop.eup %8821 }
 0x6f9   : > { %vm13580_vm11 = vcmp.le.f32.partialorder %v16047_v22, 0.7853982  ;;  %8827 = vsinq.f32 %v5260_v14  ;;  %v5852_v58 = vadd.s32 %v13490_v11, %v13497_v61  ;;  %v5586_v36 = vsel %vm5579_vm8, %v5582_v24, %v5585_v40  ;;  %v8824_v18 = vpop.eup %8823 }
 0x6fa   : > { %v5885_v48 = vsel %vm13580_vm11, 0, %v5883_v32  ;;  %v5265_v30 = vadd.s32 3, %v5261_v34  ;;  %v5466_v27 = vsub.s32 4, %v13244_v5  ;;  %v5673_v54 = vsel %vm5590_vm6, %v5672_v1, %v5671_v28 }
 0x6fb   : > { %v5864_v20 = vclz %v8261_v56  ;;  %v13592_v45 = vand.u32 3, %v5785_v31  ;;  %v16050_v37 = vand.u32 2147483647, %v13050_v9  ;;  %v5676_v11 = vsel %vm13542_vm3, %v13277_v57, %v5673_v54 }
 0x6fc   : > { %v13603_v61 = vand.u32 3, %v5681_v38  ;;  %v5889_v41 = vadd.s32 3, %v5885_v48  ;;  %8829 = vcosq.f32 %v5676_v11  ;;  %v13610_v25 = vsel %vm5576_vm13, nan, %v5586_v36 }
 0x6fd   : > { %vm13596_vm9 = vcmp.le.f32.partialorder %v16050_v37, 0.7853982  ;;  %v8262_v50 = vadd.s32 4294967294, %v5864_v20  ;;  %v5789_v60 = vxor.u32 2147483648, %v8822_v53  ;;  %8831 = vsinq.f32 %v5676_v11 }
 0x6fe   : > { %v5468_v4 = vsel %vm13596_vm9, %v13050_v9, %v5465_v0  ;;  %v5792_v7 = vxor.u32 2147483648, %v8824_v18  ;;  %v5266_v24 = vand.u32 3, %v5265_v30  ;;  %v5467_v17 = vsel %vm5382_vm14, %v5466_v27, %v13244_v5 }
 0x6ff   : > { %vm8263_vm10 = vcmp.lt.s32.totalorder %v8262_v50, 0  ;;  %vm5788_vm0 = vcmp.eq.s32.totalorder %v13592_v45, 0  ;;  %vm5791_vm6 = vcmp.eq.s32.totalorder %v13592_v45, 2  ;;  %8833 = vcosq.f32 %v5468_v4 }
 0x700   : > { %v5867_v63 = vsel %vm8263_vm10, 0, %v8262_v50  ;;  %v13617_v49 = vand.u32 3, %v5889_v41  ;;  %8835 = vsinq.f32 %v5468_v4  ;;  %v5154_v26 = vsub.s32 4, %v13004_v33 }
 0x701   : > { %v5868_v52 = vsub.s32 32, %v5867_v63  ;;  %v5872_v35 = vsub.s32 4294967266, %v5867_v63  ;;  %vm5787_vm13 = vcmp.lt.s32.totalorder %v13592_v45, 2  ;;  %v5790_v6 = vsel %vm5788_vm0, %v8824_v18, %v5789_v60 }
 0x702   : > { %v5469_v5 = vsel %vm13596_vm9, 0, %v5467_v17  ;;  %v5869_v32 = vshll.u32 %v13562_v2, %v5867_v63  ;;  %v5793_v40 = vsel %vm5791_vm6, %v5792_v7, %v8822_v53  ;;  %vm5267_vm14 = vcmp.lt.s32.totalorder %v5266_v24, 2 }
 0x703   : > { %vm16053_vm3 = vcmp.lt.s32.totalorder %v12778_v10, 0  ;;  %v5870_v14 = vshrl.u32 %v5852_v58, %v5868_v52  ;;  %v5873_v28 = vadd.s32 127, %v5872_v35  ;;  %v5362_v34 = vsub.s32 4, %v13070_v8 }
 0x704   : > { %v5155_v31 = vsel %vm16053_vm3, %v5154_v26, %v13004_v33  ;;  %vm5687_vm8 = vcmp.eq.s32.totalorder %v13603_v61, 2  ;;  %v5473_v38 = vadd.s32 3, %v5469_v5  ;;  %v5165_v22 = vxor.u32 2147483648, %v13345_v47 }
 0x705   : > { %v5157_v13 = vsel %vm13167_vm1, 0, %v5155_v31  ;;  %v8826_v0 = vpop.eup %8825  ;;  %v5168_v1 = vxor.u32 2147483648, %v13338_v42  ;;  %v5871_v33 = vor.u32 %v5870_v14, %v5869_v32  ;;  %v5874_v48 = vshll.u32 %v5873_v28, 23 }
 0x706   : > { %v5161_v2 = vadd.s32 3, %v5157_v13  ;;  %v8828_v56 = vpop.eup %8827  ;;  %v5272_v43 = vxor.u32 2147483648, %v8826_v0  ;;  %vm16054_vm1 = vcmp.lt.s32.totalorder %v12903_v51, 0  ;;  %vm5683_vm0 = vcmp.lt.s32.totalorder %v13603_v61, 2 }
 0x707   : > { %v5363_v53 = vsel %vm16054_vm1, %v5362_v34, %v13070_v8  ;;  %v5269_v58 = vxor.u32 2147483648, %v8828_v56  ;;  %vm5271_vm6 = vcmp.eq.s32.totalorder %v5266_v24, 2  ;;  %v5875_v27 = vor.u32 4788187, %v5874_v48 }
 0x708   : > { %v5162_v36 = vand.u32 3, %v5161_v2  ;;  %v5365_v30 = vsel %vm13240_vm7, 0, %v5363_v53  ;;  %vm5680_vm3 = vweird.f32 %v13277_v57  ;;  %vm5268_vm15 = vcmp.eq.s32.totalorder %v5266_v24, 0  ;;  %v16063_v57 = vld [vmem:[#allocation14_spill] sm:$0xff]  ;;  %v16069_v53 = vld [vmem:[#allocation12_spill] sm:$0xff] }
 0x709   : > { %v5273_v18 = vsel %vm5271_vm6, %v5272_v43, %v8828_v56  ;;  %v5369_v54 = vadd.s32 3, %v5365_v30  ;;  %v5270_v20 = vsel %vm5268_vm15, %v8826_v0, %v5269_v58  ;;  %v13642_v37 = vand.u32 3, %v5473_v38  ;;  %v8830_v4 = vpop.eup %8829  ;;  %v16058_v38 = vld [vmem:[#allocation15_spill] sm:$0xff]  ;;  %v16070_v58 = vld [vmem:[#allocation16_spill] sm:$0xff] }
 0x70a   : > { %vm5164_vm10 = vcmp.eq.s32.totalorder %v5162_v36, 0  ;;  %vm5167_vm9 = vcmp.eq.s32.totalorder %v5162_v36, 2  ;;  %v5876_v8 = vand.u32 2147483647, %v5875_v27  ;;  %v5878_v46 = vcvt.s32.f32 %v5871_v33  ;;  %v8832_v60 = vpop.eup %8831  ;;  %v16064_v33 = vld [vmem:[#allocation33_spill] sm:$0xff]  ;;  %v16071_v27 = vld [vmem:[#allocation32_spill] sm:$0xff] }
 0x70b   : > { %v5166_v11 = vsel %vm5164_vm10, %v13338_v42, %v5165_v22  ;;  %v5169_v41 = vsel %vm5167_vm9, %v5168_v1, %v13345_v47  ;;  %v5794_v55 = vsel %vm5787_vm13, %v5790_v6, %v5793_v40  ;;  %v5274_v50 = vsel %vm5267_vm14, %v5270_v20, %v5273_v18  ;;  %v16062_v22 = vld [vmem:[#allocation13_spill] sm:$0xff] }
 0x70c   : > { %vm5160_vm7 = vweird.f32 %v12778_v10  ;;  %vm5163_vm1 = vcmp.lt.s32.totalorder %v5162_v36, 2  ;;  %v5879_v7 = vmul.f32 %v5878_v46, %v5876_v8  ;;  %v5688_v17 = vxor.u32 2147483648, %v8830_v4  ;;  %v8834_v52 = vpop.eup %8833 }
 0x70d   : > { %v5170_v63 = vsel %vm5163_vm1, %v5166_v11, %v5169_v41  ;;  %v5370_v26 = vand.u32 3, %v5369_v54  ;;  %v5685_v35 = vxor.u32 2147483648, %v8832_v60  ;;  %vm5476_vm15 = vcmp.eq.s32.totalorder %v13642_v37, 0  ;;  %v8836_v47 = vpop.eup %8835  ;;  %v16073_v41 = vld [vmem:[#allocation10_spill] sm:$0xff] }
 0x70e   : > { %vm5479_vm9 = vcmp.eq.s32.totalorder %v13642_v37, 2  ;;  %v5373_v42 = vxor.u32 2147483648, %v13560_v19  ;;  %v5880_v45 = vxor.u32 2147483648, %v5879_v7  ;;  %v5689_v24 = vsel %vm5687_vm8, %v5688_v17, %v8832_v60 }
 0x70f   : > { %vm16055_vm13 = vweird.f32 %v12971_v3  ;;  %vm5475_vm14 = vcmp.lt.s32.totalorder %v13642_v37, 2  ;;  %v5376_v5 = vxor.u32 2147483648, %v13347_v12  ;;  %vm16056_vm10 = vcmp.eq.s32.totalorder %v13603_v61, 0 }
 0x710   : > { %v5275_v6 = vsel %vm16055_vm13, nan, %v5274_v50  ;;  %v5686_v32 = vsel %vm16056_vm10, %v8830_v4, %v5685_v35  ;;  %vm5784_vm6 = vweird.f32 %v13192_v44  ;;  %v5477_v40 = vxor.u32 2147483648, %v8836_v47  ;;  %v16077_v35 = vld [vmem:[#allocation19_spill] sm:$0xff] }
 0x711   : > { %v5480_v31 = vxor.u32 2147483648, %v8834_v52  ;;  %v5171_v14 = vsel %vm5160_vm7, nan, %v5170_v63  ;;  %vm16057_vm1 = vcmp.lt.s32.totalorder %v13294_v59, 0  ;;  %v5690_v3 = vsel %vm5683_vm0, %v5686_v32, %v5689_v24 }
 0x712   : > { %v5881_v28 = vsel %vm16057_vm1, %v5880_v45, %v5879_v7  ;;  %vm5372_vm8 = vcmp.eq.s32.totalorder %v5370_v26, 0  ;;  %vm5375_vm13 = vcmp.eq.s32.totalorder %v5370_v26, 2  ;;  %v5691_v13 = vsel %vm5680_vm3, nan, %v5690_v3 }
 0x713   : > { %v5884_v34 = vsel %vm13580_vm11, %v13294_v59, %v5881_v28  ;;  %v5374_v0 = vsel %vm5372_vm8, %v13347_v12, %v5373_v42  ;;  %v16059_v10 = vand.u32 2147483647, %v16058_v38  ;;  %5966 = vmatprep.subr.mxu0 %v5691_v13  ;;  %v5377_v61 = vsel %vm5375_vm13, %v5376_v5, %v13560_v19  ;;  %v16081_v5 = vld [vmem:[#allocation21_spill] sm:$0xff] }
 0x714   : > { %8837 = vcosq.f32 %v5884_v34  ;;  %v4842_v1 = vsub.s32 4, %v16062_v22  ;;  %5967 = vmatpush1.msra.mxu0 %v13610_v25  ;;  %v5478_v12 = vsel %vm5476_vm15, %v8834_v52, %v5477_v40  ;;  %v5481_v56 = vsel %vm5479_vm9, %v5480_v31, %v8836_v47  ;;  %v16078_v47 = vld [vmem:[#allocation28_spill] sm:$0xff]  ;;  %v16084_v13 = vld [vmem:[#allocation9_spill] sm:$0xff] }
 0x715   : > { %vm13676_vm7 = vcmp.le.f32.partialorder %v16059_v10, 0.7853982  ;;  %8839 = vsinq.f32 %v5884_v34  ;;  %v16065_v48 = vand.u32 2147483647, %v16064_v33  ;;  %5968 = vmatprep.subr.mxu0 %v5275_v6  ;;  %vm16068_vm0 = vcmp.lt.s32.totalorder %v16058_v38, 0 }
 0x716   : > { %v4844_v15 = vsel %vm13676_vm7, %v16058_v38, %v16063_v57  ;;  %v4843_v43 = vsel %vm16068_vm0, %v4842_v1, %v16062_v22  ;;  %v5050_v25 = vsub.s32 4, %v16069_v53  ;;  %5969 = vmatpush1.msra.mxu0 %v5171_v14  ;;  %vm5371_vm3 = vcmp.lt.s32.totalorder %v5370_v26, 2  ;;  %v16076_v26 = vld [vmem:[#allocation29_spill] sm:$0xff]  ;;  %v16083_v14 = vld [vmem:[#allocation31_spill] sm:$0xff]  ;;  %v16089_v1 = vld [vmem:[#allocation26_spill] sm:$0xff] }
 0x717   : > { %vm13693_vm11 = vcmp.le.f32.partialorder %v16065_v48, 0.7853982  ;;  %8841 = vcosq.f32 %v4844_v15  ;;  %v4845_v30 = vsel %vm13676_vm7, 0, %v4843_v43  ;;  %v4738_v18 = vsub.s32 4, %v16071_v27 }
 0x718   : > { %v5052_v36 = vsel %vm13693_vm11, %v16064_v33, %v16070_v58  ;;  %8843 = vsinq.f32 %v4844_v15  ;;  %v5378_v54 = vsel %vm5371_vm3, %v5374_v0, %v5377_v61  ;;  %v4849_v20 = vadd.s32 3, %v4845_v30  ;;  %v16088_v61 = vld [vmem:[#allocation20_spill] sm:$0xff] }
 0x719   : > { %vm16072_vm15 = vcmp.lt.s32.totalorder %v16064_v33, 0  ;;  %8845 = vcosq.f32 %v5052_v36  ;;  %v5482_v46 = vsel %vm5475_vm14, %v5478_v12, %v5481_v56  ;;  %vm16074_vm9 = vcmp.lt.s32.totalorder %v16073_v41, 0 }
 0x71a   : > { %v5051_v8 = vsel %vm16072_vm15, %v5050_v25, %v16069_v53  ;;  %8847 = vsinq.f32 %v5052_v36  ;;  %v4739_v4 = vsel %vm16074_vm9, %v4738_v18, %v16071_v27  ;;  %v13720_v50 = vsel %vm5784_vm6, nan, %v5794_v55 }
 0x71b   : > { %v5053_v11 = vsel %vm13693_vm11, 0, %v5051_v8  ;;  %v13722_v60 = vand.u32 3, %v4849_v20  ;;  %v4741_v63 = vsel %vm12881_vm12, 0, %v4739_v4  ;;  %vm5895_vm14 = vcmp.eq.s32.totalorder %v13617_v49, 2 }
 0x71c   : > { %v5057_v7 = vadd.s32 3, %v5053_v11  ;;  %vm5472_vm10 = vweird.f32 %v13050_v9  ;;  %vm5368_vm1 = vweird.f32 %v12903_v51  ;;  %v4745_v37 = vadd.s32 3, %v4741_v63  ;;  %v16079_v51 = vld [vmem:[#allocation39_spill] sm:$0xff] }
 0x71d   : > { %v4946_v52 = vsub.s32 4, %v16076_v26  ;;  %vm5892_vm8 = vcmp.eq.s32.totalorder %v13617_v49, 0  ;;  %v13731_v44 = vsel %vm5472_vm10, nan, %v5482_v46  ;;  %v13733_v55 = vsel %vm5368_vm1, nan, %v5378_v54 }
 0x71e   : > { %v4749_v42 = vxor.u32 2147483648, %v16077_v35  ;;  %v4752_v45 = vxor.u32 2147483648, %v16078_v47  ;;  %vm5891_vm12 = vcmp.lt.s32.totalorder %v13617_v49, 2  ;;  %v13738_v24 = vand.u32 3, %v5057_v7 }
 0x71f   : > { %v4746_v9 = vand.u32 3, %v4745_v37  ;;  %vm16080_vm6 = vcmp.lt.s32.totalorder %v16079_v51, 0  ;;  %v4957_v32 = vxor.u32 2147483648, %v16081_v5  ;;  %vm5888_vm13 = vweird.f32 %v13294_v59  ;;  %v16096_v59 = vld [vmem:[#allocation18_spill] sm:$0xff] }
 0x720   : > { %v4947_v6 = vsel %vm16080_vm6, %v4946_v52, %v16076_v26  ;;  %vm4852_vm7 = vcmp.eq.s32.totalorder %v13722_v60, 0  ;;  %vm4855_vm11 = vcmp.eq.s32.totalorder %v13722_v60, 2  ;;  %v4960_v28 = vxor.u32 2147483648, %v16083_v14 }
 0x721   : > { %v4949_v31 = vsel %vm12940_vm2, 0, %v4947_v6  ;;  %vm4748_vm3 = vcmp.eq.s32.totalorder %v4746_v9, 0  ;;  %vm4751_vm15 = vcmp.eq.s32.totalorder %v4746_v9, 2  ;;  %v16085_v34 = vand.u32 2147483647, %v16084_v13  ;;  %v8838_v15 = vpop.eup %8837 }
 0x722   : > { %v4953_v3 = vadd.s32 3, %v4949_v31  ;;  %v4750_v10 = vsel %vm4748_vm3, %v16078_v47, %v4749_v42  ;;  %v4753_v2 = vsel %vm4751_vm15, %v4752_v45, %v16077_v35  ;;  %v4426_v22 = vsub.s32 4, %v16088_v61  ;;  %v8840_v56 = vpop.eup %8839  ;;  %v16092_v42 = vld [vmem:[#allocation24_spill] sm:$0xff] }
 0x723   : > { %vm13753_vm9 = vcmp.le.f32.partialorder %v16085_v34, 0.7853982  ;;  %v5896_v48 = vxor.u32 2147483648, %v8838_v15  ;;  %vm5056_vm3 = vweird.f32 %v16064_v33  ;;  %vm4747_vm15 = vcmp.lt.s32.totalorder %v4746_v9, 2  ;;  %v16104_v34 = vld [vmem:[#allocation40_spill] sm:$0xff] }
 0x724   : > { %v4428_v57 = vsel %vm13753_vm9, %v16084_v13, %v16089_v1  ;;  %v4954_v12 = vand.u32 3, %v4953_v3  ;;  %vm16090_vm10 = vcmp.lt.s32.totalorder %v16084_v13, 0  ;;  %v8842_v43 = vpop.eup %8841  ;;  %v5893_v53 = vxor.u32 2147483648, %v8840_v56  ;;  %v16108_v1 = vld [vmem:[#allocation22_spill] sm:$0xff] }
 0x725   : > { %8849 = vcosq.f32 %v4428_v57  ;;  %v4427_v19 = vsel %vm16090_vm10, %v4426_v22, %v16088_v61  ;;  %vm5063_vm2 = vcmp.eq.s32.totalorder %v13738_v24, 2  ;;  %v4754_v25 = vsel %vm4747_vm15, %v4750_v10, %v4753_v2  ;;  %v8844_v58 = vpop.eup %8843  ;;  %v13892_v61 = vpop.permute.xlu0 %5927 }
 0x726   : > { %8851 = vsinq.f32 %v4428_v57  ;;  %vm4955_vm1 = vcmp.lt.s32.totalorder %v4954_v12, 2  ;;  %v5897_v36 = vsel %vm5895_vm14, %v5896_v48, %v8840_v56  ;;  %v4856_v30 = vxor.u32 2147483648, %v8842_v43  ;;  %v8846_v27 = vpop.eup %8845 }
 0x727   : > { %vm4956_vm6 = vcmp.eq.s32.totalorder %v4954_v12, 0  ;;  %vm4959_vm0 = vcmp.eq.s32.totalorder %v4954_v12, 2  ;;  %v5894_v18 = vsel %vm5892_vm8, %v8838_v15, %v5893_v53  ;;  %v4853_v54 = vxor.u32 2147483648, %v8844_v58  ;;  %v8848_v46 = vpop.eup %8847  ;;  %v16111_v53 = vld [vmem:[#allocation36_spill] sm:$0xff] }
 0x728   : > { %v4958_v20 = vsel %vm4956_vm6, %v16083_v14, %v4957_v32  ;;  %v4429_v8 = vsel %vm13753_vm9, 0, %v4427_v19  ;;  %v5898_v11 = vsel %vm5891_vm12, %v5894_v18, %v5897_v36  ;;  %v4857_v4 = vsel %vm4855_vm11, %v4856_v30, %v8844_v58  ;;  %v16099_v32 = vld [vmem:[#allocation35_spill] sm:$0xff]  ;;  %v16112_v58 = vld [vmem:[#allocation34_spill] sm:$0xff] }
 0x729   : > { %v5064_v7 = vxor.u32 2147483648, %v8846_v27  ;;  %v4961_v17 = vsel %vm4959_vm0, %v4960_v28, %v16081_v5  ;;  %v5899_v63 = vsel %vm5888_vm13, nan, %v5898_v11  ;;  %v4854_v37 = vsel %vm4852_vm7, %v8842_v43, %v4853_v54  ;;  %v16103_v28 = vld [vmem:[#allocation23_spill] sm:$0xff] }
 0x72a   : > { %v5061_v26 = vxor.u32 2147483648, %v8848_v46  ;;  %v4433_v52 = vadd.s32 3, %v4429_v8  ;;  %6055 = vmatprep.subr.mxu1 %v5899_v63  ;;  %vm16091_vm14 = vcmp.lt.s32.totalorder %v13722_v60, 2  ;;  %v16093_v47 = vand.u32 2147483647, %v16092_v42 }
 0x72b   : > { %v4858_v35 = vsel %vm16091_vm14, %v4854_v37, %v4857_v4  ;;  %v5065_v49 = vsel %vm5063_vm2, %v5064_v7, %v8848_v46  ;;  %v4634_v9 = vsub.s32 4, %v16096_v59  ;;  %6056 = vmatpush1.msra.mxu1 %v13720_v50  ;;  %vm16097_vm12 = vweird.f32 %v16058_v38  ;;  %v16114_v46 = vld [vmem:[#allocation25_spill] sm:$0xff] }
 0x72c   : > { %vm13795_vm8 = vcmp.le.f32.partialorder %v16093_v47, 0.7853982  ;;  %v4859_v6 = vsel %vm16097_vm12, nan, %v4858_v35  ;;  %vm16098_vm13 = vcmp.eq.s32.totalorder %v13738_v24, 0  ;;  %v4962_v5 = vsel %vm4955_vm1, %v4958_v20, %v4961_v17  ;;  %6057 = vmatprep.subr.mxu1 %v13731_v44  ;;  %v16113_v20 = vld [vmem:[#allocation38_spill] sm:$0xff] }
 0x72d   : > { %v5062_v60 = vsel %vm16098_vm13, %v8846_v27, %v5061_v26  ;;  %v4636_v40 = vsel %vm13795_vm8, %v16092_v42, %v16099_v32  ;;  %5970 = vmatprep.subr.mxu0 %v4859_v6  ;;  %vm16100_vm7 = vcmp.lt.s32.totalorder %v13738_v24, 2  ;;  %vm16101_vm11 = vweird.f32 %v16073_v41  ;;  %6058 = vmatpush1.msra.mxu1 %v13733_v55  ;;  %v16105_v55 = vld [vmem:[#allocation11_spill] sm:$0xff] }
 0x72e   : > { %v5066_v31 = vsel %vm16100_vm7, %v5062_v60, %v5065_v49  ;;  %v4755_v38 = vsel %vm16101_vm11, nan, %v4754_v25  ;;  %vm16102_vm0 = vcmp.lt.s32.totalorder %v16092_v42, 0  ;;  %8853 = vcosq.f32 %v4636_v40 }
 0x72f   : > { %v4635_v50 = vsel %vm16102_vm0, %v4634_v9, %v16096_v59  ;;  %v5067_v14 = vsel %vm5056_vm3, nan, %v5066_v31  ;;  %5971 = vmatpush1.msra.mxu0 %v4755_v38  ;;  %vm4952_vm9 = vweird.f32 %v16079_v51  ;;  %v4434_v44 = vand.u32 3, %v4433_v52 }
 0x730   : > { %6059 = vmatprep.subr.mxu1 %v5067_v14  ;;  %v4963_v24 = vsel %vm4952_vm9, nan, %v4962_v5  ;;  %8855 = vsinq.f32 %v4636_v40  ;;  %v4322_v41 = vsub.s32 4, %v16103_v28  ;;  %v4637_v3 = vsel %vm13795_vm8, 0, %v4635_v50  ;;  %v8265_v5 = vld [vmem:[%s15404_s2 + $0x48] sm:$0xff]  ;;  %v8266_v50 = vld [vmem:[%s15404_s2 + $0x50] sm:$0xff] }
 0x731   : > { %6060 = vmatpush1.msra.mxu1 %v4963_v24  ;;  %v4530_v0 = vsub.s32 4, %v16104_v34  ;;  %vm16106_vm10 = vcmp.lt.s32.totalorder %v16105_v55, 0  ;;  %vm4439_vm2 = vcmp.eq.s32.totalorder %v4434_v44, 2  ;;  %vm16109_vm1 = vcmp.lt.s32.totalorder %v16108_v1, 0 }
 0x732   : > { %v8850_v10 = vpop.eup %8849  ;;  %v4323_v33 = vsel %vm16106_vm10, %v4322_v41, %v16103_v28  ;;  %v4641_v12 = vadd.s32 3, %v4637_v3  ;;  %vm4436_vm6 = vcmp.eq.s32.totalorder %v4434_v44, 0  ;;  %v4333_v25 = vxor.u32 2147483648, %v16111_v53 }
 0x733   : > { %v8852_v2 = vpop.eup %8851  ;;  %v4440_v51 = vxor.u32 2147483648, %v8850_v10  ;;  %v4325_v22 = vsel %vm12637_vm4, 0, %v4323_v33  ;;  %v4531_v57 = vsel %vm16109_vm1, %v4530_v0, %v16104_v34  ;;  %v4336_v36 = vxor.u32 2147483648, %v16112_v58 }
 0x734   : > { %v4437_v15 = vxor.u32 2147483648, %v8852_v2  ;;  %v4329_v56 = vadd.s32 3, %v4325_v22  ;;  %v4533_v19 = vsel %vm12683_vm5, 0, %v4531_v57  ;;  %vm4435_vm3 = vcmp.lt.s32.totalorder %v4434_v44, 2  ;;  %v13876_v44 = vpop.permute.xlu1 %5922 }
 0x735   : > { %v4441_v43 = vsel %vm4439_vm2, %v4440_v51, %v8852_v2  ;;  %v4537_v18 = vadd.s32 3, %v4533_v19  ;;  %vm4432_vm4 = vweird.f32 %v16084_v13  ;;  %v4541_v8 = vxor.u32 2147483648, %v16113_v20  ;;  %v8264_v13 = vld [vmem:[%s15404_s2 + $0x40] sm:$0xff] }
 0x736   : > { %v4438_v30 = vsel %vm4436_vm6, %v8850_v10, %v4437_v15  ;;  %v4330_v27 = vand.u32 3, %v4329_v56  ;;  %v4544_v11 = vxor.u32 2147483648, %v16114_v46  ;;  %v4642_v7 = vand.u32 3, %v4641_v12 }
 0x737   : > { %v4442_v54 = vsel %vm4435_vm3, %v4438_v30, %v4441_v43  ;;  %v4538_v37 = vand.u32 3, %v4537_v18  ;;  %vm4328_vm8 = vweird.f32 %v16105_v55  ;;  %vm16115_vm11 = vcmask 261120   ;;  %v13903_v30 = vpop.permute.xlu0 %5917 }
 0x738   : > { %v4443_v4 = vsel %vm4432_vm4, nan, %v4442_v54  ;;  %vm4332_vm5 = vcmp.eq.s32.totalorder %v4330_v27, 0  ;;  %vm4335_vm15 = vcmp.eq.s32.totalorder %v4330_v27, 2  ;;  %vm4331_vm14 = vcmp.lt.s32.totalorder %v4330_v27, 2  ;;  %vm16117_vm1 = vmmov %vm16115_vm11  ;;  %v13878_v24 = vpop.permute.xlu1 %5912 }
 0x739   : > { %5972 = vmatprep.subr.mxu0 %v4443_v4  ;;  %v4334_v17 = vsel %vm4332_vm5, %v16112_v58, %v4333_v25  ;;  %v4337_v63 = vsel %vm4335_vm15, %v4336_v36, %v16111_v53  ;;  %vm4540_vm12 = vcmp.eq.s32.totalorder %v4538_v37, 0  ;;  %vm4543_vm13 = vcmp.eq.s32.totalorder %v4538_v37, 2  ;;  %vm16118_vm3 = vmmov %vm16117_vm1 }
 0x73a   : > { %v4338_v26 = vsel %vm4331_vm14, %v4334_v17, %v4337_v63  ;;  %vm4647_vm7 = vcmp.eq.s32.totalorder %v4642_v7, 2  ;;  %v4542_v45 = vsel %vm4540_vm12, %v16114_v46, %v4541_v8  ;;  %v4545_v59 = vsel %vm4543_vm13, %v4544_v11, %v16113_v20  ;;  %vm16119_vm4 = vmmov %vm16117_vm1 }
 0x73b   : > { %v8854_v52 = vpop.eup %8853  ;;  %v4339_v35 = vsel %vm4328_vm8, nan, %v4338_v26  ;;  %v16116_v60 = vmov 0.0   ;;  %vm4644_vm0 = vcmp.eq.s32.totalorder %v4642_v7, 0  ;;  %vm4539_vm9 = vcmp.lt.s32.totalorder %v4538_v37, 2  ;;  %vm16120_vm5 = vmmov %vm16117_vm1 }
 0x73c   : > { %v4648_v49 = vxor.u32 2147483648, %v8854_v52  ;;  %5973 = vmatpush1.msra.mxu0 %v4339_v35  ;;  %vm4643_vm10 = vcmp.lt.s32.totalorder %v4642_v7, 2  ;;  %v4546_v40 = vsel %vm4539_vm9, %v4542_v45, %v4545_v59  ;;  %vm4640_vm2 = vweird.f32 %v16092_v42  ;;  %v8267_v42 = vld [vmem:[%s15404_s2 + $0x58] sm:$0xff]  ;;  %vm16121_vm15 = vmmov %vm16117_vm1 }
 0x73d   : > { %v8856_v47 = vpop.eup %8855  ;;  %8272 = vmatmul.mubr.msk.f32.vlgmr.msra.gmra.mxu0 %vm16115_vm11, %v8264_v13  ;;  %vm4536_vm6 = vweird.f32 %v16108_v1  ;;  %vm16122_vm14 = vmmov %vm16117_vm1 }
 0x73e   : > { %v4645_v9 = vxor.u32 2147483648, %v8856_v47  ;;  %v4649_v6 = vsel %vm4647_vm7, %v4648_v49, %v8856_v47  ;;  %6012 = vmatprep.mubr.f32.mxu0 %v16116_v60  ;;  %v4547_v14 = vsel %vm4536_vm6, nan, %v4546_v40  ;;  %vm16123_vm8 = vmmov %vm16117_vm1 }
 0x740   : > { %v4646_v32 = vsel %vm4644_vm0, %v8854_v52, %v4645_v9 }
 0x741   : > { %v4650_v31 = vsel %vm4643_vm10, %v4646_v32, %v4649_v6  ;;  %8273 = vmatmul.mubr.msk.f32.gmra.mxu0 %vm16117_vm1, %v8265_v5 }
 0x742   : > { %v4651_v38 = vsel %vm4640_vm2, nan, %v4650_v31  ;;  %6018 = vmatprep.mubr.f32.mxu0 %v16116_v60 }
 0x743   : > { %6061 = vmatprep.subr.mxu1 %v4651_v38 }
 0x744   : > { %6062 = vmatpush1.msra.mxu1 %v4547_v14 }
 0x745   : > { %8276 = vmatmul.mubr.msk.f32.vlgmr.msra.gmra.mxu1 %vm16118_vm3, %v8264_v13  ;;  %8274 = vmatmul.mubr.msk.f32.gmra.mxu0 %vm16119_vm4, %v8266_v50 }
 0x746   : > { %6101 = vmatprep.mubr.f32.mxu1 %v16116_v60  ;;  %6024 = vmatprep.mubr.f32.mxu0 %v16116_v60 }
 0x749   : > { %8277 = vmatmul.mubr.msk.f32.gmra.mxu1 %vm16120_vm5, %v8265_v5  ;;  %8275 = vmatmul.mubr.msk.f32.gmra.mxu0 %vm16121_vm15, %v8267_v42 }
 0x74a   : > { %6107 = vmatprep.mubr.f32.mxu1 %v16116_v60  ;;  %7858 = vmatprep.mubr.f32.mxu0 %v16116_v60 }
 0x74d   : > { %8278 = vmatmul.mubr.msk.f32.gmra.mxu1 %vm16122_vm14, %v8266_v50 }
 0x74e   : > { %6113 = vmatprep.mubr.f32.mxu1 %v16116_v60 }
 0x751   : > { %8279 = vmatmul.mubr.msk.f32.gmra.mxu1 %vm16123_vm8, %v8267_v42 }
 0x752   : > { %7929 = vmatprep.mubr.f32.mxu1 %v16116_v60 }
 0x7fd   : > { %v6008_v28 = vpop.f32.mrf.mxu0 }
 0x7fe   : > { %v13881_v41 = vadd.f32 %v6008_v28, %v13878_v24 }
 0x7ff   : > { %v6010_v3 = vpop.f32.mrf.mxu0 }
 0x800   : > { %16124 = vst [vmem:[#allocation17_spill] sm:$0xff] %v13881_v41  ;;  %v6120_v34 = vand.u32 2147483647, %v13881_v41  ;;  %v6123_v0 = vand.u32 2139095040, %v13881_v41  ;;  %v13886_v10 = vadd.f32 %v6010_v3, %v13878_v24 }
 0x801   : > { %v6014_v25 = vpop.f32.mrf.mxu0 }
 0x802   : > { %16125 = vst [vmem:[#allocation41_spill] sm:$0xff] %v13886_v10  ;;  %v6124_v55 = vshrl.u32 %v6123_v0, 23  ;;  %v6127_v33 = vand.u32 8388607, %v6120_v34  ;;  %v15602_v2 = vand.u32 2147483647, %v13886_v10  ;;  %v13909_v46 = vadd.f32 %v6014_v25, %v13903_v30 }
 0x803   : > { %v6227_v51 = vand.u32 2139095040, %v13886_v10 }
 0x804   : > { %v8280_v22 = vadd.s32 4294967169, %v6124_v55  ;;  %v6128_v56 = vor.u32 8388608, %v6127_v33  ;;  %v13899_v19 = vand.u32 8388607, %v15602_v2  ;;  %16127 = vst [vmem:[#allocation13_spill] sm:$0xff] %v13909_v46 }
 0x805   : > { %v6097_v1 = vpop.f32.mrf.mxu1  ;;  %v6228_v57 = vshrl.u32 %v6227_v51, 23 }
 0x806   : > { %v6130_v15 = vadd.s32 1, %v8280_v22  ;;  %v13895_v12 = vadd.f32 %v6097_v1, %v13878_v24  ;;  %v13905_v54 = vshll.u32 %v6128_v56, 8  ;;  %v6232_v8 = vor.u32 8388608, %v13899_v19 }
 0x807   : > { %v8284_v48 = vadd.s32 4294967169, %v6228_v57 }
 0x808   : > { %16126 = vst [vmem:[#allocation15_spill] sm:$0xff] %v13895_v12  ;;  %vm6131_vm12 = vcmp.gt.s32.totalorder %v6130_v15, 0  ;;  %v6328_v43 = vand.u32 2147483647, %v13895_v12  ;;  %v6331_v53 = vand.u32 2139095040, %v13895_v12 }
 0x809   : > { %v6132_v58 = vsel %vm6131_vm12, %v6130_v15, 0  ;;  %v6234_v36 = vadd.s32 1, %v8284_v48  ;;  %v6099_v15 = vpop.f32.mrf.mxu1 }
 0x80a   : > { %v6133_v27 = vshrl.u32 %v6132_v58, 5  ;;  %v6134_v18 = vand.u32 31, %v6132_v58  ;;  %v6332_v20 = vshrl.u32 %v6331_v53, 23  ;;  %v6335_v7 = vand.u32 8388607, %v6328_v43 }
 0x80b   : > { %vm6235_vm13 = vcmp.gt.s32.totalorder %v6234_v36, 0 }
 0x80c   : > { %v6135_v11 = vsub.s32 32, %v6134_v18  ;;  %v6137_v4 = vshll.u32 %v15698_v62, %v6134_v18  ;;  %v6140_v17 = vshll.u32 %v15708_v29, %v6134_v18  ;;  %v6143_v63 = vshll.u32 %v15822_v39, %v6134_v18 }
 0x80d   : > { %v6146_v37 = vshll.u32 %v15823_v16, %v6134_v18  ;;  %v6149_v26 = vshll.u32 %v15709_v23, %v6134_v18  ;;  %vm6152_vm7 = vcmp.lt.s32.totalorder %v6133_v27, 1  ;;  %vm6153_vm11 = vcmp.lt.s32.totalorder %v6133_v27, 2 }
 0x80e   : > { %v6138_v13 = vshrl.u32 %v15708_v29, %v6135_v11  ;;  %v6141_v52 = vshrl.u32 %v15822_v39, %v6135_v11  ;;  %v6144_v35 = vshrl.u32 %v15823_v16, %v6135_v11  ;;  %v6136_v49 = vshrl.u32 %v15698_v62, %v6135_v11 }
 0x80f   : > { %v6147_v47 = vshrl.u32 %v15709_v23, %v6135_v11  ;;  %v6150_v45 = vshrl.u32 %v15697_v21, %v6135_v11  ;;  %v8288_v60 = vadd.s32 4294967169, %v6332_v20  ;;  %vm6154_vm0 = vcmp.lt.s32.totalorder %v6133_v27, 3 }
 0x810   : > { %v6139_v59 = vor.u32 %v6138_v13, %v6137_v4  ;;  %v6142_v9 = vor.u32 %v6141_v52, %v6140_v17  ;;  %v6145_v6 = vor.u32 %v6144_v35, %v6143_v63  ;;  %vm6155_vm9 = vcmp.lt.s32.totalorder %v6133_v27, 4 }
 0x811   : > { %v6148_v5 = vor.u32 %v6147_v47, %v6146_v37  ;;  %v6151_v32 = vor.u32 %v6150_v45, %v6149_v26  ;;  %v6338_v3 = vadd.s32 1, %v8288_v60  ;;  %v6336_v33 = vor.u32 8388608, %v6335_v7 }
 0x812   : > { %v6156_v40 = vsel %vm6152_vm7, %v6136_v49, %v6139_v59  ;;  %v6157_v31 = vsel %vm6155_vm9, %v6145_v6, 2102212464  ;;  %v6160_v38 = vsel %vm6152_vm7, %v6139_v59, %v6142_v9  ;;  %v6164_v50 = vsel %vm6152_vm7, %v6142_v9, %v6145_v6 }
 0x813   : > { %v6158_v14 = vsel %vm6154_vm0, %v6142_v9, %v6157_v31  ;;  %v6161_v42 = vsel %vm6155_vm9, %v6148_v5, 920167782  ;;  %v6165_v28 = vsel %vm6155_vm9, %v6151_v32, 1326507024  ;;  %v6236_v51 = vsel %vm6235_vm13, %v6234_v36, 0 }
 0x814   : > { %v6162_v0 = vsel %vm6154_vm0, %v6145_v6, %v6161_v42  ;;  %v6166_v55 = vsel %vm6154_vm0, %v6148_v5, %v6165_v28  ;;  %v6159_v22 = vsel %vm6153_vm11, %v6156_v40, %v6158_v14  ;;  %vm6339_vm10 = vcmp.gt.s32.totalorder %v6338_v3, 0 }
 0x815   : > { %v6163_v1 = vsel %vm6153_vm11, %v6160_v38, %v6162_v0  ;;  %v6167_v57 = vsel %vm6153_vm11, %v6164_v50, %v6166_v55  ;;  %v6340_v25 = vsel %vm6339_vm10, %v6338_v3, 0  ;;  %v13940_v58 = vand.u32 31, %v6236_v51 }
 0x816   : > { %v13932_v56 = vmul.u32.u64.low %v13905_v54, %v6167_v57  ;;  %v13933_v48 = vmul.u32.u64.high %v13905_v54, %v6167_v57, %v13932_v56  ;;  %v13936_v19 = vmul.u32.u64.low %v13905_v54, %v6163_v1  ;;  %v13937_v53 = vmul.u32.u64.high %v13905_v54, %v6163_v1, %v13936_v19 }
 0x817   : > { %v6539_v36 = vand.u32 2139095040, %v13909_v46  ;;  %v6342_v18 = vand.u32 31, %v6340_v25  ;;  %v13943_v20 = vshll.u32 %v6336_v33, 8  ;;  %v13945_v27 = vshll.u32 %v6232_v8, 8 }
 0x818   : > { %v13948_v11 = vadd.f32 %v6099_v15, %v13878_v24  ;;  %v6175_v4 = vmul.u32 %v13905_v54, %v6159_v22  ;;  %v6341_v7 = vshrl.u32 %v6340_v25, 5  ;;  %v13951_v17 = vshrl.u32 %v6236_v51, 5 }
 0x819   : > { %v13954_v63 = vsub.s32 32, %v13940_v58  ;;  %vm6177_vm2 = vc.u32 %v13933_v48, %v13936_v19  ;;  %v6178_v37 = vadd.s32 1, %v13937_v53  ;;  %v6343_v26 = vsub.s32 32, %v6342_v18 }
 0x81a   : > { %16128 = vst [vmem:[#allocation14_spill] sm:$0xff] %v13948_v11  ;;  %v6241_v8 = vshll.u32 %v15698_v62, %v13940_v58  ;;  %v6345_v24 = vshll.u32 %v15698_v62, %v6342_v18  ;;  %v6348_v13 = vshll.u32 %v15708_v29, %v6342_v18  ;;  %v6351_v54 = vshll.u32 %v15822_v39, %v6342_v18 }
 0x81b   : > { %v6354_v52 = vshll.u32 %v15823_v16, %v6342_v18  ;;  %v6179_v35 = vsel %vm6177_vm2, %v6178_v37, %v13937_v53  ;;  %v6344_v49 = vshrl.u32 %v15698_v62, %v6343_v26  ;;  %v6346_v47 = vshrl.u32 %v15708_v29, %v6343_v26 }
 0x81c   : > { %v6349_v45 = vshrl.u32 %v15822_v39, %v6343_v26  ;;  %v6180_v59 = vadd.s32 %v6179_v35, %v6175_v4  ;;  %v6352_v9 = vshrl.u32 %v15823_v16, %v6343_v26  ;;  %v6355_v6 = vshrl.u32 %v15709_v23, %v6343_v26 }
 0x81d   : > { %v6357_v60 = vshll.u32 %v15709_v23, %v6342_v18  ;;  %v6347_v5 = vor.u32 %v6346_v47, %v6345_v24  ;;  %v6358_v40 = vshrl.u32 %v15697_v21, %v6343_v26  ;;  %vm6360_vm1 = vcmp.lt.s32.totalorder %v6341_v7, 1 }
 0x81e   : > { %v6350_v32 = vor.u32 %v6349_v45, %v6348_v13  ;;  %v6181_v31 = vadd.s32 536870912, %v6180_v59  ;;  %v6353_v38 = vor.u32 %v6352_v9, %v6351_v54  ;;  %v6356_v50 = vor.u32 %v6355_v6, %v6354_v52 }
 0x81f   : > { %vm6361_vm6 = vcmp.lt.s32.totalorder %v6341_v7, 2  ;;  %v6359_v14 = vor.u32 %v6358_v40, %v6357_v60  ;;  %vm6362_vm3 = vcmp.lt.s32.totalorder %v6341_v7, 3  ;;  %vm6363_vm4 = vcmp.lt.s32.totalorder %v6341_v7, 4 }
 0x820   : > { %v6364_v42 = vsel %vm6360_vm1, %v6344_v49, %v6347_v5  ;;  %v13973_v28 = vshrl.u32 %v6181_v31, 30  ;;  %v6365_v3 = vsel %vm6363_vm4, %v6353_v38, 2102212464  ;;  %v6368_v0 = vsel %vm6360_vm1, %v6347_v5, %v6350_v32 }
 0x821   : > { %v6369_v55 = vsel %vm6363_vm4, %v6356_v50, 920167782  ;;  %v6366_v33 = vsel %vm6362_vm3, %v6350_v32, %v6365_v3  ;;  %v6372_v22 = vsel %vm6360_vm1, %v6350_v32, %v6353_v38  ;;  %v6373_v1 = vsel %vm6363_vm4, %v6359_v14, 1326507024 }
 0x822   : > { %16129 = vst [vmem:[#allocation33_spill] sm:$0xff] %v13973_v28  ;;  %v6370_v51 = vsel %vm6362_vm3, %v6353_v38, %v6369_v55  ;;  %v6183_v57 = vshll.u32 %v13973_v28, 30  ;;  %v6374_v56 = vsel %vm6362_vm3, %v6356_v50, %v6373_v1  ;;  %v6244_v53 = vshll.u32 %v15708_v29, %v13940_v58 }
 0x823   : > { %v6371_v15 = vsel %vm6361_vm6, %v6368_v0, %v6370_v51  ;;  %v6375_v25 = vsel %vm6361_vm6, %v6372_v22, %v6374_v56  ;;  %v6247_v37 = vshll.u32 %v15822_v39, %v13940_v58  ;;  %v6367_v24 = vsel %vm6361_vm6, %v6364_v42, %v6366_v33 }
 0x824   : > { %v13981_v18 = vmul.u32.u64.low %v13943_v20, %v6371_v15  ;;  %v13982_v4 = vmul.u32.u64.high %v13943_v20, %v6371_v15, %v13981_v18  ;;  %v13987_v26 = vsub.s32 %v6180_v59, %v6183_v57  ;;  %v6242_v52 = vshrl.u32 %v15708_v29, %v13954_v63 }
 0x825   : > { %v13991_v13 = vmul.u32.u64.low %v13943_v20, %v6375_v25  ;;  %v13992_v54 = vmul.u32.u64.high %v13943_v20, %v6375_v25, %v13991_v13  ;;  %v6245_v35 = vshrl.u32 %v15822_v39, %v13954_v63  ;;  %v6248_v49 = vshrl.u32 %v15823_v16, %v13954_v63 }
 0x826   : > { %v6250_v47 = vshll.u32 %v15823_v16, %v13940_v58  ;;  %v6186_v45 = vsub.s32 0, %v13987_v26  ;;  %v6251_v7 = vshrl.u32 %v15709_v23, %v13954_v63  ;;  %v6253_v59 = vshll.u32 %v15709_v23, %v13940_v58 }
 0x827   : > { %v6254_v9 = vshrl.u32 %v15697_v21, %v13954_v63  ;;  %v6386_v6 = vadd.s32 1, %v13982_v4  ;;  %v6243_v60 = vor.u32 %v6242_v52, %v6241_v8  ;;  %v6246_v5 = vor.u32 %v6245_v35, %v6244_v53 }
 0x828   : > { %v6249_v32 = vor.u32 %v6248_v49, %v6247_v37  ;;  %v8281_v40 = vmin.u32 %v6186_v45, %v13987_v26  ;;  %v6383_v31 = vmul.u32 %v13943_v20, %v6367_v24  ;;  %vm6385_vm5 = vc.u32 %v13992_v54, %v13981_v18 }
 0x829   : > { %v6252_v38 = vor.u32 %v6251_v7, %v6250_v47  ;;  %v6387_v50 = vsel %vm6385_vm5, %v6386_v6, %v13982_v4  ;;  %v6240_v58 = vshrl.u32 %v15698_v62, %v13954_v63  ;;  %v6255_v14 = vor.u32 %v6254_v9, %v6253_v59 }
 0x82a   : > { %v6435_v42 = vand.u32 2139095040, %v13948_v11  ;;  %v6188_v3 = vclz %v8281_v40  ;;  %v6388_v8 = vadd.s32 %v6387_v50, %v6383_v31  ;;  %vm6256_vm15 = vcmp.lt.s32.totalorder %v13951_v17, 1 }
 0x82b   : > { %vm6259_vm14 = vcmp.lt.s32.totalorder %v13951_v17, 4  ;;  %vm6258_vm8 = vcmp.lt.s32.totalorder %v13951_v17, 3  ;;  %v6264_v0 = vsel %vm6256_vm15, %v6243_v60, %v6246_v5  ;;  %vm6257_vm12 = vcmp.lt.s32.totalorder %v13951_v17, 2 }
 0x82c   : > { %v6261_v20 = vsel %vm6259_vm14, %v6249_v32, 2102212464  ;;  %v6265_v55 = vsel %vm6259_vm14, %v6252_v38, 920167782  ;;  %v8282_v33 = vadd.s32 4294967294, %v6188_v3  ;;  %v6389_v51 = vadd.s32 536870912, %v6388_v8 }
 0x82d   : > { %v6266_v22 = vsel %vm6258_vm8, %v6249_v32, %v6265_v55  ;;  %v6260_v63 = vsel %vm6256_vm15, %v6240_v58, %v6243_v60  ;;  %v6268_v57 = vsel %vm6256_vm15, %v6246_v5, %v6249_v32  ;;  %v6269_v15 = vsel %vm6259_vm14, %v6255_v14, 1326507024 }
 0x82e   : > { %v6267_v1 = vsel %vm6257_vm12, %v6264_v0, %v6266_v22  ;;  %vm8283_vm13 = vcmp.lt.s32.totalorder %v8282_v33, 0  ;;  %v14024_v56 = vshrl.u32 %v6389_v51, 30  ;;  %v6262_v53 = vsel %vm6258_vm8, %v6246_v5, %v6261_v20 }
 0x82f   : > { %v6270_v25 = vsel %vm6258_vm8, %v6252_v38, %v6269_v15  ;;  %v6191_v4 = vsel %vm8283_vm13, 0, %v8282_v33  ;;  %v14029_v24 = vmul.u32.u64.low %v13945_v27, %v6267_v1  ;;  %v14030_v13 = vmul.u32.u64.high %v13945_v27, %v6267_v1, %v14029_v24 }
 0x830   : > { %16130 = vst [vmem:[#allocation12_spill] sm:$0xff] %v14024_v56  ;;  %v6271_v37 = vsel %vm6257_vm12, %v6268_v57, %v6270_v25  ;;  %v6391_v52 = vshll.u32 %v14024_v56, 30  ;;  %v6540_v35 = vshrl.u32 %v6539_v36, 23  ;;  %v6436_v45 = vshrl.u32 %v6435_v42, 23 }
 0x831   : > { %v14037_v49 = vmul.u32.u64.low %v13945_v27, %v6271_v37  ;;  %v14038_v47 = vmul.u32.u64.high %v13945_v27, %v6271_v37, %v14037_v49  ;;  %v6196_v7 = vsub.s32 4294967266, %v6191_v4  ;;  %v6263_v9 = vsel %vm6257_vm12, %v6260_v63, %v6262_v53 }
 0x832   : > { %v14040_v59 = vsub.s32 %v6388_v8, %v6391_v52  ;;  %v6282_v6 = vadd.s32 1, %v14030_v13  ;;  %v8292_v60 = vadd.s32 4294967169, %v6436_v45  ;;  %v8296_v32 = vadd.s32 4294967169, %v6540_v35 }
 0x833   : > { %v6279_v40 = vmul.u32 %v13945_v27, %v6263_v9  ;;  %vm6281_vm7 = vc.u32 %v14038_v47, %v14029_v24  ;;  %v15601_v36 = vand.u32 2147483647, %v13948_v11  ;;  %v6192_v38 = vsub.s32 32, %v6191_v4 }
 0x834   : > { %v6394_v5 = vsub.s32 0, %v14040_v59  ;;  %v6442_v31 = vadd.s32 1, %v8292_v60  ;;  %v6197_v50 = vadd.s32 127, %v6196_v7  ;;  %v6283_v17 = vsel %vm6281_vm7, %v6282_v6, %v14030_v13 }
 0x835   : > { %v6284_v14 = vadd.s32 %v6283_v17, %v6279_v40  ;;  %v6176_v42 = vadd.s32 %v13936_v19, %v13933_v48  ;;  %v6546_v27 = vadd.s32 1, %v8296_v32  ;;  %v15605_v55 = vand.u32 2147483647, %v13909_v46 }
 0x836   : > { %v8289_v58 = vmin.u32 %v6394_v5, %v14040_v59  ;;  %vm6443_vm11 = vcmp.gt.s32.totalorder %v6442_v31, 0  ;;  %v6198_v51 = vshll.u32 %v6197_v50, 23  ;;  %v6439_v63 = vand.u32 8388607, %v15601_v36 }
 0x837   : > { %v6444_v8 = vsel %vm6443_vm11, %v6442_v31, 0  ;;  %v6285_v20 = vadd.s32 536870912, %v6284_v14  ;;  %v6194_v33 = vshrl.u32 %v6176_v42, %v6192_v38  ;;  %v6193_v15 = vshll.u32 %v13987_v26, %v6191_v4 }
 0x838   : > { %v6396_v3 = vclz %v8289_v58  ;;  %v6446_v0 = vand.u32 31, %v6444_v8  ;;  %vm6547_vm9 = vcmp.gt.s32.totalorder %v6546_v27, 0  ;;  %v6384_v48 = vadd.s32 %v13981_v18, %v13992_v54 }
 0x839   : > { %v14057_v1 = vshrl.u32 %v6285_v20, 30  ;;  %v14067_v25 = vand.u32 8388607, %v15605_v55  ;;  %v6195_v37 = vor.u32 %v6194_v33, %v6193_v15  ;;  %v6199_v13 = vor.u32 4788187, %v6198_v51 }
 0x83a   : > { %v8290_v22 = vadd.s32 4294967294, %v6396_v3  ;;  %v6447_v57 = vsub.s32 32, %v6446_v0  ;;  %v6440_v52 = vor.u32 8388608, %v6439_v63  ;;  %v6445_v26 = vshrl.u32 %v6444_v8, 5 }
 0x83b   : > { %16131 = vst [vmem:[#allocation16_spill] sm:$0xff] %v14057_v1  ;;  %v6287_v53 = vshll.u32 %v14057_v1, 30  ;;  %v6548_v45 = vsel %vm6547_vm9, %v6546_v27, 0  ;;  %v6449_v54 = vshll.u32 %v15698_v62, %v6446_v0  ;;  %v6452_v7 = vshll.u32 %v15708_v29, %v6446_v0 }
 0x83c   : > { %vm8291_vm0 = vcmp.lt.s32.totalorder %v8290_v22, 0  ;;  %v6450_v35 = vshrl.u32 %v15708_v29, %v6447_v57  ;;  %v6453_v4 = vshrl.u32 %v15822_v39, %v6447_v57  ;;  %v6456_v9 = vshrl.u32 %v15823_v16, %v6447_v57 }
 0x83d   : > { %v14062_v19 = vsel %vm8291_vm0, 0, %v8290_v22  ;;  %v14070_v49 = vsub.s32 %v6284_v14, %v6287_v53  ;;  %v6455_v60 = vshll.u32 %v15822_v39, %v6446_v0  ;;  %v6458_v5 = vshll.u32 %v15823_v16, %v6446_v0 }
 0x83e   : > { %v6404_v18 = vsub.s32 4294967266, %v14062_v19  ;;  %v6459_v32 = vshrl.u32 %v15709_v23, %v6447_v57  ;;  %v6202_v40 = vcvt.s32.f32 %v6195_v37  ;;  %v6451_v31 = vor.u32 %v6450_v35, %v6449_v54 }
 0x83f   : > { %v6290_v6 = vsub.s32 0, %v14070_v49  ;;  %v6454_v38 = vor.u32 %v6453_v4, %v6452_v7  ;;  %v14081_v50 = vshll.u32 %v6440_v52, 8  ;;  %v6457_v58 = vor.u32 %v6456_v9, %v6455_v60  ;;  %v6016_v4 = vpop.f32.mrf.mxu0 }
 0x840   : > { %v6460_v17 = vor.u32 %v6459_v32, %v6458_v5  ;;  %v6461_v14 = vshll.u32 %v15709_v23, %v6446_v0  ;;  %v6462_v42 = vshrl.u32 %v15697_v21, %v6447_v57  ;;  %v6200_v3 = vand.u32 2147483647, %v6199_v13 }
 0x841   : > { %v6405_v8 = vadd.s32 127, %v6404_v18  ;;  %v8285_v27 = vmin.u32 %v6290_v6, %v14070_v49  ;;  %v6550_v20 = vand.u32 31, %v6548_v45  ;;  %v6448_v33 = vshrl.u32 %v15698_v62, %v6447_v57 }
 0x842   : > { %v6463_v51 = vor.u32 %v6462_v42, %v6461_v14  ;;  %vm6464_vm10 = vcmp.lt.s32.totalorder %v6445_v26, 1  ;;  %vm6467_vm2 = vcmp.lt.s32.totalorder %v6445_v26, 4  ;;  %v6400_v22 = vsub.s32 32, %v14062_v19  ;;  %v6103_v42 = vpop.f32.mrf.mxu1 }
 0x843   : > { %vm6466_vm1 = vcmp.lt.s32.totalorder %v6445_v26, 3  ;;  %v6472_v63 = vsel %vm6464_vm10, %v6451_v31, %v6454_v38  ;;  %v6473_v15 = vsel %vm6467_vm2, %v6460_v17, 920167782  ;;  %vm6465_vm6 = vcmp.lt.s32.totalorder %v6445_v26, 2 }
 0x844   : > { %v6469_v0 = vsel %vm6467_vm2, %v6457_v58, 2102212464  ;;  %v6474_v53 = vsel %vm6466_vm1, %v6457_v58, %v6473_v15  ;;  %v6476_v37 = vsel %vm6464_vm10, %v6454_v38, %v6457_v58  ;;  %v6406_v13 = vshll.u32 %v6405_v8, 23 }
 0x845   : > { %v6292_v52 = vclz %v8285_v27  ;;  %v6475_v35 = vsel %vm6465_vm6, %v6472_v63, %v6474_v53  ;;  %v6477_v57 = vsel %vm6467_vm2, %v6463_v51, 1326507024  ;;  %v6544_v9 = vor.u32 8388608, %v14067_v25 }
 0x846   : > { %v6478_v18 = vsel %vm6466_vm1, %v6460_v17, %v6477_v57  ;;  %v14094_v54 = vmul.u32.u64.low %v14081_v50, %v6475_v35  ;;  %v14095_v7 = vmul.u32.u64.high %v14081_v50, %v6475_v35, %v14094_v54  ;;  %v6203_v6 = vmul.f32 %v6202_v40, %v6200_v3 }
 0x847   : > { %v6468_v60 = vsel %vm6464_vm10, %v6448_v33, %v6451_v31  ;;  %v6470_v5 = vsel %vm6466_vm1, %v6454_v38, %v6469_v0  ;;  %v6479_v32 = vsel %vm6465_vm6, %v6476_v37, %v6478_v18  ;;  %vm15635_vm3 = vcmp.lt.s32.totalorder %v13881_v41, 0 }
 0x848   : > { %v6402_v58 = vshrl.u32 %v6384_v48, %v6400_v22  ;;  %v6551_v14 = vsub.s32 32, %v6550_v20  ;;  %v14104_v17 = vadd.f32 %v6016_v4, %v13903_v30  ;;  %v6407_v8 = vor.u32 4788187, %v6406_v13 }
 0x849   : > { %v8286_v27 = vadd.s32 4294967294, %v6292_v52  ;;  %v14107_v51 = vmul.u32.u64.low %v14081_v50, %v6479_v32  ;;  %v14108_v25 = vmul.u32.u64.high %v14081_v50, %v6479_v32, %v14107_v51  ;;  %v6401_v40 = vshll.u32 %v14040_v59, %v14062_v19 }
 0x84a   : > { %16132 = vst [vmem:[#allocation32_spill] sm:$0xff] %v14104_v17  ;;  %v6471_v31 = vsel %vm6465_vm6, %v6468_v60, %v6470_v5  ;;  %v6490_v38 = vadd.s32 1, %v14095_v7  ;;  %v14114_v3 = vshll.u32 %v6544_v9, 8  ;;  %v6204_v48 = vxor.u32 2147483648, %v6203_v6 }
 0x84b   : > { %v6549_v33 = vshrl.u32 %v6548_v45, 5  ;;  %v6554_v22 = vshrl.u32 %v15708_v29, %v6551_v14  ;;  %v14118_v63 = vadd.f32 %v6103_v42, %v13903_v30  ;;  %v6403_v15 = vor.u32 %v6402_v58, %v6401_v40 }
 0x84c   : > { %v6553_v0 = vshll.u32 %v15698_v62, %v6550_v20  ;;  %v6556_v53 = vshll.u32 %v15708_v29, %v6550_v20  ;;  %v6557_v59 = vshrl.u32 %v15822_v39, %v6551_v14  ;;  %v6408_v19 = vand.u32 2147483647, %v6407_v8 }
 0x84d   : > { %16133 = vst [vmem:[#allocation10_spill] sm:$0xff] %v14118_v63  ;;  %vm8287_vm4 = vcmp.lt.s32.totalorder %v8286_v27, 0  ;;  %v6487_v26 = vmul.u32 %v14081_v50, %v6471_v31  ;;  %vm6489_vm5 = vc.u32 %v14108_v25, %v14094_v54  ;;  %v6559_v52 = vshll.u32 %v15822_v39, %v6550_v20 }
 0x84e   : > { %v6491_v45 = vsel %vm6489_vm5, %v6490_v38, %v14095_v7  ;;  %v6555_v37 = vor.u32 %v6554_v22, %v6553_v0  ;;  %v6558_v13 = vor.u32 %v6557_v59, %v6556_v53  ;;  %v6560_v57 = vshrl.u32 %v15823_v16, %v6551_v14 }
 0x84f   : > { %v6492_v35 = vadd.s32 %v6491_v45, %v6487_v26  ;;  %v6562_v4 = vshll.u32 %v15823_v16, %v6550_v20  ;;  %v6563_v18 = vshrl.u32 %v15709_v23, %v6551_v14  ;;  %v6410_v9 = vcvt.s32.f32 %v6403_v15 }
 0x850   : > { %v14131_v60 = vsel %vm8287_vm4, 0, %v8286_v27  ;;  %v6565_v50 = vshll.u32 %v15709_v23, %v6550_v20  ;;  %v6566_v5 = vshrl.u32 %v15697_v21, %v6551_v14  ;;  %v6205_v7 = vsel %vm15635_vm3, %v6204_v48, %v6203_v6 }
 0x851   : > { %v6493_v32 = vadd.s32 536870912, %v6492_v35  ;;  %v6561_v58 = vor.u32 %v6560_v57, %v6559_v52  ;;  %v6564_v42 = vor.u32 %v6563_v18, %v6562_v4  ;;  %v6411_v8 = vmul.f32 %v6410_v9, %v6408_v19 }
 0x852   : > { %v6567_v51 = vor.u32 %v6566_v5, %v6565_v50  ;;  %vm6568_vm15 = vcmp.lt.s32.totalorder %v6549_v33, 1  ;;  %vm6571_vm14 = vcmp.lt.s32.totalorder %v6549_v33, 4  ;;  %v6300_v40 = vsub.s32 4294967266, %v14131_v60 }
 0x853   : > { %v14138_v31 = vshrl.u32 %v6493_v32, 30  ;;  %v6573_v27 = vsel %vm6571_vm14, %v6561_v58, 2102212464  ;;  %v6576_v38 = vsel %vm6568_vm15, %v6555_v37, %v6558_v13  ;;  %v6552_v20 = vshrl.u32 %v15698_v62, %v6551_v14 }
 0x854   : > { %vm6570_vm8 = vcmp.lt.s32.totalorder %v6549_v33, 3  ;;  %v6577_v22 = vsel %vm6571_vm14, %v6564_v42, 920167782  ;;  %v6580_v15 = vsel %vm6568_vm15, %v6558_v13, %v6561_v58  ;;  %vm6569_vm12 = vcmp.lt.s32.totalorder %v6549_v33, 2 }
 0x855   : > { %16134 = vst [vmem:[#allocation8_spill] sm:$0xff] %v14138_v31  ;;  %v6495_v6 = vshll.u32 %v14138_v31, 30  ;;  %v6578_v48 = vsel %vm6570_vm8, %v6561_v58, %v6577_v22  ;;  %v6581_v0 = vsel %vm6571_vm14, %v6567_v51, 1326507024  ;;  %v6572_v53 = vsel %vm6568_vm15, %v6552_v20, %v6555_v37 }
 0x856   : > { %v6574_v59 = vsel %vm6570_vm8, %v6558_v13, %v6573_v27  ;;  %v6579_v19 = vsel %vm6569_vm12, %v6576_v38, %v6578_v48  ;;  %v6582_v26 = vsel %vm6570_vm8, %v6564_v42, %v6581_v0  ;;  %vm14150_vm13 = vcmp.le.f32.partialorder %v6120_v34, 0.7853982 }
 0x857   : > { %v14142_v45 = vsub.s32 %v6492_v35, %v6495_v6  ;;  %v6583_v52 = vsel %vm6569_vm12, %v6580_v15, %v6582_v26  ;;  %v14145_v57 = vmul.u32.u64.low %v14114_v3, %v6579_v19  ;;  %v14146_v4 = vmul.u32.u64.high %v14114_v3, %v6579_v19, %v14145_v57 }
 0x858   : > { %v16135_v14 = vmov 0  ;;  %v6296_v33 = vsub.s32 32, %v14131_v60  ;;  %v14156_v37 = vmul.u32.u64.low %v14114_v3, %v6583_v52  ;;  %v14157_v13 = vmul.u32.u64.high %v14114_v3, %v6583_v52, %v14156_v37 }
 0x859   : > { %v16136_v14 = vsel %vm14150_vm13, 4294967295, %v16135_v14  ;;  %v6301_v18 = vadd.s32 127, %v6300_v40  ;;  %v6575_v35 = vsel %vm6569_vm12, %v6572_v53, %v6574_v59  ;;  %v15604_v9 = vand.u32 2147483647, %v14118_v63  ;;  %v6105_v59 = vpop.f32.mrf.mxu1 }
 0x85a   : > { %16137 = vst [vmem:[#allocation29_spill] sm:$0xff] %v16136_v14  ;;  %v6747_v50 = vand.u32 2139095040, %v14118_v63  ;;  %v6208_v5 = vsel %vm14150_vm13, %v13881_v41, %v6205_v7  ;;  %v6280_v34 = vadd.s32 %v14029_v24, %v14038_v47  ;;  %v6643_v32 = vand.u32 2139095040, %v14104_v17 }
 0x85b   : > { %v6412_v58 = vxor.u32 2147483648, %v6411_v8  ;;  %v6498_v42 = vsub.s32 0, %v14142_v45  ;;  %v6594_v51 = vadd.s32 1, %v14146_v4  ;;  %v6591_v38 = vmul.u32 %v14114_v3, %v6575_v35 }
 0x85c   : > { %v6748_v40 = vshrl.u32 %v6747_v50, 23  ;;  %v6298_v27 = vshrl.u32 %v6280_v34, %v6296_v33  ;;  %vm6593_vm7 = vc.u32 %v14157_v13, %v14145_v57  ;;  %v6644_v20 = vshrl.u32 %v6643_v32, 23 }
 0x85d   : > { %v6302_v22 = vshll.u32 %v6301_v18, 23  ;;  %v6595_v7 = vsel %vm6593_vm7, %v6594_v51, %v14146_v4  ;;  %v6751_v24 = vand.u32 8388607, %v15604_v9  ;;  %vm15630_vm11 = vcmp.lt.s32.totalorder %v13895_v12, 0 }
 0x85e   : > { %v8304_v15 = vadd.s32 4294967169, %v6748_v40  ;;  %v6596_v47 = vadd.s32 %v6595_v7, %v6591_v38  ;;  %v15603_v6 = vand.u32 2147483647, %v14104_v17  ;;  %v6297_v48 = vshll.u32 %v14070_v49, %v14131_v60 }
 0x85f   : > { %v8293_v3 = vmin.u32 %v6498_v42, %v14142_v45  ;;  %v8300_v53 = vadd.s32 4294967169, %v6644_v20  ;;  %8857 = vcosq.f32 %v6208_v5  ;;  %v6413_v19 = vsel %vm15630_vm11, %v6412_v58, %v6411_v8 }
 0x860   : > { %v6754_v0 = vadd.s32 1, %v8304_v15  ;;  %v6597_v26 = vadd.s32 536870912, %v6596_v47  ;;  %v14181_v52 = vor.u32 %v6298_v27, %v6297_v48  ;;  %v14183_v4 = vor.u32 4788187, %v6302_v22 }
 0x861   : > { %v6752_v33 = vor.u32 8388608, %v6751_v24  ;;  %v14189_v49 = vand.u32 8388607, %v15603_v6  ;;  %v14192_v60 = vadd.f32 %v6105_v59, %v13903_v30  ;;  %8859 = vsinq.f32 %v6208_v5 }
 0x862   : > { %vm6755_vm0 = vcmp.gt.s32.totalorder %v6754_v0, 0  ;;  %v14185_v37 = vshrl.u32 %v6597_v26, 30  ;;  %vm14196_vm9 = vcmp.le.f32.partialorder %v6328_v43, 0.7853982  ;;  %v16140_v8 = vmov 0 }
 0x863   : > { %v6756_v18 = vsel %vm6755_vm0, %v6754_v0, 0  ;;  %16139 = vst [vmem:[#allocation28_spill] sm:$0xff] %v14192_v60  ;;  %v16141_v8 = vsel %vm14196_vm9, 4294967295, %v16140_v8  ;;  %v6500_v35 = vclz %v8293_v3  ;;  %v6650_v50 = vadd.s32 1, %v8300_v53 }
 0x864   : > { %16138 = vst [vmem:[#allocation19_spill] sm:$0xff] %v14185_v37  ;;  %16142 = vst [vmem:[#allocation39_spill] sm:$0xff] %v16141_v8  ;;  %v14203_v34 = vsel %vm14196_vm9, %v13895_v12, %v6413_v19  ;;  %v14207_v32 = vadd.s32 %v14094_v54, %v14108_v25  ;;  %v6599_v30 = vshll.u32 %v14185_v37, 30  ;;  %v6758_v5 = vand.u32 31, %v6756_v18 }
 0x865   : > { %v14213_v42 = vadd.s32 %v14145_v57, %v14157_v13  ;;  %v14215_v51 = vshll.u32 %v6752_v33, 8  ;;  %v6648_v38 = vor.u32 8388608, %v14189_v49  ;;  %v8294_v25 = vadd.s32 4294967294, %v6500_v35 }
 0x866   : > { %v14217_v40 = vsub.s32 %v6596_v47, %v6599_v30  ;;  %v6759_v27 = vsub.s32 32, %v6758_v5  ;;  %v6757_v20 = vshrl.u32 %v6756_v18, 5  ;;  %v6761_v22 = vshll.u32 %v15698_v62, %v6758_v5 }
 0x867   : > { %vm6651_vm10 = vcmp.gt.s32.totalorder %v6650_v50, 0  ;;  %v6764_v57 = vshll.u32 %v15708_v29, %v6758_v5  ;;  %v6767_v24 = vshll.u32 %v15822_v39, %v6758_v5  ;;  %v6770_v48 = vshll.u32 %v15823_v16, %v6758_v5 }
 0x868   : > { %v6602_v7 = vsub.s32 0, %v14217_v40  ;;  %v6762_v15 = vshrl.u32 %v15708_v29, %v6759_v27  ;;  %v6765_v13 = vshrl.u32 %v15822_v39, %v6759_v27  ;;  %v6768_v47 = vshrl.u32 %v15823_v16, %v6759_v27 }
 0x869   : > { %v6771_v3 = vshrl.u32 %v15709_v23, %v6759_v27  ;;  %v6652_v19 = vsel %vm6651_vm10, %v6650_v50, 0  ;;  %v6773_v18 = vshll.u32 %v15709_v23, %v6758_v5  ;;  %v6774_v49 = vshrl.u32 %v15697_v21, %v6759_v27 }
 0x86a   : > { %v8297_v0 = vmin.u32 %v6602_v7, %v14217_v40  ;;  %v6763_v53 = vor.u32 %v6762_v15, %v6761_v22  ;;  %v6766_v59 = vor.u32 %v6765_v13, %v6764_v57  ;;  %v6769_v26 = vor.u32 %v6768_v47, %v6767_v24 }
 0x86b   : > { %v6772_v33 = vor.u32 %v6771_v3, %v6770_v48  ;;  %vm6776_vm2 = vcmp.lt.s32.totalorder %v6757_v20, 1  ;;  %vm6777_vm1 = vcmp.lt.s32.totalorder %v6757_v20, 2  ;;  %vm6779_vm6 = vcmp.lt.s32.totalorder %v6757_v20, 4 }
 0x86c   : > { %v6604_v35 = vclz %v8297_v0  ;;  %v14233_v30 = vpop.eup %8857  ;;  %v6760_v36 = vshrl.u32 %v15698_v62, %v6759_v27  ;;  %v6775_v2 = vor.u32 %v6774_v49, %v6773_v18  ;;  %v6781_v6 = vsel %vm6779_vm6, %v6769_v26, 2102212464 }
 0x86d   : > { %16143 = vst [vmem:[#allocation21_spill] sm:$0xff] %v14233_v30  ;;  %v6784_v7 = vsel %vm6776_vm2, %v6763_v53, %v6766_v59  ;;  %vm6778_vm4 = vcmp.lt.s32.totalorder %v6757_v20, 3  ;;  %v6785_v50 = vsel %vm6779_vm6, %v6772_v33, 920167782  ;;  %v6788_v15 = vsel %vm6776_vm2, %v6766_v59, %v6769_v26 }
 0x86e   : > { %v8298_v22 = vadd.s32 4294967294, %v6604_v35  ;;  %v6780_v57 = vsel %vm6776_vm2, %v6760_v36, %v6763_v53  ;;  %v6782_v13 = vsel %vm6778_vm4, %v6766_v59, %v6781_v6  ;;  %v6786_v5 = vsel %vm6778_vm4, %v6769_v26, %v6785_v50  ;;  %v14236_v47 = vpop.eup %8859 }
 0x86f   : > { %v6789_v24 = vsel %vm6779_vm6, %v6775_v2, 1326507024  ;;  %16144 = vst [vmem:[#allocation37_spill] sm:$0xff] %v14236_v47  ;;  %v6787_v48 = vsel %vm6777_vm1, %v6784_v7, %v6786_v5  ;;  %v6851_v0 = vand.u32 2139095040, %v14192_v60  ;;  %vm8295_vm15 = vcmp.lt.s32.totalorder %v8294_v25, 0 }
 0x870   : > { %vm8299_vm5 = vcmp.lt.s32.totalorder %v8298_v22, 0  ;;  %v6790_v3 = vsel %vm6778_vm4, %v6772_v33, %v6789_v24  ;;  %v14241_v49 = vshll.u32 %v6648_v38, 8  ;;  %v6783_v36 = vsel %vm6777_vm1, %v6780_v57, %v6782_v13 }
 0x871   : > { %v6607_v27 = vsel %vm8299_vm5, 0, %v8298_v22  ;;  %v6791_v18 = vsel %vm6777_vm1, %v6788_v15, %v6790_v3  ;;  %v6654_v6 = vand.u32 31, %v6652_v19  ;;  %v14253_v33 = vsel %vm8295_vm15, 0, %v8294_v25 }
 0x872   : > { %v6608_v35 = vsub.s32 32, %v6607_v27  ;;  %v6612_v9 = vsub.s32 4294967266, %v6607_v27  ;;  %v14245_v2 = vmul.u32.u64.low %v14215_v51, %v6791_v18  ;;  %v14246_v53 = vmul.u32.u64.high %v14215_v51, %v6791_v18, %v14245_v2 }
 0x873   : > { %v14249_v59 = vmul.u32.u64.low %v14215_v51, %v6787_v48  ;;  %v14250_v26 = vmul.u32.u64.high %v14215_v51, %v6787_v48, %v14249_v59  ;;  %v6655_v22 = vsub.s32 32, %v6654_v6  ;;  %v6852_v38 = vshrl.u32 %v6851_v0, 23 }
 0x874   : > { %v6613_v7 = vadd.s32 127, %v6612_v9  ;;  %v6609_v50 = vshll.u32 %v14217_v40, %v6607_v27  ;;  %v6610_v20 = vshrl.u32 %v14213_v42, %v6608_v35  ;;  %v6799_v15 = vmul.u32 %v14215_v51, %v6783_v36 }
 0x875   : > { %v6653_v57 = vshrl.u32 %v6652_v19, 5  ;;  %v6657_v13 = vshll.u32 %v15698_v62, %v6654_v6  ;;  %v6658_v5 = vshrl.u32 %v15708_v29, %v6655_v22  ;;  %v6660_v24 = vshll.u32 %v15708_v29, %v6654_v6 }
 0x876   : > { %v6663_v48 = vshll.u32 %v15822_v39, %v6654_v6  ;;  %v6614_v25 = vshll.u32 %v6613_v7, 23  ;;  %vm6801_vm14 = vc.u32 %v14246_v53, %v14249_v59  ;;  %v6802_v9 = vadd.s32 1, %v14250_v26 }
 0x877   : > { %v6661_v40 = vshrl.u32 %v15822_v39, %v6655_v22  ;;  %v6659_v42 = vor.u32 %v6658_v5, %v6657_v13  ;;  %v6664_v51 = vshrl.u32 %v15823_v16, %v6655_v22  ;;  %v6666_v19 = vshll.u32 %v15823_v16, %v6654_v6 }
 0x878   : > { %v6669_v3 = vshll.u32 %v15709_v23, %v6654_v6  ;;  %v6803_v0 = vsel %vm6801_vm14, %v6802_v9, %v14250_v26  ;;  %v6667_v18 = vshrl.u32 %v15709_v23, %v6655_v22  ;;  %v6670_v35 = vshrl.u32 %v15697_v21, %v6655_v22 }
 0x879   : > { %v6662_v27 = vor.u32 %v6661_v40, %v6660_v24  ;;  %v6508_v36 = vsub.s32 4294967266, %v14253_v33  ;;  %v6804_v2 = vadd.s32 %v6803_v0, %v6799_v15  ;;  %v6665_v7 = vor.u32 %v6664_v51, %v6663_v48 }
 0x87a   : > { %v8308_v55 = vadd.s32 4294967169, %v6852_v38  ;;  %v6611_v54 = vor.u32 %v6610_v20, %v6609_v50  ;;  %v6615_v13 = vor.u32 4788187, %v6614_v25  ;;  %v6668_v5 = vor.u32 %v6667_v18, %v6666_v19  ;;  %v6020_v50 = vpop.f32.mrf.mxu0 }
 0x87b   : > { %v6671_v43 = vor.u32 %v6670_v35, %v6669_v3  ;;  %v6805_v58 = vadd.s32 536870912, %v6804_v2  ;;  %v6656_v30 = vshrl.u32 %v15698_v62, %v6655_v22  ;;  %vm6672_vm8 = vcmp.lt.s32.totalorder %v6653_v57, 1 }
 0x87c   : > { %vm6675_vm12 = vcmp.lt.s32.totalorder %v6653_v57, 4  ;;  %vm6674_vm7 = vcmp.lt.s32.totalorder %v6653_v57, 3  ;;  %v6680_v26 = vsel %vm6672_vm8, %v6659_v42, %v6662_v27  ;;  %vm6673_vm0 = vcmp.lt.s32.totalorder %v6653_v57, 2  ;;  %v6022_v56 = vpop.f32.mrf.mxu0 }
 0x87d   : > { %v6677_v6 = vsel %vm6675_vm12, %v6665_v7, 2102212464  ;;  %v6681_v24 = vsel %vm6675_vm12, %v6668_v5, 920167782  ;;  %v14275_v9 = vshrl.u32 %v6805_v58, 30  ;;  %v6684_v38 = vsel %vm6672_vm8, %v6662_v27, %v6665_v7 }
 0x87e   : > { %v6682_v15 = vsel %vm6674_vm7, %v6665_v7, %v6681_v24  ;;  %v6509_v20 = vadd.s32 127, %v6508_v36  ;;  %v6616_v48 = vand.u32 2147483647, %v6615_v13  ;;  %v6685_v22 = vsel %vm6675_vm12, %v6671_v43, 1326507024 }
 0x87f   : > { %16145 = vst [vmem:[#allocation31_spill] sm:$0xff] %v14275_v9  ;;  %v6683_v25 = vsel %vm6673_vm0, %v6680_v26, %v6682_v15  ;;  %v6807_v40 = vshll.u32 %v14275_v9, 30  ;;  %v6676_v51 = vsel %vm6672_vm8, %v6656_v30, %v6659_v42  ;;  %v6678_v19 = vsel %vm6674_vm7, %v6662_v27, %v6677_v6 }
 0x880   : > { %v6686_v58 = vsel %vm6674_vm7, %v6668_v5, %v6685_v22  ;;  %v14286_v0 = vmul.u32.u64.low %v14241_v49, %v6683_v25  ;;  %v14287_v18 = vmul.u32.u64.high %v14241_v49, %v6683_v25, %v14286_v0  ;;  %v14291_v35 = vadd.f32 %v6020_v50, %v13876_v44 }
 0x881   : > { %v6687_v3 = vsel %vm6673_vm0, %v6684_v38, %v6686_v58  ;;  %v6618_v36 = vcvt.s32.f32 %v6611_v54  ;;  %v14293_v43 = vsub.s32 %v6804_v2, %v6807_v40  ;;  %v6504_v42 = vsub.s32 32, %v14253_v33 }
 0x882   : > { %v14296_v7 = vmul.u32.u64.low %v14241_v49, %v6687_v3  ;;  %v14297_v30 = vmul.u32.u64.high %v14241_v49, %v6687_v3, %v14296_v7  ;;  %v6510_v27 = vshll.u32 %v6509_v20, 23  ;;  %v6679_v13 = vsel %vm6673_vm0, %v6676_v51, %v6678_v19 }
 0x883   : > { %v6858_v5 = vadd.s32 1, %v8308_v55  ;;  %v16146_v6 = vand.u32 2147483647, %v14183_v4  ;;  %v16147_v26 = vcvt.s32.f32 %v14181_v52  ;;  %v14307_v15 = vmul.f32 %v6618_v36, %v6616_v48 }
 0x884   : > { %v6810_v54 = vsub.s32 0, %v14293_v43  ;;  %v16148_v2 = vand.u32 2147483647, %v14192_v60  ;;  %v6698_v57 = vadd.s32 1, %v14287_v18  ;;  %v6695_v52 = vmul.u32 %v14241_v49, %v6679_v13 }
 0x885   : > { %v14305_v24 = vmul.f32 %v16147_v26, %v16146_v6  ;;  %vm6859_vm10 = vcmp.gt.s32.totalorder %v6858_v5, 0  ;;  %vm6697_vm2 = vc.u32 %v14297_v30, %v14286_v0  ;;  %v14321_v48 = vshrl.u32 %v14207_v32, %v6504_v42 }
 0x886   : > { %v6855_v38 = vand.u32 8388607, %v16148_v2  ;;  %v8305_v4 = vmin.u32 %v6810_v54, %v14293_v43  ;;  %v6860_v20 = vsel %vm6859_vm10, %v6858_v5, 0  ;;  %v14323_v25 = vor.u32 4788187, %v6510_v27 }
 0x887   : > { %v6699_v22 = vsel %vm6697_vm2, %v6698_v57, %v14287_v18  ;;  %v6862_v40 = vand.u32 31, %v6860_v20  ;;  %v6800_v19 = vadd.s32 %v14249_v59, %v14246_v53  ;;  %v14329_v36 = vshrl.u32 %v6860_v20, 5 }
 0x888   : > { %v6812_v58 = vclz %v8305_v4  ;;  %v6700_v3 = vadd.s32 %v6699_v22, %v6695_v52  ;;  %v6856_v49 = vor.u32 8388608, %v6855_v38  ;;  %v6955_v13 = vand.u32 2139095040, %v14291_v35 }
 0x889   : > { %v6863_v7 = vsub.s32 32, %v6862_v40  ;;  %v6865_v27 = vshll.u32 %v15698_v62, %v6862_v40  ;;  %v6868_v18 = vshll.u32 %v15708_v29, %v6862_v40  ;;  %v6871_v53 = vshll.u32 %v15822_v39, %v6862_v40 }
 0x88a   : > { %v8306_v32 = vadd.s32 4294967294, %v6812_v58  ;;  %v6701_v42 = vadd.s32 536870912, %v6700_v3  ;;  %v6874_v4 = vshll.u32 %v15823_v16, %v6862_v40  ;;  %v6877_v52 = vshll.u32 %v15709_v23, %v6862_v40 }
 0x88b   : > { %v6866_v5 = vshrl.u32 %v15708_v29, %v6863_v7  ;;  %v6869_v6 = vshrl.u32 %v15822_v39, %v6863_v7  ;;  %v6872_v59 = vshrl.u32 %v15823_v16, %v6863_v7  ;;  %v6875_v54 = vshrl.u32 %v15709_v23, %v6863_v7 }
 0x88c   : > { %vm8307_vm1 = vcmp.lt.s32.totalorder %v8306_v32, 0  ;;  %v14338_v26 = vshrl.u32 %v6701_v42, 30  ;;  %v6878_v2 = vshrl.u32 %v15697_v21, %v6863_v7  ;;  %v14345_v47 = vshll.u32 %v6856_v49, 8 }
 0x88d   : > { %v6815_v38 = vsel %vm8307_vm1, 0, %v8306_v32  ;;  %v6867_v57 = vor.u32 %v6866_v5, %v6865_v27  ;;  %v6870_v58 = vor.u32 %v6869_v6, %v6868_v18  ;;  %v6873_v55 = vor.u32 %v6872_v59, %v6871_v53 }
 0x88e   : > { %16149 = vst [vmem:[#allocation9_spill] sm:$0xff] %v14338_v26  ;;  %v6820_v20 = vsub.s32 4294967266, %v6815_v38  ;;  %v6703_v22 = vshll.u32 %v14338_v26, 30  ;;  %v6876_v51 = vor.u32 %v6875_v54, %v6874_v4  ;;  %v6879_v50 = vor.u32 %v6878_v2, %v6877_v52 }
 0x88f   : > { %v6956_v42 = vshrl.u32 %v6955_v13, 23  ;;  %v6816_v8 = vsub.s32 32, %v6815_v38  ;;  %v6864_v32 = vshrl.u32 %v15698_v62, %v6863_v7  ;;  %v6817_v27 = vshll.u32 %v14293_v43, %v6815_v38 }
 0x890   : > { %v6821_v12 = vadd.s32 127, %v6820_v20  ;;  %v14347_v14 = vsub.s32 %v6700_v3, %v6703_v22  ;;  %vm6880_vm6 = vcmp.lt.s32.totalorder %v14329_v36, 1  ;;  %vm6881_vm4 = vcmp.lt.s32.totalorder %v14329_v36, 2 }
 0x891   : > { %vm6883_vm5 = vcmp.lt.s32.totalorder %v14329_v36, 4  ;;  %v6888_v5 = vsel %vm6880_vm6, %v6867_v57, %v6870_v58  ;;  %v6892_v6 = vsel %vm6880_vm6, %v6870_v58, %v6873_v55  ;;  %v8312_v3 = vadd.s32 4294967169, %v6956_v42 }
 0x892   : > { %v6822_v40 = vshll.u32 %v6821_v12, 23  ;;  %v6706_v18 = vsub.s32 0, %v14347_v14  ;;  %v6885_v49 = vsel %vm6883_vm5, %v6873_v55, 2102212464  ;;  %v6889_v13 = vsel %vm6883_vm5, %v6876_v51, 920167782 }
 0x893   : > { %v6893_v53 = vsel %vm6883_vm5, %v6879_v50, 1326507024  ;;  %vm15637_vm15 = vcmp.lt.s32.totalorder %v13886_v10, 0  ;;  %v6818_v7 = vshrl.u32 %v6800_v19, %v6816_v8  ;;  %vm6882_vm14 = vcmp.lt.s32.totalorder %v14329_v36, 3 }
 0x894   : > { %v8301_v43 = vmin.u32 %v6706_v18, %v14347_v14  ;;  %v6884_v59 = vsel %vm6880_vm6, %v6864_v32, %v6867_v57  ;;  %v6886_v54 = vsel %vm6882_vm14, %v6870_v58, %v6885_v49  ;;  %v6890_v2 = vsel %vm6882_vm14, %v6873_v55, %v6889_v13 }
 0x895   : > { %v6894_v38 = vsel %vm6882_vm14, %v6876_v51, %v6893_v53  ;;  %v6962_v12 = vadd.s32 1, %v8312_v3  ;;  %v6823_v4 = vor.u32 4788187, %v6822_v40  ;;  %v6891_v20 = vsel %vm6881_vm4, %v6888_v5, %v6890_v2  ;;  %v6109_v3 = vpop.f32.mrf.mxu1 }
 0x896   : > { %v6708_v52 = vclz %v8301_v43  ;;  %v6895_v50 = vsel %vm6881_vm4, %v6892_v6, %v6894_v38  ;;  %v14367_v19 = vmul.u32.u64.low %v14345_v47, %v6891_v20  ;;  %v14368_v42 = vmul.u32.u64.high %v14345_v47, %v6891_v20, %v14367_v19 }
 0x897   : > { %v14363_v22 = vmul.u32.u64.low %v14345_v47, %v6895_v50  ;;  %v14364_v8 = vmul.u32.u64.high %v14345_v47, %v6895_v50, %v14363_v22  ;;  %8861 = vcosq.f32 %v14203_v34  ;;  %v16150_v55 = vshll.u32 %v14142_v45, %v14253_v33 }
 0x898   : > { %vm15655_vm8 = vcmp.lt.s32.totalorder %v13909_v46, 0  ;;  %vm6963_vm12 = vcmp.gt.s32.totalorder %v6962_v12, 0  ;;  %v6308_v57 = vxor.u32 2147483648, %v14305_v24  ;;  %v6819_v58 = vor.u32 %v6818_v7, %v6817_v27 }
 0x899   : > { %v6507_v51 = vor.u32 %v14321_v48, %v16150_v55  ;;  %v6887_v32 = vsel %vm6881_vm4, %v6884_v59, %v6886_v54  ;;  %v6964_v40 = vsel %vm6963_vm12, %v6962_v12, 0  ;;  %v6512_v18 = vand.u32 2147483647, %v14323_v25 }
 0x89a   : > { %v16151_v49 = vxor.u32 2147483648, %v14307_v15  ;;  %v8302_v33 = vadd.s32 4294967294, %v6708_v52  ;;  %v6966_v48 = vand.u32 31, %v6964_v40  ;;  %v6824_v5 = vand.u32 2147483647, %v6823_v4 }
 0x89b   : > { %vm6905_vm7 = vc.u32 %v14364_v8, %v14367_v19  ;;  %v6906_v27 = vadd.s32 1, %v14368_v42  ;;  %v16152_v36 = vand.u32 2147483647, %v14291_v35  ;;  %8863 = vsinq.f32 %v14203_v34 }
 0x89c   : > { %v6621_v45 = vsel %vm15655_vm8, %v16151_v49, %v14307_v15  ;;  %v6514_v25 = vcvt.s32.f32 %v6507_v51  ;;  %v16153_v6 = vand.u32 2147483647, %v13909_v46  ;;  %v16154_v53 = vmov 0 }
 0x89d   : > { %v6959_v13 = vand.u32 8388607, %v16152_v36  ;;  %v6903_v15 = vmul.u32 %v14345_v47, %v6887_v32  ;;  %v14402_v7 = vsel %vm15637_vm15, %v6308_v57, %v14305_v24  ;;  %v6826_v43 = vcvt.s32.f32 %v6819_v58 }
 0x89e   : > { %vm14394_vm0 = vcmp.le.f32.partialorder %v16153_v6, 0.7853982  ;;  %16157 = vst [vmem:[#allocation26_spill] sm:$0xff] %v14402_v7  ;;  %v6907_v59 = vsel %vm6905_vm7, %v6906_v27, %v14368_v42  ;;  %v6967_v54 = vsub.s32 32, %v6966_v48  ;;  %v14405_v34 = vmul.f32 %v6514_v25, %v6512_v18 }
 0x89f   : > { %v16155_v53 = vsel %vm14394_vm0, 4294967295, %v16154_v53  ;;  %v14410_v2 = vsel %vm14394_vm0, %v13909_v46, %v6621_v45  ;;  %vm8303_vm10 = vcmp.lt.s32.totalorder %v8302_v33, 0  ;;  %v6908_v38 = vadd.s32 %v6907_v59, %v6903_v15 }
 0x8a0   : > { %16156 = vst [vmem:[#allocation20_spill] sm:$0xff] %v16155_v53  ;;  %v14412_v47 = vmul.f32 %v6826_v43, %v6824_v5  ;;  %v6960_v12 = vor.u32 8388608, %v6959_v13  ;;  %v6970_v4 = vshrl.u32 %v15708_v29, %v6967_v54  ;;  %v14416_v24 = vadd.f32 %v6109_v3, %v13876_v44 }
 0x8a1   : > { %v6909_v52 = vadd.s32 536870912, %v6908_v38  ;;  %v6969_v20 = vshll.u32 %v15698_v62, %v6966_v48  ;;  %v6972_v50 = vshll.u32 %v15708_v29, %v6966_v48  ;;  %v6973_v22 = vshrl.u32 %v15822_v39, %v6967_v54 }
 0x8a2   : > { %v14421_v42 = vsel %vm8303_vm10, 0, %v8302_v33  ;;  %v6965_v55 = vshrl.u32 %v6964_v40, 5  ;;  %v6975_v51 = vshll.u32 %v15822_v39, %v6966_v48  ;;  %v6976_v57 = vshrl.u32 %v15823_v16, %v6967_v54 }
 0x8a3   : > { %v14425_v58 = vshrl.u32 %v6909_v52, 30  ;;  %v6971_v32 = vor.u32 %v6970_v4, %v6969_v20  ;;  %v6974_v18 = vor.u32 %v6973_v22, %v6972_v50  ;;  %v6978_v49 = vshll.u32 %v15823_v16, %v6966_v48 }
 0x8a4   : > { %v6977_v45 = vor.u32 %v6976_v57, %v6975_v51  ;;  %v6979_v5 = vshrl.u32 %v15709_v23, %v6967_v54  ;;  %v6981_v27 = vshll.u32 %v15709_v23, %v6966_v48  ;;  %v6982_v36 = vshrl.u32 %v15697_v21, %v6967_v54  ;;  %v14436_v6 = vpop.eup %8861 }
 0x8a5   : > { %16158 = vst [vmem:[#allocation24_spill] sm:$0xff] %v14425_v58  ;;  %v6911_v33 = vshll.u32 %v14425_v58, 30  ;;  %v14432_v40 = vshll.u32 %v6960_v12, 8  ;;  %v7163_v25 = vand.u32 2139095040, %v14416_v24  ;;  %16159 = vst [vmem:[#allocation18_spill] sm:$0xff] %v14436_v6  ;;  %vm15654_vm2 = vcmp.lt.s32.totalorder %v14118_v63, 0 }
 0x8a6   : > { %v6828_v15 = vxor.u32 2147483648, %v14412_v47  ;;  %v6712_v3 = vsub.s32 32, %v14421_v42  ;;  %v6980_v43 = vor.u32 %v6979_v5, %v6978_v49  ;;  %v6983_v48 = vor.u32 %v6982_v36, %v6981_v27 }
 0x8a7   : > { %v14441_v59 = vsub.s32 %v6908_v38, %v6911_v33  ;;  %v6968_v4 = vshrl.u32 %v15698_v62, %v6967_v54  ;;  %vm6984_vm1 = vcmp.lt.s32.totalorder %v6965_v55, 1  ;;  %vm6987_vm6 = vcmp.lt.s32.totalorder %v6965_v55, 4 }
 0x8a8   : > { %vm6986_vm4 = vcmp.lt.s32.totalorder %v6965_v55, 3  ;;  %v6989_v12 = vsel %vm6987_vm6, %v6977_v45, 2102212464  ;;  %v6992_v52 = vsel %vm6984_vm1, %v6971_v32, %v6974_v18  ;;  %v6993_v20 = vsel %vm6987_vm6, %v6980_v43, 920167782  ;;  %v14449_v38 = vpop.eup %8863 }
 0x8a9   : > { %vm15636_vm5 = vcmp.lt.s32.totalorder %v13948_v11, 0  ;;  %v6914_v50 = vsub.s32 0, %v14441_v59  ;;  %vm6985_vm14 = vcmp.lt.s32.totalorder %v6965_v55, 2  ;;  %v6994_v22 = vsel %vm6986_vm4, %v6977_v45, %v6993_v20  ;;  %16160 = vst [vmem:[#allocation35_spill] sm:$0xff] %v14449_v38 }
 0x8aa   : > { %v6996_v51 = vsel %vm6984_vm1, %v6974_v18, %v6977_v45  ;;  %v16161_v54 = vand.u32 2147483647, %v14118_v63  ;;  %v16162_v57 = vmov 0  ;;  %v6716_v49 = vsub.s32 4294967266, %v14421_v42 }
 0x8ab   : > { %v6995_v5 = vsel %vm6985_vm14, %v6992_v52, %v6994_v22  ;;  %v6997_v27 = vsel %vm6987_vm6, %v6983_v48, 1326507024  ;;  %v7164_v36 = vshrl.u32 %v7163_v25, 23  ;;  %v8309_v33 = vmin.u32 %v6914_v50, %v14441_v59 }
 0x8ac   : > { %vm14453_vm12 = vcmp.le.f32.partialorder %v16161_v54, 0.7853982  ;;  %v6988_v20 = vsel %vm6984_vm1, %v6968_v4, %v6971_v32  ;;  %v6990_v45 = vsel %vm6986_vm4, %v6974_v18, %v6989_v12  ;;  %v6998_v13 = vsel %vm6986_vm4, %v6980_v43, %v6997_v27 }
 0x8ad   : > { %v16163_v57 = vsel %vm14453_vm12, 4294967295, %v16162_v57  ;;  %v6999_v6 = vsel %vm6985_vm14, %v6996_v51, %v6998_v13  ;;  %v14465_v54 = vmul.u32.u64.low %v14432_v40, %v6995_v5  ;;  %v14466_v38 = vmul.u32.u64.high %v14432_v40, %v6995_v5, %v14465_v54 }
 0x8ae   : > { %16164 = vst [vmem:[#allocation23_spill] sm:$0xff] %v16163_v57  ;;  %v8320_v41 = vadd.s32 4294967169, %v7164_v36  ;;  %v6696_v25 = vadd.s32 %v14286_v0, %v14297_v30  ;;  %v6916_v48 = vclz %v8309_v33  ;;  %v6516_v18 = vxor.u32 2147483648, %v14405_v34 }
 0x8af   : > { %v14472_v52 = vmul.u32.u64.low %v14432_v40, %v6999_v6  ;;  %v14473_v32 = vmul.u32.u64.high %v14432_v40, %v6999_v6, %v14472_v52  ;;  %8865 = vcosq.f32 %v14410_v2  ;;  %v6991_v13 = vsel %vm6985_vm14, %v6988_v20, %v6990_v45 }
 0x8b0   : > { %v7170_v43 = vadd.s32 1, %v8320_v41  ;;  %v6829_v4 = vsel %vm15654_vm2, %v6828_v15, %v14412_v47  ;;  %v6713_v12 = vshll.u32 %v14347_v14, %v14421_v42  ;;  %v6714_v0 = vshrl.u32 %v6696_v25, %v6712_v3 }
 0x8b1   : > { %v14484_v30 = vadd.f32 %v6022_v56, %v13876_v44  ;;  %v6717_v6 = vadd.s32 127, %v6716_v49  ;;  %v7010_v50 = vadd.s32 1, %v14466_v38  ;;  %v16165_v22 = vand.u32 2147483647, %v14416_v24 }
 0x8b2   : > { %vm7171_vm7 = vcmp.gt.s32.totalorder %v7170_v43, 0  ;;  %v8310_v55 = vadd.s32 4294967294, %v6916_v48  ;;  %v7007_v41 = vmul.u32 %v14432_v40, %v6991_v13  ;;  %vm7009_vm10 = vc.u32 %v14473_v32, %v14465_v54 }
 0x8b3   : > { %v7167_v51 = vand.u32 8388607, %v16165_v22  ;;  %v7172_v47 = vsel %vm7171_vm7, %v7170_v43, 0  ;;  %v14495_v14 = vsel %vm15636_vm5, %v6516_v18, %v14405_v34  ;;  %8867 = vsinq.f32 %v14410_v2 }
 0x8b4   : > { %16166 = vst [vmem:[#allocation40_spill] sm:$0xff] %v14495_v14  ;;  %v7011_v56 = vsel %vm7009_vm10, %v7010_v50, %v14466_v38  ;;  %v7174_v42 = vand.u32 31, %v7172_v47  ;;  %v14502_v15 = vsel %vm14453_vm12, %v14118_v63, %v6829_v4  ;;  %v14504_v40 = vor.u32 %v6714_v0, %v6713_v12 }
 0x8b5   : > { %v14508_v3 = vadd.s32 %v14367_v19, %v14364_v8  ;;  %v7012_v49 = vadd.s32 %v7011_v56, %v7007_v41  ;;  %v6718_v5 = vshll.u32 %v6717_v6, 23  ;;  %v7168_v34 = vor.u32 8388608, %v7167_v51 }
 0x8b6   : > { %v7175_v27 = vsub.s32 32, %v7174_v42  ;;  %v7059_v2 = vand.u32 2139095040, %v14484_v30  ;;  %vm8311_vm1 = vcmp.lt.s32.totalorder %v8310_v55, 0  ;;  %v7177_v36 = vshll.u32 %v15698_v62, %v7174_v42 }
 0x8b7   : > { %v7013_v38 = vadd.s32 536870912, %v7012_v49  ;;  %v7180_v33 = vshll.u32 %v15708_v29, %v7174_v42  ;;  %v7183_v25 = vshll.u32 %v15822_v39, %v7174_v42  ;;  %v7173_v48 = vshrl.u32 %v7172_v47, 5 }
 0x8b8   : > { %v7178_v20 = vshrl.u32 %v15708_v29, %v7175_v27  ;;  %v7181_v45 = vshrl.u32 %v15822_v39, %v7175_v27  ;;  %v7184_v8 = vshrl.u32 %v15823_v16, %v7175_v27  ;;  %v7186_v52 = vshll.u32 %v15823_v16, %v7174_v42 }
 0x8b9   : > { %v14517_v19 = vshrl.u32 %v7013_v38, 30  ;;  %v7187_v18 = vshrl.u32 %v15709_v23, %v7175_v27  ;;  %v14521_v13 = vor.u32 4788187, %v6718_v5  ;;  %v7208_v50 = vshll.u32 %v7168_v34, 8 }
 0x8ba   : > { %v7179_v43 = vor.u32 %v7178_v20, %v7177_v36  ;;  %v7182_v4 = vor.u32 %v7181_v45, %v7180_v33  ;;  %v7185_v12 = vor.u32 %v7184_v8, %v7183_v25  ;;  %v14526_v51 = vsel %vm8311_vm1, 0, %v8310_v55 }
 0x8bb   : > { %v7015_v0 = vshll.u32 %v14517_v19, 30  ;;  %v7188_v6 = vor.u32 %v7187_v18, %v7186_v52  ;;  %v7189_v41 = vshll.u32 %v15709_v23, %v7174_v42  ;;  %v7190_v47 = vshrl.u32 %v15697_v21, %v7175_v27 }
 0x8bc   : > { %v7060_v56 = vshrl.u32 %v7059_v2, 23  ;;  %v14530_v38 = vpop.eup %8865  ;;  %vm7192_vm6 = vcmp.lt.s32.totalorder %v7173_v48, 1  ;;  %vm7194_vm4 = vcmp.lt.s32.totalorder %v7173_v48, 3  ;;  %vm7195_vm14 = vcmp.lt.s32.totalorder %v7173_v48, 4 }
 0x8bd   : > { %16167 = vst [vmem:[#allocation11_spill] sm:$0xff] %v14530_v38  ;;  %v14532_v5 = vsub.s32 %v7012_v49, %v7015_v0  ;;  %v7191_v36 = vor.u32 %v7190_v47, %v7189_v41  ;;  %v7197_v33 = vsel %vm7195_vm14, %v7185_v12, 2102212464  ;;  %v7200_v34 = vsel %vm7192_vm6, %v7179_v43, %v7182_v4 }
 0x8be   : > { %v7201_v20 = vsel %vm7195_vm14, %v7188_v6, 920167782  ;;  %v7176_v45 = vshrl.u32 %v15698_v62, %v7175_v27  ;;  %vm7193_vm7 = vcmp.lt.s32.totalorder %v7173_v48, 2  ;;  %v6924_v2 = vsub.s32 4294967266, %v14526_v51 }
 0x8bf   : > { %v7018_v55 = vsub.s32 0, %v14532_v5  ;;  %v7202_v42 = vsel %vm7194_vm4, %v7185_v12, %v7201_v20  ;;  %v7204_v25 = vsel %vm7192_vm6, %v7182_v4, %v7185_v12  ;;  %v7205_v8 = vsel %vm7195_vm14, %v7191_v36, 1326507024  ;;  %v6026_v12 = vpop.f32.mrf.mxu0 }
 0x8c0   : > { %v7203_v49 = vsel %vm7193_vm7, %v7200_v34, %v7202_v42  ;;  %v14541_v52 = vpop.eup %8867  ;;  %v7196_v0 = vsel %vm7192_vm6, %v7176_v45, %v7179_v43  ;;  %v7198_v41 = vsel %vm7194_vm4, %v7182_v4, %v7197_v33  ;;  %v7206_v27 = vsel %vm7194_vm4, %v7188_v6, %v7205_v8  ;;  %v6111_v42 = vpop.f32.mrf.mxu1 }
 0x8c1   : > { %16168 = vst [vmem:[#allocation30_spill] sm:$0xff] %v14541_v52  ;;  %v8313_v18 = vmin.u32 %v7018_v55, %v14532_v5  ;;  %v7207_v47 = vsel %vm7193_vm7, %v7204_v25, %v7206_v27  ;;  %v14548_v20 = vmul.u32.u64.low %v7208_v50, %v7203_v49  ;;  %v14549_v22 = vmul.u32.u64.high %v7208_v50, %v7203_v49, %v14548_v20 }
 0x8c2   : > { %v8316_v34 = vadd.s32 4294967169, %v7060_v56  ;;  %v14553_v14 = vmul.u32.u64.low %v7208_v50, %v7207_v47  ;;  %v14554_v55 = vmul.u32.u64.high %v7208_v50, %v7207_v47, %v14553_v14  ;;  %v7199_v4 = vsel %vm7193_vm7, %v7196_v0, %v7198_v41 }
 0x8c3   : > { %v7020_v28 = vclz %v8313_v18  ;;  %v16169_v6 = vand.u32 2147483647, %v14484_v30  ;;  %v7008_v49 = vadd.s32 %v14465_v54, %v14473_v32  ;;  %v14563_v25 = vadd.f32 %v6111_v42, %v13876_v44 }
 0x8c4   : > { %v7066_v45 = vadd.s32 1, %v8316_v34  ;;  %v14566_v8 = vadd.f32 %v6026_v12, %v13892_v61  ;;  %v14569_v18 = vadd.s32 127, %v6924_v2  ;;  %v7218_v48 = vadd.s32 1, %v14549_v22 }
 0x8c5   : > { %v7063_v33 = vand.u32 8388607, %v16169_v6  ;;  %v8314_v56 = vadd.s32 4294967294, %v7020_v28  ;;  %v7215_v0 = vmul.u32 %v7208_v50, %v7199_v4  ;;  %vm7217_vm6 = vc.u32 %v14554_v55, %v14548_v20 }
 0x8c6   : > { %vm7067_vm10 = vcmp.gt.s32.totalorder %v7066_v45, 0  ;;  %v7219_v44 = vsel %vm7217_vm6, %v7218_v48, %v14549_v22  ;;  %8869 = vcosq.f32 %v14502_v15  ;;  %vm15658_vm15 = vcmp.lt.s32.totalorder %v14192_v60, 0 }
 0x8c7   : > { %vm8315_vm1 = vcmp.lt.s32.totalorder %v8314_v56, 0  ;;  %v7068_v54 = vsel %vm7067_vm10, %v7066_v45, 0  ;;  %v7064_v32 = vor.u32 8388608, %v7063_v33  ;;  %v7220_v34 = vadd.s32 %v7219_v44, %v7215_v0 }
 0x8c8   : > { %v7023_v28 = vsel %vm8315_vm1, 0, %v8314_v56  ;;  %v7070_v41 = vand.u32 31, %v7068_v54  ;;  %v7069_v12 = vshrl.u32 %v7068_v54, 5  ;;  %8871 = vsinq.f32 %v14502_v15 }
 0x8c9   : > { %v7024_v27 = vsub.s32 32, %v7023_v28  ;;  %v7028_v47 = vsub.s32 4294967266, %v7023_v28  ;;  %v7025_v42 = vshll.u32 %v14532_v5, %v7023_v28  ;;  %v7221_v36 = vadd.s32 536870912, %v7220_v34 }
 0x8ca   : > { %v7071_v6 = vsub.s32 32, %v7070_v41  ;;  %v7073_v50 = vshll.u32 %v15698_v62, %v7070_v41  ;;  %v7076_v45 = vshll.u32 %v15708_v29, %v7070_v41  ;;  %v7079_v56 = vshll.u32 %v15822_v39, %v7070_v41 }
 0x8cb   : > { %v7026_v4 = vshrl.u32 %v7008_v49, %v7024_v27  ;;  %v7029_v14 = vadd.s32 127, %v7028_v47  ;;  %v14583_v44 = vshrl.u32 %v7221_v36, 30  ;;  %v7082_v5 = vshll.u32 %v15823_v16, %v7070_v41 }
 0x8cc   : > { %v7074_v22 = vshrl.u32 %v15708_v29, %v7071_v6  ;;  %v7077_v33 = vshrl.u32 %v15822_v39, %v7071_v6  ;;  %v7080_v48 = vshrl.u32 %v15823_v16, %v7071_v6  ;;  %v7083_v54 = vshrl.u32 %v15709_v23, %v7071_v6 }
 0x8cd   : > { %v7030_v0 = vshll.u32 %v7029_v14, 23  ;;  %v7267_v47 = vand.u32 2139095040, %v14563_v25  ;;  %v7027_v2 = vor.u32 %v7026_v4, %v7025_v42  ;;  %v7223_v43 = vshll.u32 %v14583_v44, 30 }
 0x8ce   : > { %v7075_v49 = vor.u32 %v7074_v22, %v7073_v50  ;;  %v7078_v28 = vor.u32 %v7077_v33, %v7076_v45  ;;  %v7081_v27 = vor.u32 %v7080_v48, %v7079_v56  ;;  %v7084_v31 = vor.u32 %v7083_v54, %v7082_v5 }
 0x8cf   : > { %v7104_v11 = vshll.u32 %v7064_v32, 8  ;;  %v7031_v7 = vor.u32 4788187, %v7030_v0  ;;  %v7072_v1 = vshrl.u32 %v15698_v62, %v7071_v6  ;;  %v7085_v36 = vshll.u32 %v15709_v23, %v7070_v41 }
 0x8d0   : > { %v7086_v14 = vshrl.u32 %v15697_v21, %v7071_v6  ;;  %v14592_v10 = vsub.s32 %v7220_v34, %v7223_v43  ;;  %vm7088_vm4 = vcmp.lt.s32.totalorder %v7069_v12, 1  ;;  %vm7090_vm14 = vcmp.lt.s32.totalorder %v7069_v12, 3 }
 0x8d1   : > { %vm7091_vm7 = vcmp.lt.s32.totalorder %v7069_v12, 4  ;;  %v7096_v42 = vsel %vm7088_vm4, %v7075_v49, %v7078_v28  ;;  %v7034_v22 = vcvt.s32.f32 %v7027_v2  ;;  %vm7089_vm10 = vcmp.lt.s32.totalorder %v7069_v12, 2 }
 0x8d2   : > { %v7087_v50 = vor.u32 %v7086_v14, %v7085_v36  ;;  %v7093_v45 = vsel %vm7091_vm7, %v7081_v27, 2102212464  ;;  %v7097_v4 = vsel %vm7091_vm7, %v7084_v31, 920167782  ;;  %v7226_v32 = vsub.s32 0, %v14592_v10 }
 0x8d3   : > { %v7098_v33 = vsel %vm7090_vm14, %v7081_v27, %v7097_v4  ;;  %v7032_v56 = vand.u32 2147483647, %v7031_v7  ;;  %v7100_v43 = vsel %vm7088_vm4, %v7078_v28, %v7081_v27  ;;  %v7092_v48 = vsel %vm7088_vm4, %v7072_v1, %v7075_v49 }
 0x8d4   : > { %v7099_v41 = vsel %vm7089_vm10, %v7096_v42, %v7098_v33  ;;  %v7101_v34 = vsel %vm7091_vm7, %v7087_v50, 1326507024  ;;  %v8321_v6 = vmin.u32 %v7226_v32, %v14592_v10  ;;  %v7094_v0 = vsel %vm7090_vm14, %v7078_v28, %v7093_v45 }
 0x8d5   : > { %v7102_v5 = vsel %vm7090_vm14, %v7084_v31, %v7101_v34  ;;  %v14604_v54 = vmul.u32.u64.low %v7104_v11, %v7099_v41  ;;  %v14605_v36 = vmul.u32.u64.high %v7104_v11, %v7099_v41, %v14604_v54  ;;  %v7268_v7 = vshrl.u32 %v7267_v47, 23 }
 0x8d6   : > { %v7103_v2 = vsel %vm7089_vm10, %v7100_v43, %v7102_v5  ;;  %v6926_v14 = vshll.u32 %v14569_v18, 23  ;;  %v7228_v42 = vclz %v8321_v6  ;;  %v7035_v1 = vmul.f32 %v7034_v22, %v7032_v56 }
 0x8d7   : > { %v14609_v27 = vmul.u32.u64.low %v7104_v11, %v7103_v2  ;;  %v14610_v50 = vmul.u32.u64.high %v7104_v11, %v7103_v2, %v14609_v27  ;;  %v7095_v49 = vsel %vm7089_vm10, %v7092_v48, %v7094_v0  ;;  %v8324_v28 = vadd.s32 4294967169, %v7268_v7 }
 0x8d8   : > { %v16170_v31 = vand.u32 2147483647, %v14521_v13  ;;  %v16171_v45 = vcvt.s32.f32 %v14504_v40  ;;  %v6921_v47 = vshll.u32 %v14441_v59, %v14526_v51  ;;  %v8322_v18 = vadd.s32 4294967294, %v7228_v42 }
 0x8d9   : > { %v16172_v32 = vand.u32 2147483647, %v14563_v25  ;;  %v16173_v41 = vsub.s32 32, %v14526_v51  ;;  %v7114_v12 = vadd.s32 1, %v14605_v36  ;;  %v7274_v56 = vadd.s32 1, %v8324_v28 }
 0x8da   : > { %v14618_v4 = vmul.f32 %v16171_v45, %v16170_v31  ;;  %v7371_v13 = vand.u32 2139095040, %v14566_v8  ;;  %v14629_v43 = vor.u32 4788187, %v6926_v14  ;;  %vm8323_vm1 = vcmp.lt.s32.totalorder %v8322_v18, 0 }
 0x8db   : > { %v7271_v33 = vand.u32 8388607, %v16172_v32  ;;  %v6922_v22 = vshrl.u32 %v14508_v3, %v16173_v41  ;;  %v7111_v40 = vmul.u32 %v7104_v11, %v7095_v49  ;;  %vm7113_vm6 = vc.u32 %v14610_v50, %v14604_v54 }
 0x8dc   : > { %v7036_v59 = vxor.u32 2147483648, %v7035_v1  ;;  %v14633_v34 = vsel %vm8323_vm1, 0, %v8322_v18  ;;  %v7115_v6 = vsel %vm7113_vm6, %v7114_v12, %v14605_v36  ;;  %vm7275_vm4 = vcmp.gt.s32.totalorder %v7274_v56, 0 }
 0x8dd   : > { %v7236_v3 = vsub.s32 4294967266, %v14633_v34  ;;  %v7116_v51 = vadd.s32 %v7115_v6, %v7111_v40  ;;  %v7272_v48 = vor.u32 8388608, %v7271_v33  ;;  %v15628_v0 = vand.u32 2147483647, %v14566_v8 }
 0x8de   : > { %vm15661_vm14 = vcmp.lt.s32.totalorder %v14291_v35, 0  ;;  %v7276_v11 = vsel %vm7275_vm4, %v7274_v56, 0  ;;  %v7372_v5 = vshrl.u32 %v7371_v13, 23  ;;  %v14641_v7 = vor.u32 %v6922_v22, %v6921_v47 }
 0x8df   : > { %v7237_v14 = vadd.s32 127, %v7236_v3  ;;  %v7117_v42 = vadd.s32 536870912, %v7116_v51  ;;  %v14646_v27 = vsel %vm15661_vm14, %v7036_v59, %v7035_v1  ;;  %v7216_v49 = vadd.s32 %v14548_v20, %v14554_v55  ;;  %v14668_v59 = vpop.eup %8869 }
 0x8e0   : > { %v7278_v15 = vand.u32 31, %v7276_v11  ;;  %v7232_v28 = vsub.s32 32, %v14633_v34  ;;  %v14653_v45 = vshll.u32 %v7272_v48, 8  ;;  %v14657_v47 = vand.u32 8388607, %v15628_v0  ;;  %16174 = vst [vmem:[#allocation22_spill] sm:$0xff] %v14668_v59 }
 0x8e1   : > { %v14651_v31 = vshrl.u32 %v7117_v42, 30  ;;  %v7233_v18 = vshll.u32 %v14592_v10, %v14633_v34  ;;  %v7277_v32 = vshrl.u32 %v7276_v11, 5  ;;  %v8328_v33 = vadd.s32 4294967169, %v7372_v5 }
 0x8e2   : > { %v7279_v1 = vsub.s32 32, %v7278_v15  ;;  %v7238_v41 = vshll.u32 %v7237_v14, 23  ;;  %v7281_v55 = vshll.u32 %v15698_v62, %v7278_v15  ;;  %v7284_v22 = vshll.u32 %v15708_v29, %v7278_v15 }
 0x8e3   : > { %v7119_v20 = vshll.u32 %v14651_v31, 30  ;;  %v7287_v13 = vshll.u32 %v15822_v39, %v7278_v15  ;;  %v7290_v34 = vshll.u32 %v15823_v16, %v7278_v15  ;;  %v7293_v3 = vshll.u32 %v15709_v23, %v7278_v15 }
 0x8e4   : > { %v7282_v12 = vshrl.u32 %v15708_v29, %v7279_v1  ;;  %v7285_v56 = vshrl.u32 %v15822_v39, %v7279_v1  ;;  %v7288_v40 = vshrl.u32 %v15823_v16, %v7279_v1  ;;  %v7291_v6 = vshrl.u32 %v15709_v23, %v7279_v1 }
 0x8e5   : > { %v14670_v10 = vsub.s32 %v7116_v51, %v7119_v20  ;;  %v7294_v14 = vshrl.u32 %v15697_v21, %v7279_v1  ;;  %v7234_v42 = vshrl.u32 %v7216_v49, %v7232_v28  ;;  %v7378_v2 = vadd.s32 1, %v8328_v33 }
 0x8e6   : > { %v7283_v48 = vor.u32 %v7282_v12, %v7281_v55  ;;  %v7286_v11 = vor.u32 %v7285_v56, %v7284_v22  ;;  %v7289_v5 = vor.u32 %v7288_v40, %v7287_v13  ;;  %v7292_v36 = vor.u32 %v7291_v6, %v7290_v34  ;;  %v14686_v13 = vpop.eup %8871 }
 0x8e7   : > { %v7122_v0 = vsub.s32 0, %v14670_v10  ;;  %vm15659_vm7 = vcmp.lt.s32.totalorder %v14104_v17, 0  ;;  %v16175_v51 = vand.u32 2147483647, %v14291_v35  ;;  %v7239_v59 = vor.u32 4788187, %v7238_v41 }
 0x8e8   : > { %v7280_v15 = vshrl.u32 %v15698_v62, %v7279_v1  ;;  %v7295_v55 = vor.u32 %v7294_v14, %v7293_v3  ;;  %vm7296_vm1 = vcmp.lt.s32.totalorder %v7277_v32, 1  ;;  %vm7298_vm6 = vcmp.lt.s32.totalorder %v7277_v32, 3  ;;  %16178 = vst [vmem:[#allocation27_spill] sm:$0xff] %v14686_v13  ;;  %v6115_v14 = vpop.f32.mrf.mxu1 }
 0x8e9   : > { %vm14680_vm10 = vcmp.le.f32.partialorder %v16175_v51, 0.7853982  ;;  %v8317_v22 = vmin.u32 %v7122_v0, %v14670_v10  ;;  %vm7299_vm4 = vcmp.lt.s32.totalorder %v7277_v32, 4  ;;  %v7304_v49 = vsel %vm7296_vm1, %v7283_v48, %v7286_v11 }
 0x8ea   : > { %v7301_v28 = vsel %vm7299_vm4, %v7289_v5, 2102212464  ;;  %v7305_v33 = vsel %vm7299_vm4, %v7292_v36, 920167782  ;;  %v7308_v12 = vsel %vm7296_vm1, %v7286_v11, %v7289_v5  ;;  %v7309_v56 = vsel %vm7299_vm4, %v7295_v55, 1326507024 }
 0x8eb   : > { %v7124_v40 = vclz %v8317_v22  ;;  %vm7297_vm11 = vcmp.lt.s32.totalorder %v7277_v32, 2  ;;  %v7306_v34 = vsel %vm7298_vm6, %v7289_v5, %v7305_v33  ;;  %v7376_v41 = vor.u32 8388608, %v14657_v47 }
 0x8ec   : > { %v7235_v1 = vor.u32 %v7234_v42, %v7233_v18  ;;  %v7300_v6 = vsel %vm7296_vm1, %v7280_v15, %v7283_v48  ;;  %v7307_v3 = vsel %vm7297_vm11, %v7304_v49, %v7306_v34  ;;  %v7310_v0 = vsel %vm7298_vm6, %v7292_v36, %v7309_v56 }
 0x8ed   : > { %v8318_v51 = vadd.s32 4294967294, %v7124_v40  ;;  %v7302_v57 = vsel %vm7298_vm6, %v7286_v11, %v7301_v28  ;;  %v7311_v55 = vsel %vm7297_vm11, %v7308_v12, %v7310_v0  ;;  %vm7379_vm4 = vcmp.gt.s32.totalorder %v7378_v2, 0 }
 0x8ee   : > { %v7240_v13 = vand.u32 2147483647, %v7239_v59  ;;  %v14695_v22 = vmul.u32.u64.low %v14653_v45, %v7311_v55  ;;  %v14696_v63 = vmul.u32.u64.high %v14653_v45, %v7311_v55, %v14695_v22  ;;  %v7380_v5 = vsel %vm7379_vm4, %v7378_v2, 0 }
 0x8ef   : > { %v6930_v47 = vcvt.s32.f32 %v14641_v7  ;;  %v14700_v18 = vmul.u32.u64.low %v14653_v45, %v7307_v3  ;;  %v14701_v48 = vmul.u32.u64.high %v14653_v45, %v7307_v3, %v14700_v18  ;;  %v14705_v36 = vadd.f32 %v6115_v14, %v13892_v61 }
 0x8f0   : > { %v7242_v11 = vcvt.s32.f32 %v7235_v1  ;;  %vm8319_vm1 = vcmp.lt.s32.totalorder %v8318_v51, 0  ;;  %v7303_v42 = vsel %vm7297_vm11, %v7300_v6, %v7302_v57  ;;  %v7382_v59 = vand.u32 31, %v7380_v5 }
 0x8f1   : > { %v16179_v15 = vxor.u32 2147483648, %v14618_v4  ;;  %v16181_v7 = vand.u32 2147483647, %v14629_v43  ;;  %v14723_v28 = vsel %vm14680_vm10, %v14291_v35, %v14646_v27  ;;  %v7112_v57 = vadd.s32 %v14604_v54, %v14610_v50 }
 0x8f2   : > { %v7243_v32 = vmul.f32 %v7242_v11, %v7240_v13  ;;  %vm7321_vm11 = vc.u32 %v14696_v63, %v14700_v18  ;;  %v7383_v33 = vsub.s32 32, %v7382_v59  ;;  %v14731_v12 = vsel %vm8319_vm1, 0, %v8318_v51 }
 0x8f3   : > { %v14713_v2 = vsel %vm15659_vm7, %v16179_v15, %v14618_v4  ;;  %v14717_v49 = vmul.f32 %v6930_v47, %v16181_v7  ;;  %v14729_v4 = vshll.u32 %v7376_v41, 8  ;;  %v7319_v43 = vmul.u32 %v14653_v45, %v7303_v42 }
 0x8f4   : > { %16180 = vst [vmem:[#allocation36_spill] sm:$0xff] %v14713_v2  ;;  %v7322_v56 = vadd.s32 1, %v14701_v48  ;;  %v7381_v27 = vshrl.u32 %v7380_v5, 5  ;;  %v7385_v34 = vshll.u32 %v15698_v62, %v7382_v59  ;;  %v7386_v54 = vshrl.u32 %v15708_v29, %v7383_v33 }
 0x8f5   : > { %v7389_v50 = vshrl.u32 %v15822_v39, %v7383_v33  ;;  %v7388_v41 = vshll.u32 %v15708_v29, %v7382_v59  ;;  %v7391_v1 = vshll.u32 %v15822_v39, %v7382_v59  ;;  %v7392_v6 = vshrl.u32 %v15823_v16, %v7383_v33 }
 0x8f6   : > { %v7323_v13 = vsel %vm7321_vm11, %v7322_v56, %v14701_v48  ;;  %vm15660_vm6 = vcmp.lt.s32.totalorder %v14416_v24, 0  ;;  %v7244_v45 = vxor.u32 2147483648, %v7243_v32  ;;  %v7132_v3 = vsub.s32 4294967266, %v14731_v12 }
 0x8f7   : > { %v7324_v0 = vadd.s32 %v7323_v13, %v7319_v43  ;;  %v7387_v14 = vor.u32 %v7386_v54, %v7385_v34  ;;  %v7390_v51 = vor.u32 %v7389_v50, %v7388_v41  ;;  %v7393_v55 = vor.u32 %v7392_v6, %v7391_v1 }
 0x8f8   : > { %v7394_v22 = vshll.u32 %v15823_v16, %v7382_v59  ;;  %v7395_v5 = vshrl.u32 %v15709_v23, %v7383_v33  ;;  %v7397_v48 = vshll.u32 %v15709_v23, %v7382_v59  ;;  %v7398_v11 = vshrl.u32 %v15697_v21, %v7383_v33 }
 0x8f9   : > { %v7325_v47 = vadd.s32 536870912, %v7324_v0  ;;  %v7579_v42 = vand.u32 2139095040, %v14705_v36  ;;  %v7128_v15 = vsub.s32 32, %v14731_v12  ;;  %vm7400_vm4 = vcmp.lt.s32.totalorder %v7381_v27, 1 }
 0x8fa   : > { %v7396_v7 = vor.u32 %v7395_v5, %v7394_v22  ;;  %vm7403_vm1 = vcmp.lt.s32.totalorder %v7381_v27, 4  ;;  %v16182_v43 = vand.u32 2147483647, %v14416_v24  ;;  %v7133_v34 = vadd.s32 127, %v7132_v3 }
 0x8fb   : > { %v14757_v54 = vshrl.u32 %v7325_v47, 30  ;;  %v7399_v50 = vor.u32 %v7398_v11, %v7397_v48  ;;  %v7405_v59 = vsel %vm7403_vm1, %v7393_v55, 2102212464  ;;  %v7384_v13 = vshrl.u32 %v15698_v62, %v7383_v33 }
 0x8fc   : > { %vm14753_vm11 = vcmp.le.f32.partialorder %v16182_v43, 0.7853982  ;;  %vm7402_vm3 = vcmp.lt.s32.totalorder %v7381_v27, 3  ;;  %v7408_v41 = vsel %vm7400_vm4, %v7387_v14, %v7390_v51  ;;  %v7409_v1 = vsel %vm7403_vm1, %v7396_v7, 920167782 }
 0x8fd   : > { %v7327_v6 = vshll.u32 %v14757_v54, 30  ;;  %vm7401_vm5 = vcmp.lt.s32.totalorder %v7381_v27, 2  ;;  %v7410_v22 = vsel %vm7402_vm3, %v7393_v55, %v7409_v1  ;;  %v7412_v5 = vsel %vm7400_vm4, %v7390_v51, %v7393_v55 }
 0x8fe   : > { %v7404_v43 = vsel %vm7400_vm4, %v7384_v13, %v7387_v14  ;;  %v7406_v40 = vsel %vm7402_vm3, %v7390_v51, %v7405_v59  ;;  %v7411_v3 = vsel %vm7401_vm5, %v7408_v41, %v7410_v22  ;;  %v7413_v47 = vsel %vm7403_vm1, %v7399_v50, 1326507024  ;;  %v6028_v59 = vpop.f32.mrf.mxu0 }
 0x8ff   : > { %v14766_v48 = vsub.s32 %v7324_v0, %v7327_v6  ;;  %v7414_v33 = vsel %vm7402_vm3, %v7396_v7, %v7413_v47  ;;  %v14769_v11 = vmul.u32.u64.low %v14729_v4, %v7411_v3  ;;  %v14770_v38 = vmul.u32.u64.high %v14729_v4, %v7411_v3, %v14769_v11 }
 0x900   : > { %v7245_v1 = vsel %vm15660_vm6, %v7244_v45, %v7243_v32  ;;  %v7130_v55 = vshrl.u32 %v7112_v57, %v7128_v15  ;;  %v7415_v14 = vsel %vm7401_vm5, %v7412_v5, %v7414_v33  ;;  %v7580_v51 = vshrl.u32 %v7579_v42, 23  ;;  %v6117_v5 = vpop.f32.mrf.mxu1 }
 0x901   : > { %v7134_v13 = vshll.u32 %v7133_v34, 23  ;;  %v7330_v50 = vsub.s32 0, %v14766_v48  ;;  %v14778_v0 = vmul.u32.u64.low %v14729_v4, %v7415_v14  ;;  %v14779_v41 = vmul.u32.u64.high %v14729_v4, %v7415_v14, %v14778_v0 }
 0x902   : > { %v7129_v7 = vshll.u32 %v14670_v10, %v14731_v12  ;;  %v7407_v6 = vsel %vm7401_vm5, %v7404_v43, %v7406_v40  ;;  %v8336_v22 = vadd.s32 4294967169, %v7580_v51  ;;  %v16185_v32 = vand.u32 2147483647, %v14705_v36 }
 0x903   : > { %v6932_v45 = vxor.u32 2147483648, %v14717_v49  ;;  %v8325_v42 = vmin.u32 %v7330_v50, %v14766_v48  ;;  %v7426_v15 = vadd.s32 1, %v14770_v38  ;;  %v14790_v34 = vadd.f32 %v6028_v59, %v13892_v61 }
 0x904   : > { %v7583_v57 = vand.u32 8388607, %v16185_v32  ;;  %8873 = vcosq.f32 %v14723_v28  ;;  %v14796_v10 = vsel %vm14753_vm11, %v14416_v24, %v7245_v1  ;;  %v14798_v12 = vor.u32 %v7130_v55, %v7129_v7 }
 0x905   : > { %v7586_v40 = vadd.s32 1, %v8336_v22  ;;  %v14800_v27 = vor.u32 4788187, %v7134_v13  ;;  %v7332_v43 = vclz %v8325_v42  ;;  %v7423_v3 = vmul.u32 %v14729_v4, %v7407_v6 }
 0x906   : > { %vm7425_vm3 = vc.u32 %v14779_v41, %v14769_v11  ;;  %v7584_v33 = vor.u32 8388608, %v7583_v57  ;;  %v14807_v14 = vadd.f32 %v6117_v5, %v13892_v61  ;;  %v15639_v59 = vand.u32 2147483647, %v14790_v34 }
 0x907   : > { %v7427_v47 = vsel %vm7425_vm3, %v7426_v15, %v14770_v38  ;;  %vm7587_vm5 = vcmp.gt.s32.totalorder %v7586_v40, 0  ;;  %v8326_v1 = vadd.s32 4294967294, %v7332_v43  ;;  %v14813_v13 = vsel %vm15658_vm15, %v6932_v45, %v14717_v49 }
 0x908   : > { %v7428_v51 = vadd.s32 %v7427_v47, %v7423_v3  ;;  %v7588_v55 = vsel %vm7587_vm5, %v7586_v40, 0  ;;  %16186 = vst [vmem:[#allocation34_spill] sm:$0xff] %v14813_v13  ;;  %8875 = vsinq.f32 %v14723_v28  ;;  %v7475_v38 = vand.u32 2139095040, %v14790_v34 }
 0x909   : > { %v7590_v4 = vand.u32 31, %v7588_v55  ;;  %8877 = vcosq.f32 %v14796_v10  ;;  %v14820_v61 = vadd.s32 %v14700_v18, %v14696_v63  ;;  %vm8327_vm4 = vcmp.lt.s32.totalorder %v8326_v1, 0 }
 0x90a   : > { %v7429_v50 = vadd.s32 536870912, %v7428_v51  ;;  %v14824_v49 = vshll.u32 %v7584_v33, 8  ;;  %v14826_v22 = vsel %vm8327_vm4, 0, %v8326_v1  ;;  %v14832_v32 = vand.u32 8388607, %v15639_v59 }
 0x90b   : > { %v7591_v6 = vsub.s32 32, %v7590_v4  ;;  %v7593_v18 = vshll.u32 %v15698_v62, %v7590_v4  ;;  %v7476_v42 = vshrl.u32 %v7475_v38, 23  ;;  %v7596_v5 = vshll.u32 %v15708_v29, %v7590_v4 }
 0x90c   : > { %v14828_v28 = vshrl.u32 %v7429_v50, 30  ;;  %v7599_v40 = vshll.u32 %v15822_v39, %v7590_v4  ;;  %v7340_v3 = vsub.s32 4294967266, %v14826_v22  ;;  %v7589_v47 = vshrl.u32 %v7588_v55, 5 }
 0x90d   : > { %v7594_v57 = vshrl.u32 %v15708_v29, %v7591_v6  ;;  %v7597_v45 = vshrl.u32 %v15822_v39, %v7591_v6  ;;  %v7600_v43 = vshrl.u32 %v15823_v16, %v7591_v6  ;;  %v7602_v33 = vshll.u32 %v15823_v16, %v7590_v4 }
 0x90e   : > { %v7431_v15 = vshll.u32 %v14828_v28, 30  ;;  %v7603_v1 = vshrl.u32 %v15709_v23, %v7591_v6  ;;  %v7424_v0 = vadd.s32 %v14769_v11, %v14779_v41  ;;  %v7605_v52 = vshll.u32 %v15709_v23, %v7590_v4 }
 0x90f   : > { %v7595_v59 = vor.u32 %v7594_v57, %v7593_v18  ;;  %v7598_v7 = vor.u32 %v7597_v45, %v7596_v5  ;;  %v7601_v38 = vor.u32 %v7600_v43, %v7599_v40  ;;  %v7606_v9 = vshrl.u32 %v15697_v21, %v7591_v6 }
 0x910   : > { %v14845_v50 = vsub.s32 %v7428_v51, %v7431_v15  ;;  %v7604_v63 = vor.u32 %v7603_v1, %v7602_v33  ;;  %v8332_v46 = vadd.s32 4294967169, %v7476_v42  ;;  %v7480_v37 = vor.u32 8388608, %v14832_v32 }
 0x911   : > { %v14851_v53 = vpop.eup %8873  ;;  %v7683_v51 = vand.u32 2139095040, %v14807_v14  ;;  %v7592_v18 = vshrl.u32 %v15698_v62, %v7591_v6  ;;  %v7607_v57 = vor.u32 %v7606_v9, %v7605_v52  ;;  %vm7608_vm1 = vcmp.lt.s32.totalorder %v7589_v47, 1 }
 0x912   : > { %v7434_v55 = vsub.s32 0, %v14845_v50  ;;  %vm7611_vm3 = vcmp.lt.s32.totalorder %v7589_v47, 4  ;;  %v7341_v11 = vadd.s32 127, %v7340_v3  ;;  %v7616_v45 = vsel %vm7608_vm1, %v7595_v59, %v7598_v7 }
 0x913   : > { %v7613_v4 = vsel %vm7611_vm3, %v7601_v38, 2102212464  ;;  %vm7610_vm5 = vcmp.lt.s32.totalorder %v7589_v47, 3  ;;  %v7617_v15 = vsel %vm7611_vm3, %v7604_v63, 920167782  ;;  %v7620_v5 = vsel %vm7608_vm1, %v7598_v7, %v7601_v38 }
 0x914   : > { %v8329_v41 = vmin.u32 %v7434_v55, %v14845_v50  ;;  %v7621_v40 = vsel %vm7611_vm3, %v7607_v57, 1326507024  ;;  %vm7609_vm4 = vcmp.lt.s32.totalorder %v7589_v47, 2  ;;  %v7612_v32 = vsel %vm7608_vm1, %v7592_v18, %v7595_v59 }
 0x915   : > { %v14858_v43 = vpop.eup %8875  ;;  %v7618_v33 = vsel %vm7610_vm5, %v7601_v38, %v7617_v15  ;;  %v7614_v9 = vsel %vm7610_vm5, %v7598_v7, %v7613_v4  ;;  %v7622_v6 = vsel %vm7610_vm5, %v7604_v63, %v7621_v40  ;;  %v7482_v3 = vadd.s32 1, %v8332_v46 }
 0x916   : > { %v7436_v42 = vclz %v8329_v41  ;;  %v14860_v1 = vpop.eup %8877  ;;  %v7619_v52 = vsel %vm7609_vm4, %v7616_v45, %v7618_v33  ;;  %v7336_v55 = vsub.s32 32, %v14826_v22  ;;  %v7342_v13 = vshll.u32 %v7341_v11, 23 }
 0x917   : > { %v7623_v60 = vsel %vm7609_vm4, %v7620_v5, %v7622_v6  ;;  %v14868_v41 = vmul.u32.u64.low %v14824_v49, %v7619_v52  ;;  %v14869_v47 = vmul.u32.u64.high %v14824_v49, %v7619_v52, %v14868_v41  ;;  %v7615_v59 = vsel %vm7609_vm4, %v7612_v32, %v7614_v9 }
 0x918   : > { %v8330_v58 = vadd.s32 4294967294, %v7436_v42  ;;  %v14864_v2 = vmul.u32.u64.low %v14824_v49, %v7623_v60  ;;  %v14865_v57 = vmul.u32.u64.high %v14824_v49, %v7623_v60, %v14864_v2  ;;  %vm7483_vm3 = vcmp.gt.s32.totalorder %v7482_v3, 0 }
 0x919   : > { %v7684_v7 = vshrl.u32 %v7683_v51, 23  ;;  %v7484_v46 = vsel %vm7483_vm3, %v7482_v3, 0  ;;  %v14872_v38 = vshll.u32 %v7480_v37, 8  ;;  %v16187_v18 = vand.u32 2147483647, %v14807_v14 }
 0x91a   : > { %vm8331_vm1 = vcmp.lt.s32.totalorder %v8330_v58, 0  ;;  %v14879_v60 = vshrl.u32 %v14820_v61, %v7336_v55  ;;  %v14881_v2 = vor.u32 4788187, %v7342_v13  ;;  %v7631_v15 = vmul.u32 %v14824_v49, %v7615_v59 }
 0x91b   : > { %v7439_v63 = vsel %vm8331_vm1, 0, %v8330_v58  ;;  %v14876_v11 = vand.u32 8388607, %v16187_v18  ;;  %vm7633_vm5 = vc.u32 %v14865_v57, %v14868_v41  ;;  %v7634_v58 = vadd.s32 1, %v14869_v47 }
 0x91c   : > { %v7440_v4 = vsub.s32 32, %v7439_v63  ;;  %v7444_v45 = vsub.s32 4294967266, %v7439_v63  ;;  %v7486_v37 = vand.u32 31, %v7484_v46  ;;  %v7441_v51 = vshll.u32 %v14845_v50, %v7439_v63 }
 0x91d   : > { %v8340_v42 = vadd.s32 4294967169, %v7684_v7  ;;  %v7635_v61 = vsel %vm7633_vm5, %v7634_v58, %v14869_v47  ;;  %v7485_v32 = vshrl.u32 %v7484_v46, 5  ;;  %vm7370_vm4 = vcmp.lt.s32.totalorder %v14566_v8, 0 }
 0x91e   : > { %v7442_v5 = vshrl.u32 %v7424_v0, %v7440_v4  ;;  %v7445_v40 = vadd.s32 127, %v7444_v45  ;;  %v7487_v13 = vsub.s32 32, %v7486_v37  ;;  %v7489_v33 = vshll.u32 %v15698_v62, %v7486_v37 }
 0x91f   : > { %v7636_v49 = vadd.s32 %v7635_v61, %v7631_v15  ;;  %v7492_v6 = vshll.u32 %v15708_v29, %v7486_v37  ;;  %v7495_v0 = vshll.u32 %v15822_v39, %v7486_v37  ;;  %v7498_v63 = vshll.u32 %v15823_v16, %v7486_v37 }
 0x920   : > { %v7443_v9 = vor.u32 %v7442_v5, %v7441_v51  ;;  %v7446_v52 = vshll.u32 %v7445_v40, 23  ;;  %v7490_v3 = vshrl.u32 %v15708_v29, %v7487_v13  ;;  %v7493_v50 = vshrl.u32 %v15822_v39, %v7487_v13 }
 0x921   : > { %v7496_v55 = vshrl.u32 %v15823_v16, %v7487_v13  ;;  %v7637_v7 = vadd.s32 536870912, %v7636_v49  ;;  %v16188_v46 = vand.u32 2147483647, %v14566_v8  ;;  %v7499_v58 = vshrl.u32 %v15709_v23, %v7487_v13 }
 0x922   : > { %v7447_v47 = vor.u32 4788187, %v7446_v52  ;;  %v7450_v59 = vcvt.s32.f32 %v7443_v9  ;;  %v7491_v4 = vor.u32 %v7490_v3, %v7489_v33  ;;  %v7494_v45 = vor.u32 %v7493_v50, %v7492_v6 }
 0x923   : > { %vm14899_vm1 = vcmp.le.f32.partialorder %v16188_v46, 0.7853982  ;;  %v7497_v15 = vor.u32 %v7496_v55, %v7495_v0  ;;  %v14904_v5 = vshrl.u32 %v7637_v7, 30  ;;  %v7501_v40 = vshll.u32 %v15709_v23, %v7486_v37 }
 0x924   : > { %v7448_v51 = vand.u32 2147483647, %v7447_v47  ;;  %v7502_v61 = vshrl.u32 %v15697_v21, %v7487_v13  ;;  %v7488_v9 = vshrl.u32 %v15698_v62, %v7487_v13  ;;  %v7500_v52 = vor.u32 %v7499_v58, %v7498_v63 }
 0x925   : > { %vm7504_vm3 = vcmp.lt.s32.totalorder %v7485_v32, 1  ;;  %vm7505_vm5 = vcmp.lt.s32.totalorder %v7485_v32, 2  ;;  %v7639_v26 = vshll.u32 %v14904_v5, 30  ;;  %vm7507_vm2 = vcmp.lt.s32.totalorder %v7485_v32, 4 }
 0x926   : > { %v7451_v46 = vmul.f32 %v7450_v59, %v7448_v51  ;;  %v7503_v33 = vor.u32 %v7502_v61, %v7501_v40  ;;  %vm7506_vm8 = vcmp.lt.s32.totalorder %v7485_v32, 3  ;;  %v7509_v6 = vsel %vm7507_vm2, %v7497_v15, 2102212464 }
 0x927   : > { %v7512_v3 = vsel %vm7504_vm3, %v7491_v4, %v7494_v45  ;;  %v7513_v50 = vsel %vm7507_vm2, %v7500_v52, 920167782  ;;  %v14910_v55 = vsub.s32 %v7636_v49, %v7639_v26  ;;  %v7516_v47 = vsel %vm7504_vm3, %v7494_v45, %v7497_v15 }
 0x928   : > { %v7452_v0 = vxor.u32 2147483648, %v7451_v46  ;;  %v7514_v37 = vsel %vm7506_vm8, %v7497_v15, %v7513_v50  ;;  %v7508_v7 = vsel %vm7504_vm3, %v7488_v9, %v7491_v4  ;;  %v7517_v63 = vsel %vm7507_vm2, %v7503_v33, 1326507024 }
 0x929   : > { %v7515_v13 = vsel %vm7505_vm5, %v7512_v3, %v7514_v37  ;;  %v7690_v58 = vadd.s32 1, %v8340_v42  ;;  %v7642_v51 = vsub.s32 0, %v14910_v55  ;;  %v7510_v40 = vsel %vm7506_vm8, %v7494_v45, %v7509_v6 }
 0x92a   : > { %v7453_v59 = vsel %vm7370_vm4, %v7452_v0, %v7451_v46  ;;  %v7518_v61 = vsel %vm7506_vm8, %v7500_v52, %v7517_v63  ;;  %v7337_v17 = vshll.u32 %v14766_v48, %v14826_v22  ;;  %v16191_v52 = vand.u32 2147483647, %v14800_v27 }
 0x92b   : > { %v7519_v26 = vsel %vm7505_vm5, %v7516_v47, %v7518_v61  ;;  %v14920_v49 = vmul.u32.u64.low %v14872_v38, %v7515_v13  ;;  %v14921_v15 = vmul.u32.u64.high %v14872_v38, %v7515_v13, %v14920_v49  ;;  %v7456_v42 = vsel %vm14899_vm1, %v14566_v8, %v7453_v59 }
 0x92c   : > { %v8337_v4 = vmin.u32 %v7642_v51, %v14910_v55  ;;  %v14929_v9 = vmul.u32.u64.low %v14872_v38, %v7519_v26  ;;  %v14930_v45 = vmul.u32.u64.high %v14872_v38, %v7519_v26, %v14929_v9  ;;  %v16192_v48 = vcvt.s32.f32 %v14798_v12 }
 0x92d   : > { %v14939_v46 = vor.u32 %v14879_v60, %v7337_v17  ;;  %v7511_v33 = vsel %vm7505_vm5, %v7508_v7, %v7510_v40  ;;  %vm7691_vm8 = vcmp.gt.s32.totalorder %v7690_v58, 0  ;;  %v7344_v6 = vand.u32 2147483647, %v14881_v2 }
 0x92e   : > { %v14936_v22 = vmul.f32 %v16192_v48, %v16191_v52  ;;  %v7644_v3 = vclz %v8337_v4  ;;  %v7688_v50 = vor.u32 8388608, %v14876_v11  ;;  %v7692_v0 = vsel %vm7691_vm8, %v7690_v58, 0 }
 0x92f   : > { %8879 = vcosq.f32 %v7456_v42  ;;  %v7632_v27 = vadd.s32 %v14868_v41, %v14865_v57  ;;  %v7530_v12 = vadd.s32 1, %v14921_v15  ;;  %v7694_v37 = vand.u32 31, %v7692_v0 }
 0x930   : > { %8881 = vsinq.f32 %v7456_v42  ;;  %v8338_v47 = vadd.s32 4294967294, %v7644_v3  ;;  %v7527_v17 = vmul.u32 %v14872_v38, %v7511_v33  ;;  %vm7529_vm2 = vc.u32 %v14930_v45, %v14920_v49 }
 0x931   : > { %v7531_v60 = vsel %vm7529_vm2, %v7530_v12, %v14921_v15  ;;  %v14951_v32 = vshrl.u32 %v7692_v0, 5  ;;  %v7695_v7 = vsub.s32 32, %v7694_v37  ;;  %v7454_v13 = vsub.s32 4, %v14828_v28 }
 0x932   : > { %vm8339_vm3 = vcmp.lt.s32.totalorder %v8338_v47, 0  ;;  %v7532_v63 = vadd.s32 %v7531_v60, %v7527_v17  ;;  %v7697_v57 = vshll.u32 %v15698_v62, %v7694_v37  ;;  %v7700_v41 = vshll.u32 %v15708_v29, %v7694_v37 }
 0x933   : > { %v7647_v58 = vsel %vm8339_vm3, 0, %v8338_v47  ;;  %v7698_v59 = vshrl.u32 %v15708_v29, %v7695_v7  ;;  %v7701_v38 = vshrl.u32 %v15822_v39, %v7695_v7  ;;  %v7703_v51 = vshll.u32 %v15822_v39, %v7694_v37 }
 0x934   : > { %v7648_v40 = vsub.s32 32, %v7647_v58  ;;  %v7652_v61 = vsub.s32 4294967266, %v7647_v58  ;;  %v7533_v26 = vadd.s32 536870912, %v7532_v63  ;;  %v7706_v15 = vshll.u32 %v15823_v16, %v7694_v37 }
 0x935   : > { %v7649_v42 = vshll.u32 %v14910_v55, %v7647_v58  ;;  %v7699_v4 = vor.u32 %v7698_v59, %v7697_v57  ;;  %v7704_v9 = vshrl.u32 %v15823_v16, %v7695_v7  ;;  %v7707_v52 = vshrl.u32 %v15709_v23, %v7695_v7 }
 0x936   : > { %v7650_v48 = vshrl.u32 %v7632_v27, %v7648_v40  ;;  %v7653_v33 = vadd.s32 127, %v7652_v61  ;;  %v14963_v3 = vshrl.u32 %v7533_v26, 30  ;;  %v7702_v29 = vor.u32 %v7701_v38, %v7700_v41 }
 0x937   : > { %v7705_v0 = vor.u32 %v7704_v9, %v7703_v51  ;;  %v7708_v12 = vor.u32 %v7707_v52, %v7706_v15  ;;  %v7709_v39 = vshll.u32 %v15709_v23, %v7694_v37  ;;  %v7710_v47 = vshrl.u32 %v15697_v21, %v7695_v7 }
 0x938   : > { %v7651_v17 = vor.u32 %v7650_v48, %v7649_v42  ;;  %v7654_v60 = vshll.u32 %v7653_v33, 23  ;;  %v7535_v55 = vshll.u32 %v14963_v3, 30  ;;  %v7455_v16 = vsel %vm7370_vm4, %v7454_v13, %v14828_v28 }
 0x939   : > { %v7696_v27 = vshrl.u32 %v15698_v62, %v7695_v7  ;;  %v7711_v57 = vor.u32 %v7710_v47, %v7709_v39  ;;  %vm7712_vm5 = vcmp.lt.s32.totalorder %v14951_v32, 1  ;;  %vm7713_vm8 = vcmp.lt.s32.totalorder %v14951_v32, 2 }
 0x93a   : > { %v7655_v41 = vor.u32 4788187, %v7654_v60  ;;  %v14974_v58 = vsub.s32 %v7532_v63, %v7535_v55  ;;  %vm7714_vm2 = vcmp.lt.s32.totalorder %v14951_v32, 3  ;;  %vm7715_vm3 = vcmp.lt.s32.totalorder %v14951_v32, 4 }
 0x93b   : > { %v7658_v21 = vcvt.s32.f32 %v7651_v17  ;;  %v7717_v23 = vsel %vm7715_vm3, %v7705_v0, 2102212464  ;;  %v7720_v37 = vsel %vm7712_vm5, %v7699_v4, %v7702_v29  ;;  %v7721_v28 = vsel %vm7715_vm3, %v7708_v12, 920167782 }
 0x93c   : > { %v14980_v13 = vpop.eup %8879  ;;  %v7656_v62 = vand.u32 2147483647, %v7655_v41  ;;  %v7538_v7 = vsub.s32 0, %v14974_v58  ;;  %v7722_v59 = vsel %vm7714_vm2, %v7705_v0, %v7721_v28  ;;  %v7724_v63 = vsel %vm7712_vm5, %v7702_v29, %v7705_v0 }
 0x93d   : > { %v14987_v38 = vpop.eup %8881  ;;  %v7716_v51 = vsel %vm7712_vm5, %v7696_v27, %v7699_v4  ;;  %v7723_v40 = vsel %vm7713_vm8, %v7720_v37, %v7722_v59  ;;  %v7725_v61 = vsel %vm7715_vm3, %v7711_v57, 1326507024  ;;  %v7728_v26 = vshll.u32 %v7688_v50, 8 }
 0x93e   : > { %vm7058_vm4 = vcmp.lt.s32.totalorder %v14484_v30, 0  ;;  %v7659_v15 = vmul.f32 %v7658_v21, %v7656_v62  ;;  %v8333_v42 = vmin.u32 %v7538_v7, %v14974_v58  ;;  %v7718_v9 = vsel %vm7714_vm2, %v7702_v29, %v7717_v23 }
 0x93f   : > { %v7726_v52 = vsel %vm7714_vm2, %v7708_v12, %v7725_v61  ;;  %v15003_v48 = vmul.u32.u64.low %v7728_v26, %v7723_v40  ;;  %v15004_v33 = vmul.u32.u64.high %v7728_v26, %v7723_v40, %v15003_v48  ;;  %v7457_v11 = vsel %vm14899_vm1, 0, %v7455_v16 }
 0x940   : > { %v7727_v4 = vsel %vm7713_vm8, %v7724_v63, %v7726_v52  ;;  %v7660_v50 = vxor.u32 2147483648, %v7659_v15  ;;  %v7540_v0 = vclz %v8333_v42  ;;  %8883 = vsinq.f32 %v14796_v10 }
 0x941   : > { %v15009_v39 = vmul.u32.u64.low %v7728_v26, %v7727_v4  ;;  %v15010_v47 = vmul.u32.u64.high %v7728_v26, %v7727_v4, %v15009_v39  ;;  %v16193_v29 = vand.u32 2147483647, %v14705_v36  ;;  %vm7578_vm2 = vcmp.lt.s32.totalorder %v14705_v36, 0 }
 0x942   : > { %v7719_v17 = vsel %vm7713_vm8, %v7716_v51, %v7718_v9  ;;  %v7140_v18 = vxor.u32 2147483648, %v14936_v22  ;;  %v7346_v60 = vcvt.s32.f32 %v14939_v46  ;;  %v7661_v55 = vsel %vm7578_vm2, %v7660_v50, %v7659_v15 }
 0x943   : > { %vm15015_vm5 = vcmp.le.f32.partialorder %v16193_v29, 0.7853982  ;;  %v8334_v16 = vadd.s32 4294967294, %v7540_v0  ;;  %v7738_v27 = vadd.s32 1, %v15004_v33  ;;  %v7461_v57 = vadd.s32 3, %v7457_v11 }
 0x944   : > { %v7664_v10 = vsel %vm15015_vm5, %v14705_v36, %v7661_v55  ;;  %v7662_v41 = vsub.s32 4, %v14904_v5  ;;  %v7347_v32 = vmul.f32 %v7346_v60, %v7344_v6  ;;  %v7735_v21 = vmul.u32 %v7728_v26, %v7719_v17 }
 0x945   : > { %vm8335_vm1 = vcmp.lt.s32.totalorder %v8334_v16, 0  ;;  %vm7737_vm8 = vc.u32 %v15010_v47, %v15003_v48  ;;  %v7528_v46 = vadd.s32 %v14920_v49, %v14930_v45  ;;  %v7558_v28 = vsub.s32 4, %v14963_v3 }
 0x946   : > { %v7543_v23 = vsel %vm8335_vm1, 0, %v8334_v16  ;;  %v7739_v37 = vsel %vm7737_vm8, %v7738_v27, %v15004_v33  ;;  %8885 = vsinq.f32 %v7664_v10  ;;  %v7141_v2 = vsel %vm7058_vm4, %v7140_v18, %v14936_v22 }
 0x947   : > { %v7544_v62 = vsub.s32 32, %v7543_v23  ;;  %v7548_v7 = vsub.s32 4294967266, %v7543_v23  ;;  %v7740_v59 = vadd.s32 %v7739_v37, %v7735_v21  ;;  %8887 = vcosq.f32 %v7664_v10 }
 0x948   : > { %v7462_v6 = vand.u32 3, %v7461_v57  ;;  %v7663_v63 = vsel %vm7578_vm2, %v7662_v41, %v14904_v5  ;;  %vm7266_vm3 = vcmp.lt.s32.totalorder %v14563_v25, 0  ;;  %v7545_v49 = vshll.u32 %v14974_v58, %v7543_v23 }
 0x949   : > { %v7546_v45 = vshrl.u32 %v7528_v46, %v7544_v62  ;;  %v7549_v51 = vadd.s32 127, %v7548_v7  ;;  %v7741_v40 = vadd.s32 536870912, %v7740_v59  ;;  %v7348_v61 = vxor.u32 2147483648, %v7347_v32 }
 0x94a   : > { %vm7474_vm1 = vcmp.lt.s32.totalorder %v14790_v34, 0  ;;  %vm15662_vm8 = vcmp.lt.s32.totalorder %v14807_v14, 0  ;;  %v7465_v22 = vxor.u32 2147483648, %v14987_v38  ;;  %v16196_v9 = vand.u32 2147483647, %v14790_v34 }
 0x94b   : > { %v7547_v26 = vor.u32 %v7546_v45, %v7545_v49  ;;  %v7550_v15 = vshll.u32 %v7549_v51, 23  ;;  %v7742_v42 = vshrl.u32 %v7741_v40, 30  ;;  %v7559_v5 = vsel %vm7474_vm1, %v7558_v28, %v14963_v3 }
 0x94c   : > { %vm15055_vm2 = vcmp.le.f32.partialorder %v16196_v9, 0.7853982  ;;  %v7468_v52 = vxor.u32 2147483648, %v14980_v13  ;;  %v7665_v4 = vsel %vm15015_vm5, 0, %v7663_v63  ;;  %v7142_v33 = vsub.s32 4, %v14651_v31 }
 0x94d   : > { %v7551_v11 = vor.u32 4788187, %v7550_v15  ;;  %v7743_v50 = vshll.u32 %v7742_v42, 30  ;;  %v7766_v0 = vsub.s32 4, %v7742_v42  ;;  %vm7464_vm15 = vcmp.eq.s32.totalorder %v7462_v6, 0  ;;  %v15073_v12 = vpop.eup %8883 }
 0x94e   : > { %v7561_v3 = vsel %vm15055_vm2, 0, %v7559_v5  ;;  %vm7460_vm7 = vweird.f32 %v14566_v8  ;;  %v7466_v39 = vsel %vm7464_vm15, %v14980_v13, %v7465_v22  ;;  %vm7467_vm6 = vcmp.eq.s32.totalorder %v7462_v6, 2 }
 0x94f   : > { %v16199_v29 = vand.u32 2147483647, %v14484_v30  ;;  %v7552_v18 = vand.u32 2147483647, %v7551_v11  ;;  %v7554_v60 = vcvt.s32.f32 %v7547_v26  ;;  %v15075_v55 = vsub.s32 %v7740_v59, %v7743_v50 }
 0x950   : > { %v7143_v16 = vsel %vm7058_vm4, %v7142_v33, %v14651_v31  ;;  %v7767_v13 = vsel %vm15662_vm8, %v7766_v0, %v7742_v42  ;;  %v7469_v10 = vsel %vm7467_vm6, %v7468_v52, %v14987_v38  ;;  %v7669_v27 = vadd.s32 3, %v7665_v4 }
 0x951   : > { %vm15069_vm14 = vcmp.le.f32.partialorder %v16199_v29, 0.7853982  ;;  %v7555_v41 = vmul.f32 %v7554_v60, %v7552_v18  ;;  %v7746_v21 = vsub.s32 0, %v15075_v55  ;;  %v7349_v31 = vsel %vm7266_vm3, %v7348_v61, %v7347_v32 }
 0x952   : > { %v7144_v57 = vsel %vm15069_vm14, %v14484_v30, %v7141_v2  ;;  %v7145_v46 = vsel %vm15069_vm14, 0, %v7143_v16  ;;  %v7565_v23 = vadd.s32 3, %v7561_v3  ;;  %v16202_v37 = vand.u32 2147483647, %v14807_v14 }
 0x953   : > { %8889 = vcosq.f32 %v7144_v57  ;;  %v7556_v28 = vxor.u32 2147483648, %v7555_v41  ;;  %v8341_v62 = vmin.u32 %v7746_v21, %v15075_v55  ;;  %vm7463_vm6 = vcmp.lt.s32.totalorder %v7462_v6, 2  ;;  %v8886_v59 = vpop.eup %8885 }
 0x954   : > { %vm15093_vm15 = vcmp.le.f32.partialorder %v16202_v37, 0.7853982  ;;  %8891 = vsinq.f32 %v7144_v57  ;;  %v7736_v2 = vadd.s32 %v15003_v48, %v15010_v47  ;;  %v7470_v32 = vsel %vm7463_vm6, %v7466_v39, %v7469_v10  ;;  %v8888_v45 = vpop.eup %8887 }
 0x955   : > { %v7769_v7 = vsel %vm15093_vm15, 0, %v7767_v13  ;;  %v7149_v63 = vadd.s32 3, %v7145_v46  ;;  %v7350_v49 = vsub.s32 4, %v14757_v54  ;;  %v7557_v51 = vsel %vm7474_vm1, %v7556_v28, %v7555_v41 }
 0x956   : > { %v7748_v40 = vclz %v8341_v62  ;;  %v15105_v61 = vand.u32 3, %v7669_v27  ;;  %v16205_v22 = vand.u32 2147483647, %v14563_v25  ;;  %v7560_v48 = vsel %vm15055_vm2, %v14790_v34, %v7557_v51 }
 0x957   : > { %v15116_v47 = vand.u32 3, %v7565_v23  ;;  %v7773_v6 = vadd.s32 3, %v7769_v7  ;;  %8893 = vcosq.f32 %v7560_v48  ;;  %v15123_v5 = vsel %vm7460_vm7, nan, %v7470_v32 }
 0x958   : > { %vm15109_vm14 = vcmp.le.f32.partialorder %v16205_v22, 0.7853982  ;;  %v8342_v42 = vadd.s32 4294967294, %v7748_v40  ;;  %v7673_v9 = vxor.u32 2147483648, %v8886_v59  ;;  %8895 = vsinq.f32 %v7560_v48 }
 0x959   : > { %v7352_v15 = vsel %vm15109_vm14, %v14563_v25, %v7349_v31  ;;  %v7676_v52 = vxor.u32 2147483648, %v8888_v45  ;;  %v7150_v4 = vand.u32 3, %v7149_v63  ;;  %v7351_v58 = vsel %vm7266_vm3, %v7350_v49, %v14757_v54 }
 0x95a   : > { %vm8343_vm4 = vcmp.lt.s32.totalorder %v8342_v42, 0  ;;  %vm7672_vm5 = vcmp.eq.s32.totalorder %v15105_v61, 0  ;;  %vm7675_vm1 = vcmp.eq.s32.totalorder %v15105_v61, 2  ;;  %8897 = vcosq.f32 %v7352_v15 }
 0x95b   : > { %v7751_v33 = vsel %vm8343_vm4, 0, %v8342_v42  ;;  %v15130_v11 = vand.u32 3, %v7773_v6  ;;  %8899 = vsinq.f32 %v7352_v15  ;;  %v7038_v8 = vsub.s32 4, %v14517_v19 }
 0x95c   : > { %v7752_v50 = vsub.s32 32, %v7751_v33  ;;  %v7756_v0 = vsub.s32 4294967266, %v7751_v33  ;;  %vm7671_vm7 = vcmp.lt.s32.totalorder %v15105_v61, 2  ;;  %v7674_v3 = vsel %vm7672_vm5, %v8888_v45, %v7673_v9 }
 0x95d   : > { %v7353_v54 = vsel %vm15109_vm14, 0, %v7351_v58  ;;  %v7753_v39 = vshll.u32 %v15075_v55, %v7751_v33  ;;  %v7677_v29 = vsel %vm7675_vm1, %v7676_v52, %v8886_v59  ;;  %vm7151_vm3 = vcmp.lt.s32.totalorder %v7150_v4, 2 }
 0x95e   : > { %vm16208_vm2 = vcmp.lt.s32.totalorder %v14291_v35, 0  ;;  %v7754_v18 = vshrl.u32 %v7736_v2, %v7752_v50  ;;  %v7757_v60 = vadd.s32 127, %v7756_v0  ;;  %v7246_v13 = vsub.s32 4, %v14583_v44 }
 0x95f   : > { %v7039_v17 = vsel %vm16208_vm2, %v7038_v8, %v14517_v19  ;;  %vm7571_vm6 = vcmp.eq.s32.totalorder %v15116_v47, 2  ;;  %v7357_v27 = vadd.s32 3, %v7353_v54  ;;  %v7049_v57 = vxor.u32 2147483648, %v14858_v43 }
 0x960   : > { %v7041_v16 = vsel %vm14680_vm10, 0, %v7039_v17  ;;  %v8890_v10 = vpop.eup %8889  ;;  %v7052_v41 = vxor.u32 2147483648, %v14851_v53  ;;  %v7755_v19 = vor.u32 %v7754_v18, %v7753_v39  ;;  %v7758_v46 = vshll.u32 %v7757_v60, 23  ;;  %v16213_v17 = vld [vmem:[#allocation32_spill] sm:$0xff]  ;;  %v16217_v60 = vld [vmem:[#allocation9_spill] sm:$0xff] }
 0x961   : > { %v7045_v55 = vadd.s32 3, %v7041_v16  ;;  %v8892_v21 = vpop.eup %8891  ;;  %v7156_v20 = vxor.u32 2147483648, %v8890_v10  ;;  %vm16209_vm10 = vcmp.lt.s32.totalorder %v14416_v24, 0  ;;  %vm7567_vm5 = vcmp.lt.s32.totalorder %v15116_v47, 2 }
 0x962   : > { %v7247_v31 = vsel %vm16209_vm10, %v7246_v13, %v14583_v44  ;;  %v7153_v23 = vxor.u32 2147483648, %v8892_v21  ;;  %vm7155_vm1 = vcmp.eq.s32.totalorder %v7150_v4, 2  ;;  %v7759_v62 = vor.u32 4788187, %v7758_v46  ;;  %v16226_v46 = vld [vmem:[#allocation19_spill] sm:$0xff] }
 0x963   : > { %v7046_v37 = vand.u32 3, %v7045_v55  ;;  %v7249_v28 = vsel %vm14753_vm11, 0, %v7247_v31  ;;  %vm7564_vm2 = vweird.f32 %v14790_v34  ;;  %vm7152_vm8 = vcmp.eq.s32.totalorder %v7150_v4, 0  ;;  %v16218_v34 = vld [vmem:[#allocation36_spill] sm:$0xff] }
 0x964   : > { %v7157_v7 = vsel %vm7155_vm1, %v7156_v20, %v8892_v21  ;;  %v7253_v59 = vadd.s32 3, %v7249_v28  ;;  %v7154_v2 = vsel %vm7152_vm8, %v8890_v10, %v7153_v23  ;;  %v15155_v32 = vand.u32 3, %v7357_v27  ;;  %v8894_v51 = vpop.eup %8893  ;;  %v16219_v10 = vld [vmem:[#allocation28_spill] sm:$0xff] }
 0x965   : > { %vm7048_vm4 = vcmp.eq.s32.totalorder %v7046_v37, 0  ;;  %vm7051_vm14 = vcmp.eq.s32.totalorder %v7046_v37, 2  ;;  %v7760_v44 = vand.u32 2147483647, %v7759_v62  ;;  %v7762_v63 = vcvt.s32.f32 %v7755_v19  ;;  %v8896_v22 = vpop.eup %8895 }
 0x966   : > { %v7050_v49 = vsel %vm7048_vm4, %v14851_v53, %v7049_v57  ;;  %v7053_v45 = vsel %vm7051_vm14, %v7052_v41, %v14858_v43  ;;  %v7678_v56 = vsel %vm7671_vm7, %v7674_v3, %v7677_v29  ;;  %v7158_v40 = vsel %vm7151_vm3, %v7154_v2, %v7157_v7  ;;  %v16224_v57 = vld [vmem:[#allocation24_spill] sm:$0xff]  ;;  %v16225_v41 = vld [vmem:[#allocation34_spill] sm:$0xff]  ;;  %v16228_v7 = vld [vmem:[#allocation13_spill] sm:$0xff] }
 0x967   : > { %vm7044_vm11 = vweird.f32 %v14291_v35  ;;  %vm7047_vm10 = vcmp.lt.s32.totalorder %v7046_v37, 2  ;;  %v7763_v26 = vmul.f32 %v7762_v63, %v7760_v44  ;;  %v7572_v48 = vxor.u32 2147483648, %v8894_v51  ;;  %v8898_v42 = vpop.eup %8897 }
 0x968   : > { %v7054_v6 = vsel %vm7047_vm10, %v7050_v49, %v7053_v45  ;;  %v7254_v15 = vand.u32 3, %v7253_v59  ;;  %v7569_v9 = vxor.u32 2147483648, %v8896_v22  ;;  %vm7360_vm8 = vcmp.eq.s32.totalorder %v15155_v32, 0  ;;  %v8900_v43 = vpop.eup %8899  ;;  %v16247_v49 = vld [vmem:[#allocation14_spill] sm:$0xff] }
 0x969   : > { %vm7363_vm14 = vcmp.eq.s32.totalorder %v15155_v32, 2  ;;  %v7257_v53 = vxor.u32 2147483648, %v15073_v12  ;;  %v7764_v61 = vxor.u32 2147483648, %v7763_v26  ;;  %v7573_v52 = vsel %vm7571_vm6, %v7572_v48, %v8896_v22  ;;  %v16232_v22 = vld [vmem:[#allocation30_spill] sm:$0xff]  ;;  %v16233_v48 = vld [vmem:[#allocation11_spill] sm:$0xff] }
 0x96a   : > { %vm16210_vm7 = vweird.f32 %v14484_v30  ;;  %vm7359_vm3 = vcmp.lt.s32.totalorder %v15155_v32, 2  ;;  %v7260_v58 = vxor.u32 2147483648, %v14860_v1  ;;  %vm16211_vm4 = vcmp.eq.s32.totalorder %v15116_v47, 0 }
 0x96b   : > { %v7159_v4 = vsel %vm16210_vm7, nan, %v7158_v40  ;;  %v7570_v33 = vsel %vm16211_vm4, %v8894_v51, %v7569_v9  ;;  %vm7668_vm1 = vweird.f32 %v14705_v36  ;;  %v7361_v8 = vxor.u32 2147483648, %v8900_v43  ;;  %v16231_v51 = vld [vmem:[#allocation31_spill] sm:$0xff] }
 0x96c   : > { %v7364_v50 = vxor.u32 2147483648, %v8898_v42  ;;  %v7055_v0 = vsel %vm7044_vm11, nan, %v7054_v6  ;;  %vm16212_vm10 = vcmp.lt.s32.totalorder %v14807_v14, 0  ;;  %v7574_v30 = vsel %vm7567_vm5, %v7570_v33, %v7573_v52  ;;  %v16236_v9 = vld [vmem:[#allocation27_spill] sm:$0xff]  ;;  %v16238_v52 = vld [vmem:[#allocation22_spill] sm:$0xff]  ;;  %v16239_v33 = vld [vmem:[#allocation41_spill] sm:$0xff] }
 0x96d   : > { %v7765_v3 = vsel %vm16212_vm10, %v7764_v61, %v7763_v26  ;;  %vm7256_vm6 = vcmp.eq.s32.totalorder %v7254_v15, 0  ;;  %vm7259_vm7 = vcmp.eq.s32.totalorder %v7254_v15, 2  ;;  %v7575_v54 = vsel %vm7564_vm2, nan, %v7574_v30  ;;  %v16243_v30 = vld [vmem:[#allocation16_spill] sm:$0xff] }
 0x96e   : > { %v7768_v39 = vsel %vm15093_vm15, %v14807_v14, %v7765_v3  ;;  %v7258_v29 = vsel %vm7256_vm6, %v14860_v1, %v7257_v53  ;;  %v16214_v35 = vand.u32 2147483647, %v16213_v17  ;;  %7818 = vmatprep.subr.mxu0 %v7575_v54  ;;  %v7261_v47 = vsel %vm7259_vm7, %v7260_v58, %v15073_v12 }
 0x96f   : > { %8901 = vcosq.f32 %v7768_v39  ;;  %v6726_v16 = vsub.s32 4, %v16217_v60  ;;  %7819 = vmatpush1.msra.mxu0 %v15123_v5  ;;  %v7362_v1 = vsel %vm7360_vm8, %v8898_v42, %v7361_v8  ;;  %v7365_v13 = vsel %vm7363_vm14, %v7364_v50, %v8900_v43 }
 0x970   : > { %vm15189_vm11 = vcmp.le.f32.partialorder %v16214_v35, 0.7853982  ;;  %8903 = vsinq.f32 %v7768_v39  ;;  %v16220_v27 = vand.u32 2147483647, %v16219_v10  ;;  %7820 = vmatprep.subr.mxu0 %v7159_v4  ;;  %vm16223_vm5 = vcmp.lt.s32.totalorder %v16213_v17, 0  ;;  %v16244_v39 = vld [vmem:[#allocation26_spill] sm:$0xff] }
 0x971   : > { %v6728_v38 = vsel %vm15189_vm11, %v16213_v17, %v16218_v34  ;;  %v6727_v55 = vsel %vm16223_vm5, %v6726_v16, %v16217_v60  ;;  %v6934_v5 = vsub.s32 4, %v16224_v57  ;;  %7821 = vmatpush1.msra.mxu0 %v7055_v0  ;;  %vm7255_vm2 = vcmp.lt.s32.totalorder %v7254_v15, 2 }
 0x972   : > { %vm15206_vm15 = vcmp.le.f32.partialorder %v16220_v27, 0.7853982  ;;  %8905 = vcosq.f32 %v6728_v38  ;;  %v6729_v19 = vsel %vm15189_vm11, 0, %v6727_v55  ;;  %v6622_v20 = vsub.s32 4, %v16226_v46 }
 0x973   : > { %v6936_v21 = vsel %vm15206_vm15, %v16219_v10, %v16225_v41  ;;  %8907 = vsinq.f32 %v6728_v38  ;;  %v7262_v31 = vsel %vm7255_vm2, %v7258_v29, %v7261_v47  ;;  %v6733_v23 = vadd.s32 3, %v6729_v19 }
 0x974   : > { %vm16227_vm8 = vcmp.lt.s32.totalorder %v16219_v10, 0  ;;  %8909 = vcosq.f32 %v6936_v21  ;;  %v7366_v28 = vsel %vm7359_vm3, %v7362_v1, %v7365_v13  ;;  %vm16229_vm14 = vcmp.lt.s32.totalorder %v16228_v7, 0 }
 0x975   : > { %v6935_v37 = vsel %vm16227_vm8, %v6934_v5, %v16224_v57  ;;  %8911 = vsinq.f32 %v6936_v21  ;;  %v6623_v59 = vsel %vm16229_vm14, %v6622_v20, %v16226_v46  ;;  %v15233_v2 = vsel %vm7668_vm1, nan, %v7678_v56 }
 0x976   : > { %v6937_v62 = vsel %vm15206_vm15, 0, %v6935_v37  ;;  %v15235_v44 = vand.u32 3, %v6733_v23  ;;  %v6625_v45 = vsel %vm14394_vm0, 0, %v6623_v59  ;;  %vm7779_vm3 = vcmp.eq.s32.totalorder %v15130_v11, 2 }
 0x977   : > { %v6941_v63 = vadd.s32 3, %v6937_v62  ;;  %vm7356_vm4 = vweird.f32 %v14563_v25  ;;  %vm7252_vm10 = vweird.f32 %v14416_v24  ;;  %v6629_v32 = vadd.s32 3, %v6625_v45  ;;  %v16234_v24 = vld [vmem:[#allocation10_spill] sm:$0xff] }
 0x978   : > { %v6830_v40 = vsub.s32 4, %v16231_v51  ;;  %vm7776_vm6 = vcmp.eq.s32.totalorder %v15130_v11, 0  ;;  %v15244_v36 = vsel %vm7356_vm4, nan, %v7366_v28  ;;  %v15246_v56 = vsel %vm7252_vm10, nan, %v7262_v31 }
 0x979   : > { %v6633_v26 = vxor.u32 2147483648, %v16232_v22  ;;  %v6636_v6 = vxor.u32 2147483648, %v16233_v48  ;;  %vm7775_vm0 = vcmp.lt.s32.totalorder %v15130_v11, 2  ;;  %v15251_v15 = vand.u32 3, %v6941_v63 }
 0x97a   : > { %v6630_v25 = vand.u32 3, %v6629_v32  ;;  %vm16235_vm1 = vcmp.lt.s32.totalorder %v16234_v24, 0  ;;  %v6841_v53 = vxor.u32 2147483648, %v16236_v9  ;;  %vm7772_vm7 = vweird.f32 %v14807_v14  ;;  %v16251_v14 = vld [vmem:[#allocation8_spill] sm:$0xff] }
 0x97b   : > { %v6831_v42 = vsel %vm16235_vm1, %v6830_v40, %v16231_v51  ;;  %vm6736_vm11 = vcmp.eq.s32.totalorder %v15235_v44, 0  ;;  %vm6739_vm15 = vcmp.eq.s32.totalorder %v15235_v44, 2  ;;  %v6844_v4 = vxor.u32 2147483648, %v16238_v52 }
 0x97c   : > { %v6833_v61 = vsel %vm14453_vm12, 0, %v6831_v42  ;;  %vm6632_vm2 = vcmp.eq.s32.totalorder %v6630_v25, 0  ;;  %vm6635_vm8 = vcmp.eq.s32.totalorder %v6630_v25, 2  ;;  %v16240_v8 = vand.u32 2147483647, %v16239_v33  ;;  %v8902_v35 = vpop.eup %8901  ;;  %v16258_v42 = vld [vmem:[#allocation33_spill] sm:$0xff] }
 0x97d   : > { %v6837_v58 = vadd.s32 3, %v6833_v61  ;;  %v6634_v0 = vsel %vm6632_vm2, %v16233_v48, %v6633_v26  ;;  %v6637_v3 = vsel %vm6635_vm8, %v6636_v6, %v16232_v22  ;;  %v6310_v54 = vsub.s32 4, %v16243_v30  ;;  %v8904_v47 = vpop.eup %8903  ;;  %v16254_v26 = vld [vmem:[#allocation40_spill] sm:$0xff] }
 0x97e   : > { %vm15266_vm14 = vcmp.le.f32.partialorder %v16240_v8, 0.7853982  ;;  %v7780_v60 = vxor.u32 2147483648, %v8902_v35  ;;  %vm6940_vm2 = vweird.f32 %v16219_v10  ;;  %vm6631_vm8 = vcmp.lt.s32.totalorder %v6630_v25, 2  ;;  %v16263_v8 = vld [vmem:[#allocation15_spill] sm:$0xff] }
 0x97f   : > { %v6312_v29 = vsel %vm15266_vm14, %v16239_v33, %v16244_v39  ;;  %v6838_v18 = vand.u32 3, %v6837_v58  ;;  %vm16245_vm4 = vcmp.lt.s32.totalorder %v16239_v33, 0  ;;  %v8906_v34 = vpop.eup %8905  ;;  %v7777_v38 = vxor.u32 2147483648, %v8904_v47 }
 0x980   : > { %8913 = vcosq.f32 %v6312_v29  ;;  %v6311_v16 = vsel %vm16245_vm4, %v6310_v54, %v16243_v30  ;;  %vm6947_vm12 = vcmp.eq.s32.totalorder %v15251_v15, 2  ;;  %v6638_v1 = vsel %vm6631_vm8, %v6634_v0, %v6637_v3  ;;  %v8908_v13 = vpop.eup %8907 }
 0x981   : > { %8915 = vsinq.f32 %v6312_v29  ;;  %vm6839_vm10 = vcmp.lt.s32.totalorder %v6838_v18, 2  ;;  %v7781_v27 = vsel %vm7779_vm3, %v7780_v60, %v8904_v47  ;;  %v6740_v12 = vxor.u32 2147483648, %v8906_v34  ;;  %v8910_v55 = vpop.eup %8909  ;;  %v16267_v47 = vld [vmem:[#allocation21_spill] sm:$0xff] }
 0x982   : > { %vm6840_vm1 = vcmp.eq.s32.totalorder %v6838_v18, 0  ;;  %vm6843_vm5 = vcmp.eq.s32.totalorder %v6838_v18, 2  ;;  %v7778_v57 = vsel %vm7776_vm6, %v8902_v35, %v7777_v38  ;;  %v6737_v5 = vxor.u32 2147483648, %v8908_v13  ;;  %v8912_v19 = vpop.eup %8911  ;;  %v16266_v35 = vld [vmem:[#allocation37_spill] sm:$0xff] }
 0x983   : > { %v6842_v41 = vsel %vm6840_vm1, %v16238_v52, %v6841_v53  ;;  %v6313_v21 = vsel %vm15266_vm14, 0, %v6311_v16  ;;  %v7782_v46 = vsel %vm7775_vm0, %v7778_v57, %v7781_v27  ;;  %v6741_v20 = vsel %vm6739_vm15, %v6740_v12, %v8908_v13  ;;  %v16259_v53 = vld [vmem:[#allocation12_spill] sm:$0xff]  ;;  %v16268_v13 = vld [vmem:[#allocation35_spill] sm:$0xff]  ;;  %v16269_v12 = vld [vmem:[#allocation18_spill] sm:$0xff] }
 0x984   : > { %v6948_v31 = vxor.u32 2147483648, %v8910_v55  ;;  %v6845_v23 = vsel %vm6843_vm5, %v6844_v4, %v16236_v9  ;;  %v7783_v37 = vsel %vm7772_vm7, nan, %v7782_v46  ;;  %v6738_v28 = vsel %vm6736_vm11, %v8906_v34, %v6737_v5 }
 0x985   : > { %v6945_v62 = vxor.u32 2147483648, %v8912_v19  ;;  %v6317_v59 = vadd.s32 3, %v6313_v21  ;;  %7889 = vmatprep.subr.mxu1 %v7783_v37  ;;  %vm16246_vm3 = vcmp.lt.s32.totalorder %v15235_v44, 2  ;;  %v16248_v45 = vand.u32 2147483647, %v16247_v49 }
 0x986   : > { %v6742_v63 = vsel %vm16246_vm3, %v6738_v28, %v6741_v20  ;;  %v6949_v11 = vsel %vm6947_vm12, %v6948_v31, %v8912_v19  ;;  %v6518_v51 = vsub.s32 4, %v16251_v14  ;;  %7890 = vmatpush1.msra.mxu1 %v15233_v2  ;;  %vm16252_vm0 = vweird.f32 %v16213_v17 }
 0x987   : > { %vm15308_vm6 = vcmp.le.f32.partialorder %v16248_v45, 0.7853982  ;;  %v6743_v40 = vsel %vm16252_vm0, nan, %v6742_v63  ;;  %vm16253_vm7 = vcmp.eq.s32.totalorder %v15251_v15, 0  ;;  %v6846_v22 = vsel %vm6839_vm10, %v6842_v41, %v6845_v23  ;;  %7891 = vmatprep.subr.mxu1 %v15244_v36 }
 0x988   : > { %v6946_v44 = vsel %vm16253_vm7, %v8910_v55, %v6945_v62  ;;  %v6520_v48 = vsel %vm15308_vm6, %v16247_v49, %v16254_v26  ;;  %7822 = vmatprep.subr.mxu0 %v6743_v40  ;;  %vm16255_vm11 = vcmp.lt.s32.totalorder %v15251_v15, 2  ;;  %vm16256_vm15 = vweird.f32 %v16228_v7  ;;  %7892 = vmatpush1.msra.mxu1 %v15246_v56  ;;  %v16260_v56 = vld [vmem:[#allocation17_spill] sm:$0xff] }
 0x989   : > { %v6950_v6 = vsel %vm16255_vm11, %v6946_v44, %v6949_v11  ;;  %v6639_v17 = vsel %vm16256_vm15, nan, %v6638_v1  ;;  %vm16257_vm5 = vcmp.lt.s32.totalorder %v16247_v49, 0  ;;  %8917 = vcosq.f32 %v6520_v48  ;;  %v7789_v44 = vpop.permute.xlu0 %7788 }
 0x98a   : > { %v6519_v2 = vsel %vm16257_vm5, %v6518_v51, %v16251_v14  ;;  %v6951_v25 = vsel %vm6940_vm2, nan, %v6950_v6  ;;  %7823 = vmatpush1.msra.mxu0 %v6639_v17  ;;  %vm6836_vm14 = vweird.f32 %v16234_v24  ;;  %v6318_v36 = vand.u32 3, %v6317_v59 }
 0x98b   : > { %7893 = vmatprep.subr.mxu1 %v6951_v25  ;;  %v6847_v15 = vsel %vm6836_vm14, nan, %v6846_v22  ;;  %8919 = vsinq.f32 %v6520_v48  ;;  %v6206_v7 = vsub.s32 4, %v16258_v42  ;;  %v6521_v9 = vsel %vm15308_vm6, 0, %v6519_v2 }
 0x98c   : > { %7894 = vmatpush1.msra.mxu1 %v6847_v15  ;;  %v6414_v43 = vsub.s32 4, %v16259_v53  ;;  %vm16261_vm4 = vcmp.lt.s32.totalorder %v16260_v56, 0  ;;  %vm6323_vm12 = vcmp.eq.s32.totalorder %v6318_v36, 2  ;;  %vm16264_vm10 = vcmp.lt.s32.totalorder %v16263_v8, 0 }
 0x98d   : > { %v8914_v61 = vpop.eup %8913  ;;  %v6207_v10 = vsel %vm16261_vm4, %v6206_v7, %v16258_v42  ;;  %v6525_v3 = vadd.s32 3, %v6521_v9  ;;  %vm6320_vm1 = vcmp.eq.s32.totalorder %v6318_v36, 0  ;;  %v6217_v18 = vxor.u32 2147483648, %v16266_v35 }
 0x98e   : > { %v8916_v52 = vpop.eup %8915  ;;  %v6324_v24 = vxor.u32 2147483648, %v8914_v61  ;;  %v6209_v58 = vsel %vm14150_vm13, 0, %v6207_v10  ;;  %v6415_v50 = vsel %vm16264_vm10, %v6414_v43, %v16259_v53  ;;  %v6220_v60 = vxor.u32 2147483648, %v16267_v47 }
 0x98f   : > { %v6321_v0 = vxor.u32 2147483648, %v8916_v52  ;;  %v6213_v30 = vadd.s32 3, %v6209_v58  ;;  %v6417_v39 = vsel %vm14196_vm9, 0, %v6415_v50  ;;  %vm6319_vm2 = vcmp.lt.s32.totalorder %v6318_v36, 2 }
 0x990   : > { %v6325_v29 = vsel %vm6323_vm12, %v6324_v24, %v8916_v52  ;;  %v6421_v38 = vadd.s32 3, %v6417_v39  ;;  %vm6316_vm13 = vweird.f32 %v16239_v33  ;;  %v6425_v27 = vxor.u32 2147483648, %v16268_v13  ;;  %v7784_v33 = vld [vmem:[%s15406_s4] sm:$0x7] }
 0x991   : > { %v6322_v16 = vsel %vm6320_vm1, %v8914_v61, %v6321_v0  ;;  %v6214_v34 = vand.u32 3, %v6213_v30  ;;  %v6428_v55 = vxor.u32 2147483648, %v16269_v12  ;;  %v6526_v5 = vand.u32 3, %v6525_v3 }
 0x992   : > { %v6326_v1 = vsel %vm6319_vm2, %v6322_v16, %v6325_v29  ;;  %v6422_v19 = vand.u32 3, %v6421_v38  ;;  %vm6212_vm6 = vweird.f32 %v16260_v56  ;;  %vm16270_vm15 = vcmask 261120  }
 0x993   : > { %v6327_v57 = vsel %vm6316_vm13, nan, %v6326_v1  ;;  %vm6216_vm9 = vcmp.eq.s32.totalorder %v6214_v34, 0  ;;  %vm6219_vm8 = vcmp.eq.s32.totalorder %v6214_v34, 2  ;;  %vm6215_vm3 = vcmp.lt.s32.totalorder %v6214_v34, 2  ;;  %vm16271_vm1 = vmmov %vm16270_vm15 }
 0x994   : > { %7824 = vmatprep.subr.mxu0 %v6327_v57  ;;  %v6218_v41 = vsel %vm6216_vm9, %v16267_v47, %v6217_v18  ;;  %v6221_v21 = vsel %vm6219_vm8, %v6220_v60, %v16266_v35  ;;  %vm6424_vm0 = vcmp.eq.s32.totalorder %v6422_v19, 0  ;;  %vm6427_vm7 = vcmp.eq.s32.totalorder %v6422_v19, 2 }
 0x995   : > { %v6222_v46 = vsel %vm6215_vm3, %v6218_v41, %v6221_v21  ;;  %vm6531_vm11 = vcmp.eq.s32.totalorder %v6526_v5, 2  ;;  %v6426_v28 = vsel %vm6424_vm0, %v16269_v12, %v6425_v27  ;;  %v6429_v62 = vsel %vm6427_vm7, %v6428_v55, %v16268_v13 }
 0x996   : > { %v8918_v20 = vpop.eup %8917  ;;  %v6223_v31 = vsel %vm6212_vm6, nan, %v6222_v46  ;;  %vm6528_vm5 = vcmp.eq.s32.totalorder %v6526_v5, 0  ;;  %vm6423_vm14 = vcmp.lt.s32.totalorder %v6422_v19, 2  ;;  %vm6527_vm4 = vcmp.lt.s32.totalorder %v6526_v5, 2 }
 0x997   : > { %v6532_v23 = vxor.u32 2147483648, %v8918_v20  ;;  %7825 = vmatpush1.msra.mxu0 %v6223_v31  ;;  %v6430_v45 = vsel %vm6423_vm14, %v6426_v28, %v6429_v62  ;;  %vm6524_vm12 = vweird.f32 %v16247_v49  ;;  %vm6420_vm10 = vweird.f32 %v16263_v8 }
 0x998   : > { %v8920_v37 = vpop.eup %8919  ;;  %8344 = vmatmul.mubr.msk.f32.vlgmr.msra.gmra.mxu0 %vm16270_vm15, %v7784_v33  ;;  %v6431_v51 = vsel %vm6420_vm10, nan, %v6430_v45 }
 0x999   : > { %v6529_v59 = vxor.u32 2147483648, %v8920_v37  ;;  %v6533_v63 = vsel %vm6531_vm11, %v6532_v23, %v8920_v37 }
 0x99b   : > { %v6530_v11 = vsel %vm6528_vm5, %v8918_v20, %v6529_v59 }
 0x99c   : > { %v6534_v32 = vsel %vm6527_vm4, %v6530_v11, %v6533_v63 }
 0x99d   : > { %v6535_v14 = vsel %vm6524_vm12, nan, %v6534_v32 }
 0x99e   : > { %7895 = vmatprep.subr.mxu1 %v6535_v14 }
 0x99f   : > { %7896 = vmatpush1.msra.mxu1 %v6431_v51 }
 0x9a0   : > { %8345 = vmatmul.mubr.msk.f32.vlgmr.msra.gmra.mxu1 %vm16271_vm1, %v7784_v33 }
 0xa58   : > { %v7860_v40 = vpop.f32.mrf.mxu0 }
 0xa59   : > { %v7861_v26 = vadd.f32 %v7860_v40, %v7789_v44 }
 0xa5a   : > { %v7862_v22 = vpop.f32.mrf.mxu0 }
 0xa5b   : > { %v7863_v48 = vadd.f32 %v7862_v22, %v7789_v44 }
 0xa5d   : > { %v7940_v6 = vcombine.low %v7861_v26, %v7863_v48 }
 0xa5f   : > { %7944 = vst [vmem:[%s267_s12] sm:$0x77] %v7940_v6 }
 0xa60   : > { %v7931_v49 = vpop.f32.mrf.mxu1 }
 0xa61   : > { %v7932_v2 = vadd.f32 %v7931_v49, %v7789_v44 }
 0xa62   : > { %v7933_v17 = vpop.f32.mrf.mxu1 }
 0xa63   : > { %v7934_v25 = vadd.f32 %v7933_v17, %v7789_v44 }
 0xa65   : > { %v7941_v36 = vcombine.low %v7932_v2, %v7934_v25 }
 0xa67   : > { %7945 = vst [vmem:[%s267_s12 + $0x8] sm:$0x77] %v7941_v36 }
 0xa68   : > { %8962 = shalt.err (!%p8959_p10)
}
 0xa69   : > { %s8963_s18 = scalar_lea.hbm %s7959_s17, 256  ;;  %s8967_s19 = scalar_lea.hbm %s15408_s6, 512 }
 0xa6a   : > { %p8964_p2 = scmp.ne.s32.totalorder %s7959_s17, %s8963_s18  ;;  %p8968_p7 = scmp.lt.s32.totalorder %s7959_s17, %s15408_s6 }
 0xa6b   : > { %p8969_p0 = scmp.lt.s32.totalorder %s8967_s19, %s8963_s18 }
 0xa6c   : > { %p8965_p4 = pnand %p8964_p2, %p16272_p12 }
 0xa6d   : > { %p8970_p6 = por %p8969_p0, %p8968_p7 }
 0xa6e   : > { %p8966_p9 = pneg %p8965_p4 }
 0xa70   : > { %p8971_p11 = pnand %p8970_p6, %p8966_p9 }
 0xa72   : > { %8974 = shalt.err (!%p8971_p11)
}
 0xa73   : > { %8611 = dma.vmem_to_hbm [thread:$0]  (%p16272_p12), %s7962_s11, 256, %s7959_s17, %s7947_s28  }
 0xa74 PF: > { %s7973_s13 = sand.u32 1, %s9001_s21   ;;  %p16273_p13 = scmp.ne.s32.totalorder %s15666_s10, 0 }
 0xa75   : > { %p16274_p1 = scmp.ge.s32.totalorder %s9013_s24, 2  ;;  %s7974_s14 = scalar_lea.sflag [#allocation4], %s7973_s13 }
 0xa77   : > { %p8618_p3 = pnand %p16274_p1, %p16273_p13 }
 0xa79   : > { %p8619_p5 = pneg %p8618_p3 }
 0xa7b   : > { %8996 = dma.done.wait (%p8619_p5), %s7974_s14, 256  }
 0xa7c   : > { %8998 = vsyncadd (%p8619_p5), %s7974_s14, 4294967040  ;;  %p19_p8 = scmp.ge.s32.totalorder %s9085_s27, 4   ;;  %s16275_s21 = smov %s9005_s22 }
 0xa7d   : > { %s16276_s22 = smov %s9009_s23  ;;  %s16277_s23 = smov %s9097_s30 }
 0xa7e   : > { %s16278_s24 = smov %s9085_s27  ;;  %21 = sbr.rel (!%p19_p8) target bundleno = 5 (0x5), region = 93 }
 0xa83   :  { %7979 = vsyncpa [#allocation3], 1 }
 0xa84   :  { %7981 = vsyncpa [#allocation3 + $0x1], 1 }
 0xa85   :  { %7982 = vsyncpa [#allocation4], 1 }
 0xa86   :  { %7984 = vsyncpa [#allocation4 + $0x1], 1 }

</bundles_post_ra>
